<compile_context>
chip_gen: v5e
topology: v5e:2x2
jax: 0.10.0
libtpu: 0.0.40
codegen_flags: <defaults>
</compile_context>

<pallas_src>
import math
import jax
import jax.numpy as jnp
from jax import lax
from jax.experimental import pallas as pl
from jax.experimental.pallas import tpu as pltpu


def _phi_kernel(x_ref, s1_ref, b1_ref, w1_ref, s2_ref, b2_ref, w2_ref,
                s3_ref, b3_ref, aw_ref, ah_ref, o_ref, pad1_ref, pad2_ref):
    _, H, W, Cin = x_ref.shape
    D = w1_ref.shape[1]
    Wo = aw_ref.shape[0]

    # Zero the padded-scratch borders once.  Scratch persists across grid steps and the grid
    # is sequential (dimension_semantics=("arbitrary",)); interiors are fully overwritten
    # every step, so no per-step zero-fill is needed.
    @pl.when(pl.program_id(0) == 0)
    def _():
        pad1_ref[...] = jnp.zeros(pad1_ref.shape, pad1_ref.dtype)
        pad2_ref[...] = jnp.zeros(pad2_ref.shape, pad2_ref.dtype)

    # Hoisted per-channel BN affine parameters (JAX does not CSE broadcasts).
    s1 = s1_ref[...].reshape(1, 1, Cin)
    b1 = b1_ref[...].reshape(1, 1, Cin)
    s2 = s2_ref[...]                      # (1, D)
    b2 = b2_ref[...]
    s3 = s3_ref[...]
    b3 = b3_ref[...]

    # ---- BN1 + ReLU, stored once into the padded interior ------------------
    x = x_ref[0]                                                   # [H, W, Cin]
    pad1_ref[1:H + 1, 1:W + 1, :] = jnp.maximum(x * s1 + b1, 0.0)

    # ---- Conv1: im2col, single MXU matmul (H*W, 9*Cin) @ (9*Cin, D) --------
    patches1 = jnp.concatenate(
        [pad1_ref[kh:kh + H, kw:kw + W, :].reshape(H * W, Cin)
         for kh in range(3) for kw in range(3)], axis=1)           # [H*W, 9*Cin]
    y1 = jnp.dot(patches1, w1_ref[...], preferred_element_type=jnp.float32)

    # ---- BN2 + ReLU, single store into second padded interior --------------
    pad2_ref[1:H + 1, 1:W + 1, :] = jnp.maximum(y1 * s2 + b2, 0.0).reshape(H, W, D)

    # ---- Conv2: im2col, single MXU matmul (H*W, 9*D) @ (9*D, D) ------------
    patches2 = jnp.concatenate(
        [pad2_ref[kh:kh + H, kw:kw + W, :].reshape(H * W, D)
         for kh in range(3) for kw in range(3)], axis=1)           # [H*W, 9*D]
    y2 = jnp.dot(patches2, w2_ref[...], preferred_element_type=jnp.float32)

    # ---- BN3 + ReLU ---------------------------------------------------------
    v = jnp.maximum(y2 * s3 + b3, 0.0)                             # [H*W, D]

    # ---- separable bilinear upsample (no dense kron(Ah, Aw)) ----------------
    # width pass: batched matmul over image rows
    v3 = v.reshape(H, W, D)
    awb = jnp.broadcast_to(aw_ref[...][None, :, :], (H, Wo, W))    # [H, Wo, W]
    zw = jnp.einsum('how,hwd->hod', awb, v3,
                    preferred_element_type=jnp.float32)            # [H, Wo, D]
    # height pass: one 2-D matmul on the lane-dense (H, Wo*D) slab
    out = jnp.dot(ah_ref[...], zw.reshape(H, Wo * D),
                  preferred_element_type=jnp.float32)              # [Ho, Wo*D]
    o_ref[0] = out


def bilinear_resize_matrix(in_size, out_size):
    """Matrix reproducing F.interpolate(mode='bilinear', align_corners=False) along one axis."""
    scale = in_size / out_size
    rows = []
    for dst in range(out_size):
        src = max((dst + 0.5) * scale - 0.5, 0.0)
        i0 = int(math.floor(src))
        lam = src - i0
        i1 = min(i0 + 1, in_size - 1)
        row = [0.0] * in_size
        row[i0] += 1.0 - lam
        row[i1] += lam
        rows.append(row)
    return jnp.array(rows, jnp.float32)


def _bn_affine(bn, eps=1e-5):
    gamma, beta, mean, var = bn
    scale = gamma / jnp.sqrt(var + eps)
    shift = beta - mean * scale
    return scale.reshape(1, -1), shift.reshape(1, -1)


def make_params(key, in_channels, depth):
    ks = jax.random.split(key, 5)

    def bn(k, c):
        k1, k2, k3, k4 = jax.random.split(k, 4)
        gamma = 1.0 + 0.1 * jax.random.normal(k1, (c,), jnp.float32)
        beta = 0.1 * jax.random.normal(k2, (c,), jnp.float32)
        mean = 0.1 * jax.random.normal(k3, (c,), jnp.float32)
        var = jax.random.uniform(k4, (c,), jnp.float32, minval=0.5, maxval=1.5)
        return gamma, beta, mean, var

    bn1 = bn(ks[0], in_channels)
    w1 = jax.random.normal(ks[1], (depth, in_channels, 3, 3), jnp.float32) / math.sqrt(in_channels * 9)
    bn2 = bn(ks[2], depth)
    w2 = jax.random.normal(ks[3], (depth, depth, 3, 3), jnp.float32) / math.sqrt(depth * 9)
    bn3 = bn(ks[4], depth)
    return dict(bn1=bn1, w1=w1, bn2=bn2, w2=w2, bn3=bn3)


def phi_subnet(x_nchw, params, level):
    B, Cin, H, W = x_nchw.shape
    D = params["w1"].shape[0]
    factor = 2 ** (level - 2)
    Ho, Wo = H * factor, W * factor

    x = jnp.transpose(x_nchw, (0, 2, 3, 1)).astype(jnp.float32)        # NHWC

    s1, b1 = _bn_affine(params["bn1"])
    s2, b2 = _bn_affine(params["bn2"])
    s3, b3 = _bn_affine(params["bn3"])
    # conv weights: OIHW -> ((kh*3+kw)*I + i, O)  to match im2col tap/channel ordering
    w1 = jnp.transpose(params["w1"], (2, 3, 1, 0)).reshape(9 * Cin, D)
    w2 = jnp.transpose(params["w2"], (2, 3, 1, 0)).reshape(9 * D, D)

    Ah = bilinear_resize_matrix(H, Ho)                                 # [Ho, H]
    Aw = bilinear_resize_matrix(W, Wo)                                 # [Wo, W]

    grid_spec = pltpu.PrefetchScalarGridSpec(
        num_scalar_prefetch=0,
        grid=(B,),
        in_specs=[
            pl.BlockSpec((1, H, W, Cin), lambda b: (b, 0, 0, 0)),
            pl.BlockSpec((1, Cin), lambda b: (0, 0)),
            pl.BlockSpec((1, Cin), lambda b: (0, 0)),
            pl.BlockSpec((9 * Cin, D), lambda b: (0, 0)),
            pl.BlockSpec((1, D), lambda b: (0, 0)),
            pl.BlockSpec((1, D), lambda b: (0, 0)),
            pl.BlockSpec((9 * D, D), lambda b: (0, 0)),
            pl.BlockSpec((1, D), lambda b: (0, 0)),
            pl.BlockSpec((1, D), lambda b: (0, 0)),
            pl.BlockSpec((Wo, W), lambda b: (0, 0)),
            pl.BlockSpec((Ho, H), lambda b: (0, 0)),
        ],
        # lane-dense output slab: last dim Wo*D (a 128-multiple for this config)
        out_specs=pl.BlockSpec((1, Ho, Wo * D), lambda b: (b, 0, 0)),
        scratch_shapes=[
            pltpu.VMEM((H + 2, W + 2, Cin), jnp.float32),
            pltpu.VMEM((H + 2, W + 2, D), jnp.float32),
        ],
    )
    out2d = pl.pallas_call(
        _phi_kernel,
        out_shape=jax.ShapeDtypeStruct((B, Ho, Wo * D), jnp.float32),
        grid_spec=grid_spec,
        # "arbitrary": the grid must run sequentially on one core so the once-zeroed scratch
        # borders persist across batch iterations.
        compiler_params=pltpu.CompilerParams(dimension_semantics=("arbitrary",)),
    )(x, s1, b1, w1, s2, b2, w2, s3, b3, Aw, Ah)

    out_nhwc = out2d.reshape(B, Ho, Wo, D)
    return jnp.transpose(out_nhwc, (0, 3, 1, 2))                       # back to NCHW


def reference_forward(x_nchw, params, level):
    """Pure-JAX reference with identical semantics (for correctness checking)."""
    B, Cin, H, W = x_nchw.shape
    D = params["w1"].shape[0]
    factor = 2 ** (level - 2)
    Ho, Wo = H * factor, W * factor

    x = jnp.transpose(x_nchw, (0, 2, 3, 1))
    s1, b1 = _bn_affine(params["bn1"])
    s2, b2 = _bn_affine(params["bn2"])
    s3, b3 = _bn_affine(params["bn3"])
    w1 = jnp.transpose(params["w1"], (2, 3, 1, 0))                     # HWIO
    w2 = jnp.transpose(params["w2"], (2, 3, 1, 0))
    dn = ("NHWC", "HWIO", "NHWC")

    t = jnp.maximum(x * s1 + b1, 0.0)
    y = lax.conv_general_dilated(t, w1, (1, 1), "SAME", dimension_numbers=dn)
    u = jnp.maximum(y * s2 + b2, 0.0)
    z = lax.conv_general_dilated(u, w2, (1, 1), "SAME", dimension_numbers=dn)
    v = jnp.maximum(z * s3 + b3, 0.0)

    Ah = bilinear_resize_matrix(H, Ho)
    Aw = bilinear_resize_matrix(W, Wo)
    M = jnp.kron(Ah, Aw)
    out = jnp.einsum("oi,bid->bod", M, v.reshape(B, H * W, D)).reshape(B, Ho, Wo, D)
    return jnp.transpose(out, (0, 3, 1, 2))


if __name__ == "__main__":
    B, Cin, H, W = 2, 4, 16, 16
    depth, level = 8, 3               # upsample factor = 2**(level-2) = 2

    key = jax.random.PRNGKey(0)
    kx, kp = jax.random.split(key)
    x = jax.random.normal(kx, (B, Cin, H, W), jnp.float32)
    params = make_params(kp, Cin, depth)

    out = jax.block_until_ready(phi_subnet(x, params, level))
    assert out.shape == (B, depth, H * 2, W * 2), out.shape

    ref = jax.block_until_ready(reference_forward(x, params, level))
    err = float(jnp.max(jnp.abs(out - ref)))
    assert jnp.allclose(out, ref, atol=1e-3, rtol=1e-3), err

    print("KERNEL_OK")
</pallas_src>

<mosaic_0001>
module attributes {stable_mosaic.version = 11 : i64} {
  func.func @_phi_kernel(%arg0: i32, %arg1: memref<1x16x16x4xf32, #tpu.memory_space<vmem>>, %arg2: memref<1x4xf32, #tpu.memory_space<vmem>>, %arg3: memref<1x4xf32, #tpu.memory_space<vmem>>, %arg4: memref<36x8xf32, #tpu.memory_space<vmem>>, %arg5: memref<1x8xf32, #tpu.memory_space<vmem>>, %arg6: memref<1x8xf32, #tpu.memory_space<vmem>>, %arg7: memref<72x8xf32, #tpu.memory_space<vmem>>, %arg8: memref<1x8xf32, #tpu.memory_space<vmem>>, %arg9: memref<1x8xf32, #tpu.memory_space<vmem>>, %arg10: memref<32x16xf32, #tpu.memory_space<vmem>>, %arg11: memref<32x16xf32, #tpu.memory_space<vmem>>, %arg12: memref<1x32x256xf32, #tpu.memory_space<vmem>>, %arg13: memref<18x18x4xf32, #tpu.memory_space<vmem>>, %arg14: memref<18x18x8xf32, #tpu.memory_space<vmem>>) attributes {dimension_semantics = [#tpu.dimension_semantics<arbitrary>], iteration_bounds = array<i64: 2>, scalar_prefetch = 0 : i64, scratch_operands = 2 : i64, tpu.core_type = #tpu.core_type<tc>, window_params = [{transform_indices = @transform_0, window_bounds = array<i64: 1, 16, 16, 4>}, {pipeline_mode = #tpu.pipeline_mode<synchronous>, transform_indices = @transform_1, window_bounds = array<i64: 1, 4>}, {pipeline_mode = #tpu.pipeline_mode<synchronous>, transform_indices = @transform_2, window_bounds = array<i64: 1, 4>}, {pipeline_mode = #tpu.pipeline_mode<synchronous>, transform_indices = @transform_3, window_bounds = array<i64: 36, 8>}, {pipeline_mode = #tpu.pipeline_mode<synchronous>, transform_indices = @transform_4, window_bounds = array<i64: 1, 8>}, {pipeline_mode = #tpu.pipeline_mode<synchronous>, transform_indices = @transform_5, window_bounds = array<i64: 1, 8>}, {pipeline_mode = #tpu.pipeline_mode<synchronous>, transform_indices = @transform_6, window_bounds = array<i64: 72, 8>}, {pipeline_mode = #tpu.pipeline_mode<synchronous>, transform_indices = @transform_7, window_bounds = array<i64: 1, 8>}, {pipeline_mode = #tpu.pipeline_mode<synchronous>, transform_indices = @transform_8, window_bounds = array<i64: 1, 8>}, {pipeline_mode = #tpu.pipeline_mode<synchronous>, transform_indices = @transform_9, window_bounds = array<i64: 32, 16>}, {pipeline_mode = #tpu.pipeline_mode<synchronous>, transform_indices = @transform_10, window_bounds = array<i64: 32, 16>}, {transform_indices = @transform_11, window_bounds = array<i64: 1, 32, 256>}]} {
    %c0_i32 = arith.constant 0 : i32
    %0 = arith.cmpi eq, %arg0, %c0_i32 : i32
    %1 = arith.extui %0 : i1 to i32
    %c0_i32_0 = arith.constant 0 : i32
    %2 = arith.cmpi ne, %1, %c0_i32_0 : i32
    scf.if %2 {
      %cst_91 = arith.constant 0.000000e+00 : f32
      %88 = vector.broadcast %cst_91 : f32 to vector<18x18x4xf32>
      %c0_92 = arith.constant 0 : index
      %c0_93 = arith.constant 0 : index
      %c0_94 = arith.constant 0 : index
      %89 = vector.load %arg13[%c0_92, %c0_93, %c0_94] : memref<18x18x4xf32, #tpu.memory_space<vmem>>, vector<18x18x4xf32>
      tpu.vector_store %arg13[%c0_92, %c0_93, %c0_94], %88 {strides = array<i32>} : memref<18x18x4xf32, #tpu.memory_space<vmem>>, vector<18x18x4xf32>,
      %cst_95 = arith.constant 0.000000e+00 : f32
      %90 = vector.broadcast %cst_95 : f32 to vector<18x18x8xf32>
      %c0_96 = arith.constant 0 : index
      %c0_97 = arith.constant 0 : index
      %c0_98 = arith.constant 0 : index
      %91 = vector.load %arg14[%c0_96, %c0_97, %c0_98] : memref<18x18x8xf32, #tpu.memory_space<vmem>>, vector<18x18x8xf32>
      tpu.vector_store %arg14[%c0_96, %c0_97, %c0_98], %90 {strides = array<i32>} : memref<18x18x8xf32, #tpu.memory_space<vmem>>, vector<18x18x8xf32>,
    } else {
    }
    %c0 = arith.constant 0 : index
    %c0_1 = arith.constant 0 : index
    %3 = vector.load %arg2[%c0, %c0_1] : memref<1x4xf32, #tpu.memory_space<vmem>>, vector<1x4xf32>
    %4 = vector.shape_cast %3 : vector<1x4xf32> to vector<1x1x4xf32>
    %c0_2 = arith.constant 0 : index
    %c0_3 = arith.constant 0 : index
    %5 = vector.load %arg3[%c0_2, %c0_3] : memref<1x4xf32, #tpu.memory_space<vmem>>, vector<1x4xf32>
    %6 = vector.shape_cast %5 : vector<1x4xf32> to vector<1x1x4xf32>
    %c0_4 = arith.constant 0 : index
    %c0_5 = arith.constant 0 : index
    %7 = vector.load %arg5[%c0_4, %c0_5] : memref<1x8xf32, #tpu.memory_space<vmem>>, vector<1x8xf32>
    %c0_6 = arith.constant 0 : index
    %c0_7 = arith.constant 0 : index
    %8 = vector.load %arg6[%c0_6, %c0_7] : memref<1x8xf32, #tpu.memory_space<vmem>>, vector<1x8xf32>
    %c0_8 = arith.constant 0 : index
    %c0_9 = arith.constant 0 : index
    %9 = vector.load %arg8[%c0_8, %c0_9] : memref<1x8xf32, #tpu.memory_space<vmem>>, vector<1x8xf32>
    %c0_10 = arith.constant 0 : index
    %c0_11 = arith.constant 0 : index
    %10 = vector.load %arg9[%c0_10, %c0_11] : memref<1x8xf32, #tpu.memory_space<vmem>>, vector<1x8xf32>
    %c0_12 = arith.constant 0 : index
    %c0_13 = arith.constant 0 : index
    %c0_14 = arith.constant 0 : index
    %c0_15 = arith.constant 0 : index
    %11 = vector.load %arg1[%c0_12, %c0_13, %c0_14, %c0_15] : memref<1x16x16x4xf32, #tpu.memory_space<vmem>>, vector<1x16x16x4xf32>
    %12 = vector.shape_cast %11 : vector<1x16x16x4xf32> to vector<16x16x4xf32>
    %13 = vector.broadcast %4 : vector<1x1x4xf32> to vector<16x16x4xf32>
    %14 = arith.mulf %12, %13 : vector<16x16x4xf32>
    %15 = vector.broadcast %6 : vector<1x1x4xf32> to vector<16x16x4xf32>
    %16 = arith.addf %14, %15 : vector<16x16x4xf32>
    %cst = arith.constant 0.000000e+00 : f32
    %17 = vector.broadcast %cst : f32 to vector<16x16x4xf32>
    %18 = arith.maximumf %16, %17 : vector<16x16x4xf32>
    %c1 = arith.constant 1 : index
    %c1_16 = arith.constant 1 : index
    %c0_17 = arith.constant 0 : index
    %19 = vector.load %arg13[%c1, %c1_16, %c0_17] : memref<18x18x4xf32, #tpu.memory_space<vmem>>, vector<16x16x4xf32>
    tpu.vector_store %arg13[%c1, %c1_16, %c0_17], %18 {strides = array<i32>} : memref<18x18x4xf32, #tpu.memory_space<vmem>>, vector<16x16x4xf32>,
    %c0_18 = arith.constant 0 : index
    %c0_19 = arith.constant 0 : index
    %c0_20 = arith.constant 0 : index
    %20 = vector.load %arg13[%c0_18, %c0_19, %c0_20] : memref<18x18x4xf32, #tpu.memory_space<vmem>>, vector<16x16x4xf32>
    %21 = vector.shape_cast %20 : vector<16x16x4xf32> to vector<256x4xf32>
    %c0_21 = arith.constant 0 : index
    %c1_22 = arith.constant 1 : index
    %c0_23 = arith.constant 0 : index
    %22 = vector.load %arg13[%c0_21, %c1_22, %c0_23] : memref<18x18x4xf32, #tpu.memory_space<vmem>>, vector<16x16x4xf32>
    %23 = vector.shape_cast %22 : vector<16x16x4xf32> to vector<256x4xf32>
    %c0_24 = arith.constant 0 : index
    %c2 = arith.constant 2 : index
    %c0_25 = arith.constant 0 : index
    %24 = vector.load %arg13[%c0_24, %c2, %c0_25] : memref<18x18x4xf32, #tpu.memory_space<vmem>>, vector<16x16x4xf32>
    %25 = vector.shape_cast %24 : vector<16x16x4xf32> to vector<256x4xf32>
    %c1_26 = arith.constant 1 : index
    %c0_27 = arith.constant 0 : index
    %c0_28 = arith.constant 0 : index
    %26 = vector.load %arg13[%c1_26, %c0_27, %c0_28] : memref<18x18x4xf32, #tpu.memory_space<vmem>>, vector<16x16x4xf32>
    %27 = vector.shape_cast %26 : vector<16x16x4xf32> to vector<256x4xf32>
    %c1_29 = arith.constant 1 : index
    %c1_30 = arith.constant 1 : index
    %c0_31 = arith.constant 0 : index
    %28 = vector.load %arg13[%c1_29, %c1_30, %c0_31] : memref<18x18x4xf32, #tpu.memory_space<vmem>>, vector<16x16x4xf32>
    %29 = vector.shape_cast %28 : vector<16x16x4xf32> to vector<256x4xf32>
    %c1_32 = arith.constant 1 : index
    %c2_33 = arith.constant 2 : index
    %c0_34 = arith.constant 0 : index
    %30 = vector.load %arg13[%c1_32, %c2_33, %c0_34] : memref<18x18x4xf32, #tpu.memory_space<vmem>>, vector<16x16x4xf32>
    %31 = vector.shape_cast %30 : vector<16x16x4xf32> to vector<256x4xf32>
    %c2_35 = arith.constant 2 : index
    %c0_36 = arith.constant 0 : index
    %c0_37 = arith.constant 0 : index
    %32 = vector.load %arg13[%c2_35, %c0_36, %c0_37] : memref<18x18x4xf32, #tpu.memory_space<vmem>>, vector<16x16x4xf32>
    %33 = vector.shape_cast %32 : vector<16x16x4xf32> to vector<256x4xf32>
    %c2_38 = arith.constant 2 : index
    %c1_39 = arith.constant 1 : index
    %c0_40 = arith.constant 0 : index
    %34 = vector.load %arg13[%c2_38, %c1_39, %c0_40] : memref<18x18x4xf32, #tpu.memory_space<vmem>>, vector<16x16x4xf32>
    %35 = vector.shape_cast %34 : vector<16x16x4xf32> to vector<256x4xf32>
    %c2_41 = arith.constant 2 : index
    %c2_42 = arith.constant 2 : index
    %c0_43 = arith.constant 0 : index
    %36 = vector.load %arg13[%c2_41, %c2_42, %c0_43] : memref<18x18x4xf32, #tpu.memory_space<vmem>>, vector<16x16x4xf32>
    %37 = vector.shape_cast %36 : vector<16x16x4xf32> to vector<256x4xf32>
    %38 = tpu.concatenate %21, %23, %25, %27, %29, %31, %33, %35, %37 in 1 : vector<256x4xf32>, vector<256x4xf32>, vector<256x4xf32>, vector<256x4xf32>, vector<256x4xf32>, vector<256x4xf32>, vector<256x4xf32>, vector<256x4xf32>, vector<256x4xf32> -> vector<256x36xf32>
    %c0_44 = arith.constant 0 : index
    %c0_45 = arith.constant 0 : index
    %39 = vector.load %arg4[%c0_44, %c0_45] : memref<36x8xf32, #tpu.memory_space<vmem>>, vector<36x8xf32>
    %cst_46 = arith.constant dense<0.000000e+00> : vector<256x8xf32>
    %40 = tpu.matmul %38, %39, %cst_46 {dimension_numbers = #tpu.dot_dimension_numbers<[1], [0], [0], [1], [0, 0, 1, 1], [], []>} : vector<256x36xf32>, vector<36x8xf32>, vector<256x8xf32> -> vector<256x8xf32>
    %41 = vector.broadcast %7 : vector<1x8xf32> to vector<256x8xf32>
    %42 = arith.mulf %40, %41 : vector<256x8xf32>
    %43 = vector.broadcast %8 : vector<1x8xf32> to vector<256x8xf32>
    %44 = arith.addf %42, %43 : vector<256x8xf32>
    %cst_47 = arith.constant 0.000000e+00 : f32
    %45 = vector.broadcast %cst_47 : f32 to vector<256x8xf32>
    %46 = arith.maximumf %44, %45 : vector<256x8xf32>
    %47 = vector.shape_cast %46 : vector<256x8xf32> to vector<16x16x8xf32>
    %c1_48 = arith.constant 1 : index
    %c1_49 = arith.constant 1 : index
    %c0_50 = arith.constant 0 : index
    %48 = vector.load %arg14[%c1_48, %c1_49, %c0_50] : memref<18x18x8xf32, #tpu.memory_space<vmem>>, vector<16x16x8xf32>
    tpu.vector_store %arg14[%c1_48, %c1_49, %c0_50], %47 {strides = array<i32>} : memref<18x18x8xf32, #tpu.memory_space<vmem>>, vector<16x16x8xf32>,
    %c0_51 = arith.constant 0 : index
    %c0_52 = arith.constant 0 : index
    %c0_53 = arith.constant 0 : index
    %49 = vector.load %arg14[%c0_51, %c0_52, %c0_53] : memref<18x18x8xf32, #tpu.memory_space<vmem>>, vector<16x16x8xf32>
    %50 = vector.shape_cast %49 : vector<16x16x8xf32> to vector<256x8xf32>
    %c0_54 = arith.constant 0 : index
    %c1_55 = arith.constant 1 : index
    %c0_56 = arith.constant 0 : index
    %51 = vector.load %arg14[%c0_54, %c1_55, %c0_56] : memref<18x18x8xf32, #tpu.memory_space<vmem>>, vector<16x16x8xf32>
    %52 = vector.shape_cast %51 : vector<16x16x8xf32> to vector<256x8xf32>
    %c0_57 = arith.constant 0 : index
    %c2_58 = arith.constant 2 : index
    %c0_59 = arith.constant 0 : index
    %53 = vector.load %arg14[%c0_57, %c2_58, %c0_59] : memref<18x18x8xf32, #tpu.memory_space<vmem>>, vector<16x16x8xf32>
    %54 = vector.shape_cast %53 : vector<16x16x8xf32> to vector<256x8xf32>
    %c1_60 = arith.constant 1 : index
    %c0_61 = arith.constant 0 : index
    %c0_62 = arith.constant 0 : index
    %55 = vector.load %arg14[%c1_60, %c0_61, %c0_62] : memref<18x18x8xf32, #tpu.memory_space<vmem>>, vector<16x16x8xf32>
    %56 = vector.shape_cast %55 : vector<16x16x8xf32> to vector<256x8xf32>
    %c1_63 = arith.constant 1 : index
    %c1_64 = arith.constant 1 : index
    %c0_65 = arith.constant 0 : index
    %57 = vector.load %arg14[%c1_63, %c1_64, %c0_65] : memref<18x18x8xf32, #tpu.memory_space<vmem>>, vector<16x16x8xf32>
    %58 = vector.shape_cast %57 : vector<16x16x8xf32> to vector<256x8xf32>
    %c1_66 = arith.constant 1 : index
    %c2_67 = arith.constant 2 : index
    %c0_68 = arith.constant 0 : index
    %59 = vector.load %arg14[%c1_66, %c2_67, %c0_68] : memref<18x18x8xf32, #tpu.memory_space<vmem>>, vector<16x16x8xf32>
    %60 = vector.shape_cast %59 : vector<16x16x8xf32> to vector<256x8xf32>
    %c2_69 = arith.constant 2 : index
    %c0_70 = arith.constant 0 : index
    %c0_71 = arith.constant 0 : index
    %61 = vector.load %arg14[%c2_69, %c0_70, %c0_71] : memref<18x18x8xf32, #tpu.memory_space<vmem>>, vector<16x16x8xf32>
    %62 = vector.shape_cast %61 : vector<16x16x8xf32> to vector<256x8xf32>
    %c2_72 = arith.constant 2 : index
    %c1_73 = arith.constant 1 : index
    %c0_74 = arith.constant 0 : index
    %63 = vector.load %arg14[%c2_72, %c1_73, %c0_74] : memref<18x18x8xf32, #tpu.memory_space<vmem>>, vector<16x16x8xf32>
    %64 = vector.shape_cast %63 : vector<16x16x8xf32> to vector<256x8xf32>
    %c2_75 = arith.constant 2 : index
    %c2_76 = arith.constant 2 : index
    %c0_77 = arith.constant 0 : index
    %65 = vector.load %arg14[%c2_75, %c2_76, %c0_77] : memref<18x18x8xf32, #tpu.memory_space<vmem>>, vector<16x16x8xf32>
    %66 = vector.shape_cast %65 : vector<16x16x8xf32> to vector<256x8xf32>
    %67 = tpu.concatenate %50, %52, %54, %56, %58, %60, %62, %64, %66 in 1 : vector<256x8xf32>, vector<256x8xf32>, vector<256x8xf32>, vector<256x8xf32>, vector<256x8xf32>, vector<256x8xf32>, vector<256x8xf32>, vector<256x8xf32>, vector<256x8xf32> -> vector<256x72xf32>
    %c0_78 = arith.constant 0 : index
    %c0_79 = arith.constant 0 : index
    %68 = vector.load %arg7[%c0_78, %c0_79] : memref<72x8xf32, #tpu.memory_space<vmem>>, vector<72x8xf32>
    %cst_80 = arith.constant dense<0.000000e+00> : vector<256x8xf32>
    %69 = tpu.matmul %67, %68, %cst_80 {dimension_numbers = #tpu.dot_dimension_numbers<[1], [0], [0], [1], [0, 0, 1, 1], [], []>} : vector<256x72xf32>, vector<72x8xf32>, vector<256x8xf32> -> vector<256x8xf32>
    %70 = vector.broadcast %9 : vector<1x8xf32> to vector<256x8xf32>
    %71 = arith.mulf %69, %70 : vector<256x8xf32>
    %72 = vector.broadcast %10 : vector<1x8xf32> to vector<256x8xf32>
    %73 = arith.addf %71, %72 : vector<256x8xf32>
    %cst_81 = arith.constant 0.000000e+00 : f32
    %74 = vector.broadcast %cst_81 : f32 to vector<256x8xf32>
    %75 = arith.maximumf %73, %74 : vector<256x8xf32>
    %76 = vector.shape_cast %75 : vector<256x8xf32> to vector<16x16x8xf32>
    %c0_82 = arith.constant 0 : index
    %c0_83 = arith.constant 0 : index
    %77 = vector.load %arg10[%c0_82, %c0_83] : memref<32x16xf32, #tpu.memory_space<vmem>>, vector<32x16xf32>
    %78 = vector.shape_cast %77 : vector<32x16xf32> to vector<1x32x16xf32>
    %79 = vector.shape_cast %78 : vector<1x32x16xf32> to vector<1x32x16xf32>
    %80 = vector.broadcast %79 : vector<1x32x16xf32> to vector<16x32x16xf32>
    "tpu.trace_start"() <{level = 10 : i32, message = "how,hwd->hod"}> : () -> ()
    %cst_84 = arith.constant dense<0.000000e+00> : vector<16x32x8xf32>
    %81 = tpu.matmul %80, %76, %cst_84 {dimension_numbers = #tpu.dot_dimension_numbers<[2], [1], [1], [2], [0, 0, 0, 1, 1, 2], [0], [0]>} : vector<16x32x16xf32>, vector<16x16x8xf32>, vector<16x32x8xf32> -> vector<16x32x8xf32>
    "tpu.trace_stop"() : () -> ()
    %c0_85 = arith.constant 0 : index
    %c0_86 = arith.constant 0 : index
    %82 = vector.load %arg11[%c0_85, %c0_86] : memref<32x16xf32, #tpu.memory_space<vmem>>, vector<32x16xf32>
    %83 = vector.shape_cast %81 : vector<16x32x8xf32> to vector<16x256xf32>
    %cst_87 = arith.constant dense<0.000000e+00> : vector<32x256xf32>
    %84 = tpu.matmul %82, %83, %cst_87 {dimension_numbers = #tpu.dot_dimension_numbers<[1], [0], [0], [1], [0, 0, 1, 1], [], []>} : vector<32x16xf32>, vector<16x256xf32>, vector<32x256xf32> -> vector<32x256xf32>
    %c0_88 = arith.constant 0 : index
    %c0_89 = arith.constant 0 : index
    %c0_90 = arith.constant 0 : index
    %85 = vector.load %arg12[%c0_88, %c0_89, %c0_90] : memref<1x32x256xf32, #tpu.memory_space<vmem>>, vector<1x32x256xf32>
    %86 = vector.shape_cast %85 : vector<1x32x256xf32> to vector<32x256xf32>
    %87 = vector.shape_cast %84 : vector<32x256xf32> to vector<1x32x256xf32>
    tpu.vector_store %arg12[%c0_88, %c0_89, %c0_90], %87 {strides = array<i32>} : memref<1x32x256xf32, #tpu.memory_space<vmem>>, vector<1x32x256xf32>,
    return
  }
  func.func @transform_0(%arg0: i32) -> (i32, i32, i32, i32) {
    %c0_i32 = arith.constant 0 : i32
    %c0_i32_0 = arith.constant 0 : i32
    %c0_i32_1 = arith.constant 0 : i32
    %c0_i32_2 = arith.constant 0 : i32
    return %arg0, %c0_i32, %c0_i32_0, %c0_i32_1 : i32, i32, i32, i32
  }
  func.func @transform_1(%arg0: i32) -> (i32, i32) {
    %c0_i32 = arith.constant 0 : i32
    %c0_i32_0 = arith.constant 0 : i32
    %c0_i32_1 = arith.constant 0 : i32
    return %c0_i32, %c0_i32_0 : i32, i32
  }
  func.func @transform_2(%arg0: i32) -> (i32, i32) {
    %c0_i32 = arith.constant 0 : i32
    %c0_i32_0 = arith.constant 0 : i32
    %c0_i32_1 = arith.constant 0 : i32
    return %c0_i32, %c0_i32_0 : i32, i32
  }
  func.func @transform_3(%arg0: i32) -> (i32, i32) {
    %c0_i32 = arith.constant 0 : i32
    %c0_i32_0 = arith.constant 0 : i32
    %c0_i32_1 = arith.constant 0 : i32
    return %c0_i32, %c0_i32_0 : i32, i32
  }
  func.func @transform_4(%arg0: i32) -> (i32, i32) {
    %c0_i32 = arith.constant 0 : i32
    %c0_i32_0 = arith.constant 0 : i32
    %c0_i32_1 = arith.constant 0 : i32
    return %c0_i32, %c0_i32_0 : i32, i32
  }
  func.func @transform_5(%arg0: i32) -> (i32, i32) {
    %c0_i32 = arith.constant 0 : i32
    %c0_i32_0 = arith.constant 0 : i32
    %c0_i32_1 = arith.constant 0 : i32
    return %c0_i32, %c0_i32_0 : i32, i32
  }
  func.func @transform_6(%arg0: i32) -> (i32, i32) {
    %c0_i32 = arith.constant 0 : i32
    %c0_i32_0 = arith.constant 0 : i32
    %c0_i32_1 = arith.constant 0 : i32
    return %c0_i32, %c0_i32_0 : i32, i32
  }
  func.func @transform_7(%arg0: i32) -> (i32, i32) {
    %c0_i32 = arith.constant 0 : i32
    %c0_i32_0 = arith.constant 0 : i32
    %c0_i32_1 = arith.constant 0 : i32
    return %c0_i32, %c0_i32_0 : i32, i32
  }
  func.func @transform_8(%arg0: i32) -> (i32, i32) {
    %c0_i32 = arith.constant 0 : i32
    %c0_i32_0 = arith.constant 0 : i32
    %c0_i32_1 = arith.constant 0 : i32
    return %c0_i32, %c0_i32_0 : i32, i32
  }
  func.func @transform_9(%arg0: i32) -> (i32, i32) {
    %c0_i32 = arith.constant 0 : i32
    %c0_i32_0 = arith.constant 0 : i32
    %c0_i32_1 = arith.constant 0 : i32
    return %c0_i32, %c0_i32_0 : i32, i32
  }
  func.func @transform_10(%arg0: i32) -> (i32, i32) {
    %c0_i32 = arith.constant 0 : i32
    %c0_i32_0 = arith.constant 0 : i32
    %c0_i32_1 = arith.constant 0 : i32
    return %c0_i32, %c0_i32_0 : i32, i32
  }
  func.func @transform_11(%arg0: i32) -> (i32, i32, i32) {
    %c0_i32 = arith.constant 0 : i32
    %c0_i32_0 = arith.constant 0 : i32
    %c0_i32_1 = arith.constant 0 : i32
    return %arg0, %c0_i32, %c0_i32_0 : i32, i32, i32
  }
}

</mosaic_0001>

<bundles_post_ra>
// kernel: tpu_custom_call.1
= control target key start
LH: loop header
LB: loop body
LE: loop exit
PB: predicated region body
PF: predicated region fallthrough
CT: control target
= control target key end

     0   :  { %s11312_s0 = inlined_call_operand.vmem [shape: f32[2,16,16,4], index: 0, kind: input, shape index: {}]   ;;  %s11313_s1 = inlined_call_operand.vmem [shape: f32[1,4], index: 1, kind: input, shape index: {}]   ;;  %s11314_s2 = inlined_call_operand.vmem [shape: f32[1,4], index: 2, kind: input, shape index: {}]   ;;  %s11315_s3 = inlined_call_operand.vmem [shape: f32[36,8], index: 3, kind: input, shape index: {}]   ;;  %s11316_s4 = inlined_call_operand.vmem [shape: f32[1,8], index: 4, kind: input, shape index: {}]   ;;  %s11317_s5 = inlined_call_operand.vmem [shape: f32[1,8], index: 5, kind: input, shape index: {}]   ;;  %s11318_s6 = inlined_call_operand.vmem [shape: f32[72,8], index: 6, kind: input, shape index: {}]   ;;  %s11319_s7 = inlined_call_operand.vmem [shape: f32[1,8], index: 7, kind: input, shape index: {}]   ;;  %s11320_s8 = inlined_call_operand.vmem [shape: f32[1,8], index: 8, kind: input, shape index: {}]   ;;  %s11321_s9 = inlined_call_operand.vmem [shape: f32[32,16], index: 9, kind: input, shape index: {}]   ;;  %s11322_s10 = inlined_call_operand.vmem [shape: f32[32,16], index: 10, kind: input, shape index: {}]   ;;  %s11323_s11 = inlined_call_operand.hbm [shape: f32[2,32,256], index: 11, kind: output, shape index: {}]  }
   0x1   :  { %11377 = sst [smem:[#allocation169_spill]] %s11312_s0 }
   0x2   :  { %11378 = sst [smem:[#allocation170_spill]] %s11313_s1 }
   0x3   :  { %11379 = sst [smem:[#allocation171_spill]] %s11314_s2 }
   0x4   :  { %11380 = sst [smem:[#allocation172_spill]] %s11315_s3 }
   0x5   :  { %11381 = sst [smem:[#allocation173_spill]] %s11316_s4 }
   0x6   :  { %16 = vsyncpa [#allocation5], 0 }
   0x7   :  { %18 = vsyncpa [#allocation5 + $0x1], 0  ;;  %s6899_s17 = smov 0   ;;  %s6901_s18 = smov 0  }
   0x8   :  { %s6903_s19 = smov 0   ;;  %s6905_s20 = smov 0  }
   0x9 LB: > { %s6920_s21 = sadd.s32 4294967295, %s6814_s20   ;;  %s6342_s22 = sadd.s32 4294967294, %s6814_s20   ;;  %s6814_s20 = sphi %s6905_s20, %s11866_s20   ;;  %s6810_s19 = sphi %s6903_s19, %s11865_s19   ;;  %s6806_s18 = sphi %s6901_s18, %s11864_s18   ;;  %s6802_s17 = sphi %s6899_s17, %s11863_s17  }
   0xa   : > { %s6924_s23 = sadd.s32 1, %s6814_s20   ;;  %s267_s24 = sadd.s32 1, %s6810_s19 }
   0xb   : > { %s264_s25 = ssub.s32 %s6814_s20, %s6924_s23  ;;  %p277_p0 = scmp.ne.s32.totalorder %s6810_s19, %s6806_s18 }
   0xc   : > { %p265_p1 = scmp.eq.s32.totalorder %s264_s25, 0  ;;  %p278_p2 = scmp.eq.s32.totalorder %s6920_s21, 1 }
   0xd   : > { %p283_p3 = scmp.ne.s32.totalorder %s6806_s18, %s6802_s17  ;;  %p284_p4 = scmp.eq.s32.totalorder %s6342_s22, 1 }
   0xe   : > { %s6935_s26 = scalar_select %p265_p1, %s6810_s19, %s267_s24  }
   0xf   : > { %p6937_p5 = por %p278_p2, %p277_p0  ;;  %p6941_p6 = por %p284_p4, %p283_p3 }
  0x10   : > { %p6345_p7 = scmp.ge.s32.totalorder %s6814_s20, 1  ;;  %p340_p8 = scmp.lt.s32.totalorder %s6814_s20, 3 }
  0x12   : > { %p341_p9 = pnand %p6345_p7, %p340_p8 }
  0x14   : > { %344 = sbr.rel (%p341_p9) target bundleno = 2601 (0xa29), region = 64 }
  0x19   : > { %s11344_s29 = sand.u32 1, %s6806_s18   ;;  %p380_p10 = scmp.lt.s32.totalorder %s6920_s21, 1 }
  0x1a   : > { %s6346_s30 = sshll.u32 %s11344_s29, 6  ;;  %s11384_s0 = sld [smem:[#allocation169_spill]] }
  0x1b   : > { %s381_s12 = scalar_select %p380_p10, %s6920_s21, 1 }
  0x1c   : > { %s6957_s22 = scalar_lea.vmem [#allocation4], %s6346_s30  ;;  %p6349_p11 = scmp.ne.s32.totalorder %s6920_s21, 0 }
  0x1d   : > { %s6492_s13 = sshll.u32 %s381_s12, 8 }
  0x1e   : > { %388 = sbr.rel (%p6349_p11) target bundleno = 144 (0x90), region = 68 }
  0x20   : > { %s6955_s16 = scalar_lea.vmem %s11384_s0, %s6492_s13 }
  0x23   : > { %vm389_vm0 = vcmask 31744   ;;  %v6816_v0 = vmov 0.0   ;;  %vm392_vm1 = vcmask 25600   ;;  %vm445_vm2 = vcmask 64512  }
  0x24   : > { %390 = vst.msk [vmem:[#allocation2] sm:$0xff] %vm389_vm0, %v6816_v0  ;;  %vm448_vm3 = vcmask 58368  }
  0x25   : > { %391 = vst.msk [vmem:[#allocation2 + $0x8] sm:$0xff] %vm389_vm0, %v6816_v0 }
  0x26   : > { %394 = vst.msk [vmem:[#allocation2 + $0x18] sm:$0xff] %vm389_vm0, %v6816_v0 }
  0x27   : > { %395 = vst.msk [vmem:[#allocation2 + $0x20] sm:$0xff] %vm389_vm0, %v6816_v0 }
  0x28   : > { %397 = vst.msk [vmem:[#allocation2 + $0x30] sm:$0xff] %vm389_vm0, %v6816_v0 }
  0x29   : > { %398 = vst.msk [vmem:[#allocation2 + $0x38] sm:$0xff] %vm389_vm0, %v6816_v0 }
  0x2a   : > { %400 = vst.msk [vmem:[#allocation2 + $0x48] sm:$0xff] %vm389_vm0, %v6816_v0 }
  0x2b   : > { %401 = vst.msk [vmem:[#allocation2 + $0x50] sm:$0xff] %vm389_vm0, %v6816_v0 }
  0x2c   : > { %403 = vst.msk [vmem:[#allocation2 + $0x60] sm:$0xff] %vm389_vm0, %v6816_v0 }
  0x2d   : > { %404 = vst.msk [vmem:[#allocation2 + $0x68] sm:$0xff] %vm389_vm0, %v6816_v0 }
  0x2e   : > { %406 = vst.msk [vmem:[#allocation2 + $0x78] sm:$0xff] %vm389_vm0, %v6816_v0 }
  0x2f   : > { %407 = vst.msk [vmem:[#allocation2 + $0x80] sm:$0xff] %vm389_vm0, %v6816_v0 }
  0x30   : > { %409 = vst.msk [vmem:[#allocation2 + $0x90] sm:$0xff] %vm389_vm0, %v6816_v0 }
  0x31   : > { %410 = vst.msk [vmem:[#allocation2 + $0x98] sm:$0xff] %vm389_vm0, %v6816_v0 }
  0x32   : > { %412 = vst.msk [vmem:[#allocation2 + $0xa8] sm:$0xff] %vm389_vm0, %v6816_v0 }
  0x33   : > { %413 = vst.msk [vmem:[#allocation2 + $0xb0] sm:$0xff] %vm389_vm0, %v6816_v0 }
  0x34   : > { %415 = vst.msk [vmem:[#allocation2 + $0xc0] sm:$0xff] %vm389_vm0, %v6816_v0 }
  0x35   : > { %416 = vst.msk [vmem:[#allocation2 + $0xc8] sm:$0xff] %vm389_vm0, %v6816_v0 }
  0x36   : > { %418 = vst.msk [vmem:[#allocation2 + $0xd8] sm:$0xff] %vm389_vm0, %v6816_v0 }
  0x37   : > { %419 = vst.msk [vmem:[#allocation2 + $0xe0] sm:$0xff] %vm389_vm0, %v6816_v0 }
  0x38   : > { %421 = vst.msk [vmem:[#allocation2 + $0xf0] sm:$0xff] %vm389_vm0, %v6816_v0 }
  0x39   : > { %422 = vst.msk [vmem:[#allocation2 + $0xf8] sm:$0xff] %vm389_vm0, %v6816_v0 }
  0x3a   : > { %424 = vst.msk [vmem:[#allocation2 + $0x108] sm:$0xff] %vm389_vm0, %v6816_v0 }
  0x3b   : > { %425 = vst.msk [vmem:[#allocation2 + $0x110] sm:$0xff] %vm389_vm0, %v6816_v0 }
  0x3c   : > { %427 = vst.msk [vmem:[#allocation2 + $0x120] sm:$0xff] %vm389_vm0, %v6816_v0 }
  0x3d   : > { %428 = vst.msk [vmem:[#allocation2 + $0x128] sm:$0xff] %vm389_vm0, %v6816_v0 }
  0x3e   : > { %430 = vst.msk [vmem:[#allocation2 + $0x138] sm:$0xff] %vm389_vm0, %v6816_v0 }
  0x3f   : > { %431 = vst.msk [vmem:[#allocation2 + $0x140] sm:$0xff] %vm389_vm0, %v6816_v0 }
  0x40   : > { %433 = vst.msk [vmem:[#allocation2 + $0x150] sm:$0xff] %vm389_vm0, %v6816_v0 }
  0x41   : > { %434 = vst.msk [vmem:[#allocation2 + $0x158] sm:$0xff] %vm389_vm0, %v6816_v0 }
  0x42   : > { %436 = vst.msk [vmem:[#allocation2 + $0x168] sm:$0xff] %vm389_vm0, %v6816_v0 }
  0x43   : > { %437 = vst.msk [vmem:[#allocation2 + $0x170] sm:$0xff] %vm389_vm0, %v6816_v0 }
  0x44   : > { %439 = vst.msk [vmem:[#allocation2 + $0x180] sm:$0xff] %vm389_vm0, %v6816_v0 }
  0x45   : > { %440 = vst.msk [vmem:[#allocation2 + $0x188] sm:$0xff] %vm389_vm0, %v6816_v0 }
  0x46   : > { %442 = vst.msk [vmem:[#allocation2 + $0x198] sm:$0xff] %vm389_vm0, %v6816_v0 }
  0x47   : > { %443 = vst.msk [vmem:[#allocation2 + $0x1a0] sm:$0xff] %vm389_vm0, %v6816_v0 }
  0x48   : > { %393 = vst.msk [vmem:[#allocation2 + $0x10] sm:$0x3] %vm392_vm1, %v6816_v0 }
  0x49   : > { %396 = vst.msk [vmem:[#allocation2 + $0x28] sm:$0x3] %vm392_vm1, %v6816_v0 }
  0x4a   : > { %399 = vst.msk [vmem:[#allocation2 + $0x40] sm:$0x3] %vm392_vm1, %v6816_v0 }
  0x4b   : > { %402 = vst.msk [vmem:[#allocation2 + $0x58] sm:$0x3] %vm392_vm1, %v6816_v0 }
  0x4c   : > { %405 = vst.msk [vmem:[#allocation2 + $0x70] sm:$0x3] %vm392_vm1, %v6816_v0 }
  0x4d   : > { %408 = vst.msk [vmem:[#allocation2 + $0x88] sm:$0x3] %vm392_vm1, %v6816_v0 }
  0x4e   : > { %411 = vst.msk [vmem:[#allocation2 + $0xa0] sm:$0x3] %vm392_vm1, %v6816_v0 }
  0x4f   : > { %414 = vst.msk [vmem:[#allocation2 + $0xb8] sm:$0x3] %vm392_vm1, %v6816_v0 }
  0x50   : > { %417 = vst.msk [vmem:[#allocation2 + $0xd0] sm:$0x3] %vm392_vm1, %v6816_v0 }
  0x51   : > { %420 = vst.msk [vmem:[#allocation2 + $0xe8] sm:$0x3] %vm392_vm1, %v6816_v0 }
  0x52   : > { %423 = vst.msk [vmem:[#allocation2 + $0x100] sm:$0x3] %vm392_vm1, %v6816_v0 }
  0x53   : > { %426 = vst.msk [vmem:[#allocation2 + $0x118] sm:$0x3] %vm392_vm1, %v6816_v0 }
  0x54   : > { %429 = vst.msk [vmem:[#allocation2 + $0x130] sm:$0x3] %vm392_vm1, %v6816_v0 }
  0x55   : > { %432 = vst.msk [vmem:[#allocation2 + $0x148] sm:$0x3] %vm392_vm1, %v6816_v0 }
  0x56   : > { %435 = vst.msk [vmem:[#allocation2 + $0x160] sm:$0x3] %vm392_vm1, %v6816_v0 }
  0x57   : > { %438 = vst.msk [vmem:[#allocation2 + $0x178] sm:$0x3] %vm392_vm1, %v6816_v0 }
  0x58   : > { %441 = vst.msk [vmem:[#allocation2 + $0x190] sm:$0x3] %vm392_vm1, %v6816_v0 }
  0x59   : > { %444 = vst.msk [vmem:[#allocation2 + $0x1a8] sm:$0x3] %vm392_vm1, %v6816_v0 }
  0x5a   : > { %446 = vst.msk [vmem:[#allocation3] sm:$0xff] %vm445_vm2, %v6816_v0 }
  0x5b   : > { %447 = vst.msk [vmem:[#allocation3 + $0x8] sm:$0xff] %vm445_vm2, %v6816_v0 }
  0x5c   : > { %450 = vst.msk [vmem:[#allocation3 + $0x18] sm:$0xff] %vm445_vm2, %v6816_v0 }
  0x5d   : > { %451 = vst.msk [vmem:[#allocation3 + $0x20] sm:$0xff] %vm445_vm2, %v6816_v0 }
  0x5e   : > { %453 = vst.msk [vmem:[#allocation3 + $0x30] sm:$0xff] %vm445_vm2, %v6816_v0 }
  0x5f   : > { %454 = vst.msk [vmem:[#allocation3 + $0x38] sm:$0xff] %vm445_vm2, %v6816_v0 }
  0x60   : > { %456 = vst.msk [vmem:[#allocation3 + $0x48] sm:$0xff] %vm445_vm2, %v6816_v0 }
  0x61   : > { %457 = vst.msk [vmem:[#allocation3 + $0x50] sm:$0xff] %vm445_vm2, %v6816_v0 }
  0x62   : > { %459 = vst.msk [vmem:[#allocation3 + $0x60] sm:$0xff] %vm445_vm2, %v6816_v0 }
  0x63   : > { %460 = vst.msk [vmem:[#allocation3 + $0x68] sm:$0xff] %vm445_vm2, %v6816_v0 }
  0x64   : > { %462 = vst.msk [vmem:[#allocation3 + $0x78] sm:$0xff] %vm445_vm2, %v6816_v0 }
  0x65   : > { %463 = vst.msk [vmem:[#allocation3 + $0x80] sm:$0xff] %vm445_vm2, %v6816_v0 }
  0x66   : > { %465 = vst.msk [vmem:[#allocation3 + $0x90] sm:$0xff] %vm445_vm2, %v6816_v0 }
  0x67   : > { %466 = vst.msk [vmem:[#allocation3 + $0x98] sm:$0xff] %vm445_vm2, %v6816_v0 }
  0x68   : > { %468 = vst.msk [vmem:[#allocation3 + $0xa8] sm:$0xff] %vm445_vm2, %v6816_v0 }
  0x69   : > { %469 = vst.msk [vmem:[#allocation3 + $0xb0] sm:$0xff] %vm445_vm2, %v6816_v0 }
  0x6a   : > { %471 = vst.msk [vmem:[#allocation3 + $0xc0] sm:$0xff] %vm445_vm2, %v6816_v0 }
  0x6b   : > { %472 = vst.msk [vmem:[#allocation3 + $0xc8] sm:$0xff] %vm445_vm2, %v6816_v0 }
  0x6c   : > { %474 = vst.msk [vmem:[#allocation3 + $0xd8] sm:$0xff] %vm445_vm2, %v6816_v0 }
  0x6d   : > { %475 = vst.msk [vmem:[#allocation3 + $0xe0] sm:$0xff] %vm445_vm2, %v6816_v0 }
  0x6e   : > { %477 = vst.msk [vmem:[#allocation3 + $0xf0] sm:$0xff] %vm445_vm2, %v6816_v0 }
  0x6f   : > { %478 = vst.msk [vmem:[#allocation3 + $0xf8] sm:$0xff] %vm445_vm2, %v6816_v0 }
  0x70   : > { %480 = vst.msk [vmem:[#allocation3 + $0x108] sm:$0xff] %vm445_vm2, %v6816_v0 }
  0x71   : > { %481 = vst.msk [vmem:[#allocation3 + $0x110] sm:$0xff] %vm445_vm2, %v6816_v0 }
  0x72   : > { %483 = vst.msk [vmem:[#allocation3 + $0x120] sm:$0xff] %vm445_vm2, %v6816_v0 }
  0x73   : > { %484 = vst.msk [vmem:[#allocation3 + $0x128] sm:$0xff] %vm445_vm2, %v6816_v0 }
  0x74   : > { %486 = vst.msk [vmem:[#allocation3 + $0x138] sm:$0xff] %vm445_vm2, %v6816_v0 }
  0x75   : > { %487 = vst.msk [vmem:[#allocation3 + $0x140] sm:$0xff] %vm445_vm2, %v6816_v0 }
  0x76   : > { %489 = vst.msk [vmem:[#allocation3 + $0x150] sm:$0xff] %vm445_vm2, %v6816_v0 }
  0x77   : > { %490 = vst.msk [vmem:[#allocation3 + $0x158] sm:$0xff] %vm445_vm2, %v6816_v0 }
  0x78   : > { %492 = vst.msk [vmem:[#allocation3 + $0x168] sm:$0xff] %vm445_vm2, %v6816_v0 }
  0x79   : > { %493 = vst.msk [vmem:[#allocation3 + $0x170] sm:$0xff] %vm445_vm2, %v6816_v0 }
  0x7a   : > { %495 = vst.msk [vmem:[#allocation3 + $0x180] sm:$0xff] %vm445_vm2, %v6816_v0 }
  0x7b   : > { %496 = vst.msk [vmem:[#allocation3 + $0x188] sm:$0xff] %vm445_vm2, %v6816_v0 }
  0x7c   : > { %498 = vst.msk [vmem:[#allocation3 + $0x198] sm:$0xff] %vm445_vm2, %v6816_v0 }
  0x7d   : > { %499 = vst.msk [vmem:[#allocation3 + $0x1a0] sm:$0xff] %vm445_vm2, %v6816_v0 }
  0x7e   : > { %449 = vst.msk [vmem:[#allocation3 + $0x10] sm:$0x3] %vm448_vm3, %v6816_v0 }
  0x7f   : > { %452 = vst.msk [vmem:[#allocation3 + $0x28] sm:$0x3] %vm448_vm3, %v6816_v0 }
  0x80   : > { %455 = vst.msk [vmem:[#allocation3 + $0x40] sm:$0x3] %vm448_vm3, %v6816_v0 }
  0x81   : > { %458 = vst.msk [vmem:[#allocation3 + $0x58] sm:$0x3] %vm448_vm3, %v6816_v0 }
  0x82   : > { %461 = vst.msk [vmem:[#allocation3 + $0x70] sm:$0x3] %vm448_vm3, %v6816_v0 }
  0x83   : > { %464 = vst.msk [vmem:[#allocation3 + $0x88] sm:$0x3] %vm448_vm3, %v6816_v0 }
  0x84   : > { %467 = vst.msk [vmem:[#allocation3 + $0xa0] sm:$0x3] %vm448_vm3, %v6816_v0 }
  0x85   : > { %470 = vst.msk [vmem:[#allocation3 + $0xb8] sm:$0x3] %vm448_vm3, %v6816_v0 }
  0x86   : > { %473 = vst.msk [vmem:[#allocation3 + $0xd0] sm:$0x3] %vm448_vm3, %v6816_v0 }
  0x87   : > { %476 = vst.msk [vmem:[#allocation3 + $0xe8] sm:$0x3] %vm448_vm3, %v6816_v0 }
  0x88   : > { %479 = vst.msk [vmem:[#allocation3 + $0x100] sm:$0x3] %vm448_vm3, %v6816_v0 }
  0x89   : > { %482 = vst.msk [vmem:[#allocation3 + $0x118] sm:$0x3] %vm448_vm3, %v6816_v0 }
  0x8a   : > { %485 = vst.msk [vmem:[#allocation3 + $0x130] sm:$0x3] %vm448_vm3, %v6816_v0 }
  0x8b   : > { %488 = vst.msk [vmem:[#allocation3 + $0x148] sm:$0x3] %vm448_vm3, %v6816_v0 }
  0x8c   : > { %491 = vst.msk [vmem:[#allocation3 + $0x160] sm:$0x3] %vm448_vm3, %v6816_v0 }
  0x8d   : > { %494 = vst.msk [vmem:[#allocation3 + $0x178] sm:$0x3] %vm448_vm3, %v6816_v0 }
  0x8e   : > { %497 = vst.msk [vmem:[#allocation3 + $0x190] sm:$0x3] %vm448_vm3, %v6816_v0 }
  0x8f   : > { %500 = vst.msk [vmem:[#allocation3 + $0x1a8] sm:$0x3] %vm448_vm3, %v6816_v0 }
  0x90 PF: > { %v707_v1 = vld [vmem:[#allocation2 + $0x1] sm:$0xff]  ;;  %s6817_s24 = smov 4   ;;  %s11385_s1 = sld [smem:[#allocation170_spill]]  ;;  %v509_v5 = vld [vmem:[%s6955_s16 + $0x10] sm:$0xff]  ;;  %v514_v10 = vld [vmem:[%s6955_s16 + $0x38] sm:$0xff]  ;;  %vm642_vm4 = vcmask 31744  }
  0x91   : > { %996 = vrot.lane.b32.xlu0 %v707_v1, %s6817_s24  ;;  %v511_v2 = vld [vmem:[%s6955_s16 + $0x20] sm:$0xff]  ;;  %s11386_s2 = sld [smem:[#allocation171_spill]]  ;;  %v510_v11 = vld [vmem:[%s6955_s16 + $0x18] sm:$0xff]  ;;  %v508_v12 = vld [vmem:[%s6955_s16 + $0x8] sm:$0xff]  ;;  %s11349_s14 = smov 8   ;;  %vm2353_vm5 = vcmask 1043456  }
  0x92   : > { %v507_v6 = vld [vmem:[%s6955_s16] sm:$0xff]  ;;  %v517_v16 = vld [vmem:[%s6955_s16 + $0x50] sm:$0xff]  ;;  %v512_v23 = vld [vmem:[%s6955_s16 + $0x28] sm:$0xff]  ;;  %s6819_s15 = smov 12   ;;  %s11345_s25 = smov 24   ;;  %vm2020_vm6 = vcmask 64512  }
  0x93   : > { %v513_v17 = vld [vmem:[%s6955_s16 + $0x30] sm:$0xff]  ;;  %v520_v24 = vld [vmem:[%s6955_s16 + $0x68] sm:$0xff]  ;;  %v515_v30 = vld [vmem:[%s6955_s16 + $0x40] sm:$0xff]  ;;  %s6823_s30 = smov 28   ;;  %s11357_s12 = smov 32   ;;  %vm2053_vm7 = vcmask 97280  }
  0x94   : > { %v708_v18 = vld [vmem:[#allocation2 + $0x9] sm:$0xff]  ;;  %v523_v31 = vld [vmem:[%s6955_s16 + $0x80] sm:$0xff]  ;;  %v518_v40 = vld [vmem:[%s6955_s16 + $0x58] sm:$0xff]  ;;  %s11581_s3 = sld [smem:[#allocation172_spill]]  ;;  %vm2119_vm8 = vcmask 162816   ;;  %vm2086_vm9 = vcmask 130048  }
  0x95   : > { %v516_v29 = vld [vmem:[%s6955_s16 + $0x48] sm:$0xff]  ;;  %v519_v36 = vld [vmem:[%s6955_s16 + $0x60] sm:$0xff]  ;;  %v522_v55 = vld [vmem:[%s6955_s16 + $0x78] sm:$0xff]  ;;  %vm2152_vm10 = vcmask 195584   ;;  %vm2218_vm11 = vcmask 261120   ;;  %vm2185_vm12 = vcmask 228352  }
  0x96   : > { %v7181_v3 = vld [vmem:[%s11385_s1] ss:$0 sm:$0xff]  ;;  %v521_v56 = vld [vmem:[%s6955_s16 + $0x70] sm:$0xff]  ;;  %v526_v59 = vld [vmem:[%s6955_s16 + $0x98] sm:$0xff]  ;;  %vm2256_vm13 = vcmask 293888   ;;  %s11639_s4 = sld [smem:[#allocation173_spill]] }
  0x97   : > { %v7186_v4 = vld [vmem:[%s11386_s2] ss:$0 sm:$0xff]  ;;  %v546_v7 = vmul.f32 %v7181_v3, %v511_v2  ;;  %v544_v8 = vmul.f32 %v7181_v3, %v509_v5  ;;  %v542_v9 = vmul.f32 %v7181_v3, %v507_v6  ;;  %v549_v13 = vmul.f32 %v7181_v3, %v514_v10  ;;  %s11353_s29 = smov 40   ;;  %s11355_s13 = smov 48  }
  0x98   : > { %v545_v14 = vmul.f32 %v7181_v3, %v510_v11  ;;  %v543_v15 = vmul.f32 %v7181_v3, %v508_v12  ;;  %v552_v22 = vmul.f32 %v7181_v3, %v517_v16  ;;  %v548_v28 = vmul.f32 %v7181_v3, %v513_v17  ;;  %v525_v16 = vld [vmem:[%s6955_s16 + $0x90] sm:$0xff]  ;;  %v524_v17 = vld [vmem:[%s6955_s16 + $0x88] sm:$0xff]  ;;  %s11780_s0 = smov 32  }
  0x99   : > { %v581_v19 = vadd.f32 %v7186_v4, %v546_v7  ;;  %v579_v20 = vadd.f32 %v7186_v4, %v544_v8  ;;  %v577_v21 = vadd.f32 %v7186_v4, %v542_v9  ;;  %v584_v25 = vadd.f32 %v7186_v4, %v549_v13  ;;  %998 = vrot.lane.b32.xlu0 %v708_v18, %s6817_s24 }
  0x9a   : > { %v580_v26 = vadd.f32 %v7186_v4, %v545_v14  ;;  %v578_v27 = vadd.f32 %v7186_v4, %v543_v15  ;;  %v587_v35 = vadd.f32 %v7186_v4, %v552_v22  ;;  %v583_v39 = vadd.f32 %v7186_v4, %v548_v28 }
  0x9b   : > { %v613_v32 = vmax.f32 %v581_v19, 0.0  ;;  %v611_v33 = vmax.f32 %v579_v20, 0.0  ;;  %v609_v34 = vmax.f32 %v577_v21, 0.0  ;;  %v616_v37 = vmax.f32 %v584_v25, 0.0  ;;  %v529_v19 = vld [vmem:[%s6955_s16 + $0xb0] sm:$0xff] }
  0x9c   : > { %v612_v38 = vmax.f32 %v580_v26, 0.0  ;;  %v610_v41 = vmax.f32 %v578_v27, 0.0  ;;  %v547_v42 = vmul.f32 %v7181_v3, %v512_v23  ;;  %v555_v43 = vmul.f32 %v7181_v3, %v520_v24 }
  0x9d   : > { %647 = vst.msk [vmem:[#allocation2 + $0x49] sm:$0xff] %vm642_vm4, %v613_v32  ;;  %v551_v44 = vmul.f32 %v7181_v3, %v516_v29  ;;  %v619_v45 = vmax.f32 %v587_v35, 0.0  ;;  %v550_v46 = vmul.f32 %v7181_v3, %v515_v30  ;;  %v558_v47 = vmul.f32 %v7181_v3, %v523_v31  ;;  %v532_v35 = vld [vmem:[%s6955_s16 + $0xc8] sm:$0xff] }
  0x9e   : > { %645 = vst.msk [vmem:[#allocation2 + $0x31] sm:$0xff] %vm642_vm4, %v611_v33  ;;  %v554_v48 = vmul.f32 %v7181_v3, %v519_v36  ;;  %v582_v49 = vadd.f32 %v7186_v4, %v547_v42  ;;  %v590_v50 = vadd.f32 %v7186_v4, %v555_v43  ;;  %v553_v52 = vmul.f32 %v7181_v3, %v518_v40  ;;  %v528_v33 = vld [vmem:[%s6955_s16 + $0xa8] sm:$0xff] }
  0x9f   : > { %643 = vst.msk [vmem:[#allocation2 + $0x19] sm:$0xff] %vm642_vm4, %v609_v34  ;;  %v586_v51 = vadd.f32 %v7186_v4, %v551_v44  ;;  %v615_v53 = vmax.f32 %v583_v39, 0.0  ;;  %v585_v54 = vadd.f32 %v7186_v4, %v550_v46  ;;  %v593_v58 = vadd.f32 %v7186_v4, %v558_v47  ;;  %v527_v34 = vld [vmem:[%s6955_s16 + $0xa0] sm:$0xff] }
  0xa0   : > { %650 = vst.msk [vmem:[#allocation2 + $0x69] sm:$0xff] %vm642_vm4, %v616_v37  ;;  %v614_v57 = vmax.f32 %v582_v49, 0.0  ;;  %v622_v60 = vmax.f32 %v590_v50, 0.0  ;;  %v589_v61 = vadd.f32 %v7186_v4, %v554_v48  ;;  %v561_v62 = vmul.f32 %v7181_v3, %v526_v59  ;;  %v531_v48 = vld [vmem:[%s6955_s16 + $0xc0] sm:$0xff]  ;;  %v530_v49 = vld [vmem:[%s6955_s16 + $0xb8] sm:$0xff] }
  0xa1   : > { %646 = vst.msk [vmem:[#allocation2 + $0x39] sm:$0xff] %vm642_vm4, %v612_v38  ;;  %v618_v63 = vmax.f32 %v586_v51, 0.0  ;;  %v588_v0 = vadd.f32 %v7186_v4, %v553_v52  ;;  %v557_v1 = vmul.f32 %v7181_v3, %v522_v55  ;;  %v556_v2 = vmul.f32 %v7181_v3, %v521_v56  ;;  %v535_v50 = vld [vmem:[%s6955_s16 + $0xe0] sm:$0xff] }
  0xa2   : > { %644 = vst.msk [vmem:[#allocation2 + $0x21] sm:$0xff] %vm642_vm4, %v610_v41  ;;  %v617_v6 = vmax.f32 %v585_v54, 0.0  ;;  %v596_v7 = vadd.f32 %v7186_v4, %v561_v62  ;;  %v625_v9 = vmax.f32 %v593_v58, 0.0  ;;  %v621_v12 = vmax.f32 %v589_v61, 0.0 }
  0xa3   : > { %653 = vst.msk [vmem:[#allocation2 + $0x91] sm:$0xff] %vm642_vm4, %v619_v45  ;;  %v592_v10 = vadd.f32 %v7186_v4, %v557_v1  ;;  %v591_v13 = vadd.f32 %v7186_v4, %v556_v2  ;;  %v620_v14 = vmax.f32 %v588_v0, 0.0  ;;  %v560_v20 = vmul.f32 %v7181_v3, %v525_v16  ;;  %v533_v0 = vld [vmem:[%s6955_s16 + $0xd0] sm:$0xff] }
  0xa4   : > { %v713_v5 = vld [vmem:[#allocation2 + $0x49] sm:$0xff]  ;;  %649 = vst.msk [vmem:[#allocation2 + $0x61] sm:$0xff] %vm642_vm4, %v615_v53  ;;  %v628_v15 = vmax.f32 %v596_v7, 0.0  ;;  %v559_v21 = vmul.f32 %v7181_v3, %v524_v17  ;;  %v564_v24 = vmul.f32 %v7181_v3, %v529_v19  ;;  %v563_v36 = vmul.f32 %v7181_v3, %v528_v33 }
  0xa5   : > { %1008 = vrot.lane.b32.xlu0 %v713_v5, %s6817_s24  ;;  %v7249_v8 = vld [vmem:[#allocation2 + $0x31] sm:$0xff]  ;;  %648 = vst.msk [vmem:[#allocation2 + $0x51] sm:$0xff] %vm642_vm4, %v614_v57  ;;  %v624_v18 = vmax.f32 %v592_v10, 0.0  ;;  %v623_v23 = vmax.f32 %v591_v13, 0.0  ;;  %v595_v26 = vadd.f32 %v7186_v4, %v560_v20  ;;  %v562_v37 = vmul.f32 %v7181_v3, %v527_v34 }
  0xa6   : > { %1004 = vrot.lane.b32.xlu2 %v7249_v8, %s6817_s24  ;;  %v7255_v11 = vld [vmem:[#allocation2 + $0x19] sm:$0xff]  ;;  %656 = vst.msk [vmem:[#allocation2 + $0xb1] sm:$0xff] %vm642_vm4, %v622_v60  ;;  %v594_v27 = vadd.f32 %v7186_v4, %v559_v21  ;;  %v599_v29 = vadd.f32 %v7186_v4, %v564_v24  ;;  %v567_v39 = vmul.f32 %v7181_v3, %v532_v35  ;;  %v740_v33 = vld [vmem:[#allocation2 + $0xa] sm:$0xff]  ;;  %vm4046_vm14 = vcmask 326656  }
  0xa7   : > { %1000 = vrot.lane.b32.xlu1 %v7255_v11, %s6817_s24  ;;  %652 = vst.msk [vmem:[#allocation2 + $0x81] sm:$0xff] %vm642_vm4, %v618_v63  ;;  %v7269_v22 = vld [vmem:[#allocation2 + $0x69] sm:$0xff]  ;;  %v627_v30 = vmax.f32 %v595_v26, 0.0  ;;  %v598_v41 = vadd.f32 %v7186_v4, %v563_v36  ;;  %v597_v42 = vadd.f32 %v7186_v4, %v562_v37  ;;  %v566_v51 = vmul.f32 %v7181_v3, %v531_v48  ;;  %v534_v63 = vld [vmem:[%s6955_s16 + $0xd8] sm:$0xff] }
  0xa8   : > { %651 = vst.msk [vmem:[#allocation2 + $0x79] sm:$0xff] %vm642_vm4, %v617_v6  ;;  %v7273_v25 = vld [vmem:[#allocation2 + $0x39] sm:$0xff]  ;;  %v626_v31 = vmax.f32 %v594_v27, 0.0  ;;  %v631_v32 = vmax.f32 %v599_v29, 0.0  ;;  %v602_v44 = vadd.f32 %v7186_v4, %v567_v39  ;;  %v565_v52 = vmul.f32 %v7181_v3, %v530_v49  ;;  %v739_v37 = vld [vmem:[#allocation2 + $0x2] sm:$0xff] }
  0xa9   : > { %659 = vst.msk [vmem:[#allocation2 + $0xd9] sm:$0xff] %vm642_vm4, %v625_v9  ;;  %v7278_v28 = vld [vmem:[#allocation2 + $0x21] sm:$0xff]  ;;  %v630_v45 = vmax.f32 %v598_v41, 0.0  ;;  %v629_v46 = vmax.f32 %v597_v42, 0.0  ;;  %v570_v54 = vmul.f32 %v7181_v3, %v535_v50  ;;  %v601_v56 = vadd.f32 %v7186_v4, %v566_v51  ;;  %v7422_v36 = vld [vmem:[#allocation2 + $0x32] sm:$0xff] }
  0xaa   : > { %655 = vst.msk [vmem:[#allocation2 + $0xa9] sm:$0xff] %vm642_vm4, %v621_v12  ;;  %v7298_v38 = vld [vmem:[#allocation2 + $0x91] sm:$0xff]  ;;  %v634_v47 = vmax.f32 %v602_v44, 0.0  ;;  %v600_v57 = vadd.f32 %v7186_v4, %v565_v52  ;;  %v569_v1 = vmul.f32 %v7181_v3, %v534_v63  ;;  %v568_v2 = vmul.f32 %v7181_v3, %v533_v0  ;;  %v7433_v42 = vld [vmem:[#allocation2 + $0x22] sm:$0xff]  ;;  %v7435_v44 = vld [vmem:[#allocation2 + $0x1a] sm:$0xff] }
  0xab   : > { %654 = vst.msk [vmem:[#allocation2 + $0x99] sm:$0xff] %vm642_vm4, %v620_v14  ;;  %v7301_v40 = vld [vmem:[#allocation2 + $0x61] sm:$0xff]  ;;  %v605_v59 = vadd.f32 %v7186_v4, %v570_v54  ;;  %v633_v60 = vmax.f32 %v601_v56, 0.0  ;;  %v7463_v52 = vld [vmem:[#allocation2 + $0x6a] sm:$0xff]  ;;  %vm4079_vm15 = vcmask 392192   ;;  %vm4112_vm0 = vcmask 457728  }
  0xac   : > { %662 = vst.msk [vmem:[#allocation2 + $0xf9] sm:$0xff] %vm642_vm4, %v628_v15  ;;  %v7305_v43 = vld [vmem:[#allocation2 + $0x51] sm:$0xff]  ;;  %v632_v61 = vmax.f32 %v600_v57, 0.0  ;;  %v604_v7 = vadd.f32 %v7186_v4, %v569_v1  ;;  %v603_v9 = vadd.f32 %v7186_v4, %v568_v2  ;;  %v536_v14 = vld [vmem:[%s6955_s16 + $0xe8] sm:$0xff]  ;;  %v7449_v48 = vld [vmem:[#allocation2 + $0x3a] sm:$0xff]  ;;  %vm4145_vm1 = vcmask 523264  }
  0xad   : > { %1014 = vrot.lane.b32.xlu0 %v7269_v22, %s6817_s24  ;;  %658 = vst.msk [vmem:[#allocation2 + $0xc9] sm:$0xff] %vm642_vm4, %v624_v18  ;;  %v7322_v53 = vld [vmem:[#allocation2 + $0xb1] sm:$0xff]  ;;  %v637_v62 = vmax.f32 %v605_v59, 0.0  ;;  %v571_v15 = vmul.f32 %v7181_v3, %v536_v14  ;;  %v7465_v54 = vld [vmem:[#allocation2 + $0x62] sm:$0xff]  ;;  %vm4187_vm2 = vcmask 588800   ;;  %vm4984_vm3 = vcmask 1047556  }
  0xae   : > { %1006 = vrot.lane.b32.xlu2 %v7273_v25, %s6817_s24  ;;  %657 = vst.msk [vmem:[#allocation2 + $0xc1] sm:$0xff] %vm642_vm4, %v623_v23  ;;  %v7325_v55 = vld [vmem:[#allocation2 + $0x81] sm:$0xff]  ;;  %v636_v12 = vmax.f32 %v604_v7, 0.0  ;;  %v635_v13 = vmax.f32 %v603_v9, 0.0  ;;  %v7431_v41 = vld [vmem:[#allocation2 + $0x52] sm:$0xff] }
  0xaf   : > { %1002 = vrot.lane.b32.xlu1 %v7278_v28, %s6817_s24  ;;  %661 = vst.msk [vmem:[#allocation2 + $0xf1] sm:$0xff] %vm642_vm4, %v627_v30  ;;  %v7329_v58 = vld [vmem:[#allocation2 + $0x79] sm:$0xff]  ;;  %v606_v18 = vadd.f32 %v7186_v4, %v571_v15 }
  0xb0   : > { %665 = vst.msk [vmem:[#allocation2 + $0x121] sm:$0xff] %vm642_vm4, %v631_v32  ;;  %v7345_v5 = vld [vmem:[#allocation2 + $0xd9] sm:$0xff] }
  0xb1   : > { %660 = vst.msk [vmem:[#allocation2 + $0xe1] sm:$0xff] %vm642_vm4, %v626_v31  ;;  %v7347_v6 = vld [vmem:[#allocation2 + $0xa9] sm:$0xff]  ;;  %v638_v20 = vmax.f32 %v606_v18, 0.0  ;;  %v7497_v2 = vld [vmem:[#allocation2 + $0xb2] sm:$0xff] }
  0xb2   : > { %664 = vst.msk [vmem:[#allocation2 + $0x111] sm:$0xff] %vm642_vm4, %v630_v45  ;;  %v7351_v10 = vld [vmem:[#allocation2 + $0x99] sm:$0xff]  ;;  %v7499_v7 = vld [vmem:[#allocation2 + $0xaa] sm:$0xff] }
  0xb3   : > { %668 = vst.msk [vmem:[#allocation2 + $0x141] sm:$0xff] %vm642_vm4, %v634_v47  ;;  %v7363_v16 = vld [vmem:[#allocation2 + $0xf9] sm:$0xff]  ;;  %v7447_v47 = vld [vmem:[#allocation2 + $0x4a] sm:$0xff] }
  0xb4   : > { %663 = vst.msk [vmem:[#allocation2 + $0x109] sm:$0xff] %vm642_vm4, %v629_v46  ;;  %v7365_v17 = vld [vmem:[#allocation2 + $0xc9] sm:$0xff]  ;;  %v7445_v46 = vld [vmem:[#allocation2 + $0x7a] sm:$0xff] }
  0xb5   : > { %1020 = vrot.lane.b32.xlu0 %v7298_v38, %s6817_s24  ;;  %667 = vst.msk [vmem:[#allocation2 + $0x139] sm:$0xff] %vm642_vm4, %v633_v60  ;;  %v7368_v19 = vld [vmem:[#allocation2 + $0xc1] sm:$0xff]  ;;  %v7479_v60 = vld [vmem:[#allocation2 + $0x92] sm:$0xff]  ;;  %v7517_v18 = vld [vmem:[#allocation2 + $0xca] sm:$0xff] }
  0xb6   : > { %1012 = vrot.lane.b32.xlu2 %v7301_v40, %s6817_s24  ;;  %671 = vst.msk [vmem:[#allocation2 + $0x169] sm:$0xff] %vm642_vm4, %v637_v62  ;;  %v7379_v23 = vld [vmem:[#allocation2 + $0xf1] sm:$0xff]  ;;  %v7461_v51 = vld [vmem:[#allocation2 + $0x9a] sm:$0xff]  ;;  %v7477_v59 = vld [vmem:[#allocation2 + $0xc2] sm:$0xff] }
  0xb7   : > { %1010 = vrot.lane.b32.xlu1 %v7305_v43, %s6817_s24  ;;  %666 = vst.msk [vmem:[#allocation2 + $0x129] sm:$0xff] %vm642_vm4, %v632_v61  ;;  %v7377_v21 = vld [vmem:[#allocation2 + $0x121] sm:$0xff] }
  0xb8   : > { %670 = vst.msk [vmem:[#allocation2 + $0x159] sm:$0xff] %vm642_vm4, %v636_v12  ;;  %v7381_v24 = vld [vmem:[#allocation2 + $0xe1] sm:$0xff] }
  0xb9   : > { %669 = vst.msk [vmem:[#allocation2 + $0x151] sm:$0xff] %vm642_vm4, %v635_v13  ;;  %v7391_v27 = vld [vmem:[#allocation2 + $0x111] sm:$0xff]  ;;  %v7481_v61 = vld [vmem:[#allocation2 + $0x82] sm:$0xff]  ;;  %v7515_v15 = vld [vmem:[#allocation2 + $0xda] sm:$0xff] }
  0xba   : > { %672 = vst.msk [vmem:[#allocation2 + $0x171] sm:$0xff] %vm642_vm4, %v638_v20  ;;  %v7389_v26 = vld [vmem:[#allocation2 + $0x141] sm:$0xff] }
  0xbb   : > { %v7393_v29 = vld [vmem:[#allocation2 + $0x109] sm:$0xff] }
  0xbc   : > { %v7403_v31 = vld [vmem:[#allocation2 + $0x139] sm:$0xff]  ;;  %v7495_v1 = vld [vmem:[#allocation2 + $0xe2] sm:$0xff]  ;;  %v7513_v14 = vld [vmem:[#allocation2 + $0x10a] sm:$0xff] }
  0xbd   : > { %1026 = vrot.lane.b32.xlu0 %v7322_v53, %s6817_s24  ;;  %v7401_v30 = vld [vmem:[#allocation2 + $0x169] sm:$0xff]  ;;  %11398 = vst [vmem:[#allocation18_spill] sm:$0xff] %v7513_v14 }
  0xbe   : > { %1018 = vrot.lane.b32.xlu2 %v7325_v55, %s6817_s24  ;;  %v7405_v32 = vld [vmem:[#allocation2 + $0x129] sm:$0xff] }
  0xbf   : > { %1016 = vrot.lane.b32.xlu1 %v7329_v58, %s6817_s24  ;;  %v7413_v34 = vld [vmem:[#allocation2 + $0x159] sm:$0xff] }
  0xc0   : > { %v7415_v35 = vld [vmem:[#allocation2 + $0x151] sm:$0xff] }
  0xc1   : > { %v7424_v39 = vld [vmem:[#allocation2 + $0x171] sm:$0xff] }
  0xc5   : > { %1032 = vrot.lane.b32.xlu0 %v7345_v5, %s6817_s24 }
  0xc6   : > { %1024 = vrot.lane.b32.xlu2 %v7347_v6, %s6817_s24 }
  0xc7   : > { %1022 = vrot.lane.b32.xlu1 %v7351_v10, %s6817_s24 }
  0xcd   : > { %1038 = vrot.lane.b32.xlu0 %v7363_v16, %s6817_s24 }
  0xce   : > { %1030 = vrot.lane.b32.xlu2 %v7365_v17, %s6817_s24 }
  0xcf   : > { %1028 = vrot.lane.b32.xlu1 %v7368_v19, %s6817_s24 }
  0xd5   : > { %1044 = vrot.lane.b32.xlu0 %v7377_v21, %s6817_s24 }
  0xd6   : > { %1036 = vrot.lane.b32.xlu2 %v7379_v23, %s6817_s24 }
  0xd7   : > { %1034 = vrot.lane.b32.xlu1 %v7381_v24, %s6817_s24 }
  0xdd   : > { %1050 = vrot.lane.b32.xlu0 %v7389_v26, %s6817_s24 }
  0xde   : > { %1042 = vrot.lane.b32.xlu2 %v7391_v27, %s6817_s24 }
  0xdf   : > { %1040 = vrot.lane.b32.xlu1 %v7393_v29, %s6817_s24 }
  0xe5   : > { %1056 = vrot.lane.b32.xlu0 %v7401_v30, %s6817_s24 }
  0xe6   : > { %1048 = vrot.lane.b32.xlu2 %v7403_v31, %s6817_s24 }
  0xe7   : > { %1046 = vrot.lane.b32.xlu1 %v7405_v32, %s6817_s24 }
  0xed   : > { %1126 = vrot.lane.b32.xlu0 %v740_v33, %s11349_s14 }
  0xee   : > { %1054 = vrot.lane.b32.xlu2 %v7413_v34, %s6817_s24 }
  0xef   : > { %1052 = vrot.lane.b32.xlu1 %v7415_v35, %s6817_s24 }
  0xf5   : > { %1132 = vrot.lane.b32.xlu0 %v7422_v36, %s11349_s14 }
  0xf6   : > { %1124 = vrot.lane.b32.xlu2 %v739_v37, %s11349_s14 }
  0xf7   : > { %1058 = vrot.lane.b32.xlu1 %v7424_v39, %s6817_s24  ;;  %s6821_s24 = smov 20  }
  0xfd   : > { %1138 = vrot.lane.b32.xlu0 %v7431_v41, %s11349_s14 }
  0xfe   : > { %1130 = vrot.lane.b32.xlu2 %v7433_v42, %s11349_s14 }
  0xff   : > { %1128 = vrot.lane.b32.xlu1 %v7435_v44, %s11349_s14 }
 0x100   : > { %v7443_v45 = vpop.permute.xlu2 %1004 }
 0x101   : > { %11387 = vst [vmem:[#allocation7_spill] sm:$0xff] %v7443_v45  ;;  %v7567_v45 = vld [vmem:[#allocation2 + $0x172] sm:$0xff] }
 0x102   : > { %11411 = vst [vmem:[#allocation31_spill] sm:$0xff] %v7567_v45 }
 0x103   : > { %v7457_v49 = vpop.permute.xlu0 %996 }
 0x104   : > { %11388 = vst [vmem:[#allocation8_spill] sm:$0xff] %v7457_v49  ;;  %v679_v49 = vld [vmem:[#allocation2 + $0x30] sm:$0xff] }
 0x105   : > { %1144 = vrot.lane.b32.xlu0 %v7445_v46, %s11349_s14 }
 0x106   : > { %1136 = vrot.lane.b32.xlu2 %v7447_v47, %s11349_s14 }
 0x107   : > { %1134 = vrot.lane.b32.xlu1 %v7449_v48, %s11349_s14 }
 0x108   : > { %v7459_v50 = vpop.permute.xlu2 %1006 }
 0x109   : > { %11389 = vst [vmem:[#allocation9_spill] sm:$0xff] %v7459_v50  ;;  %v7553_v50 = vld [vmem:[#allocation2 + $0x112] sm:$0xff] }
 0x10a   : > { %11407 = vst [vmem:[#allocation27_spill] sm:$0xff] %v7553_v50 }
 0x10b   : > { %v7473_v56 = vpop.permute.xlu0 %998 }
 0x10c   : > { %11390 = vst [vmem:[#allocation10_spill] sm:$0xff] %v7473_v56  ;;  %v7585_v56 = vld [vmem:[#allocation2 + $0x16a] sm:$0xff] }
 0x10d   : > { %1150 = vrot.lane.b32.xlu0 %v7461_v51, %s11349_s14  ;;  %11417 = vst [vmem:[#allocation37_spill] sm:$0xff] %v7585_v56 }
 0x10e   : > { %1142 = vrot.lane.b32.xlu2 %v7463_v52, %s11349_s14 }
 0x10f   : > { %1140 = vrot.lane.b32.xlu1 %v7465_v54, %s11349_s14 }
 0x110   : > { %v7475_v57 = vpop.permute.xlu2 %1012 }
 0x111   : > { %11391 = vst [vmem:[#allocation11_spill] sm:$0xff] %v7475_v57 }
 0x115   : > { %1156 = vrot.lane.b32.xlu0 %v7477_v59, %s11349_s14 }
 0x116   : > { %1148 = vrot.lane.b32.xlu2 %v7479_v60, %s11349_s14 }
 0x117   : > { %1146 = vrot.lane.b32.xlu1 %v7481_v61, %s11349_s14  ;;  %v7489_v62 = vpop.permute.xlu0 %1008 }
 0x118   : > { %11392 = vst [vmem:[#allocation12_spill] sm:$0xff] %v7489_v62  ;;  %v7491_v63 = vpop.permute.xlu2 %1018  ;;  %v7551_v62 = vld [vmem:[#allocation2 + $0x122] sm:$0xff] }
 0x119   : > { %11393 = vst [vmem:[#allocation13_spill] sm:$0xff] %v7491_v63  ;;  %v7493_v0 = vpop.permute.xlu1 %1000  ;;  %v7533_v63 = vld [vmem:[#allocation2 + $0xfa] sm:$0xff] }
 0x11a   : > { %11394 = vst [vmem:[#allocation14_spill] sm:$0xff] %v7493_v0  ;;  %v7571_v0 = vld [vmem:[#allocation2 + $0x13a] sm:$0xff] }
 0x11b   : > { %11413 = vst [vmem:[#allocation33_spill] sm:$0xff] %v7571_v0 }
 0x11d   : > { %1162 = vrot.lane.b32.xlu0 %v7495_v1, %s11349_s14 }
 0x11e   : > { %1154 = vrot.lane.b32.xlu2 %v7497_v2, %s11349_s14 }
 0x11f   : > { %1152 = vrot.lane.b32.xlu1 %v7499_v7, %s11349_s14  ;;  %v7507_v9 = vpop.permute.xlu0 %1014 }
 0x120   : > { %11395 = vst [vmem:[#allocation15_spill] sm:$0xff] %v7507_v9  ;;  %v7509_v12 = vpop.permute.xlu2 %1024  ;;  %v7535_v9 = vld [vmem:[#allocation2 + $0xf2] sm:$0xff] }
 0x121   : > { %11396 = vst [vmem:[#allocation16_spill] sm:$0xff] %v7509_v12  ;;  %v7511_v13 = vpop.permute.xlu1 %1002  ;;  %v7531_v12 = vld [vmem:[#allocation2 + $0x12a] sm:$0xff] }
 0x122   : > { %11397 = vst [vmem:[#allocation17_spill] sm:$0xff] %v7511_v13  ;;  %v7569_v13 = vld [vmem:[#allocation2 + $0x142] sm:$0xff] }
 0x123   : > { %11402 = vst [vmem:[#allocation22_spill] sm:$0xff] %v7531_v12 }
 0x124   : > { %11412 = vst [vmem:[#allocation32_spill] sm:$0xff] %v7569_v13 }
 0x125   : > { %1168 = vrot.lane.b32.xlu0 %v7513_v14, %s11349_s14 }
 0x126   : > { %1160 = vrot.lane.b32.xlu2 %v7515_v15, %s11349_s14 }
 0x127   : > { %1158 = vrot.lane.b32.xlu1 %v7517_v18, %s11349_s14  ;;  %v7525_v20 = vpop.permute.xlu0 %1020 }
 0x128   : > { %11399 = vst [vmem:[#allocation19_spill] sm:$0xff] %v7525_v20  ;;  %v7527_v33 = vpop.permute.xlu2 %1030 }
 0x129   : > { %11400 = vst [vmem:[#allocation20_spill] sm:$0xff] %v7527_v33  ;;  %v7529_v37 = vpop.permute.xlu1 %1010 }
 0x12a   : > { %11401 = vst [vmem:[#allocation21_spill] sm:$0xff] %v7529_v37  ;;  %v7549_v37 = vld [vmem:[#allocation2 + $0x152] sm:$0xff] }
 0x12b   : > { %11406 = vst [vmem:[#allocation26_spill] sm:$0xff] %v7549_v37 }
 0x12d   : > { %1174 = vrot.lane.b32.xlu0 %v7531_v12, %s11349_s14  ;;  %v678_v12 = vld [vmem:[#allocation2 + $0x20] sm:$0xff] }
 0x12e   : > { %1166 = vrot.lane.b32.xlu2 %v7533_v63, %s11349_s14 }
 0x12f   : > { %1164 = vrot.lane.b32.xlu1 %v7535_v9, %s11349_s14  ;;  %v7543_v20 = vpop.permute.xlu0 %1026 }
 0x130   : > { %11403 = vst [vmem:[#allocation23_spill] sm:$0xff] %v7543_v20  ;;  %v7545_v33 = vpop.permute.xlu2 %1036 }
 0x131   : > { %11404 = vst [vmem:[#allocation24_spill] sm:$0xff] %v7545_v33  ;;  %v7547_v57 = vpop.permute.xlu1 %1016 }
 0x132   : > { %11405 = vst [vmem:[#allocation25_spill] sm:$0xff] %v7547_v57 }
 0x135   : > { %1180 = vrot.lane.b32.xlu0 %v7549_v37, %s11349_s14  ;;  %v7587_v37 = vld [vmem:[#allocation2 + $0x15a] sm:$0xff] }
 0x136   : > { %1172 = vrot.lane.b32.xlu2 %v7551_v62, %s11349_s14  ;;  %11418 = vst [vmem:[#allocation38_spill] sm:$0xff] %v7587_v37 }
 0x137   : > { %1170 = vrot.lane.b32.xlu1 %v7553_v50, %s11349_s14  ;;  %v7561_v20 = vpop.permute.xlu0 %1032 }
 0x138   : > { %11408 = vst [vmem:[#allocation28_spill] sm:$0xff] %v7561_v20  ;;  %v7563_v33 = vpop.permute.xlu2 %1042 }
 0x139   : > { %11409 = vst [vmem:[#allocation29_spill] sm:$0xff] %v7563_v33  ;;  %v7565_v57 = vpop.permute.xlu1 %1022 }
 0x13a   : > { %11410 = vst [vmem:[#allocation30_spill] sm:$0xff] %v7565_v57 }
 0x13d   : > { %1186 = vrot.lane.b32.xlu0 %v7567_v45, %s11349_s14 }
 0x13e   : > { %1178 = vrot.lane.b32.xlu2 %v7569_v13, %s11349_s14  ;;  %v7678_v13 = vld [vmem:[#allocation2 + $0x108] sm:$0xff] }
 0x13f   : > { %1176 = vrot.lane.b32.xlu1 %v7571_v0, %s11349_s14  ;;  %v7579_v20 = vpop.permute.xlu0 %1038  ;;  %v677_v0 = vld [vmem:[#allocation2 + $0x18] sm:$0xff] }
 0x140   : > { %11414 = vst [vmem:[#allocation34_spill] sm:$0xff] %v7579_v20  ;;  %v7581_v33 = vpop.permute.xlu2 %1048 }
 0x141   : > { %11415 = vst [vmem:[#allocation35_spill] sm:$0xff] %v7581_v33  ;;  %v7583_v57 = vpop.permute.xlu1 %1028 }
 0x142   : > { %11416 = vst [vmem:[#allocation36_spill] sm:$0xff] %v7583_v57  ;;  %v7600_v57 = vld [vmem:[#allocation2 + $0x50] sm:$0xff] }
 0x143   : > { %11422 = vst [vmem:[#allocation42_spill] sm:$0xff] %v7600_v57 }
 0x145   : > { %1256 = vrot.lane.b32.xlu0 %v679_v49, %s6819_s15 }
 0x146   : > { %1184 = vrot.lane.b32.xlu2 %v7585_v56, %s11349_s14  ;;  %v680_v56 = vld [vmem:[#allocation2 + $0x38] sm:$0xff] }
 0x147   : > { %1182 = vrot.lane.b32.xlu1 %v7587_v37, %s11349_s14  ;;  %v7594_v45 = vpop.permute.xlu0 %1044  ;;  %s11634_s14 = smov 8  }
 0x148   : > { %11419 = vst [vmem:[#allocation39_spill] sm:$0xff] %v7594_v45  ;;  %v7596_v20 = vpop.permute.xlu2 %1054 }
 0x149   : > { %11420 = vst [vmem:[#allocation40_spill] sm:$0xff] %v7596_v20  ;;  %v7598_v33 = vpop.permute.xlu1 %1034  ;;  %v7612_v20 = vld [vmem:[#allocation2 + $0x78] sm:$0xff] }
 0x14a   : > { %11421 = vst [vmem:[#allocation41_spill] sm:$0xff] %v7598_v33  ;;  %v7614_v33 = vld [vmem:[#allocation2 + $0x48] sm:$0xff] }
 0x14b   : > { %11426 = vst [vmem:[#allocation46_spill] sm:$0xff] %v7612_v20 }
 0x14c   : > { %11427 = vst [vmem:[#allocation47_spill] sm:$0xff] %v7614_v33 }
 0x14d   : > { %1262 = vrot.lane.b32.xlu0 %v7600_v57, %s6819_s15  ;;  %v7644_v57 = vld [vmem:[#allocation2 + $0x90] sm:$0xff] }
 0x14e   : > { %1254 = vrot.lane.b32.xlu2 %v678_v12, %s6819_s15  ;;  %11437 = vst [vmem:[#allocation57_spill] sm:$0xff] %v7644_v57 }
 0x14f   : > { %1252 = vrot.lane.b32.xlu1 %v677_v0, %s6819_s15  ;;  %v7606_v49 = vpop.permute.xlu0 %1050 }
 0x150   : > { %11423 = vst [vmem:[#allocation43_spill] sm:$0xff] %v7606_v49  ;;  %v7608_v37 = vpop.permute.xlu2 %1124 }
 0x151   : > { %11424 = vst [vmem:[#allocation44_spill] sm:$0xff] %v7608_v37  ;;  %v7610_v45 = vpop.permute.xlu1 %1040  ;;  %v7629_v37 = vld [vmem:[#allocation2 + $0x68] sm:$0xff] }
 0x152   : > { %11425 = vst [vmem:[#allocation45_spill] sm:$0xff] %v7610_v45  ;;  %v7627_v45 = vld [vmem:[#allocation2 + $0x98] sm:$0xff] }
 0x153   : > { %11431 = vst [vmem:[#allocation51_spill] sm:$0xff] %v7627_v45 }
 0x154   : > { %11432 = vst [vmem:[#allocation52_spill] sm:$0xff] %v7629_v37 }
 0x155   : > { %1268 = vrot.lane.b32.xlu0 %v7612_v20, %s6819_s15  ;;  %v683_v20 = vld [vmem:[#allocation2 + $0x60] sm:$0xff] }
 0x156   : > { %1260 = vrot.lane.b32.xlu2 %v7614_v33, %s6819_s15 }
 0x157   : > { %1258 = vrot.lane.b32.xlu1 %v680_v56, %s6819_s15  ;;  %v7621_v0 = vpop.permute.xlu0 %1056 }
 0x158   : > { %11428 = vst [vmem:[#allocation48_spill] sm:$0xff] %v7621_v0  ;;  %v7623_v12 = vpop.permute.xlu2 %1130 }
 0x159   : > { %11429 = vst [vmem:[#allocation49_spill] sm:$0xff] %v7623_v12  ;;  %v7625_v49 = vpop.permute.xlu1 %1046 }
 0x15a   : > { %11430 = vst [vmem:[#allocation50_spill] sm:$0xff] %v7625_v49  ;;  %v7642_v49 = vld [vmem:[#allocation2 + $0xc0] sm:$0xff] }
 0x15b   : > { %11436 = vst [vmem:[#allocation56_spill] sm:$0xff] %v7642_v49 }
 0x15d   : > { %1274 = vrot.lane.b32.xlu0 %v7627_v45, %s6819_s15  ;;  %v686_v45 = vld [vmem:[#allocation2 + $0x80] sm:$0xff] }
 0x15e   : > { %1266 = vrot.lane.b32.xlu2 %v7629_v37, %s6819_s15  ;;  %v7659_v37 = vld [vmem:[#allocation2 + $0xb0] sm:$0xff] }
 0x15f   : > { %1264 = vrot.lane.b32.xlu1 %v683_v20, %s6819_s15  ;;  %v7636_v56 = vpop.permute.xlu0 %1126  ;;  %11442 = vst [vmem:[#allocation62_spill] sm:$0xff] %v7659_v37 }
 0x160   : > { %11433 = vst [vmem:[#allocation53_spill] sm:$0xff] %v7636_v56  ;;  %v7638_v0 = vpop.permute.xlu2 %1136  ;;  %v7657_v56 = vld [vmem:[#allocation2 + $0xe0] sm:$0xff] }
 0x161   : > { %11434 = vst [vmem:[#allocation54_spill] sm:$0xff] %v7638_v0  ;;  %v7640_v12 = vpop.permute.xlu1 %1052 }
 0x162   : > { %11435 = vst [vmem:[#allocation55_spill] sm:$0xff] %v7640_v12 }
 0x163   : > { %11441 = vst [vmem:[#allocation61_spill] sm:$0xff] %v7657_v56 }
 0x165   : > { %1280 = vrot.lane.b32.xlu0 %v7642_v49, %s6819_s15  ;;  %v689_v49 = vld [vmem:[#allocation2 + $0xa8] sm:$0xff] }
 0x166   : > { %1272 = vrot.lane.b32.xlu2 %v7644_v57, %s6819_s15  ;;  %v538_v57 = vld [vmem:[%s6955_s16 + $0xf8] sm:$0xff] }
 0x167   : > { %1270 = vrot.lane.b32.xlu1 %v686_v45, %s6819_s15  ;;  %v7651_v20 = vpop.permute.xlu0 %1132  ;;  %v573_v14 = vmul.f32 %v7181_v3, %v538_v57 }
 0x168   : > { %11438 = vst [vmem:[#allocation58_spill] sm:$0xff] %v7651_v20  ;;  %v7653_v0 = vpop.permute.xlu2 %1142 }
 0x169   : > { %11439 = vst [vmem:[#allocation59_spill] sm:$0xff] %v7653_v0  ;;  %v7655_v12 = vpop.permute.xlu1 %1058  ;;  %v537_v0 = vld [vmem:[%s6955_s16 + $0xf0] sm:$0xff]  ;;  %v608_v50 = vadd.f32 %v7186_v4, %v573_v14  ;;  %v7695_v14 = vld [vmem:[#allocation2 + $0x128] sm:$0xff]  ;;  %s11347_s16 = smov 16  }
 0x16a   : > { %11440 = vst [vmem:[#allocation60_spill] sm:$0xff] %v7655_v12  ;;  %v572_v33 = vmul.f32 %v7181_v3, %v537_v0 }
 0x16d   : > { %1286 = vrot.lane.b32.xlu0 %v7657_v56, %s6819_s15  ;;  %v607_v56 = vadd.f32 %v7186_v4, %v572_v33  ;;  %v7697_v33 = vld [vmem:[#allocation2 + $0xf8] sm:$0xff] }
 0x16e   : > { %1278 = vrot.lane.b32.xlu2 %v7659_v37, %s6819_s15  ;;  %v7680_v37 = vld [vmem:[#allocation2 + $0xd8] sm:$0xff] }
 0x16f   : > { %1276 = vrot.lane.b32.xlu1 %v689_v49, %s6819_s15  ;;  %v7666_v45 = vpop.permute.xlu0 %1138  ;;  %v639_v49 = vmax.f32 %v607_v56, 0.0 }
 0x170   : > { %11443 = vst [vmem:[#allocation63_spill] sm:$0xff] %v7666_v45  ;;  %v7668_v20 = vpop.permute.xlu2 %1148  ;;  %v692_v45 = vld [vmem:[#allocation2 + $0xc8] sm:$0xff] }
 0x171   : > { %11444 = vst [vmem:[#allocation64_spill] sm:$0xff] %v7668_v20  ;;  %v7672_v12 = vpop.permute.xlu1 %1128  ;;  %v640_v20 = vmax.f32 %v608_v50, 0.0  ;;  %v695_v50 = vld [vmem:[#allocation2 + $0xf0] sm:$0xff] }
 0x172   : > { %11445 = vst [vmem:[#allocation65_spill] sm:$0xff] %v7672_v12  ;;  %v7744_v12 = vld [vmem:[#allocation2 + $0x158] sm:$0xff] }
 0x173   : > { %673 = vst.msk [vmem:[#allocation2 + $0x181] sm:$0xff] %vm642_vm4, %v639_v49  ;;  %v7712_v49 = vld [vmem:[#allocation2 + $0x120] sm:$0xff] }
 0x174   : > { %674 = vst.msk [vmem:[#allocation2 + $0x189] sm:$0xff] %vm642_vm4, %v640_v20 }
 0x175   : > { %1292 = vrot.lane.b32.xlu0 %v7678_v13, %s6819_s15 }
 0x176   : > { %1284 = vrot.lane.b32.xlu2 %v7680_v37, %s6819_s15 }
 0x177   : > { %1282 = vrot.lane.b32.xlu1 %v692_v45, %s6819_s15  ;;  %v7687_v3 = vpop.permute.xlu0 %1144  ;;  %v7710_v45 = vld [vmem:[#allocation2 + $0x150] sm:$0xff] }
 0x178   : > { %11446 = vst [vmem:[#allocation66_spill] sm:$0xff] %v7687_v3  ;;  %v7690_v4 = vpop.permute.xlu2 %1154  ;;  %v7725_v3 = vld [vmem:[#allocation2 + $0x170] sm:$0xff] }
 0x179   : > { %11447 = vst [vmem:[#allocation67_spill] sm:$0xff] %v7690_v4  ;;  %v7693_v57 = vpop.permute.xlu1 %1134  ;;  %v698_v4 = vld [vmem:[#allocation2 + $0x110] sm:$0xff] }
 0x17a   : > { %11448 = vst [vmem:[#allocation68_spill] sm:$0xff] %v7693_v57  ;;  %v701_v57 = vld [vmem:[#allocation2 + $0x138] sm:$0xff] }
 0x17b   : > { %11455 = vst [vmem:[#allocation75_spill] sm:$0xff] %v7725_v3 }
 0x17d   : > { %1298 = vrot.lane.b32.xlu0 %v7695_v14, %s6819_s15 }
 0x17e   : > { %1290 = vrot.lane.b32.xlu2 %v7697_v33, %s6819_s15 }
 0x17f   : > { %1288 = vrot.lane.b32.xlu1 %v695_v50, %s6819_s15  ;;  %v7704_v0 = vpop.permute.xlu0 %1150 }
 0x180   : > { %11449 = vst [vmem:[#allocation69_spill] sm:$0xff] %v7704_v0  ;;  %v7706_v56 = vpop.permute.xlu2 %1160 }
 0x181   : > { %11450 = vst [vmem:[#allocation70_spill] sm:$0xff] %v7706_v56  ;;  %v7708_v20 = vpop.permute.xlu1 %1140 }
 0x182   : > { %11451 = vst [vmem:[#allocation71_spill] sm:$0xff] %v7708_v20  ;;  %v7727_v20 = vld [vmem:[#allocation2 + $0x140] sm:$0xff] }
 0x185   : > { %1304 = vrot.lane.b32.xlu0 %v7710_v45, %s6819_s15 }
 0x186   : > { %1296 = vrot.lane.b32.xlu2 %v7712_v49, %s6819_s15 }
 0x187   : > { %1294 = vrot.lane.b32.xlu1 %v698_v4, %s6819_s15  ;;  %v7719_v50 = vpop.permute.xlu0 %1156 }
 0x188   : > { %11452 = vst [vmem:[#allocation72_spill] sm:$0xff] %v7719_v50  ;;  %v7721_v0 = vpop.permute.xlu2 %1166 }
 0x189   : > { %11453 = vst [vmem:[#allocation73_spill] sm:$0xff] %v7721_v0  ;;  %v7723_v56 = vpop.permute.xlu1 %1146 }
 0x18a   : > { %11454 = vst [vmem:[#allocation74_spill] sm:$0xff] %v7723_v56  ;;  %v7740_v56 = vld [vmem:[#allocation2 + $0x168] sm:$0xff] }
 0x18d   : > { %1310 = vrot.lane.b32.xlu0 %v7725_v3, %s6819_s15  ;;  %v7758_v3 = vld [vmem:[#allocation2 + $0x180] sm:$0xff] }
 0x18e   : > { %1302 = vrot.lane.b32.xlu2 %v7727_v20, %s6819_s15  ;;  %11462 = vst [vmem:[#allocation82_spill] sm:$0xff] %v7758_v3 }
 0x18f   : > { %1300 = vrot.lane.b32.xlu1 %v701_v57, %s6819_s15  ;;  %v7734_v4 = vpop.permute.xlu0 %1162 }
 0x190   : > { %11456 = vst [vmem:[#allocation76_spill] sm:$0xff] %v7734_v4  ;;  %v7736_v50 = vpop.permute.xlu2 %1172 }
 0x191   : > { %11457 = vst [vmem:[#allocation77_spill] sm:$0xff] %v7736_v50  ;;  %v7738_v0 = vpop.permute.xlu1 %1152 }
 0x192   : > { %11458 = vst [vmem:[#allocation78_spill] sm:$0xff] %v7738_v0  ;;  %v7756_v0 = vld [vmem:[#allocation2 + $0x188] sm:$0xff] }
 0x195   : > { %1380 = vrot.lane.b32.xlu0 %v7255_v11, %s11347_s16 }
 0x196   : > { %1308 = vrot.lane.b32.xlu2 %v7740_v56, %s6819_s15 }
 0x197   : > { %1306 = vrot.lane.b32.xlu1 %v7744_v12, %s6819_s15  ;;  %v7750_v57 = vpop.permute.xlu0 %1168 }
 0x198   : > { %11459 = vst [vmem:[#allocation79_spill] sm:$0xff] %v7750_v57  ;;  %v7752_v4 = vpop.permute.xlu2 %1178 }
 0x199   : > { %11460 = vst [vmem:[#allocation80_spill] sm:$0xff] %v7752_v4  ;;  %v7754_v50 = vpop.permute.xlu1 %1158 }
 0x19a   : > { %11461 = vst [vmem:[#allocation81_spill] sm:$0xff] %v7754_v50 }
 0x19d   : > { %1386 = vrot.lane.b32.xlu0 %v7273_v25, %s11347_s16 }
 0x19e   : > { %1314 = vrot.lane.b32.xlu2 %v7756_v0, %s6819_s15 }
 0x19f   : > { %1312 = vrot.lane.b32.xlu1 %v7758_v3, %s6819_s15  ;;  %v7766_v11 = vpop.permute.xlu0 %1174  ;;  %s11351_s15 = smov 56  }
 0x1a0   : > { %11463 = vst [vmem:[#allocation83_spill] sm:$0xff] %v7766_v11  ;;  %v7768_v57 = vpop.permute.xlu2 %1184  ;;  %v7784_v11 = vld [vmem:[#allocation2 + $0x49] sm:$0xff] }
 0x1a1   : > { %11464 = vst [vmem:[#allocation84_spill] sm:$0xff] %v7768_v57  ;;  %v7770_v4 = vpop.permute.xlu1 %1164 }
 0x1a2   : > { %11465 = vst [vmem:[#allocation85_spill] sm:$0xff] %v7770_v4  ;;  %v11521_v4 = vld [vmem:[#allocation42_spill] sm:$0xff] }
 0x1a5   : > { %1392 = vrot.lane.b32.xlu0 %v7301_v40, %s11347_s16 }
 0x1a6   : > { %1384 = vrot.lane.b32.xlu2 %v7249_v8, %s11347_s16 }
 0x1a7   : > { %1382 = vrot.lane.b32.xlu1 %v7278_v28, %s11347_s16  ;;  %v7778_v25 = vpop.permute.xlu0 %1180 }
 0x1a8   : > { %11466 = vst [vmem:[#allocation86_spill] sm:$0xff] %v7778_v25  ;;  %v7780_v50 = vpop.permute.xlu2 %1254  ;;  %v7896_v25 = vld [vmem:[#allocation2 + $0x189] sm:$0xff] }
 0x1a9   : > { %v7782_v3 = vpop.permute.xlu1 %1170 }
 0x1aa   : > { %11467 = vst [vmem:[#allocation87_spill] sm:$0xff] %v7782_v3  ;;  %v11512_v3 = vld [vmem:[#allocation47_spill] sm:$0xff] }
 0x1ad   : > { %1398 = vrot.lane.b32.xlu0 %v7325_v55, %s11347_s16 }
 0x1ae   : > { %1390 = vrot.lane.b32.xlu2 %v7305_v43, %s11347_s16 }
 0x1af   : > { %1388 = vrot.lane.b32.xlu1 %v7784_v11, %s11347_s16  ;;  %v7792_v8 = vpop.permute.xlu0 %1186 }
 0x1b0   : > { %11468 = vst [vmem:[#allocation88_spill] sm:$0xff] %v7792_v8  ;;  %v7794_v28 = vpop.permute.xlu2 %1260  ;;  %v7870_v8 = vld [vmem:[#allocation2 + $0x181] sm:$0xff] }
 0x1b1   : > { %v7796_v40 = vpop.permute.xlu1 %1176 }
 0x1b2   : > { %11469 = vst [vmem:[#allocation89_spill] sm:$0xff] %v7796_v40 }
 0x1b5   : > { %1404 = vrot.lane.b32.xlu0 %v7347_v6, %s11347_s16 }
 0x1b6   : > { %1396 = vrot.lane.b32.xlu2 %v7329_v58, %s11347_s16 }
 0x1b7   : > { %1394 = vrot.lane.b32.xlu1 %v7269_v22, %s11347_s16  ;;  %v7804_v55 = vpop.permute.xlu0 %1256 }
 0x1b8   : > { %v7806_v43 = vpop.permute.xlu2 %1266 }
 0x1b9   : > { %v7808_v57 = vpop.permute.xlu1 %1182 }
 0x1ba   : > { %11470 = vst [vmem:[#allocation90_spill] sm:$0xff] %v7808_v57 }
 0x1bd   : > { %1410 = vrot.lane.b32.xlu0 %v7365_v17, %s11347_s16 }
 0x1be   : > { %1402 = vrot.lane.b32.xlu2 %v7351_v10, %s11347_s16 }
 0x1bf   : > { %1400 = vrot.lane.b32.xlu1 %v7298_v38, %s11347_s16  ;;  %v7816_v6 = vpop.permute.xlu0 %1262 }
 0x1c0   : > { %v7818_v58 = vpop.permute.xlu2 %1272 }
 0x1c1   : > { %v7820_v22 = vpop.permute.xlu1 %1252 }
 0x1c5   : > { %1416 = vrot.lane.b32.xlu0 %v7379_v23, %s11347_s16 }
 0x1c6   : > { %1408 = vrot.lane.b32.xlu2 %v7368_v19, %s11347_s16 }
 0x1c7   : > { %1406 = vrot.lane.b32.xlu1 %v7322_v53, %s11347_s16  ;;  %v7828_v17 = vpop.permute.xlu0 %1268 }
 0x1c8   : > { %v7830_v10 = vpop.permute.xlu2 %1278 }
 0x1c9   : > { %11471 = vst [vmem:[#allocation91_spill] sm:$0xff] %v7830_v10  ;;  %v7832_v38 = vpop.permute.xlu1 %1258  ;;  %v926_v10 = vld [vmem:[#allocation2 + $0x169] sm:$0xff] }
 0x1cd   : > { %1422 = vrot.lane.b32.xlu0 %v7391_v27, %s11347_s16 }
 0x1ce   : > { %1414 = vrot.lane.b32.xlu2 %v7381_v24, %s11347_s16 }
 0x1cf   : > { %1412 = vrot.lane.b32.xlu1 %v7345_v5, %s11347_s16  ;;  %v7840_v23 = vpop.permute.xlu0 %1274 }
 0x1d0   : > { %11472 = vst [vmem:[#allocation92_spill] sm:$0xff] %v7840_v23  ;;  %v7842_v19 = vpop.permute.xlu2 %1284 }
 0x1d1   : > { %11473 = vst [vmem:[#allocation93_spill] sm:$0xff] %v7842_v19  ;;  %v7844_v53 = vpop.permute.xlu1 %1264  ;;  %v910_v19 = vld [vmem:[#allocation2 + $0xa9] sm:$0xff] }
 0x1d5   : > { %1428 = vrot.lane.b32.xlu0 %v7403_v31, %s11347_s16 }
 0x1d6   : > { %1420 = vrot.lane.b32.xlu2 %v7393_v29, %s11347_s16 }
 0x1d7   : > { %1418 = vrot.lane.b32.xlu1 %v7363_v16, %s11347_s16  ;;  %v7852_v27 = vpop.permute.xlu0 %1280 }
 0x1d8   : > { %11474 = vst [vmem:[#allocation94_spill] sm:$0xff] %v7852_v27  ;;  %v7854_v24 = vpop.permute.xlu2 %1290  ;;  %v920_v27 = vld [vmem:[#allocation2 + $0x121] sm:$0xff] }
 0x1d9   : > { %11475 = vst [vmem:[#allocation95_spill] sm:$0xff] %v7854_v24  ;;  %v7856_v5 = vpop.permute.xlu1 %1270  ;;  %v881_v24 = vld [vmem:[#allocation2 + $0xc8] sm:$0xff] }
 0x1dd   : > { %1434 = vrot.lane.b32.xlu0 %v7413_v34, %s11347_s16 }
 0x1de   : > { %1426 = vrot.lane.b32.xlu2 %v7405_v32, %s11347_s16 }
 0x1df   : > { %1424 = vrot.lane.b32.xlu1 %v7377_v21, %s11347_s16  ;;  %v7864_v31 = vpop.permute.xlu0 %1286 }
 0x1e0   : > { %11476 = vst [vmem:[#allocation96_spill] sm:$0xff] %v7864_v31  ;;  %v7866_v29 = vpop.permute.xlu2 %1296 }
 0x1e1   : > { %11477 = vst [vmem:[#allocation97_spill] sm:$0xff] %v7866_v29  ;;  %v7868_v16 = vpop.permute.xlu1 %1276 }
 0x1e2   : > { %11478 = vst [vmem:[#allocation98_spill] sm:$0xff] %v7868_v16  ;;  %v947_v16 = vld [vmem:[#allocation2 + $0xe2] sm:$0xff] }
 0x1e5   : > { %1440 = vrot.lane.b32.xlu0 %v7870_v8, %s11347_s16 }
 0x1e6   : > { %1432 = vrot.lane.b32.xlu2 %v7415_v35, %s11347_s16 }
 0x1e7   : > { %1430 = vrot.lane.b32.xlu1 %v7389_v26, %s11347_s16  ;;  %v7878_v32 = vpop.permute.xlu0 %1292 }
 0x1e8   : > { %11479 = vst [vmem:[#allocation99_spill] sm:$0xff] %v7878_v32  ;;  %v7880_v21 = vpop.permute.xlu2 %1302 }
 0x1e9   : > { %11480 = vst [vmem:[#allocation100_spill] sm:$0xff] %v7880_v21  ;;  %v7882_v34 = vpop.permute.xlu1 %1282  ;;  %v8006_v21 = vld [vmem:[#allocation2 + $0x18a] sm:$0xff] }
 0x1ea   : > { %11481 = vst [vmem:[#allocation101_spill] sm:$0xff] %v7882_v34  ;;  %v917_v34 = vld [vmem:[#allocation2 + $0xf9] sm:$0xff] }
 0x1ed   : > { %1510 = vrot.lane.b32.xlu0 %v7433_v42, %s6821_s24 }
 0x1ee   : > { %1438 = vrot.lane.b32.xlu2 %v7424_v39, %s11347_s16 }
 0x1ef   : > { %1436 = vrot.lane.b32.xlu1 %v7401_v30, %s11347_s16  ;;  %v7890_v35 = vpop.permute.xlu0 %1298 }
 0x1f0   : > { %11482 = vst [vmem:[#allocation102_spill] sm:$0xff] %v7890_v35  ;;  %v7892_v57 = vpop.permute.xlu2 %1308 }
 0x1f1   : > { %11483 = vst [vmem:[#allocation103_spill] sm:$0xff] %v7892_v57  ;;  %v7894_v26 = vpop.permute.xlu1 %1288 }
 0x1f2   : > { %11484 = vst [vmem:[#allocation104_spill] sm:$0xff] %v7894_v26  ;;  %v887_v26 = vld [vmem:[#allocation2 + $0x110] sm:$0xff] }
 0x1f5   : > { %1516 = vrot.lane.b32.xlu0 %v7447_v47, %s6821_s24 }
 0x1f6   : > { %1508 = vrot.lane.b32.xlu2 %v7435_v44, %s6821_s24 }
 0x1f7   : > { %1442 = vrot.lane.b32.xlu1 %v7896_v25, %s11347_s16  ;;  %v7904_v39 = vpop.permute.xlu0 %1304  ;;  %s11359_s16 = smov 64  }
 0x1f8   : > { %11485 = vst [vmem:[#allocation105_spill] sm:$0xff] %v7904_v39  ;;  %v7906_v30 = vpop.permute.xlu2 %1314  ;;  %v11502_v39 = vld [vmem:[#allocation33_spill] sm:$0xff] }
 0x1f9   : > { %11486 = vst [vmem:[#allocation106_spill] sm:$0xff] %v7906_v30  ;;  %v7908_v42 = vpop.permute.xlu1 %1294  ;;  %v11496_v30 = vld [vmem:[#allocation32_spill] sm:$0xff] }
 0x1fa   : > { %11487 = vst [vmem:[#allocation107_spill] sm:$0xff] %v7908_v42  ;;  %v868_v42 = vld [vmem:[#allocation2 + $0x30] sm:$0xff] }
 0x1fd   : > { %1522 = vrot.lane.b32.xlu0 %v7463_v52, %s6821_s24 }
 0x1fe   : > { %1514 = vrot.lane.b32.xlu2 %v7449_v48, %s6821_s24 }
 0x1ff   : > { %1512 = vrot.lane.b32.xlu1 %v7422_v36, %s6821_s24  ;;  %v7916_v47 = vpop.permute.xlu0 %1310 }
 0x200   : > { %11488 = vst [vmem:[#allocation108_spill] sm:$0xff] %v7916_v47  ;;  %v7918_v44 = vpop.permute.xlu2 %1384 }
 0x201   : > { %v7920_v57 = vpop.permute.xlu1 %1300 }
 0x202   : > { %11489 = vst [vmem:[#allocation109_spill] sm:$0xff] %v7920_v57  ;;  %v11507_v57 = vld [vmem:[#allocation38_spill] sm:$0xff] }
 0x205   : > { %1528 = vrot.lane.b32.xlu0 %v7479_v60, %s6821_s24 }
 0x206   : > { %1520 = vrot.lane.b32.xlu2 %v7465_v54, %s6821_s24 }
 0x207   : > { %1518 = vrot.lane.b32.xlu1 %v7431_v41, %s6821_s24  ;;  %v7928_v52 = vpop.permute.xlu0 %1380 }
 0x208   : > { %v7930_v48 = vpop.permute.xlu2 %1390 }
 0x209   : > { %v7932_v36 = vpop.permute.xlu1 %1306 }
 0x20a   : > { %11490 = vst [vmem:[#allocation110_spill] sm:$0xff] %v7932_v36  ;;  %v11501_v36 = vld [vmem:[#allocation37_spill] sm:$0xff] }
 0x20d   : > { %1534 = vrot.lane.b32.xlu0 %v7497_v2, %s6821_s24 }
 0x20e   : > { %1526 = vrot.lane.b32.xlu2 %v7481_v61, %s6821_s24 }
 0x20f   : > { %1524 = vrot.lane.b32.xlu1 %v7445_v46, %s6821_s24  ;;  %v7940_v60 = vpop.permute.xlu0 %1386 }
 0x210   : > { %v7942_v54 = vpop.permute.xlu2 %1396 }
 0x211   : > { %v7944_v41 = vpop.permute.xlu1 %1312 }
 0x212   : > { %11491 = vst [vmem:[#allocation111_spill] sm:$0xff] %v7944_v41  ;;  %v11497_v41 = vld [vmem:[#allocation27_spill] sm:$0xff] }
 0x215   : > { %1540 = vrot.lane.b32.xlu0 %v7515_v15, %s6821_s24 }
 0x216   : > { %1532 = vrot.lane.b32.xlu2 %v7499_v7, %s6821_s24 }
 0x217   : > { %1530 = vrot.lane.b32.xlu1 %v7461_v51, %s6821_s24  ;;  %v7952_v2 = vpop.permute.xlu0 %1392 }
 0x218   : > { %v7954_v61 = vpop.permute.xlu2 %1402 }
 0x219   : > { %11492 = vst [vmem:[#allocation112_spill] sm:$0xff] %v7954_v61  ;;  %v7956_v46 = vpop.permute.xlu1 %1382  ;;  %v957_v61 = vld [vmem:[#allocation2 + $0x15a] sm:$0xff] }
 0x21d   : > { %1546 = vrot.lane.b32.xlu0 %v7533_v63, %s6821_s24 }
 0x21e   : > { %1538 = vrot.lane.b32.xlu2 %v7517_v18, %s6821_s24 }
 0x21f   : > { %1536 = vrot.lane.b32.xlu1 %v7477_v59, %s6821_s24  ;;  %v7964_v15 = vpop.permute.xlu0 %1398 }
 0x220   : > { %v7966_v7 = vpop.permute.xlu2 %1408 }
 0x221   : > { %11493 = vst [vmem:[#allocation113_spill] sm:$0xff] %v7966_v7  ;;  %v7968_v51 = vpop.permute.xlu1 %1388  ;;  %v924_v7 = vld [vmem:[#allocation2 + $0x151] sm:$0xff] }
 0x225   : > { %1552 = vrot.lane.b32.xlu0 %v7551_v62, %s6821_s24  ;;  %v11498_v62 = vld [vmem:[#allocation18_spill] sm:$0xff] }
 0x226   : > { %1544 = vrot.lane.b32.xlu2 %v7535_v9, %s6821_s24 }
 0x227   : > { %1542 = vrot.lane.b32.xlu1 %v7495_v1, %s6821_s24  ;;  %v7976_v63 = vpop.permute.xlu0 %1404 }
 0x228   : > { %11494 = vst [vmem:[#allocation114_spill] sm:$0xff] %v7976_v63  ;;  %v7978_v18 = vpop.permute.xlu2 %1414  ;;  %v943_v63 = vld [vmem:[#allocation2 + $0xb2] sm:$0xff] }
 0x229   : > { %11495 = vst [vmem:[#allocation115_spill] sm:$0xff] %v7978_v18  ;;  %v7980_v59 = vpop.permute.xlu1 %1394  ;;  %v890_v18 = vld [vmem:[#allocation2 + $0x138] sm:$0xff] }
 0x22d   : > { %1558 = vrot.lane.b32.xlu0 %v11496_v30, %s6821_s24  ;;  %v11503_v30 = vld [vmem:[#allocation22_spill] sm:$0xff] }
 0x22e   : > { %1550 = vrot.lane.b32.xlu2 %v11497_v41, %s6821_s24 }
 0x22f   : > { %1548 = vrot.lane.b32.xlu1 %v11498_v62, %s6821_s24  ;;  %v7988_v47 = vpop.permute.xlu0 %1410 }
 0x230   : > { %11499 = vst [vmem:[#allocation32_spill] sm:$0xff] %v7988_v47  ;;  %v7990_v9 = vpop.permute.xlu2 %1420  ;;  %v913_v47 = vld [vmem:[#allocation2 + $0xc9] sm:$0xff] }
 0x231   : > { %11500 = vst [vmem:[#allocation27_spill] sm:$0xff] %v7990_v9  ;;  %v7992_v1 = vpop.permute.xlu1 %1400  ;;  %v11517_v9 = vld [vmem:[#allocation52_spill] sm:$0xff] }
 0x235   : > { %1564 = vrot.lane.b32.xlu0 %v11501_v36, %s6821_s24  ;;  %v11508_v36 = vld [vmem:[#allocation26_spill] sm:$0xff] }
 0x236   : > { %1556 = vrot.lane.b32.xlu2 %v11502_v39, %s6821_s24 }
 0x237   : > { %1554 = vrot.lane.b32.xlu1 %v11503_v30, %s6821_s24  ;;  %v8000_v40 = vpop.permute.xlu0 %1416 }
 0x238   : > { %11504 = vst [vmem:[#allocation18_spill] sm:$0xff] %v8000_v40  ;;  %v8002_v41 = vpop.permute.xlu2 %1426  ;;  %v884_v40 = vld [vmem:[#allocation2 + $0xf0] sm:$0xff] }
 0x239   : > { %11505 = vst [vmem:[#allocation37_spill] sm:$0xff] %v8002_v41  ;;  %v8004_v62 = vpop.permute.xlu1 %1406  ;;  %v8020_v41 = vld [vmem:[#allocation2 + $0x182] sm:$0xff] }
 0x23a   : > { %11506 = vst [vmem:[#allocation33_spill] sm:$0xff] %v8004_v62  ;;  %v923_v62 = vld [vmem:[#allocation2 + $0x141] sm:$0xff] }
 0x23d   : > { %1570 = vrot.lane.b32.xlu0 %v8006_v21, %s6821_s24 }
 0x23e   : > { %1562 = vrot.lane.b32.xlu2 %v11507_v57, %s6821_s24  ;;  %v11513_v57 = vld [vmem:[#allocation31_spill] sm:$0xff] }
 0x23f   : > { %1560 = vrot.lane.b32.xlu1 %v11508_v36, %s6821_s24  ;;  %v8014_v39 = vpop.permute.xlu0 %1422 }
 0x240   : > { %11509 = vst [vmem:[#allocation22_spill] sm:$0xff] %v8014_v39  ;;  %v8016_v30 = vpop.permute.xlu2 %1432 }
 0x241   : > { %11510 = vst [vmem:[#allocation38_spill] sm:$0xff] %v8016_v30  ;;  %v8018_v35 = vpop.permute.xlu1 %1412  ;;  %v869_v30 = vld [vmem:[#allocation2 + $0x38] sm:$0xff] }
 0x242   : > { %11511 = vst [vmem:[#allocation26_spill] sm:$0xff] %v8018_v35  ;;  %v901_v35 = vld [vmem:[#allocation2 + $0x39] sm:$0xff] }
 0x245   : > { %1640 = vrot.lane.b32.xlu0 %v11512_v3, %s11345_s25 }
 0x246   : > { %1568 = vrot.lane.b32.xlu2 %v8020_v41, %s6821_s24 }
 0x247   : > { %1566 = vrot.lane.b32.xlu1 %v11513_v57, %s6821_s24  ;;  %v8028_v29 = vpop.permute.xlu0 %1428 }
 0x248   : > { %11514 = vst [vmem:[#allocation47_spill] sm:$0xff] %v8028_v29  ;;  %v8030_v36 = vpop.permute.xlu2 %1438  ;;  %v872_v29 = vld [vmem:[#allocation2 + $0x60] sm:$0xff] }
 0x249   : > { %11515 = vst [vmem:[#allocation31_spill] sm:$0xff] %v8030_v36  ;;  %v8032_v39 = vpop.permute.xlu1 %1418  ;;  %v11520_v36 = vld [vmem:[#allocation57_spill] sm:$0xff] }
 0x24a   : > { %11516 = vst [vmem:[#allocation116_spill] sm:$0xff] %v8032_v39  ;;  %v11524_v39 = vld [vmem:[#allocation62_spill] sm:$0xff] }
 0x24d   : > { %1646 = vrot.lane.b32.xlu0 %v11517_v9, %s11345_s25 }
 0x24e   : > { %1638 = vrot.lane.b32.xlu2 %v869_v30, %s11345_s25 }
 0x24f   : > { %1636 = vrot.lane.b32.xlu1 %v868_v42, %s11345_s25  ;;  %v8038_v3 = vpop.permute.xlu0 %1434 }
 0x250   : > { %11518 = vst [vmem:[#allocation52_spill] sm:$0xff] %v8038_v3  ;;  %v8040_v32 = vpop.permute.xlu2 %1508  ;;  %v875_v3 = vld [vmem:[#allocation2 + $0x80] sm:$0xff] }
 0x251   : > { %v8042_v57 = vpop.permute.xlu1 %1424 }
 0x252   : > { %11519 = vst [vmem:[#allocation117_spill] sm:$0xff] %v8042_v57  ;;  %v11525_v57 = vld [vmem:[#allocation46_spill] sm:$0xff] }
 0x255   : > { %1652 = vrot.lane.b32.xlu0 %v11520_v36, %s11345_s25 }
 0x256   : > { %1644 = vrot.lane.b32.xlu2 %v872_v29, %s11345_s25 }
 0x257   : > { %1642 = vrot.lane.b32.xlu1 %v11521_v4, %s11345_s25  ;;  %v8049_v9 = vpop.permute.xlu0 %1440 }
 0x258   : > { %11522 = vst [vmem:[#allocation57_spill] sm:$0xff] %v8049_v9  ;;  %v8051_v30 = vpop.permute.xlu2 %1514  ;;  %v878_v9 = vld [vmem:[#allocation2 + $0xa8] sm:$0xff] }
 0x259   : > { %v8053_v42 = vpop.permute.xlu1 %1430 }
 0x25a   : > { %11523 = vst [vmem:[#allocation42_spill] sm:$0xff] %v8053_v42  ;;  %v11527_v42 = vld [vmem:[#allocation51_spill] sm:$0xff] }
 0x25d   : > { %1658 = vrot.lane.b32.xlu0 %v11524_v39, %s11345_s25 }
 0x25e   : > { %1650 = vrot.lane.b32.xlu2 %v875_v3, %s11345_s25 }
 0x25f   : > { %1648 = vrot.lane.b32.xlu1 %v11525_v57, %s11345_s25  ;;  %v8060_v36 = vpop.permute.xlu0 %1510 }
 0x260   : > { %v8062_v29 = vpop.permute.xlu2 %1520 }
 0x261   : > { %v8064_v4 = vpop.permute.xlu1 %1436 }
 0x262   : > { %11526 = vst [vmem:[#allocation62_spill] sm:$0xff] %v8064_v4  ;;  %v11529_v4 = vld [vmem:[#allocation56_spill] sm:$0xff] }
 0x265   : > { %1664 = vrot.lane.b32.xlu0 %v7680_v37, %s11345_s25 }
 0x266   : > { %1656 = vrot.lane.b32.xlu2 %v878_v9, %s11345_s25 }
 0x267   : > { %1654 = vrot.lane.b32.xlu1 %v11527_v42, %s11345_s25  ;;  %v8071_v39 = vpop.permute.xlu0 %1516 }
 0x268   : > { %v8073_v3 = vpop.permute.xlu2 %1526 }
 0x269   : > { %v8075_v57 = vpop.permute.xlu1 %1442 }
 0x26a   : > { %11528 = vst [vmem:[#allocation46_spill] sm:$0xff] %v8075_v57  ;;  %v11531_v57 = vld [vmem:[#allocation61_spill] sm:$0xff] }
 0x26d   : > { %1670 = vrot.lane.b32.xlu0 %v7697_v33, %s11345_s25 }
 0x26e   : > { %1662 = vrot.lane.b32.xlu2 %v881_v24, %s11345_s25 }
 0x26f   : > { %1660 = vrot.lane.b32.xlu1 %v11529_v4, %s11345_s25  ;;  %v8082_v37 = vpop.permute.xlu0 %1522 }
 0x270   : > { %v8084_v9 = vpop.permute.xlu2 %1532 }
 0x271   : > { %11530 = vst [vmem:[#allocation51_spill] sm:$0xff] %v8084_v9  ;;  %v8086_v42 = vpop.permute.xlu1 %1512  ;;  %v944_v9 = vld [vmem:[#allocation2 + $0xc2] sm:$0xff] }
 0x275   : > { %1676 = vrot.lane.b32.xlu0 %v7712_v49, %s11345_s25 }
 0x276   : > { %1668 = vrot.lane.b32.xlu2 %v884_v40, %s11345_s25 }
 0x277   : > { %1666 = vrot.lane.b32.xlu1 %v11531_v57, %s11345_s25  ;;  %v8093_v33 = vpop.permute.xlu0 %1528 }
 0x278   : > { %11532 = vst [vmem:[#allocation56_spill] sm:$0xff] %v8093_v33  ;;  %v8095_v24 = vpop.permute.xlu2 %1538  ;;  %v955_v33 = vld [vmem:[#allocation2 + $0x142] sm:$0xff] }
 0x279   : > { %11533 = vst [vmem:[#allocation61_spill] sm:$0xff] %v8095_v24  ;;  %v8097_v4 = vpop.permute.xlu1 %1518  ;;  %v914_v24 = vld [vmem:[#allocation2 + $0xd9] sm:$0xff] }
 0x27d   : > { %1682 = vrot.lane.b32.xlu0 %v7727_v20, %s11345_s25 }
 0x27e   : > { %1674 = vrot.lane.b32.xlu2 %v887_v26, %s11345_s25 }
 0x27f   : > { %1672 = vrot.lane.b32.xlu1 %v7678_v13, %s11345_s25  ;;  %v8104_v49 = vpop.permute.xlu0 %1534 }
 0x280   : > { %11534 = vst [vmem:[#allocation118_spill] sm:$0xff] %v8104_v49  ;;  %v8106_v40 = vpop.permute.xlu2 %1544  ;;  %v927_v49 = vld [vmem:[#allocation2 + $0x171] sm:$0xff] }
 0x281   : > { %11535 = vst [vmem:[#allocation119_spill] sm:$0xff] %v8106_v40  ;;  %v8108_v57 = vpop.permute.xlu1 %1524  ;;  %v900_v40 = vld [vmem:[#allocation2 + $0x31] sm:$0xff] }
 0x285   : > { %1688 = vrot.lane.b32.xlu0 %v7740_v56, %s11345_s25 }
 0x286   : > { %1680 = vrot.lane.b32.xlu2 %v890_v18, %s11345_s25 }
 0x287   : > { %1678 = vrot.lane.b32.xlu1 %v7695_v14, %s11345_s25  ;;  %v8115_v20 = vpop.permute.xlu0 %1540 }
 0x288   : > { %11536 = vst [vmem:[#allocation120_spill] sm:$0xff] %v8115_v20  ;;  %v8117_v26 = vpop.permute.xlu2 %1550  ;;  %v898_v20 = vld [vmem:[#allocation2 + $0x198] sm:$0xff] }
 0x289   : > { %11537 = vst [vmem:[#allocation121_spill] sm:$0xff] %v8117_v26  ;;  %v8119_v13 = vpop.permute.xlu1 %1530  ;;  %v11542_v26 = vld [vmem:[#allocation82_spill] sm:$0xff] }
 0x28a   : > { %11538 = vst [vmem:[#allocation122_spill] sm:$0xff] %v8119_v13  ;;  %v950_v13 = vld [vmem:[#allocation2 + $0x10a] sm:$0xff] }
 0x28d   : > { %1694 = vrot.lane.b32.xlu0 %v7756_v0, %s11345_s25  ;;  %v11543_v0 = vld [vmem:[#allocation75_spill] sm:$0xff] }
 0x28e   : > { %1686 = vrot.lane.b32.xlu2 %v7744_v12, %s11345_s25 }
 0x28f   : > { %1684 = vrot.lane.b32.xlu1 %v7710_v45, %s11345_s25  ;;  %v8127_v56 = vpop.permute.xlu0 %1546 }
 0x290   : > { %11539 = vst [vmem:[#allocation123_spill] sm:$0xff] %v8127_v56  ;;  %v8129_v18 = vpop.permute.xlu2 %1556  ;;  %v903_v56 = vld [vmem:[#allocation2 + $0x51] sm:$0xff] }
 0x291   : > { %11540 = vst [vmem:[#allocation124_spill] sm:$0xff] %v8129_v18  ;;  %v8131_v14 = vpop.permute.xlu1 %1536  ;;  %v899_v18 = vld [vmem:[#allocation2 + $0x1a0] sm:$0xff] }
 0x292   : > { %11541 = vst [vmem:[#allocation125_spill] sm:$0xff] %v8131_v14  ;;  %v916_v14 = vld [vmem:[#allocation2 + $0xf1] sm:$0xff] }
 0x295   : > { %1764 = vrot.lane.b32.xlu0 %v900_v40, %s6823_s30 }
 0x296   : > { %1692 = vrot.lane.b32.xlu2 %v11542_v26, %s11345_s25 }
 0x297   : > { %1690 = vrot.lane.b32.xlu1 %v11543_v0, %s11345_s25  ;;  %v8138_v12 = vpop.permute.xlu0 %1552 }
 0x298   : > { %11544 = vst [vmem:[#allocation82_spill] sm:$0xff] %v8138_v12  ;;  %v8140_v31 = vpop.permute.xlu2 %1562  ;;  %v906_v12 = vld [vmem:[#allocation2 + $0x79] sm:$0xff] }
 0x299   : > { %11545 = vst [vmem:[#allocation75_spill] sm:$0xff] %v8140_v31  ;;  %v8142_v45 = vpop.permute.xlu1 %1542  ;;  %v909_v31 = vld [vmem:[#allocation2 + $0x99] sm:$0xff] }
 0x29a   : > { %11546 = vst [vmem:[#allocation126_spill] sm:$0xff] %v8142_v45  ;;  %v907_v45 = vld [vmem:[#allocation2 + $0x81] sm:$0xff] }
 0x29d   : > { %1770 = vrot.lane.b32.xlu0 %v903_v56, %s6823_s30 }
 0x29e   : > { %1698 = vrot.lane.b32.xlu2 %v899_v18, %s11345_s25 }
 0x29f   : > { %1696 = vrot.lane.b32.xlu1 %v898_v20, %s11345_s25  ;;  %v8147_v40 = vpop.permute.xlu0 %1558  ;;  %s11759_s25 = smov 24  }
 0x2a0   : > { %11547 = vst [vmem:[#allocation127_spill] sm:$0xff] %v8147_v40  ;;  %v8149_v26 = vpop.permute.xlu2 %1568  ;;  %v905_v40 = vld [vmem:[#allocation2 + $0x69] sm:$0xff] }
 0x2a1   : > { %11548 = vst [vmem:[#allocation128_spill] sm:$0xff] %v8149_v26  ;;  %v8151_v0 = vpop.permute.xlu1 %1548  ;;  %v904_v26 = vld [vmem:[#allocation2 + $0x61] sm:$0xff] }
 0x2a2   : > { %11549 = vst [vmem:[#allocation129_spill] sm:$0xff] %v8151_v0  ;;  %v908_v0 = vld [vmem:[#allocation2 + $0x91] sm:$0xff] }
 0x2a5   : > { %1776 = vrot.lane.b32.xlu0 %v906_v12, %s6823_s30 }
 0x2a6   : > { %1768 = vrot.lane.b32.xlu2 %v7784_v11, %s6823_s30 }
 0x2a7   : > { %1766 = vrot.lane.b32.xlu1 %v901_v35, %s6823_s30  ;;  %v8157_v56 = vpop.permute.xlu0 %1564 }
 0x2a8   : > { %11550 = vst [vmem:[#allocation130_spill] sm:$0xff] %v8157_v56  ;;  %v8159_v18 = vpop.permute.xlu2 %1638  ;;  %v912_v56 = vld [vmem:[#allocation2 + $0xc1] sm:$0xff] }
 0x2a9   : > { %v8161_v20 = vpop.permute.xlu1 %1554 }
 0x2aa   : > { %11551 = vst [vmem:[#allocation131_spill] sm:$0xff] %v8161_v20  ;;  %v911_v20 = vld [vmem:[#allocation2 + $0xb1] sm:$0xff] }
 0x2ad   : > { %1782 = vrot.lane.b32.xlu0 %v909_v31, %s6823_s30 }
 0x2ae   : > { %1774 = vrot.lane.b32.xlu2 %v905_v40, %s6823_s30 }
 0x2af   : > { %1772 = vrot.lane.b32.xlu1 %v904_v26, %s6823_s30  ;;  %v8166_v12 = vpop.permute.xlu0 %1570 }
 0x2b0   : > { %11552 = vst [vmem:[#allocation132_spill] sm:$0xff] %v8166_v12  ;;  %v8168_v11 = vpop.permute.xlu2 %1644  ;;  %v915_v12 = vld [vmem:[#allocation2 + $0xe1] sm:$0xff] }
 0x2b1   : > { %v8170_v35 = vpop.permute.xlu1 %1560 }
 0x2b2   : > { %11553 = vst [vmem:[#allocation133_spill] sm:$0xff] %v8170_v35  ;;  %v918_v35 = vld [vmem:[#allocation2 + $0x109] sm:$0xff] }
 0x2b5   : > { %1788 = vrot.lane.b32.xlu0 %v912_v56, %s6823_s30 }
 0x2b6   : > { %1780 = vrot.lane.b32.xlu2 %v908_v0, %s6823_s30 }
 0x2b7   : > { %1778 = vrot.lane.b32.xlu1 %v907_v45, %s6823_s30  ;;  %v8175_v31 = vpop.permute.xlu0 %1640 }
 0x2b8   : > { %v8177_v40 = vpop.permute.xlu2 %1650 }
 0x2b9   : > { %v8179_v26 = vpop.permute.xlu1 %1566 }
 0x2ba   : > { %11554 = vst [vmem:[#allocation134_spill] sm:$0xff] %v8179_v26  ;;  %v921_v26 = vld [vmem:[#allocation2 + $0x129] sm:$0xff] }
 0x2bd   : > { %1794 = vrot.lane.b32.xlu0 %v915_v12, %s6823_s30 }
 0x2be   : > { %1786 = vrot.lane.b32.xlu2 %v911_v20, %s6823_s30 }
 0x2bf   : > { %1784 = vrot.lane.b32.xlu1 %v910_v19, %s6823_s30  ;;  %v8184_v56 = vpop.permute.xlu0 %1646 }
 0x2c0   : > { %v8186_v0 = vpop.permute.xlu2 %1656 }
 0x2c1   : > { %11555 = vst [vmem:[#allocation135_spill] sm:$0xff] %v8186_v0  ;;  %v8188_v45 = vpop.permute.xlu1 %1636 }
 0x2c5   : > { %1800 = vrot.lane.b32.xlu0 %v918_v35, %s6823_s30 }
 0x2c6   : > { %1792 = vrot.lane.b32.xlu2 %v914_v24, %s6823_s30 }
 0x2c7   : > { %1790 = vrot.lane.b32.xlu1 %v913_v47, %s6823_s30  ;;  %v8193_v12 = vpop.permute.xlu0 %1652 }
 0x2c8   : > { %v8195_v20 = vpop.permute.xlu2 %1662 }
 0x2c9   : > { %11556 = vst [vmem:[#allocation136_spill] sm:$0xff] %v8195_v20  ;;  %v8197_v19 = vpop.permute.xlu1 %1642  ;;  %v919_v20 = vld [vmem:[#allocation2 + $0x111] sm:$0xff] }
 0x2cd   : > { %1806 = vrot.lane.b32.xlu0 %v921_v26, %s6823_s30 }
 0x2ce   : > { %1798 = vrot.lane.b32.xlu2 %v917_v34, %s6823_s30 }
 0x2cf   : > { %1796 = vrot.lane.b32.xlu1 %v916_v14, %s6823_s30  ;;  %v8202_v35 = vpop.permute.xlu0 %1658 }
 0x2d0   : > { %11557 = vst [vmem:[#allocation137_spill] sm:$0xff] %v8202_v35  ;;  %v8204_v24 = vpop.permute.xlu2 %1668  ;;  %v946_v35 = vld [vmem:[#allocation2 + $0xda] sm:$0xff] }
 0x2d1   : > { %11558 = vst [vmem:[#allocation138_spill] sm:$0xff] %v8204_v24  ;;  %v8206_v47 = vpop.permute.xlu1 %1648  ;;  %v922_v24 = vld [vmem:[#allocation2 + $0x139] sm:$0xff] }
 0x2d5   : > { %1812 = vrot.lane.b32.xlu0 %v924_v7, %s6823_s30 }
 0x2d6   : > { %1804 = vrot.lane.b32.xlu2 %v920_v27, %s6823_s30 }
 0x2d7   : > { %1802 = vrot.lane.b32.xlu1 %v919_v20, %s6823_s30  ;;  %v8211_v26 = vpop.permute.xlu0 %1664 }
 0x2d8   : > { %11559 = vst [vmem:[#allocation139_spill] sm:$0xff] %v8211_v26  ;;  %v8213_v34 = vpop.permute.xlu2 %1674  ;;  %v930_v26 = vld [vmem:[#allocation2 + $0x199] sm:$0xff] }
 0x2d9   : > { %11560 = vst [vmem:[#allocation140_spill] sm:$0xff] %v8213_v34  ;;  %v8215_v14 = vpop.permute.xlu1 %1654  ;;  %v925_v34 = vld [vmem:[#allocation2 + $0x159] sm:$0xff] }
 0x2dd   : > { %1818 = vrot.lane.b32.xlu0 %v927_v49, %s6823_s30 }
 0x2de   : > { %1810 = vrot.lane.b32.xlu2 %v923_v62, %s6823_s30 }
 0x2df   : > { %1808 = vrot.lane.b32.xlu1 %v922_v24, %s6823_s30  ;;  %v8220_v7 = vpop.permute.xlu0 %1670 }
 0x2e0   : > { %11561 = vst [vmem:[#allocation141_spill] sm:$0xff] %v8220_v7  ;;  %v8222_v27 = vpop.permute.xlu2 %1680  ;;  %v933_v7 = vld [vmem:[#allocation2 + $0x3a] sm:$0xff] }
 0x2e1   : > { %11562 = vst [vmem:[#allocation142_spill] sm:$0xff] %v8222_v27  ;;  %v8224_v20 = vpop.permute.xlu1 %1660  ;;  %v936_v27 = vld [vmem:[#allocation2 + $0x62] sm:$0xff] }
 0x2e2   : > { %11563 = vst [vmem:[#allocation143_spill] sm:$0xff] %v8224_v20  ;;  %v940_v20 = vld [vmem:[#allocation2 + $0x92] sm:$0xff] }
 0x2e5   : > { %1824 = vrot.lane.b32.xlu0 %v930_v26, %s6823_s30 }
 0x2e6   : > { %1816 = vrot.lane.b32.xlu2 %v926_v10, %s6823_s30 }
 0x2e7   : > { %1814 = vrot.lane.b32.xlu1 %v925_v34, %s6823_s30  ;;  %v8229_v49 = vpop.permute.xlu0 %1676 }
 0x2e8   : > { %11564 = vst [vmem:[#allocation144_spill] sm:$0xff] %v8229_v49  ;;  %v8231_v62 = vpop.permute.xlu2 %1686  ;;  %v931_v49 = vld [vmem:[#allocation2 + $0x1a1] sm:$0xff] }
 0x2e9   : > { %11565 = vst [vmem:[#allocation145_spill] sm:$0xff] %v8231_v62  ;;  %v8233_v24 = vpop.permute.xlu1 %1666  ;;  %v932_v62 = vld [vmem:[#allocation2 + $0x32] sm:$0xff] }
 0x2ea   : > { %11566 = vst [vmem:[#allocation146_spill] sm:$0xff] %v8233_v24  ;;  %v935_v24 = vld [vmem:[#allocation2 + $0x52] sm:$0xff] }
 0x2ed   : > { %1894 = vrot.lane.b32.xlu0 %v933_v7, %s11357_s12 }
 0x2ee   : > { %1822 = vrot.lane.b32.xlu2 %v7896_v25, %s6823_s30 }
 0x2ef   : > { %1820 = vrot.lane.b32.xlu1 %v7870_v8, %s6823_s30  ;;  %v8240_v26 = vpop.permute.xlu0 %1682 }
 0x2f0   : > { %11567 = vst [vmem:[#allocation147_spill] sm:$0xff] %v8240_v26  ;;  %v8242_v10 = vpop.permute.xlu2 %1692  ;;  %v939_v26 = vld [vmem:[#allocation2 + $0x82] sm:$0xff] }
 0x2f1   : > { %11568 = vst [vmem:[#allocation148_spill] sm:$0xff] %v8242_v10  ;;  %v8244_v34 = vpop.permute.xlu1 %1672  ;;  %v934_v10 = vld [vmem:[#allocation2 + $0x4a] sm:$0xff] }
 0x2f2   : > { %11569 = vst [vmem:[#allocation149_spill] sm:$0xff] %v8244_v34  ;;  %v938_v34 = vld [vmem:[#allocation2 + $0x7a] sm:$0xff] }
 0x2f5   : > { %1900 = vrot.lane.b32.xlu0 %v936_v27, %s11357_s12 }
 0x2f6   : > { %1892 = vrot.lane.b32.xlu2 %v932_v62, %s11357_s12 }
 0x2f7   : > { %1826 = vrot.lane.b32.xlu1 %v931_v49, %s6823_s30  ;;  %v8249_v7 = vpop.permute.xlu0 %1688  ;;  %s11758_s30 = smov 16  }
 0x2f8   : > { %11570 = vst [vmem:[#allocation150_spill] sm:$0xff] %v8249_v7  ;;  %v8251_v25 = vpop.permute.xlu2 %1698  ;;  %v942_v7 = vld [vmem:[#allocation2 + $0xaa] sm:$0xff] }
 0x2f9   : > { %11571 = vst [vmem:[#allocation151_spill] sm:$0xff] %v8251_v25  ;;  %v8253_v8 = vpop.permute.xlu1 %1678  ;;  %v937_v25 = vld [vmem:[#allocation2 + $0x6a] sm:$0xff] }
 0x2fa   : > { %11572 = vst [vmem:[#allocation152_spill] sm:$0xff] %v8253_v8  ;;  %v941_v8 = vld [vmem:[#allocation2 + $0x9a] sm:$0xff] }
 0x2fd   : > { %1906 = vrot.lane.b32.xlu0 %v939_v26, %s11357_s12 }
 0x2fe   : > { %1898 = vrot.lane.b32.xlu2 %v935_v24, %s11357_s12 }
 0x2ff   : > { %1896 = vrot.lane.b32.xlu1 %v934_v10, %s11357_s12  ;;  %v8258_v27 = vpop.permute.xlu0 %1694 }
 0x300   : > { %11573 = vst [vmem:[#allocation153_spill] sm:$0xff] %v8258_v27  ;;  %v8260_v62 = vpop.permute.xlu2 %1768  ;;  %v945_v27 = vld [vmem:[#allocation2 + $0xca] sm:$0xff] }
 0x301   : > { %v8262_v49 = vpop.permute.xlu1 %1684 }
 0x302   : > { %11574 = vst [vmem:[#allocation154_spill] sm:$0xff] %v8262_v49  ;;  %v948_v49 = vld [vmem:[#allocation2 + $0xf2] sm:$0xff] }
 0x305   : > { %1912 = vrot.lane.b32.xlu0 %v942_v7, %s11357_s12 }
 0x306   : > { %1904 = vrot.lane.b32.xlu2 %v938_v34, %s11357_s12 }
 0x307   : > { %1902 = vrot.lane.b32.xlu1 %v937_v25, %s11357_s12  ;;  %v8267_v26 = vpop.permute.xlu0 %1764 }
 0x308   : > { %v8269_v24 = vpop.permute.xlu2 %1774 }
 0x309   : > { %v8271_v10 = vpop.permute.xlu1 %1690 }
 0x30a   : > { %11575 = vst [vmem:[#allocation155_spill] sm:$0xff] %v8271_v10  ;;  %v951_v10 = vld [vmem:[#allocation2 + $0x112] sm:$0xff] }
 0x30d   : > { %1918 = vrot.lane.b32.xlu0 %v945_v27, %s11357_s12 }
 0x30e   : > { %1910 = vrot.lane.b32.xlu2 %v941_v8, %s11357_s12 }
 0x30f   : > { %1908 = vrot.lane.b32.xlu1 %v940_v20, %s11357_s12  ;;  %v8276_v7 = vpop.permute.xlu0 %1770 }
 0x310   : > { %v8278_v34 = vpop.permute.xlu2 %1780 }
 0x311   : > { %v8280_v25 = vpop.permute.xlu1 %1696 }
 0x312   : > { %11576 = vst [vmem:[#allocation156_spill] sm:$0xff] %v8280_v25  ;;  %v954_v25 = vld [vmem:[#allocation2 + $0x13a] sm:$0xff] }
 0x315   : > { %1924 = vrot.lane.b32.xlu0 %v948_v49, %s11357_s12 }
 0x316   : > { %1916 = vrot.lane.b32.xlu2 %v944_v9, %s11357_s12 }
 0x317   : > { %1914 = vrot.lane.b32.xlu1 %v943_v63, %s11357_s12  ;;  %v8285_v27 = vpop.permute.xlu0 %1776 }
 0x318   : > { %v8287_v8 = vpop.permute.xlu2 %1786 }
 0x319   : > { %11577 = vst [vmem:[#allocation157_spill] sm:$0xff] %v8287_v8  ;;  %v8289_v20 = vpop.permute.xlu1 %1766  ;;  %v949_v8 = vld [vmem:[#allocation2 + $0xfa] sm:$0xff] }
 0x31d   : > { %1930 = vrot.lane.b32.xlu0 %v951_v10, %s11357_s12 }
 0x31e   : > { %1922 = vrot.lane.b32.xlu2 %v947_v16, %s11357_s12 }
 0x31f   : > { %1920 = vrot.lane.b32.xlu1 %v946_v35, %s11357_s12  ;;  %v8294_v49 = vpop.permute.xlu0 %1782 }
 0x320   : > { %v8296_v9 = vpop.permute.xlu2 %1792 }
 0x321   : > { %11578 = vst [vmem:[#allocation158_spill] sm:$0xff] %v8296_v9  ;;  %v8298_v63 = vpop.permute.xlu1 %1772  ;;  %v2255_v9 = vld [vmem:[%s11581_s3 + $0x20] sm:$0xf] }
 0x322   : > { %6350 = vmatpush.msk.msra.mxu0 %vm2353_vm5, %v2255_v9  ;;  %vm6141_vm5 = vcmask 719872  }
 0x325   : > { %1936 = vrot.lane.b32.xlu0 %v954_v25, %s11357_s12  ;;  %v2254_v25 = vld [vmem:[%s11581_s3 + $0x18] sm:$0xff] }
 0x326   : > { %1928 = vrot.lane.b32.xlu2 %v950_v13, %s11357_s12  ;;  %v953_v13 = vld [vmem:[#allocation2 + $0x12a] sm:$0xff]  ;;  %2369 = vmatpush.msra.mxu0 %v2254_v25  ;;  %v956_v25 = vld [vmem:[#allocation2 + $0x152] sm:$0xff] }
 0x327   : > { %1926 = vrot.lane.b32.xlu1 %v949_v8, %s11357_s12  ;;  %v8303_v10 = vpop.permute.xlu0 %1788  ;;  %v2253_v8 = vld [vmem:[%s11581_s3 + $0x10] sm:$0xff] }
 0x328   : > { %11579 = vst [vmem:[#allocation159_spill] sm:$0xff] %v8303_v10  ;;  %v8305_v16 = vpop.permute.xlu2 %1798  ;;  %v952_v10 = vld [vmem:[#allocation2 + $0x122] sm:$0xff]  ;;  %2370 = vmatpush.msra.mxu0 %v2253_v8 }
 0x329   : > { %11580 = vst [vmem:[#allocation160_spill] sm:$0xff] %v8305_v16  ;;  %v8307_v35 = vpop.permute.xlu1 %1778  ;;  %v2252_v16 = vld [vmem:[%s11581_s3 + $0x8] sm:$0xff] }
 0x32a   : > { %2371 = vmatpush.msra.mxu0 %v2252_v16  ;;  %v963_v8 = vld [vmem:[#allocation2 + $0x1a2] sm:$0xff] }
 0x32d   : > { %1942 = vrot.lane.b32.xlu0 %v957_v61, %s11357_s12  ;;  %v2251_v61 = vld [vmem:[%s11581_s3] sm:$0xff]  ;;  %s11779_s3 = smov 48  }
 0x32e   : > { %1934 = vrot.lane.b32.xlu2 %v953_v13, %s11357_s12  ;;  %2372 = vmatpush.msra.mxu0 %v2251_v61 }
 0x32f   : > { %1932 = vrot.lane.b32.xlu1 %v952_v10, %s11357_s12  ;;  %v8324_v9 = vpop.permute.xlu0 %1794 }
 0x330   : > { %11582 = vst [vmem:[#allocation161_spill] sm:$0xff] %v8324_v9  ;;  %v8326_v23 = vpop.permute.xlu2 %1804  ;;  %v958_v9 = vld [vmem:[#allocation2 + $0x16a] sm:$0xff] }
 0x331   : > { %11583 = vst [vmem:[#allocation162_spill] sm:$0xff] %v8326_v23  ;;  %v8328_v0 = vpop.permute.xlu1 %1784  ;;  %v959_v23 = vld [vmem:[#allocation2 + $0x172] sm:$0xff] }
 0x335   : > { %1948 = vrot.lane.b32.xlu0 %v8020_v41, %s11357_s12 }
 0x336   : > { %1940 = vrot.lane.b32.xlu2 %v956_v25, %s11357_s12  ;;  %v962_v25 = vld [vmem:[#allocation2 + $0x19a] sm:$0xff] }
 0x337   : > { %1938 = vrot.lane.b32.xlu1 %v955_v33, %s11357_s12  ;;  %v8337_v10 = vpop.permute.xlu0 %1800 }
 0x338   : > { %11584 = vst [vmem:[#allocation163_spill] sm:$0xff] %v8337_v10  ;;  %v8339_v13 = vpop.permute.xlu2 %1810 }
 0x339   : > { %11585 = vst [vmem:[#allocation164_spill] sm:$0xff] %v8339_v13  ;;  %v8341_v16 = vpop.permute.xlu1 %1790  ;;  %v675_v13 = vld [vmem:[#allocation2] sm:$0xff] }
 0x33d   : > { %1954 = vrot.lane.b32.xlu0 %v963_v8, %s11357_s12 }
 0x33e   : > { %1946 = vrot.lane.b32.xlu2 %v959_v23, %s11357_s12 }
 0x33f   : > { %1944 = vrot.lane.b32.xlu1 %v958_v9, %s11357_s12  ;;  %v8346_v41 = vpop.permute.xlu0 %1806  ;;  %v11590_v9 = vld [vmem:[#allocation8_spill] sm:$0xff] }
 0x340   : > { %11586 = vst [vmem:[#allocation165_spill] sm:$0xff] %v8346_v41  ;;  %v8348_v61 = vpop.permute.xlu2 %1816  ;;  %v1988_v41 = vsel %vm642_vm4, %v675_v13, %v11590_v9 }
 0x341   : > { %11587 = vst [vmem:[#allocation166_spill] sm:$0xff] %v8348_v61  ;;  %v8350_v33 = vpop.permute.xlu1 %1796  ;;  %v11591_v61 = vld [vmem:[#allocation44_spill] sm:$0xff] }
 0x342   : > { %11588 = vst [vmem:[#allocation167_spill] sm:$0xff] %v8350_v33  ;;  %v2021_v33 = vsel %vm2020_vm6, %v1988_v41, %v11591_v61 }
 0x346   : > { %1952 = vrot.lane.b32.xlu2 %v962_v25, %s11357_s12  ;;  %v2054_v25 = vsel %vm2053_vm7, %v2021_v33, %v7820_v22 }
 0x347   : > { %1950 = vrot.lane.b32.xlu1 %v8006_v21, %s11357_s12  ;;  %v8355_v10 = vpop.permute.xlu0 %1812  ;;  %v2087_v21 = vsel %vm2086_vm9, %v2054_v25, %v7928_v52  ;;  %v11594_v25 = vld [vmem:[#allocation10_spill] sm:$0xff] }
 0x348   : > { %v8357_v8 = vpop.permute.xlu2 %1822 }
 0x349   : > { %11589 = vst [vmem:[#allocation168_spill] sm:$0xff] %v8357_v8  ;;  %v8359_v23 = vpop.permute.xlu1 %1802  ;;  %v2120_v8 = vsel %vm2119_vm8, %v2087_v21, %v8040_v32  ;;  %v676_v32 = vld [vmem:[#allocation2 + $0x8] sm:$0xff]  ;;  %v11595_v21 = vld [vmem:[#allocation53_spill] sm:$0xff] }
 0x34a   : > { %v2153_v13 = vsel %vm2152_vm10, %v2120_v8, %v8188_v45  ;;  %v1989_v45 = vsel %vm642_vm4, %v676_v32, %v11594_v25 }
 0x34b   : > { %v2186_v41 = vsel %vm2185_vm12, %v2153_v13, %v8267_v26 }
 0x34f   : > { %v8373_v9 = vpop.permute.xlu0 %1818 }
 0x350   : > { %11592 = vst [vmem:[#allocation8_spill] sm:$0xff] %v8373_v9  ;;  %v1893_v22 = vpop.permute.xlu2 %1892  ;;  %v2022_v9 = vsel %vm2020_vm6, %v1989_v45, %v11595_v21 }
 0x351   : > { %v8377_v61 = vpop.permute.xlu1 %1808  ;;  %v2219_v52 = vsel %vm2218_vm11, %v2186_v41, %v1893_v22  ;;  %v2055_v26 = vsel %vm2053_vm7, %v2022_v9, %v7780_v50  ;;  %v6716_v9 = vld [vmem:[#allocation2 + $0x18] sm:$0xff] }
 0x352   : > { %6351 = vmatmul.msk.f32.vlgmr.msra.gmra.mxu0 %vm2256_vm13, %v2219_v52  ;;  %v2088_v13 = vsel %vm2086_vm9, %v2055_v26, %v7956_v46  ;;  %v11596_v46 = vld [vmem:[#allocation14_spill] sm:$0xff] }
 0x353   : > { %v2121_v41 = vsel %vm2119_vm8, %v2088_v13, %v8060_v36  ;;  %v1990_v45 = vsel %vm642_vm4, %v6716_v9, %v11596_v46  ;;  %v11597_v36 = vld [vmem:[#allocation65_spill] sm:$0xff] }
 0x354   : > { %v2154_v22 = vsel %vm2152_vm10, %v2121_v41, %v8159_v18  ;;  %v2023_v21 = vsel %vm2020_vm6, %v1990_v45, %v11597_v36 }
 0x355   : > { %v2187_v52 = vsel %vm2185_vm12, %v2154_v22, %v8289_v20  ;;  %v2056_v18 = vsel %vm2053_vm7, %v2023_v21, %v7804_v55  ;;  %v11599_v55 = vld [vmem:[#allocation49_spill] sm:$0xff] }
 0x356   : > { %v2089_v20 = vsel %vm2086_vm9, %v2056_v18, %v7918_v44  ;;  %v6718_v18 = vld [vmem:[#allocation2 + $0x30] sm:$0xff] }
 0x357   : > { %v8381_v33 = vpop.permute.xlu0 %1824  ;;  %v2122_v26 = vsel %vm2119_vm8, %v2089_v20, %v8086_v42  ;;  %v11600_v20 = vld [vmem:[#allocation7_spill] sm:$0xff] }
 0x358   : > { %11593 = vst [vmem:[#allocation44_spill] sm:$0xff] %v8381_v33  ;;  %v2155_v13 = vsel %vm2152_vm10, %v2122_v26, %v8175_v31  ;;  %v1899_v46 = vpop.permute.xlu2 %1898  ;;  %v1992_v26 = vsel %vm642_vm4, %v6718_v18, %v11600_v20 }
 0x359   : > { %v8385_v8 = vpop.permute.xlu1 %1814  ;;  %v2188_v41 = vsel %vm2185_vm12, %v2155_v13, %v8260_v62 }
 0x35f   : > { %v1895_v32 = vpop.permute.xlu0 %1894 }
 0x360   : > { %v2220_v25 = vsel %vm2218_vm11, %v2187_v52, %v1895_v32  ;;  %v6717_v32 = vld [vmem:[#allocation2 + $0x20] sm:$0xff] }
 0x361   : > { %v8400_v33 = vpop.permute.xlu1 %1820  ;;  %6352 = vmatmul.msk.f32.gmra.mxu0 %vm2256_vm13, %v2220_v25  ;;  %v11598_v25 = vld [vmem:[#allocation17_spill] sm:$0xff] }
 0x362   : > { %v1991_v9 = vsel %vm642_vm4, %v6717_v32, %v11598_v25  ;;  %v6719_v32 = vld [vmem:[#allocation2 + $0x38] sm:$0xff]  ;;  %v11602_v25 = vld [vmem:[#allocation9_spill] sm:$0xff] }
 0x363   : > { %v2024_v44 = vsel %vm2020_vm6, %v1991_v9, %v11599_v55  ;;  %v1993_v9 = vsel %vm642_vm4, %v6719_v32, %v11602_v25 }
 0x364   : > { %v2057_v42 = vsel %vm2053_vm7, %v2024_v44, %v7832_v38  ;;  %v11601_v38 = vld [vmem:[#allocation58_spill] sm:$0xff] }
 0x365   : > { %v2090_v31 = vsel %vm2086_vm9, %v2057_v42, %v7940_v60  ;;  %v2025_v60 = vsel %vm2020_vm6, %v1992_v26, %v11601_v38  ;;  %v6721_v26 = vld [vmem:[#allocation2 + $0x50] sm:$0xff] }
 0x366   : > { %v2123_v62 = vsel %vm2119_vm8, %v2090_v31, %v8051_v30  ;;  %v2058_v30 = vsel %vm2053_vm7, %v2025_v60, %v7794_v28  ;;  %v11603_v28 = vld [vmem:[#allocation68_spill] sm:$0xff]  ;;  %v11606_v38 = vld [vmem:[#allocation21_spill] sm:$0xff] }
 0x367   : > { %v2156_v45 = vsel %vm2152_vm10, %v2123_v62, %v8197_v19  ;;  %v2091_v19 = vsel %vm2086_vm9, %v2058_v30, %v7968_v51  ;;  %v1901_v13 = vpop.permute.xlu0 %1900  ;;  %v2026_v51 = vsel %vm2020_vm6, %v1993_v9, %v11603_v28  ;;  %v6720_v62 = vld [vmem:[#allocation2 + $0x48] sm:$0xff]  ;;  %v1995_v60 = vsel %vm642_vm4, %v6721_v26, %v11606_v38 }
 0x368   : > { %v2189_v36 = vsel %vm2185_vm12, %v2156_v45, %v8276_v7  ;;  %v2124_v7 = vsel %vm2119_vm8, %v2091_v19, %v8071_v39  ;;  %v2059_v39 = vsel %vm2053_vm7, %v2026_v51, %v7816_v6  ;;  %v11605_v6 = vld [vmem:[#allocation54_spill] sm:$0xff]  ;;  %v6723_v51 = vld [vmem:[#allocation2 + $0x68] sm:$0xff] }
 0x369   : > { %v8403_v50 = vpop.permute.xlu1 %1826  ;;  %v2222_v21 = vsel %vm2218_vm11, %v2189_v36, %v1899_v46  ;;  %v11604_v46 = vld [vmem:[#allocation12_spill] sm:$0xff]  ;;  %v1905_v36 = vpop.permute.xlu2 %1904 }
 0x36a   : > { %v1994_v45 = vsel %vm642_vm4, %v6720_v62, %v11604_v46  ;;  %v11612_v62 = vld [vmem:[#allocation25_spill] sm:$0xff]  ;;  %v11619_v38 = vld [vmem:[#allocation112_spill] sm:$0xff] }
 0x36f   : > { %v1907_v30 = vpop.permute.xlu0 %1906 }
 0x371   : > { %v1897_v22 = vpop.permute.xlu1 %1896 }
 0x372   : > { %v2221_v52 = vsel %vm2218_vm11, %v2188_v41, %v1897_v22  ;;  %v2157_v41 = vsel %vm2152_vm10, %v2124_v7, %v8168_v11  ;;  %v2092_v11 = vsel %vm2086_vm9, %v2059_v39, %v7930_v48  ;;  %v2027_v48 = vsel %vm2020_vm6, %v1994_v45, %v11605_v6  ;;  %v11610_v39 = vld [vmem:[#allocation15_spill] sm:$0xff]  ;;  %v11614_v45 = vld [vmem:[#allocation56_spill] sm:$0xff] }
 0x373   : > { %6353 = vmatmul.msk.f32.gmra.mxu0 %vm2256_vm13, %v2221_v52  ;;  %v2190_v22 = vsel %vm2185_vm12, %v2157_v41, %v8298_v63  ;;  %v2125_v63 = vsel %vm2119_vm8, %v2092_v11, %v8097_v4  ;;  %v2060_v4 = vsel %vm2053_vm7, %v2027_v48, %v7844_v53  ;;  %v11607_v53 = vld [vmem:[#allocation63_spill] sm:$0xff]  ;;  %v1997_v11 = vsel %vm642_vm4, %v6723_v51, %v11610_v39 }
 0x374   : > { %v2223_v52 = vsel %vm2218_vm11, %v2190_v22, %v1901_v13  ;;  %v2158_v44 = vsel %vm2152_vm10, %v2125_v63, %v8184_v56  ;;  %v2093_v56 = vsel %vm2086_vm9, %v2060_v4, %v7952_v2  ;;  %v2028_v2 = vsel %vm2020_vm6, %v1995_v60, %v11607_v53  ;;  %v6722_v41 = vld [vmem:[#allocation2 + $0x60] sm:$0xff]  ;;  %v1911_v63 = vpop.permute.xlu2 %1910  ;;  %v11620_v53 = vld [vmem:[#allocation122_spill] sm:$0xff] }
 0x375   : > { %v2191_v42 = vsel %vm2185_vm12, %v2158_v44, %v8269_v24  ;;  %v2126_v24 = vsel %vm2119_vm8, %v2093_v56, %v8062_v29  ;;  %v2061_v29 = vsel %vm2053_vm7, %v2028_v2, %v7806_v43  ;;  %v11608_v22 = vld [vmem:[#allocation11_spill] sm:$0xff] }
 0x376   : > { %v11609_v43 = vld [vmem:[#allocation71_spill] sm:$0xff] }
 0x377   : > { %v1913_v6 = vpop.permute.xlu0 %1912  ;;  %v11615_v48 = vld [vmem:[#allocation135_spill] sm:$0xff] }
 0x378   : > { %v11629_v51 = vld [vmem:[#allocation159_spill] sm:$0xff] }
 0x379   : > { %v1903_v55 = vpop.permute.xlu1 %1902 }
 0x37a   : > { %v2224_v31 = vsel %vm2218_vm11, %v2191_v42, %v1903_v55 }
 0x37b   : > { %6354 = vmatmul.msk.f32.gmra.mxu0 %vm2256_vm13, %v2222_v21  ;;  %v2159_v21 = vsel %vm2152_vm10, %v2126_v24, %v8206_v47  ;;  %v2094_v47 = vsel %vm2086_vm9, %v2061_v29, %v7980_v59  ;;  %v11621_v29 = vld [vmem:[#allocation137_spill] sm:$0xff] }
 0x37c   : > { %v2192_v18 = vsel %vm2185_vm12, %v2159_v21, %v8285_v27  ;;  %v2127_v27 = vsel %vm2119_vm8, %v2094_v47, %v8082_v37  ;;  %v11616_v21 = vld [vmem:[#allocation13_spill] sm:$0xff] }
 0x37d   : > { %v2225_v20 = vsel %vm2218_vm11, %v2192_v18, %v1905_v36  ;;  %v2160_v19 = vsel %vm2152_vm10, %v2127_v27, %v8177_v40  ;;  %v6725_v36 = vld [vmem:[#allocation2 + $0x80] sm:$0xff]  ;;  %v11622_v27 = vld [vmem:[#allocation157_spill] sm:$0xff] }
 0x37e   : > { %v2193_v7 = vsel %vm2185_vm12, %v2160_v19, %v8307_v35  ;;  %v1999_v18 = vsel %vm642_vm4, %v6725_v36, %v11616_v21  ;;  %v11640_v36 = vld [vmem:[#allocation94_spill] sm:$0xff] }
 0x37f   : > { %v2226_v13 = vsel %vm2218_vm11, %v2193_v7, %v1907_v30  ;;  %v6726_v7 = vld [vmem:[#allocation2 + $0x90] sm:$0xff] }
 0x381   : > { %v1909_v32 = vpop.permute.xlu1 %1908 }
 0x383   : > { %6355 = vmatmul.msk.f32.gmra.mxu0 %vm2256_vm13, %v2223_v52  ;;  %v1996_v52 = vsel %vm642_vm4, %v6722_v41, %v11608_v22  ;;  %v11624_v22 = vld [vmem:[#allocation64_spill] sm:$0xff] }
 0x384   : > { %v2029_v59 = vsel %vm2020_vm6, %v1996_v52, %v11609_v43  ;;  %v11625_v43 = vld [vmem:[#allocation98_spill] sm:$0xff] }
 0x385   : > { %v2062_v37 = vsel %vm2053_vm7, %v2029_v59, %v7828_v17  ;;  %v11611_v17 = vld [vmem:[#allocation59_spill] sm:$0xff] }
 0x386   : > { %v2095_v40 = vsel %vm2086_vm9, %v2062_v37, %v7942_v54  ;;  %v2030_v54 = vsel %vm2020_vm6, %v1997_v11, %v11611_v17  ;;  %v11626_v37 = vld [vmem:[#allocation114_spill] sm:$0xff] }
 0x387   : > { %v2128_v35 = vsel %vm2119_vm8, %v2095_v40, %v8108_v57  ;;  %v2063_v57 = vsel %vm2053_vm7, %v2030_v54, %v7856_v5  ;;  %v11613_v5 = vld [vmem:[#allocation66_spill] sm:$0xff] }
 0x388   : > { %v2161_v25 = vsel %vm2152_vm10, %v2128_v35, %v8193_v12  ;;  %v2096_v12 = vsel %vm2086_vm9, %v2063_v57, %v7964_v15  ;;  %v11627_v35 = vld [vmem:[#allocation51_spill] sm:$0xff]  ;;  %v6727_v17 = vld [vmem:[#allocation2 + $0x98] sm:$0xff] }
 0x389   : > { %v2194_v9 = vsel %vm2185_vm12, %v2161_v25, %v8278_v34  ;;  %v2129_v34 = vsel %vm2119_vm8, %v2096_v12, %v8073_v3  ;;  %v1915_v2 = vpop.permute.xlu1 %1914  ;;  %v1917_v25 = vpop.permute.xlu2 %1916  ;;  %v11630_v54 = vld [vmem:[#allocation30_spill] sm:$0xff]  ;;  %v11631_v12 = vld [vmem:[#allocation69_spill] sm:$0xff] }
 0x38a   : > { %v2227_v28 = vsel %vm2218_vm11, %v2194_v9, %v1909_v32  ;;  %v2162_v55 = vsel %vm2152_vm10, %v2129_v34, %v8215_v14  ;;  %v11628_v9 = vld [vmem:[#allocation143_spill] sm:$0xff]  ;;  %v2001_v57 = vsel %vm642_vm4, %v6727_v17, %v11630_v54  ;;  %v11652_v54 = vld [vmem:[#allocation36_spill] sm:$0xff] }
 0x38b   : > { %6356 = vmatmul.msk.f32.gmra.mxu0 %vm2256_vm13, %v2224_v31  ;;  %v2195_v44 = vsel %vm2185_vm12, %v2162_v55, %v8294_v49  ;;  %v6724_v31 = vld [vmem:[#allocation2 + $0x78] sm:$0xff]  ;;  %v2034_v34 = vsel %vm2020_vm6, %v2001_v57, %v11631_v12  ;;  %v6730_v17 = vld [vmem:[#allocation2 + $0xc0] sm:$0xff]  ;;  %v11653_v12 = vld [vmem:[#allocation72_spill] sm:$0xff] }
 0x38c   : > { %v2228_v42 = vsel %vm2218_vm11, %v2195_v44, %v1911_v63  ;;  %v1998_v46 = vsel %vm642_vm4, %v6724_v31, %v11612_v62  ;;  %v11632_v63 = vld [vmem:[#allocation91_spill] sm:$0xff]  ;;  %v2637_v44 = vld [vmem:[#allocation3 + $0x1] sm:$0xff]  ;;  %v2004_v57 = vsel %vm642_vm4, %v6730_v17, %v11652_v54 }
 0x38d   : > { %v2031_v15 = vsel %vm2020_vm6, %v1998_v46, %v11613_v5  ;;  %v2067_v55 = vsel %vm2053_vm7, %v2034_v34, %v11632_v63  ;;  %2926 = vrot.lane.b32.xlu1 %v2637_v44, %s11634_s14  ;;  %v11635_v62 = vld [vmem:[#allocation118_spill] sm:$0xff]  ;;  %v1919_v5 = vpop.permute.xlu0 %1918  ;;  %v2037_v34 = vsel %vm2020_vm6, %v2004_v57, %v11653_v12  ;;  %v11654_v63 = vld [vmem:[#allocation93_spill] sm:$0xff]  ;;  %v6733_v12 = vld [vmem:[#allocation2 + $0xe0] sm:$0xff] }
 0x38e   : > { %v2064_v3 = vsel %vm2053_vm7, %v2031_v15, %v7818_v58  ;;  %v11617_v58 = vld [vmem:[#allocation74_spill] sm:$0xff]  ;;  %v11636_v15 = vld [vmem:[#allocation136_spill] sm:$0xff] }
 0x38f   : > { %v2097_v14 = vsel %vm2086_vm9, %v2064_v3, %v7992_v1  ;;  %v2032_v1 = vsel %vm2020_vm6, %v1999_v18, %v11617_v58  ;;  %v8614_v58 = vld [vmem:[%s11317_s5] ss:$0 sm:$0xff] }
 0x390   : > { %v2130_v49 = vsel %vm2119_vm8, %v2097_v14, %v11614_v45 }
 0x391   : > { %v2163_v4 = vsel %vm2152_vm10, %v2130_v49, %v11615_v48  ;;  %v6728_v49 = vld [vmem:[#allocation2 + $0xa8] sm:$0xff] }
 0x392   : > { %v2196_v56 = vsel %vm2185_vm12, %v2163_v4, %v8328_v0  ;;  %v11638_v4 = vld [vmem:[#allocation78_spill] sm:$0xff] }
 0x393   : > { %6357 = vmatmul.msk.f32.gmra.mxu0 %vm2256_vm13, %v2225_v20  ;;  %v2229_v24 = vsel %vm2218_vm11, %v2196_v56, %v1913_v6  ;;  %v11618_v20 = vld [vmem:[#allocation92_spill] sm:$0xff] }
 0x394   : > { %v2065_v26 = vsel %vm2053_vm7, %v2032_v1, %v11618_v20  ;;  %v11637_v6 = vld [vmem:[#allocation16_spill] sm:$0xff]  ;;  %v11642_v1 = vld [vmem:[#allocation125_spill] sm:$0xff] }
 0x395   : > { %v2098_v60 = vsel %vm2086_vm9, %v2065_v26, %v11619_v38  ;;  %v2002_v48 = vsel %vm642_vm4, %v6728_v49, %v11637_v6  ;;  %v1921_v26 = vpop.permute.xlu1 %1920  ;;  %v11658_v49 = vld [vmem:[#allocation167_spill] sm:$0xff] }
 0x396   : > { %v2131_v0 = vsel %vm2119_vm8, %v2098_v60, %v11620_v53  ;;  %v2035_v56 = vsel %vm2020_vm6, %v2002_v48, %v11638_v4  ;;  %v11643_v60 = vld [vmem:[#allocation139_spill] sm:$0xff] }
 0x397   : > { %v2164_v47 = vsel %vm2152_vm10, %v2131_v0, %v11621_v29  ;;  %v2068_v21 = vsel %vm2053_vm7, %v2035_v56, %v11640_v36  ;;  %v6731_v56 = vld [vmem:[#allocation2 + $0xc8] sm:$0xff] }
 0x398   : > { %v2197_v30 = vsel %vm2185_vm12, %v2164_v47, %v11622_v27  ;;  %v11659_v36 = vld [vmem:[#allocation20_spill] sm:$0xff] }
 0x399   : > { %v2230_v19 = vsel %vm2218_vm11, %v2197_v30, %v1915_v2  ;;  %v11644_v2 = vld [vmem:[#allocation158_spill] sm:$0xff]  ;;  %v6729_v30 = vld [vmem:[#allocation2 + $0xb0] sm:$0xff] }
 0x39b   : > { %6358 = vmatmul.msk.f32.gmra.mxu0 %vm2256_vm13, %v2226_v13  ;;  %v11623_v13 = vld [vmem:[#allocation19_spill] sm:$0xff] }
 0x39c   : > { %v2000_v41 = vsel %vm642_vm4, %v6726_v7, %v11623_v13  ;;  %v11646_v13 = vld [vmem:[#allocation67_spill] sm:$0xff] }
 0x39d   : > { %v2033_v52 = vsel %vm2020_vm6, %v2000_v41, %v11624_v22 }
 0x39e   : > { %v2066_v59 = vsel %vm2053_vm7, %v2033_v52, %v11625_v43  ;;  %v11647_v52 = vld [vmem:[#allocation101_spill] sm:$0xff] }
 0x39f   : > { %v2099_v40 = vsel %vm2086_vm9, %v2066_v59, %v11626_v37  ;;  %v11648_v59 = vld [vmem:[#allocation32_spill] sm:$0xff] }
 0x3a0   : > { %v2132_v32 = vsel %vm2119_vm8, %v2099_v40, %v11627_v35  ;;  %v2638_v40 = vld [vmem:[#allocation3 + $0x9] sm:$0xff]  ;;  %v11649_v35 = vld [vmem:[#allocation61_spill] sm:$0xff] }
 0x3a1   : > { %2928 = vrot.lane.b32.xlu2 %v2638_v40, %s11634_s14  ;;  %v11669_v40 = vld [vmem:[#allocation18_spill] sm:$0xff] }
 0x3a3   : > { %6359 = vmatmul.msk.f32.gmra.mxu0 %vm2256_vm13, %v2227_v28  ;;  %v2165_v28 = vsel %vm2152_vm10, %v2132_v32, %v11628_v9  ;;  %v11650_v9 = vld [vmem:[#allocation146_spill] sm:$0xff] }
 0x3a4   : > { %v2198_v39 = vsel %vm2185_vm12, %v2165_v28, %v11629_v51  ;;  %v11651_v51 = vld [vmem:[#allocation161_spill] sm:$0xff] }
 0x3a5   : > { %v2231_v11 = vsel %vm2218_vm11, %v2198_v39, %v1917_v25  ;;  %v1923_v25 = vpop.permute.xlu2 %1922 }
 0x3ab   : > { %6360 = vmatmul.msk.f32.gmra.mxu0 %vm2256_vm13, %v2228_v42  ;;  %v11633_v42 = vld [vmem:[#allocation33_spill] sm:$0xff] }
 0x3ac   : > { %v2100_v31 = vsel %vm2086_vm9, %v2067_v55, %v11633_v42  ;;  %v2070_v55 = vsel %vm2053_vm7, %v2037_v34, %v11654_v63  ;;  %v11655_v42 = vld [vmem:[#allocation26_spill] sm:$0xff]  ;;  %v11673_v34 = vld [vmem:[#allocation41_spill] sm:$0xff] }
 0x3ad   : > { %v2133_v46 = vsel %vm2119_vm8, %v2100_v31, %v11635_v62  ;;  %v2103_v31 = vsel %vm2086_vm9, %v2070_v55, %v11655_v42  ;;  %v2007_v63 = vsel %vm642_vm4, %v6733_v12, %v11673_v34  ;;  %v11674_v42 = vld [vmem:[#allocation76_spill] sm:$0xff] }
 0x3ae   : > { %v2166_v3 = vsel %vm2152_vm10, %v2133_v46, %v11636_v15  ;;  %v11656_v46 = vld [vmem:[#allocation120_spill] sm:$0xff]  ;;  %v1925_v15 = vpop.permute.xlu0 %1924 }
 0x3af   : > { %v2199_v14 = vsel %vm2185_vm12, %v2166_v3, %v8341_v16  ;;  %v11641_v16 = vld [vmem:[#allocation113_spill] sm:$0xff] }
 0x3b0   : > { %v2232_v45 = vsel %vm2218_vm11, %v2199_v14, %v1919_v5  ;;  %v2101_v18 = vsel %vm2086_vm9, %v2068_v21, %v11641_v16  ;;  %v2136_v5 = vsel %vm2119_vm8, %v2103_v31, %v11656_v46  ;;  %v11657_v14 = vld [vmem:[#allocation138_spill] sm:$0xff]  ;;  %v2005_v21 = vsel %vm642_vm4, %v6731_v56, %v11659_v36 }
 0x3b1   : > { %v2134_v20 = vsel %vm2119_vm8, %v2101_v18, %v11642_v1  ;;  %v11660_v18 = vld [vmem:[#allocation81_spill] sm:$0xff]  ;;  %v2040_v31 = vsel %vm2020_vm6, %v2007_v63, %v11674_v42  ;;  %v11691_v63 = vld [vmem:[#allocation152_spill] sm:$0xff] }
 0x3b2   : > { %v2167_v53 = vsel %vm2152_vm10, %v2134_v20, %v11643_v60  ;;  %v2038_v1 = vsel %vm2020_vm6, %v2005_v21, %v11660_v18  ;;  %v11661_v20 = vld [vmem:[#allocation96_spill] sm:$0xff] }
 0x3b3   : > { %6361 = vmatmul.msk.f32.gmra.mxu0 %vm2256_vm13, %v2229_v24  ;;  %v8605_v24 = vld [vmem:[%s11639_s4] ss:$0 sm:$0xff]  ;;  %v2200_v29 = vsel %vm2185_vm12, %v2167_v53, %v11644_v2  ;;  %v11663_v53 = vld [vmem:[#allocation126_spill] sm:$0xff]  ;;  %v1927_v2 = vpop.permute.xlu1 %1926  ;;  %v11679_v18 = vld [vmem:[#allocation24_spill] sm:$0xff] }
 0x3b4   : > { %v2233_v27 = vsel %vm2218_vm11, %v2200_v29, %v1921_v26  ;;  %v2071_v26 = vsel %vm2053_vm7, %v2038_v1, %v11661_v20  ;;  %v11664_v29 = vld [vmem:[#allocation141_spill] sm:$0xff] }
 0x3bb   : > { %6362 = vmatmul.msk.f32.gmra.mxu0 %vm2256_vm13, %v2230_v19  ;;  %v11645_v19 = vld [vmem:[#allocation23_spill] sm:$0xff] }
 0x3bc   : > { %v2003_v7 = vsel %vm642_vm4, %v6729_v30, %v11645_v19 }
 0x3bd   : > { %v2036_v41 = vsel %vm2020_vm6, %v2003_v7, %v11646_v13  ;;  %v6732_v7 = vld [vmem:[#allocation2 + $0xd8] sm:$0xff]  ;;  %v11666_v13 = vld [vmem:[#allocation28_spill] sm:$0xff] }
 0x3be   : > { %v2069_v43 = vsel %vm2053_vm7, %v2036_v41, %v11647_v52  ;;  %v2006_v41 = vsel %vm642_vm4, %v6732_v7, %v11666_v13 }
 0x3bf   : > { %v2102_v37 = vsel %vm2086_vm9, %v2069_v43, %v11648_v59  ;;  %v11668_v59 = vld [vmem:[#allocation104_spill] sm:$0xff] }
 0x3c0   : > { %v2135_v32 = vsel %vm2119_vm8, %v2102_v37, %v11649_v35 }
 0x3c1   : > { %v2168_v28 = vsel %vm2152_vm10, %v2135_v32, %v11650_v9  ;;  %v11670_v32 = vld [vmem:[#allocation119_spill] sm:$0xff]  ;;  %v1929_v9 = vpop.permute.xlu2 %1928 }
 0x3c2   : > { %v2201_v39 = vsel %vm2185_vm12, %v2168_v28, %v11651_v51  ;;  %v11671_v28 = vld [vmem:[#allocation149_spill] sm:$0xff] }
 0x3c3   : > { %6363 = vmatmul.msk.f32.gmra.mxu0 %vm2256_vm13, %v2231_v11  ;;  %v2234_v11 = vsel %vm2218_vm11, %v2201_v39, %v1923_v25 }
 0x3c9   : > { %v1935_v34 = vpop.permute.xlu2 %1934 }
 0x3cb   : > { %6364 = vmatmul.msk.f32.gmra.mxu0 %vm2256_vm13, %v2232_v45  ;;  %v2169_v45 = vsel %vm2152_vm10, %v2136_v5, %v11657_v14  ;;  %v11677_v14 = vld [vmem:[#allocation123_spill] sm:$0xff] }
 0x3cc   : > { %v2202_v6 = vsel %vm2185_vm12, %v2169_v45, %v11658_v49  ;;  %v1931_v49 = vpop.permute.xlu0 %1930 }
 0x3cd   : > { %v2235_v4 = vsel %vm2218_vm11, %v2202_v6, %v1925_v15  ;;  %v11676_v15 = vld [vmem:[#allocation116_spill] sm:$0xff] }
 0x3ce   : > { %v11678_v6 = vld [vmem:[#allocation140_spill] sm:$0xff] }
 0x3cf   : > { %v2374_v38 = vpop.f32.mrf.mxu0 }
 0x3d0   : > { %v2473_v0 = vmul.f32 %v8605_v24, %v2374_v38  ;;  %v11662_v38 = vld [vmem:[#allocation115_spill] sm:$0xff] }
 0x3d1   : > { %v2104_v60 = vsel %vm2086_vm9, %v2071_v26, %v11662_v38  ;;  %v11680_v26 = vld [vmem:[#allocation85_spill] sm:$0xff] }
 0x3d2   : > { %v2508_v47 = vadd.f32 %v8614_v58, %v2473_v0  ;;  %v2137_v0 = vsel %vm2119_vm8, %v2104_v60, %v11663_v53  ;;  %v11681_v60 = vld [vmem:[#allocation99_spill] sm:$0xff] }
 0x3d3   : > { %6365 = vmatmul.msk.f32.gmra.mxu0 %vm2256_vm13, %v2233_v27  ;;  %v11665_v27 = vld [vmem:[#allocation160_spill] sm:$0xff] }
 0x3d4   : > { %v2540_v22 = vmax.f32 %v2508_v47, 0.0  ;;  %v2170_v47 = vsel %vm2152_vm10, %v2137_v0, %v11664_v29 }
 0x3d5   : > { %v2203_v30 = vsel %vm2185_vm12, %v2170_v47, %v11665_v27  ;;  %v11683_v47 = vld [vmem:[#allocation129_spill] sm:$0xff] }
 0x3d6   : > { %2573 = vst.msk [vmem:[#allocation3 + $0x19] sm:$0xff] %vm2020_vm6, %v2540_v22  ;;  %v2236_v19 = vsel %vm2218_vm11, %v2203_v30, %v1927_v2  ;;  %v11667_v22 = vld [vmem:[#allocation70_spill] sm:$0xff]  ;;  %v1933_v30 = vpop.permute.xlu1 %1932 }
 0x3d7   : > { %v2039_v52 = vsel %vm2020_vm6, %v2006_v41, %v11667_v22  ;;  %v11685_v41 = vld [vmem:[#allocation162_spill] sm:$0xff] }
 0x3d8   : > { %v2072_v37 = vsel %vm2053_vm7, %v2039_v52, %v11668_v59 }
 0x3d9   : > { %v2105_v35 = vsel %vm2086_vm9, %v2072_v37, %v11669_v40  ;;  %v6735_v37 = vld [vmem:[#allocation2 + $0xf8] sm:$0xff] }
 0x3da   : > { %v2138_v25 = vsel %vm2119_vm8, %v2105_v35, %v11670_v32  ;;  %v11686_v40 = vld [vmem:[#allocation34_spill] sm:$0xff] }
 0x3db   : > { %6366 = vmatmul.msk.f32.gmra.mxu0 %vm2256_vm13, %v2234_v11  ;;  %v2171_v51 = vsel %vm2152_vm10, %v2138_v25, %v11671_v28  ;;  %v11672_v11 = vld [vmem:[#allocation163_spill] sm:$0xff]  ;;  %v2009_v35 = vsel %vm642_vm4, %v6735_v37, %v11686_v40  ;;  %v11687_v25 = vld [vmem:[#allocation73_spill] sm:$0xff] }
 0x3dc   : > { %v2204_v17 = vsel %vm2185_vm12, %v2171_v51, %v11672_v11  ;;  %v11688_v28 = vld [vmem:[#allocation107_spill] sm:$0xff]  ;;  %v11689_v11 = vld [vmem:[#allocation22_spill] sm:$0xff] }
 0x3dd   : > { %v8650_v44 = vld [vmem:[#allocation3 + $0x19] sm:$0xff]  ;;  %v2237_v57 = vsel %vm2218_vm11, %v2204_v17, %v1929_v9  ;;  %v2042_v9 = vsel %vm2020_vm6, %v2009_v35, %v11687_v25  ;;  %v11703_v37 = vld [vmem:[#allocation131_spill] sm:$0xff] }
 0x3de   : > { %2930 = vrot.lane.b32.xlu0 %v8650_v44, %s11634_s14  ;;  %v2377_v62 = vpop.f32.mrf.mxu0  ;;  %v2075_v51 = vsel %vm2053_vm7, %v2042_v9, %v11688_v28  ;;  %v1939_v35 = vpop.permute.xlu1 %1938  ;;  %v11705_v28 = vld [vmem:[#allocation164_spill] sm:$0xff] }
 0x3df   : > { %v2474_v3 = vmul.f32 %v8605_v24, %v2377_v62  ;;  %v11675_v62 = vld [vmem:[#allocation95_spill] sm:$0xff]  ;;  %v2108_v17 = vsel %vm2086_vm9, %v2075_v51, %v11689_v11 }
 0x3e0   : > { %v2073_v46 = vsel %vm2053_vm7, %v2040_v31, %v11675_v62  ;;  %v11692_v31 = vld [vmem:[#allocation165_spill] sm:$0xff] }
 0x3e1   : > { %v2509_v48 = vadd.f32 %v8614_v58, %v2474_v3  ;;  %v2106_v3 = vsel %vm2086_vm9, %v2073_v46, %v11676_v15  ;;  %v6736_v15 = vld [vmem:[#allocation2 + $0x108] sm:$0xff] }
 0x3e2   : > { %v2139_v45 = vsel %vm2119_vm8, %v2106_v3, %v11677_v14  ;;  %v11693_v3 = vld [vmem:[#allocation45_spill] sm:$0xff] }
 0x3e3   : > { %v2541_v16 = vmax.f32 %v2509_v48, 0.0  ;;  %6367 = vmatmul.msk.f32.gmra.mxu0 %vm2256_vm13, %v2235_v4  ;;  %v2172_v48 = vsel %vm2152_vm10, %v2139_v45, %v11678_v6  ;;  %v2010_v14 = vsel %vm642_vm4, %v6736_v15, %v11693_v3  ;;  %v11710_v3 = vld [vmem:[#allocation124_spill] sm:$0xff] }
 0x3e4   : > { %v2205_v56 = vsel %vm2185_vm12, %v2172_v48, %v8359_v23  ;;  %v11682_v23 = vld [vmem:[#allocation27_spill] sm:$0xff]  ;;  %v11695_v48 = vld [vmem:[#allocation97_spill] sm:$0xff] }
 0x3e5   : > { %2574 = vst.msk [vmem:[#allocation3 + $0x21] sm:$0xff] %vm2020_vm6, %v2541_v16  ;;  %v2238_v21 = vsel %vm2218_vm11, %v2205_v56, %v1931_v49  ;;  %v6734_v16 = vld [vmem:[#allocation2 + $0xf0] sm:$0xff]  ;;  %v11694_v49 = vld [vmem:[#allocation79_spill] sm:$0xff] }
 0x3e6   : > { %v2008_v1 = vsel %vm642_vm4, %v6734_v16, %v11679_v18  ;;  %v2043_v6 = vsel %vm2020_vm6, %v2010_v14, %v11694_v49  ;;  %v11697_v18 = vld [vmem:[#allocation82_spill] sm:$0xff] }
 0x3e7   : > { %v2041_v38 = vsel %vm2020_vm6, %v2008_v1, %v11680_v26  ;;  %v11698_v26 = vld [vmem:[#allocation142_spill] sm:$0xff] }
 0x3e8   : > { %v2074_v53 = vsel %vm2053_vm7, %v2041_v38, %v11681_v60  ;;  %v11711_v49 = vld [vmem:[#allocation154_spill] sm:$0xff] }
 0x3e9   : > { %v2107_v2 = vsel %vm2086_vm9, %v2074_v53, %v11682_v23 }
 0x3ea   : > { %v2140_v27 = vsel %vm2119_vm8, %v2107_v2, %v11683_v47  ;;  %v6737_v2 = vld [vmem:[#allocation2 + $0x110] sm:$0xff] }
 0x3eb   : > { %6368 = vmatmul.msk.f32.gmra.mxu0 %vm2256_vm13, %v2236_v19  ;;  %v11684_v19 = vld [vmem:[#allocation144_spill] sm:$0xff]  ;;  %v11699_v47 = vld [vmem:[#allocation29_spill] sm:$0xff] }
 0x3ec   : > { %v8687_v43 = vld [vmem:[#allocation3 + $0x21] sm:$0xff]  ;;  %v2173_v7 = vsel %vm2152_vm10, %v2140_v27, %v11684_v19  ;;  %v2011_v27 = vsel %vm642_vm4, %v6737_v2, %v11699_v47  ;;  %v11700_v19 = vld [vmem:[#allocation87_spill] sm:$0xff] }
 0x3ed   : > { %2932 = vrot.lane.b32.xlu1 %v8687_v43, %s11634_s14  ;;  %v2206_v22 = vsel %vm2185_vm12, %v2173_v7, %v11685_v41  ;;  %v2044_v7 = vsel %vm2020_vm6, %v2011_v27, %v11700_v19  ;;  %v11716_v47 = vld [vmem:[#allocation127_spill] sm:$0xff]  ;;  %v11717_v19 = vld [vmem:[#allocation145_spill] sm:$0xff] }
 0x3ee   : > { %v2239_v59 = vsel %vm2218_vm11, %v2206_v22, %v1933_v30 }
 0x3f0   : > { %v2380_v39 = vpop.f32.mrf.mxu0 }
 0x3f1   : > { %v2475_v54 = vmul.f32 %v8605_v24, %v2380_v39 }
 0x3f3   : > { %v2510_v55 = vadd.f32 %v8614_v58, %v2475_v54  ;;  %6369 = vmatmul.msk.f32.gmra.mxu0 %vm2256_vm13, %v2237_v57  ;;  %v11690_v57 = vld [vmem:[#allocation121_spill] sm:$0xff] }
 0x3f4   : > { %v2141_v12 = vsel %vm2119_vm8, %v2108_v17, %v11690_v57  ;;  %v6738_v17 = vld [vmem:[#allocation2 + $0x120] sm:$0xff] }
 0x3f5   : > { %v2542_v5 = vmax.f32 %v2510_v55, 0.0  ;;  %v2174_v55 = vsel %vm2152_vm10, %v2141_v12, %v11691_v63  ;;  %v11706_v57 = vld [vmem:[#allocation39_spill] sm:$0xff]  ;;  %v11707_v63 = vld [vmem:[#allocation77_spill] sm:$0xff] }
 0x3f6   : > { %v2207_v62 = vsel %vm2185_vm12, %v2174_v55, %v11692_v31  ;;  %v2012_v12 = vsel %vm642_vm4, %v6738_v17, %v11706_v57  ;;  %v11722_v17 = vld [vmem:[#allocation133_spill] sm:$0xff] }
 0x3f7   : > { %2575 = vst.msk [vmem:[#allocation3 + $0x31] sm:$0xff] %vm2020_vm6, %v2542_v5  ;;  %v2240_v5 = vsel %vm2218_vm11, %v2207_v62, %v1935_v34  ;;  %v2045_v55 = vsel %vm2020_vm6, %v2012_v12, %v11707_v63  ;;  %v1945_v12 = vpop.permute.xlu1 %1944 }
 0x3f8   : > { %v2383_v4 = vpop.f32.mrf.mxu0 }
 0x3f9   : > { %v2476_v36 = vmul.f32 %v8605_v24, %v2383_v4  ;;  %v2076_v4 = vsel %vm2053_vm7, %v2043_v6, %v11695_v48 }
 0x3fb   : > { %v2511_v20 = vadd.f32 %v8614_v58, %v2476_v36  ;;  %6370 = vmatmul.msk.f32.gmra.mxu0 %vm2256_vm13, %v2238_v21  ;;  %v11696_v36 = vld [vmem:[#allocation117_spill] sm:$0xff] }
 0x3fc   : > { %v2109_v21 = vsel %vm2086_vm9, %v2076_v4, %v11696_v36 }
 0x3fd   : > { %v2543_v0 = vmax.f32 %v2511_v20, 0.0  ;;  %v2142_v1 = vsel %vm2119_vm8, %v2109_v21, %v11697_v18  ;;  %v1937_v20 = vpop.permute.xlu0 %1936  ;;  %v6739_v21 = vld [vmem:[#allocation2 + $0x128] sm:$0xff]  ;;  %v11712_v18 = vld [vmem:[#allocation50_spill] sm:$0xff] }
 0x3fe   : > { %v8732_v29 = vld [vmem:[#allocation3 + $0x31] sm:$0xff]  ;;  %v2175_v38 = vsel %vm2152_vm10, %v2142_v1, %v11698_v26  ;;  %v2013_v1 = vsel %vm642_vm4, %v6739_v21, %v11712_v18 }
 0x3ff   : > { %2576 = vst.msk [vmem:[#allocation3 + $0x39] sm:$0xff] %vm2020_vm6, %v2543_v0  ;;  %2934 = vrot.lane.b32.xlu2 %v8732_v29, %s11634_s14  ;;  %v2208_v53 = vsel %vm2185_vm12, %v2175_v38, %v8377_v61  ;;  %v11702_v61 = vld [vmem:[#allocation37_spill] sm:$0xff]  ;;  %v11713_v26 = vld [vmem:[#allocation83_spill] sm:$0xff] }
 0x400   : > { %v2386_v13 = vpop.f32.mrf.mxu0  ;;  %v2241_v23 = vsel %vm2218_vm11, %v2208_v53, %v1937_v20  ;;  %v2046_v38 = vsel %vm2020_vm6, %v2013_v1, %v11713_v26  ;;  %v11729_v1 = vld [vmem:[#allocation75_spill] sm:$0xff] }
 0x401   : > { %v2477_v52 = vmul.f32 %v8605_v24, %v2386_v13  ;;  %v11701_v13 = vld [vmem:[#allocation102_spill] sm:$0xff] }
 0x402   : > { %v2077_v41 = vsel %vm2053_vm7, %v2044_v7, %v11701_v13 }
 0x403   : > { %v2512_v32 = vadd.f32 %v8614_v58, %v2477_v52  ;;  %6371 = vmatmul.msk.f32.gmra.mxu0 %vm2256_vm13, %v2239_v59  ;;  %v2110_v52 = vsel %vm2086_vm9, %v2077_v41, %v11702_v61 }
 0x404   : > { %v2143_v40 = vsel %vm2119_vm8, %v2110_v52, %v11703_v37  ;;  %v6740_v52 = vld [vmem:[#allocation2 + $0x138] sm:$0xff]  ;;  %v11718_v37 = vld [vmem:[#allocation35_spill] sm:$0xff] }
 0x405   : > { %v2544_v39 = vmax.f32 %v2512_v32, 0.0  ;;  %v11704_v32 = vld [vmem:[#allocation147_spill] sm:$0xff] }
 0x406   : > { %v8755_v54 = vld [vmem:[#allocation3 + $0x39] sm:$0xff]  ;;  %v2176_v25 = vsel %vm2152_vm10, %v2143_v40, %v11704_v32  ;;  %v2014_v40 = vsel %vm642_vm4, %v6740_v52, %v11718_v37  ;;  %v11735_v37 = vld [vmem:[#allocation62_spill] sm:$0xff] }
 0x407   : > { %2577 = vst.msk [vmem:[#allocation3 + $0x49] sm:$0xff] %vm2020_vm6, %v2544_v39  ;;  %2936 = vrot.lane.b32.xlu0 %v8755_v54, %s11634_s14  ;;  %v2209_v51 = vsel %vm2185_vm12, %v2176_v25, %v11705_v28  ;;  %v11719_v32 = vld [vmem:[#allocation89_spill] sm:$0xff] }
 0x408   : > { %v2389_v42 = vpop.f32.mrf.mxu0  ;;  %v2242_v11 = vsel %vm2218_vm11, %v2209_v51, %v1939_v35  ;;  %v2047_v25 = vsel %vm2020_vm6, %v2014_v40, %v11719_v32  ;;  %v11736_v32 = vld [vmem:[#allocation130_spill] sm:$0xff] }
 0x409   : > { %v2478_v46 = vmul.f32 %v8605_v24, %v2389_v42  ;;  %v11708_v42 = vld [vmem:[#allocation109_spill] sm:$0xff] }
 0x40a   : > { %v2078_v31 = vsel %vm2053_vm7, %v2045_v55, %v11708_v42  ;;  %v11724_v42 = vld [vmem:[#allocation166_spill] sm:$0xff] }
 0x40b   : > { %v2513_v45 = vadd.f32 %v8614_v58, %v2478_v46  ;;  %6372 = vmatmul.msk.f32.gmra.mxu0 %vm2256_vm13, %v2240_v5  ;;  %v11709_v46 = vld [vmem:[#allocation47_spill] sm:$0xff] }
 0x40c   : > { %v2111_v5 = vsel %vm2086_vm9, %v2078_v31, %v11709_v46 }
 0x40d   : > { %v2545_v56 = vmax.f32 %v2513_v45, 0.0  ;;  %v2144_v14 = vsel %vm2119_vm8, %v2111_v5, %v11710_v3  ;;  %v1941_v45 = vpop.permute.xlu2 %1940  ;;  %v6741_v5 = vld [vmem:[#allocation2 + $0x140] sm:$0xff] }
 0x40e   : > { %v8778_v16 = vld [vmem:[#allocation3 + $0x49] sm:$0xff]  ;;  %v2177_v6 = vsel %vm2152_vm10, %v2144_v14, %v11711_v49  ;;  %v11726_v49 = vld [vmem:[#allocation80_spill] sm:$0xff] }
 0x40f   : > { %2578 = vst.msk [vmem:[#allocation3 + $0x51] sm:$0xff] %vm2020_vm6, %v2545_v56  ;;  %2938 = vrot.lane.b32.xlu1 %v8778_v16, %s11634_s14  ;;  %v2210_v4 = vsel %vm2185_vm12, %v2177_v6, %v8355_v10  ;;  %v11715_v10 = vld [vmem:[#allocation42_spill] sm:$0xff]  ;;  %v11725_v3 = vld [vmem:[#allocation43_spill] sm:$0xff] }
 0x410   : > { %v2392_v60 = vpop.f32.mrf.mxu0  ;;  %v2243_v36 = vsel %vm2218_vm11, %v2210_v4, %v1941_v45  ;;  %v2015_v14 = vsel %vm642_vm4, %v6741_v5, %v11725_v3 }
 0x411   : > { %v2479_v0 = vmul.f32 %v8605_v24, %v2392_v60  ;;  %v11714_v60 = vld [vmem:[#allocation100_spill] sm:$0xff]  ;;  %v2048_v6 = vsel %vm2020_vm6, %v2015_v14, %v11726_v49 }
 0x412   : > { %v2079_v53 = vsel %vm2053_vm7, %v2046_v38, %v11714_v60  ;;  %v11730_v38 = vld [vmem:[#allocation155_spill] sm:$0xff] }
 0x413   : > { %v2514_v30 = vadd.f32 %v8614_v58, %v2479_v0  ;;  %6373 = vmatmul.msk.f32.gmra.mxu0 %vm2256_vm13, %v2241_v23  ;;  %v2112_v23 = vsel %vm2086_vm9, %v2079_v53, %v11715_v10 }
 0x414   : > { %v2145_v27 = vsel %vm2119_vm8, %v2112_v23, %v11716_v47 }
 0x415   : > { %v2546_v22 = vmax.f32 %v2514_v30, 0.0  ;;  %v1943_v30 = vpop.permute.xlu0 %1942  ;;  %v2178_v7 = vsel %vm2152_vm10, %v2145_v27, %v11717_v19  ;;  %v1947_v26 = vpop.permute.xlu2 %1946  ;;  %v6742_v27 = vld [vmem:[#allocation2 + $0x150] sm:$0xff] }
 0x416   : > { %v8801_v59 = vld [vmem:[#allocation3 + $0x51] sm:$0xff]  ;;  %v2211_v41 = vsel %vm2185_vm12, %v2178_v7, %v8385_v8  ;;  %v11721_v8 = vld [vmem:[#allocation38_spill] sm:$0xff] }
 0x417   : > { %2579 = vst.msk [vmem:[#allocation3 + $0x61] sm:$0xff] %vm2020_vm6, %v2546_v22  ;;  %2940 = vrot.lane.b32.xlu2 %v8801_v59, %s11634_s14  ;;  %v2244_v61 = vsel %vm2218_vm11, %v2211_v41, %v1943_v30  ;;  %v11732_v30 = vld [vmem:[#allocation55_spill] sm:$0xff] }
 0x418   : > { %v2395_v9 = vpop.f32.mrf.mxu0  ;;  %v2016_v19 = vsel %vm642_vm4, %v6742_v27, %v11732_v30  ;;  %v11748_v30 = vld [vmem:[#allocation57_spill] sm:$0xff] }
 0x419   : > { %v2480_v39 = vmul.f32 %v8605_v24, %v2395_v9  ;;  %v11720_v9 = vld [vmem:[#allocation105_spill] sm:$0xff] }
 0x41a   : > { %v2080_v28 = vsel %vm2053_vm7, %v2047_v25, %v11720_v9 }
 0x41b   : > { %v2515_v34 = vadd.f32 %v8614_v58, %v2480_v39  ;;  %6374 = vmatmul.msk.f32.gmra.mxu0 %vm2256_vm13, %v2242_v11  ;;  %v2113_v39 = vsel %vm2086_vm9, %v2080_v28, %v11721_v8  ;;  %v11737_v28 = vld [vmem:[#allocation148_spill] sm:$0xff] }
 0x41c   : > { %v2146_v57 = vsel %vm2119_vm8, %v2113_v39, %v11722_v17 }
 0x41d   : > { %v2547_v62 = vmax.f32 %v2515_v34, 0.0  ;;  %v11723_v34 = vld [vmem:[#allocation150_spill] sm:$0xff]  ;;  %v1949_v9 = vpop.permute.xlu0 %1948 }
 0x41e   : > { %v8824_v15 = vld [vmem:[#allocation3 + $0x61] sm:$0xff]  ;;  %v2179_v63 = vsel %vm2152_vm10, %v2146_v57, %v11723_v34  ;;  %v11738_v34 = vld [vmem:[#allocation40_spill] sm:$0xff] }
 0x41f   : > { %2580 = vst.msk [vmem:[#allocation3 + $0x69] sm:$0xff] %vm2020_vm6, %v2547_v62  ;;  %2942 = vrot.lane.b32.xlu0 %v8824_v15, %s11634_s14  ;;  %v2212_v31 = vsel %vm2185_vm12, %v2179_v63, %v11724_v42  ;;  %v11739_v42 = vld [vmem:[#allocation90_spill] sm:$0xff] }
 0x420   : > { %v2398_v48 = vpop.f32.mrf.mxu0  ;;  %v2245_v46 = vsel %vm2218_vm11, %v2212_v31, %v1945_v12  ;;  %v6743_v12 = vld [vmem:[#allocation2 + $0x158] sm:$0xff] }
 0x421   : > { %v2481_v56 = vmul.f32 %v8605_v24, %v2398_v48  ;;  %v11727_v48 = vld [vmem:[#allocation110_spill] sm:$0xff]  ;;  %v2017_v63 = vsel %vm642_vm4, %v6743_v12, %v11738_v34 }
 0x422   : > { %v2081_v4 = vsel %vm2053_vm7, %v2048_v6, %v11727_v48  ;;  %v2050_v31 = vsel %vm2020_vm6, %v2017_v63, %v11739_v42  ;;  %v1951_v6 = vpop.permute.xlu1 %1950  ;;  %v11743_v48 = vld [vmem:[#allocation153_spill] sm:$0xff]  ;;  %v11754_v12 = vld [vmem:[#allocation106_spill] sm:$0xff] }
 0x423   : > { %v2516_v20 = vadd.f32 %v8614_v58, %v2481_v56  ;;  %6375 = vmatmul.msk.f32.gmra.mxu0 %vm2256_vm13, %v2243_v36  ;;  %v11728_v36 = vld [vmem:[#allocation52_spill] sm:$0xff] }
 0x424   : > { %v2114_v21 = vsel %vm2086_vm9, %v2081_v4, %v11728_v36  ;;  %v11744_v36 = vld [vmem:[#allocation168_spill] sm:$0xff] }
 0x425   : > { %v2548_v0 = vmax.f32 %v2516_v20, 0.0  ;;  %v2147_v20 = vsel %vm2119_vm8, %v2114_v21, %v11729_v1 }
 0x426   : > { %v8847_v2 = vld [vmem:[#allocation3 + $0x69] sm:$0xff]  ;;  %v2180_v60 = vsel %vm2152_vm10, %v2147_v20, %v11730_v38  ;;  %v11745_v38 = vld [vmem:[#allocation48_spill] sm:$0xff] }
 0x427   : > { %2581 = vst.msk [vmem:[#allocation3 + $0x79] sm:$0xff] %vm2020_vm6, %v2548_v0  ;;  %2944 = vrot.lane.b32.xlu1 %v8847_v2, %s11634_s14  ;;  %v11731_v0 = vld [vmem:[#allocation8_spill] sm:$0xff] }
 0x428   : > { %v2401_v13 = vpop.f32.mrf.mxu0  ;;  %v2213_v10 = vsel %vm2185_vm12, %v2180_v60, %v11731_v0  ;;  %v11746_v0 = vld [vmem:[#allocation84_spill] sm:$0xff] }
 0x429   : > { %v2482_v22 = vmul.f32 %v8605_v24, %v2401_v13  ;;  %v2246_v47 = vsel %vm2218_vm11, %v2213_v10, %v1947_v26  ;;  %v11733_v13 = vld [vmem:[#allocation86_spill] sm:$0xff]  ;;  %v6744_v26 = vld [vmem:[#allocation2 + $0x168] sm:$0xff] }
 0x42a   : > { %v2049_v41 = vsel %vm2020_vm6, %v2016_v19, %v11733_v13  ;;  %v2018_v60 = vsel %vm642_vm4, %v6744_v26, %v11745_v38  ;;  %v11749_v13 = vld [vmem:[#allocation128_spill] sm:$0xff] }
 0x42b   : > { %v2517_v35 = vadd.f32 %v8614_v58, %v2482_v22  ;;  %6376 = vmatmul.msk.f32.gmra.mxu0 %vm2256_vm13, %v2244_v61  ;;  %v11734_v22 = vld [vmem:[#allocation103_spill] sm:$0xff]  ;;  %v2051_v10 = vsel %vm2020_vm6, %v2018_v60, %v11746_v0 }
 0x42c   : > { %v2082_v61 = vsel %vm2053_vm7, %v2049_v41, %v11734_v22  ;;  %v1953_v22 = vpop.permute.xlu2 %1952 }
 0x42d   : > { %v2549_v51 = vmax.f32 %v2517_v35, 0.0  ;;  %v2115_v40 = vsel %vm2086_vm9, %v2082_v61, %v11735_v37  ;;  %v11750_v61 = vld [vmem:[#allocation156_spill] sm:$0xff] }
 0x42e   : > { %v8870_v11 = vld [vmem:[#allocation3 + $0x79] sm:$0xff]  ;;  %v2148_v25 = vsel %vm2119_vm8, %v2115_v40, %v11736_v32 }
 0x42f   : > { %2582 = vst.msk [vmem:[#allocation3 + $0x81] sm:$0xff] %vm2020_vm6, %v2549_v51  ;;  %2946 = vrot.lane.b32.xlu2 %v8870_v11, %s11634_s14  ;;  %v2181_v51 = vsel %vm2152_vm10, %v2148_v25, %v11737_v28  ;;  %v11751_v40 = vld [vmem:[#allocation44_spill] sm:$0xff]  ;;  %v6745_v28 = vld [vmem:[#allocation2 + $0x170] sm:$0xff] }
 0x430   : > { %v2404_v55 = vpop.f32.mrf.mxu0  ;;  %v2214_v39 = vsel %vm2185_vm12, %v2181_v51, %v8400_v33  ;;  %v11741_v33 = vld [vmem:[#allocation31_spill] sm:$0xff]  ;;  %v11752_v51 = vld [vmem:[#allocation60_spill] sm:$0xff] }
 0x431   : > { %v2483_v62 = vmul.f32 %v8605_v24, %v2404_v55  ;;  %v2247_v57 = vsel %vm2218_vm11, %v2214_v39, %v1949_v9 }
 0x433   : > { %v2518_v45 = vadd.f32 %v8614_v58, %v2483_v62  ;;  %6377 = vmatmul.msk.f32.gmra.mxu0 %vm2256_vm13, %v2245_v46  ;;  %v11740_v62 = vld [vmem:[#allocation108_spill] sm:$0xff] }
 0x434   : > { %v2083_v46 = vsel %vm2053_vm7, %v2050_v31, %v11740_v62  ;;  %v11756_v62 = vld [vmem:[#allocation132_spill] sm:$0xff] }
 0x435   : > { %v2550_v56 = vmax.f32 %v2518_v45, 0.0  ;;  %v2116_v3 = vsel %vm2086_vm9, %v2083_v46, %v11741_v33  ;;  %v11742_v45 = vld [vmem:[#allocation134_spill] sm:$0xff]  ;;  %v11757_v33 = vld [vmem:[#allocation151_spill] sm:$0xff] }
 0x436   : > { %v8893_v18 = vld [vmem:[#allocation3 + $0x81] sm:$0xff]  ;;  %v2149_v49 = vsel %vm2119_vm8, %v2116_v3, %v11742_v45 }
 0x437   : > { %2583 = vst.msk [vmem:[#allocation3 + $0x91] sm:$0xff] %vm2020_vm6, %v2550_v56  ;;  %2948 = vrot.lane.b32.xlu0 %v8893_v18, %s11634_s14  ;;  %v2182_v4 = vsel %vm2152_vm10, %v2149_v49, %v11743_v48 }
 0x438   : > { %v2407_v53 = vpop.f32.mrf.mxu0  ;;  %v2215_v21 = vsel %vm2185_vm12, %v2182_v4, %v11744_v36 }
 0x439   : > { %v2484_v23 = vmul.f32 %v8605_v24, %v2407_v53  ;;  %v2248_v20 = vsel %vm2218_vm11, %v2215_v21, %v1951_v6 }
 0x43b   : > { %v2519_v7 = vadd.f32 %v8614_v58, %v2484_v23  ;;  %6378 = vmatmul.msk.f32.gmra.mxu0 %vm2256_vm13, %v2246_v47  ;;  %v11747_v23 = vld [vmem:[#allocation111_spill] sm:$0xff] }
 0x43c   : > { %v2084_v47 = vsel %vm2053_vm7, %v2051_v10, %v11747_v23 }
 0x43d   : > { %v2551_v52 = vmax.f32 %v2519_v7, 0.0  ;;  %v2117_v19 = vsel %vm2086_vm9, %v2084_v47, %v11748_v30 }
 0x43e   : > { %v8916_v35 = vld [vmem:[#allocation3 + $0x91] sm:$0xff]  ;;  %v2150_v41 = vsel %vm2119_vm8, %v2117_v19, %v11749_v13 }
 0x43f   : > { %2584 = vst.msk [vmem:[#allocation3 + $0x99] sm:$0xff] %vm2020_vm6, %v2551_v52  ;;  %2950 = vrot.lane.b32.xlu1 %v8916_v35, %s11634_s14  ;;  %v2183_v52 = vsel %vm2152_vm10, %v2150_v41, %v11750_v61 }
 0x440   : > { %v2410_v8 = vpop.f32.mrf.mxu0  ;;  %v2216_v32 = vsel %vm2185_vm12, %v2183_v52, %v11751_v40 }
 0x441   : > { %v2485_v17 = vmul.f32 %v8605_v24, %v2410_v8  ;;  %v2249_v9 = vsel %vm2218_vm11, %v2216_v32, %v1953_v22  ;;  %v2019_v8 = vsel %vm642_vm4, %v6745_v28, %v11752_v51  ;;  %vm6138_vm4 = vcmask 654336  }
 0x443   : > { %v2520_v55 = vadd.f32 %v8614_v58, %v2485_v17  ;;  %6379 = vmatmul.msk.f32.gmra.mxu0 %vm2256_vm13, %v2247_v57  ;;  %v11753_v17 = vld [vmem:[#allocation88_spill] sm:$0xff] }
 0x444   : > { %v2052_v57 = vsel %vm2020_vm6, %v2019_v8, %v11753_v17 }
 0x445   : > { %v2552_v5 = vmax.f32 %v2520_v55, 0.0  ;;  %v2085_v34 = vsel %vm2053_vm7, %v2052_v57, %v11754_v12  ;;  %v11755_v55 = vld [vmem:[#allocation46_spill] sm:$0xff]  ;;  %vm6147_vm7 = vcmask 850944  }
 0x446   : > { %v8939_v14 = vld [vmem:[#allocation3 + $0x99] sm:$0xff]  ;;  %v2118_v42 = vsel %vm2086_vm9, %v2085_v34, %v11755_v55 }
 0x447   : > { %2585 = vst.msk [vmem:[#allocation3 + $0xa9] sm:$0xff] %vm2020_vm6, %v2552_v5  ;;  %2952 = vrot.lane.b32.xlu2 %v8939_v14, %s11634_s14  ;;  %v2151_v46 = vsel %vm2119_vm8, %v2118_v42, %v11756_v62  ;;  %v1955_v5 = vpop.permute.xlu0 %1954  ;;  %vm6150_vm8 = vcmask 916480  }
 0x448   : > { %v2413_v56 = vpop.f32.mrf.mxu0  ;;  %v2184_v3 = vsel %vm2152_vm10, %v2151_v46, %v11757_v33 }
 0x449   : > { %v2486_v1 = vmul.f32 %v8605_v24, %v2413_v56  ;;  %v2217_v49 = vsel %vm2185_vm12, %v2184_v3, %v8403_v50 }
 0x44a   : > { %v2250_v48 = vsel %vm2218_vm11, %v2217_v49, %v1955_v5 }
 0x44b   : > { %v2521_v53 = vadd.f32 %v8614_v58, %v2486_v1  ;;  %6380 = vmatmul.msk.f32.gmra.mxu0 %vm2256_vm13, %v2248_v20 }
 0x44d   : > { %v2553_v27 = vmax.f32 %v2521_v53, 0.0 }
 0x44e   : > { %v8962_v7 = vld [vmem:[#allocation3 + $0xa9] sm:$0xff] }
 0x44f   : > { %2586 = vst.msk [vmem:[#allocation3 + $0xb1] sm:$0xff] %vm2020_vm6, %v2553_v27  ;;  %2954 = vrot.lane.b32.xlu0 %v8962_v7, %s11634_s14 }
 0x450   : > { %v2416_v37 = vpop.f32.mrf.mxu0 }
 0x451   : > { %v2487_v25 = vmul.f32 %v8605_v24, %v2416_v37 }
 0x453   : > { %v2522_v39 = vadd.f32 %v8614_v58, %v2487_v25  ;;  %6381 = vmatmul.msk.f32.gmra.mxu0 %vm2256_vm13, %v2249_v9 }
 0x455   : > { %v2554_v63 = vmax.f32 %v2522_v39, 0.0 }
 0x456   : > { %v2652_v31 = vld [vmem:[#allocation3 + $0xb1] sm:$0xff] }
 0x457   : > { %2587 = vst.msk [vmem:[#allocation3 + $0xc1] sm:$0xff] %vm2020_vm6, %v2554_v63  ;;  %2956 = vrot.lane.b32.xlu1 %v2652_v31, %s11634_s14 }
 0x458   : > { %v2419_v45 = vpop.f32.mrf.mxu0 }
 0x459   : > { %v2488_v6 = vmul.f32 %v8605_v24, %v2419_v45 }
 0x45b   : > { %v2523_v4 = vadd.f32 %v8614_v58, %v2488_v6  ;;  %6382 = vmatmul.msk.f32.gmra.mxu0 %vm2256_vm13, %v2250_v48 }
 0x45d   : > { %v2555_v56 = vmax.f32 %v2523_v4, 0.0 }
 0x45e   : > { %v2653_v36 = vld [vmem:[#allocation3 + $0xc1] sm:$0xff] }
 0x45f   : > { %2588 = vst.msk [vmem:[#allocation3 + $0xc9] sm:$0xff] %vm2020_vm6, %v2555_v56  ;;  %2958 = vrot.lane.b32.xlu2 %v2653_v36, %s11634_s14 }
 0x460   : > { %v2422_v21 = vpop.f32.mrf.mxu0 }
 0x461   : > { %v2489_v1 = vmul.f32 %v8605_v24, %v2422_v21 }
 0x463   : > { %v2524_v20 = vadd.f32 %v8614_v58, %v2489_v1 }
 0x465   : > { %v2556_v50 = vmax.f32 %v2524_v20, 0.0 }
 0x466   : > { %v2654_v26 = vld [vmem:[#allocation3 + $0xc9] sm:$0xff] }
 0x467   : > { %2589 = vst.msk [vmem:[#allocation3 + $0xd9] sm:$0xff] %vm2020_vm6, %v2556_v50  ;;  %2960 = vrot.lane.b32.xlu0 %v2654_v26, %s11634_s14 }
 0x468   : > { %v2425_v38 = vpop.f32.mrf.mxu0 }
 0x469   : > { %v2490_v60 = vmul.f32 %v8605_v24, %v2425_v38 }
 0x46b   : > { %v2525_v53 = vadd.f32 %v8614_v58, %v2490_v60 }
 0x46d   : > { %v2557_v0 = vmax.f32 %v2525_v53, 0.0 }
 0x46e   : > { %v2655_v10 = vld [vmem:[#allocation3 + $0xd9] sm:$0xff] }
 0x46f   : > { %2590 = vst.msk [vmem:[#allocation3 + $0xe1] sm:$0xff] %vm2020_vm6, %v2557_v0  ;;  %2962 = vrot.lane.b32.xlu1 %v2655_v10, %s11634_s14 }
 0x470   : > { %v2428_v23 = vpop.f32.mrf.mxu0 }
 0x471   : > { %v2491_v47 = vmul.f32 %v8605_v24, %v2428_v23 }
 0x473   : > { %v2526_v27 = vadd.f32 %v8614_v58, %v2491_v47 }
 0x475   : > { %v2558_v30 = vmax.f32 %v2526_v27, 0.0 }
 0x476   : > { %v2656_v19 = vld [vmem:[#allocation3 + $0xe1] sm:$0xff] }
 0x477   : > { %2591 = vst.msk [vmem:[#allocation3 + $0xf1] sm:$0xff] %vm2020_vm6, %v2558_v30  ;;  %2964 = vrot.lane.b32.xlu2 %v2656_v19, %s11634_s14 }
 0x478   : > { %v2431_v13 = vpop.f32.mrf.mxu0 }
 0x479   : > { %v2492_v41 = vmul.f32 %v8605_v24, %v2431_v13 }
 0x47b   : > { %v2527_v22 = vadd.f32 %v8614_v58, %v2492_v41 }
 0x47d   : > { %v2559_v61 = vmax.f32 %v2527_v22, 0.0 }
 0x47e   : > { %v2657_v52 = vld [vmem:[#allocation3 + $0xf1] sm:$0xff] }
 0x47f   : > { %2592 = vst.msk [vmem:[#allocation3 + $0xf9] sm:$0xff] %vm2020_vm6, %v2559_v61  ;;  %2966 = vrot.lane.b32.xlu0 %v2657_v52, %s11634_s14  ;;  %v2669_v52 = vld [vmem:[#allocation3 + $0x2] sm:$0xff] }
 0x480   : > { %v2434_v37 = vpop.f32.mrf.mxu0 }
 0x481   : > { %v2493_v40 = vmul.f32 %v8605_v24, %v2434_v37 }
 0x483   : > { %v2528_v32 = vadd.f32 %v8614_v58, %v2493_v40 }
 0x485   : > { %v2560_v25 = vmax.f32 %v2528_v32, 0.0 }
 0x486   : > { %v2658_v9 = vld [vmem:[#allocation3 + $0xf9] sm:$0xff] }
 0x487   : > { %2593 = vst.msk [vmem:[#allocation3 + $0x109] sm:$0xff] %vm2020_vm6, %v2560_v25  ;;  %2968 = vrot.lane.b32.xlu1 %v2658_v9, %s11634_s14 }
 0x488   : > { %v2437_v28 = vpop.f32.mrf.mxu0 }
 0x489   : > { %v2494_v51 = vmul.f32 %v8605_v24, %v2437_v28  ;;  %v2670_v28 = vld [vmem:[#allocation3 + $0xa] sm:$0xff] }
 0x48b   : > { %v2529_v8 = vadd.f32 %v8614_v58, %v2494_v51 }
 0x48d   : > { %v2561_v39 = vmax.f32 %v2529_v8, 0.0  ;;  %v2672_v8 = vld [vmem:[#allocation3 + $0x22] sm:$0xff] }
 0x48e   : > { %v2659_v17 = vld [vmem:[#allocation3 + $0x109] sm:$0xff] }
 0x48f   : > { %2594 = vst.msk [vmem:[#allocation3 + $0x111] sm:$0xff] %vm2020_vm6, %v2561_v39  ;;  %2970 = vrot.lane.b32.xlu2 %v2659_v17, %s11634_s14 }
 0x490   : > { %v2440_v57 = vpop.f32.mrf.mxu0 }
 0x491   : > { %v2495_v12 = vmul.f32 %v8605_v24, %v2440_v57 }
 0x493   : > { %v2530_v34 = vadd.f32 %v8614_v58, %v2495_v12 }
 0x495   : > { %v2562_v63 = vmax.f32 %v2530_v34, 0.0 }
 0x496   : > { %v2660_v55 = vld [vmem:[#allocation3 + $0x111] sm:$0xff] }
 0x497   : > { %2595 = vst.msk [vmem:[#allocation3 + $0x121] sm:$0xff] %vm2020_vm6, %v2562_v63  ;;  %2972 = vrot.lane.b32.xlu0 %v2660_v55, %s11634_s14  ;;  %v9064_v63 = vld [vmem:[#allocation3 + $0x4a] sm:$0xff]  ;;  %v9066_v55 = vld [vmem:[#allocation3 + $0x32] sm:$0xff] }
 0x498   : > { %v2443_v42 = vpop.f32.mrf.mxu0 }
 0x499   : > { %v2496_v31 = vmul.f32 %v8605_v24, %v2443_v42  ;;  %v2671_v42 = vld [vmem:[#allocation3 + $0x1a] sm:$0xff] }
 0x49b   : > { %v2531_v62 = vadd.f32 %v8614_v58, %v2496_v31  ;;  %v9073_v31 = vpop.permute.xlu2 %2928 }
 0x49d   : > { %v2563_v46 = vmax.f32 %v2531_v62, 0.0  ;;  %v9084_v62 = vld [vmem:[#allocation3 + $0x3a] sm:$0xff] }
 0x49e   : > { %v2661_v5 = vld [vmem:[#allocation3 + $0x121] sm:$0xff] }
 0x49f   : > { %2596 = vst.msk [vmem:[#allocation3 + $0x129] sm:$0xff] %vm2020_vm6, %v2563_v46  ;;  %2974 = vrot.lane.b32.xlu1 %v2661_v5, %s11634_s14  ;;  %v9090_v5 = vld [vmem:[#allocation3 + $0x92] sm:$0xff] }
 0x4a0   : > { %v2446_v33 = vpop.f32.mrf.mxu0 }
 0x4a1   : > { %v2497_v3 = vmul.f32 %v8605_v24, %v2446_v33  ;;  %v9092_v33 = vld [vmem:[#allocation3 + $0x7a] sm:$0xff] }
 0x4a3   : > { %v2532_v45 = vadd.f32 %v8614_v58, %v2497_v3  ;;  %v9088_v46 = vpop.permute.xlu2 %2934  ;;  %v9094_v3 = vpop.permute.xlu1 %2926 }
 0x4a5   : > { %v2564_v49 = vmax.f32 %v2532_v45, 0.0  ;;  %v9100_v45 = vld [vmem:[#allocation3 + $0x62] sm:$0xff] }
 0x4a6   : > { %v2662_v6 = vld [vmem:[#allocation3 + $0x129] sm:$0xff] }
 0x4a7   : > { %2597 = vst.msk [vmem:[#allocation3 + $0x139] sm:$0xff] %vm2020_vm6, %v2564_v49  ;;  %2976 = vrot.lane.b32.xlu2 %v2662_v6, %s11634_s14  ;;  %v9104_v49 = vpop.permute.xlu0 %2930 }
 0x4a8   : > { %v2449_v48 = vpop.f32.mrf.mxu0 }
 0x4a9   : > { %v2498_v4 = vmul.f32 %v8605_v24, %v2449_v48  ;;  %v9108_v48 = vld [vmem:[#allocation3 + $0xb2] sm:$0xff] }
 0x4ab   : > { %v2533_v56 = vadd.f32 %v8614_v58, %v2498_v4  ;;  %v9106_v6 = vpop.permute.xlu2 %2940  ;;  %v9110_v4 = vld [vmem:[#allocation3 + $0x9a] sm:$0xff] }
 0x4ad   : > { %v2565_v36 = vmax.f32 %v2533_v56, 0.0  ;;  %v9116_v56 = vld [vmem:[#allocation3 + $0x82] sm:$0xff] }
 0x4ae   : > { %v2663_v21 = vld [vmem:[#allocation3 + $0x139] sm:$0xff] }
 0x4af   : > { %2598 = vst.msk [vmem:[#allocation3 + $0x141] sm:$0xff] %vm2020_vm6, %v2565_v36  ;;  %2978 = vrot.lane.b32.xlu0 %v2663_v21, %s11634_s14  ;;  %v9120_v36 = vpop.permute.xlu1 %2932  ;;  %v9122_v21 = vpop.permute.xlu0 %2936 }
 0x4b0   : > { %v2452_v1 = vpop.f32.mrf.mxu0 }
 0x4b1   : > { %v2499_v20 = vmul.f32 %v8605_v24, %v2452_v1 }
 0x4b3   : > { %v2534_v50 = vadd.f32 %v8614_v58, %v2499_v20  ;;  %v9124_v1 = vpop.permute.xlu2 %2946  ;;  %v9126_v20 = vld [vmem:[#allocation3 + $0x18] sm:$0xff] }
 0x4b5   : > { %v2566_v26 = vmax.f32 %v2534_v50, 0.0  ;;  %v9131_v50 = vld [vmem:[#allocation3 + $0xaa] sm:$0xff] }
 0x4b6   : > { %v2664_v38 = vld [vmem:[#allocation3 + $0x141] sm:$0xff] }
 0x4b7   : > { %2599 = vst.msk [vmem:[#allocation3 + $0x151] sm:$0xff] %vm2020_vm6, %v2566_v26  ;;  %2980 = vrot.lane.b32.xlu1 %v2664_v38, %s11634_s14  ;;  %v9135_v26 = vpop.permute.xlu1 %2938  ;;  %v9137_v38 = vpop.permute.xlu0 %2942 }
 0x4b8   : > { %v2455_v60 = vpop.f32.mrf.mxu0 }
 0x4b9   : > { %v2500_v53 = vmul.f32 %v8605_v24, %v2455_v60 }
 0x4bb   : > { %v2535_v0 = vadd.f32 %v8614_v58, %v2500_v53  ;;  %v9139_v60 = vpop.permute.xlu2 %2952  ;;  %v9141_v53 = vld [vmem:[#allocation3 + $0x30] sm:$0xff] }
 0x4bd   : > { %v2567_v10 = vmax.f32 %v2535_v0, 0.0 }
 0x4be   : > { %v2665_v23 = vld [vmem:[#allocation3 + $0x151] sm:$0xff] }
 0x4bf   : > { %2600 = vst.msk [vmem:[#allocation3 + $0x159] sm:$0xff] %vm2020_vm6, %v2567_v10  ;;  %2982 = vrot.lane.b32.xlu2 %v2665_v23, %s11634_s14  ;;  %v9149_v0 = vpop.permute.xlu1 %2944  ;;  %v9151_v10 = vpop.permute.xlu0 %2948 }
 0x4c0   : > { %v2458_v47 = vpop.f32.mrf.mxu0 }
 0x4c1   : > { %v2501_v27 = vmul.f32 %v8605_v24, %v2458_v47  ;;  %v9155_v47 = vld [vmem:[#allocation3 + $0x20] sm:$0xff] }
 0x4c3   : > { %v2536_v30 = vadd.f32 %v8614_v58, %v2501_v27  ;;  %v9153_v23 = vpop.permute.xlu2 %2958 }
 0x4c4   : > { %11760 = vst [vmem:[#allocation10_spill] sm:$0xff] %v9153_v23  ;;  %v9343_v23 = vld [vmem:[#allocation3 + $0x80] sm:$0xff] }
 0x4c5   : > { %v2568_v19 = vmax.f32 %v2536_v30, 0.0 }
 0x4c6   : > { %v2666_v13 = vld [vmem:[#allocation3 + $0x159] sm:$0xff] }
 0x4c7   : > { %2601 = vst.msk [vmem:[#allocation3 + $0x169] sm:$0xff] %vm2020_vm6, %v2568_v19  ;;  %2984 = vrot.lane.b32.xlu0 %v2666_v13, %s11634_s14  ;;  %v9162_v27 = vpop.permute.xlu1 %2950  ;;  %v9168_v19 = vld [vmem:[#allocation3 + $0x38] sm:$0xff] }
 0x4c8   : > { %v2461_v41 = vpop.f32.mrf.mxu0 }
 0x4c9   : > { %v2502_v22 = vmul.f32 %v8605_v24, %v2461_v41 }
 0x4cb   : > { %v2537_v61 = vadd.f32 %v8614_v58, %v2502_v22 }
 0x4cd   : > { %v2569_v37 = vmax.f32 %v2537_v61, 0.0 }
 0x4ce   : > { %v2667_v40 = vld [vmem:[#allocation3 + $0x169] sm:$0xff] }
 0x4cf   : > { %2602 = vst.msk [vmem:[#allocation3 + $0x171] sm:$0xff] %vm2020_vm6, %v2569_v37  ;;  %3054 = vrot.lane.b32.xlu0 %v2669_v52, %s11758_s30  ;;  %2986 = vrot.lane.b32.xlu1 %v2667_v40, %s11634_s14  ;;  %v9176_v13 = vpop.permute.xlu1 %2956  ;;  %v9194_v37 = vld [vmem:[#allocation3 + $0x48] sm:$0xff] }
 0x4d0   : > { %v2464_v32 = vpop.f32.mrf.mxu0 }
 0x4d1   : > { %v2503_v25 = vmul.f32 %v8605_v24, %v2464_v32  ;;  %v9166_v30 = vpop.permute.xlu2 %2964 }
 0x4d2   : > { %11761 = vst [vmem:[#allocation53_spill] sm:$0xff] %v9166_v30 }
 0x4d3   : > { %v2538_v9 = vadd.f32 %v8614_v58, %v2503_v25 }
 0x4d5   : > { %v2570_v51 = vmax.f32 %v2538_v9, 0.0 }
 0x4d6   : > { %v2668_v39 = vld [vmem:[#allocation3 + $0x171] sm:$0xff] }
 0x4d7   : > { %2603 = vst.msk [vmem:[#allocation3 + $0x181] sm:$0xff] %vm2020_vm6, %v2570_v51  ;;  %3060 = vrot.lane.b32.xlu0 %v2672_v8, %s11758_s30  ;;  %3056 = vrot.lane.b32.xlu1 %v2670_v28, %s11758_s30  ;;  %v9220_v51 = vld [vmem:[#allocation3 + $0x50] sm:$0xff] }
 0x4d8   : > { %2988 = vrot.lane.b32.xlu2 %v2668_v39, %s11634_s14  ;;  %v2467_v17 = vpop.f32.mrf.mxu0 }
 0x4d9   : > { %v2504_v57 = vmul.f32 %v8605_v24, %v2467_v17  ;;  %v9076_v24 = vld [vmem:[#allocation3 + $0x6a] sm:$0xff] }
 0x4db   : > { %v2539_v12 = vadd.f32 %v8614_v58, %v2504_v57  ;;  %v9078_v58 = vld [vmem:[#allocation3 + $0x52] sm:$0xff] }
 0x4dd   : > { %v2571_v34 = vmax.f32 %v2539_v12, 0.0 }
 0x4df   : > { %2604 = vst.msk [vmem:[#allocation3 + $0x189] sm:$0xff] %vm2020_vm6, %v2571_v34  ;;  %3066 = vrot.lane.b32.xlu0 %v9064_v63, %s11758_s30  ;;  %3062 = vrot.lane.b32.xlu1 %v9066_v55, %s11758_s30 }
 0x4e0   : > { %3058 = vrot.lane.b32.xlu2 %v2671_v42, %s11758_s30 }
 0x4e1   : > { %v9188_v61 = vpop.permute.xlu1 %2962 }
 0x4e2   : > { %11764 = vst [vmem:[#allocation17_spill] sm:$0xff] %v9188_v61 }
 0x4e7   : > { %3072 = vrot.lane.b32.xlu0 %v9076_v24, %s11758_s30  ;;  %3068 = vrot.lane.b32.xlu1 %v9078_v58, %s11758_s30 }
 0x4e8   : > { %3064 = vrot.lane.b32.xlu2 %v9084_v62, %s11758_s30 }
 0x4e9   : > { %v9180_v22 = vpop.permute.xlu2 %2970 }
 0x4ea   : > { %11763 = vst [vmem:[#allocation65_spill] sm:$0xff] %v9180_v22  ;;  %v2605_v22 = vld [vmem:[#allocation3] sm:$0xff] }
 0x4ef   : > { %3078 = vrot.lane.b32.xlu0 %v9090_v5, %s11758_s30  ;;  %3074 = vrot.lane.b32.xlu1 %v9092_v33, %s11758_s30 }
 0x4f0   : > { %3070 = vrot.lane.b32.xlu2 %v9100_v45, %s11758_s30 }
 0x4f7   : > { %3084 = vrot.lane.b32.xlu0 %v9108_v48, %s11758_s30  ;;  %3080 = vrot.lane.b32.xlu1 %v9110_v4, %s11758_s30 }
 0x4f8   : > { %3076 = vrot.lane.b32.xlu2 %v9116_v56, %s11758_s30 }
 0x4f9   : > { %v9202_v40 = vpop.permute.xlu1 %2968 }
 0x4fa   : > { %11767 = vst [vmem:[#allocation58_spill] sm:$0xff] %v9202_v40  ;;  %v3918_v40 = vsel %vm2020_vm6, %v2605_v22, %v9094_v3 }
 0x4ff   : > { %3438 = vrot.lane.b32.xlu0 %v2671_v42, %s11353_s29  ;;  %3182 = vrot.lane.b32.xlu1 %v9126_v20, %s11759_s25 }
 0x500   : > { %3082 = vrot.lane.b32.xlu2 %v9131_v50, %s11758_s30 }
 0x507   : > { %3822 = vrot.lane.b32.xlu0 %v9066_v55, %s11359_s16  ;;  %3566 = vrot.lane.b32.xlu1 %v9141_v53, %s11355_s13 }
 0x508   : > { %3310 = vrot.lane.b32.xlu2 %v8650_v44, %s11357_s12  ;;  %v9164_v44 = vpop.permute.xlu0 %2954 }
 0x50f   : > { %3440 = vrot.lane.b32.xlu0 %v2672_v8, %s11353_s29  ;;  %3184 = vrot.lane.b32.xlu1 %v9155_v47, %s11759_s25 }
 0x510   : > { %3694 = vrot.lane.b32.xlu2 %v8732_v29, %s11351_s15  ;;  %v9178_v41 = vpop.permute.xlu0 %2960 }
 0x511   : > { %11762 = vst [vmem:[#allocation14_spill] sm:$0xff] %v9178_v41  ;;  %v9214_v9 = vpop.permute.xlu1 %2974 }
 0x512   : > { %11770 = vst [vmem:[#allocation12_spill] sm:$0xff] %v9214_v9 }
 0x517   : > { %3824 = vrot.lane.b32.xlu0 %v9084_v62, %s11359_s16  ;;  %3568 = vrot.lane.b32.xlu1 %v9168_v19, %s11355_s13 }
 0x518   : > { %3312 = vrot.lane.b32.xlu2 %v8687_v43, %s11357_s12  ;;  %v9190_v52 = vpop.permute.xlu0 %2966  ;;  %v9192_v43 = vpop.permute.xlu2 %2976 }
 0x519   : > { %11765 = vst [vmem:[#allocation49_spill] sm:$0xff] %v9190_v52 }
 0x51a   : > { %11766 = vst [vmem:[#allocation7_spill] sm:$0xff] %v9192_v43  ;;  %v4179_v43 = vld [vmem:[%s11318_s6 + $0x8] sm:$0xff] }
 0x51f   : > { %3442 = vrot.lane.b32.xlu0 %v9066_v55, %s11353_s29  ;;  %3186 = vrot.lane.b32.xlu1 %v9141_v53, %s11759_s25 }
 0x520   : > { %3696 = vrot.lane.b32.xlu2 %v8755_v54, %s11351_s15  ;;  %v9204_v32 = vpop.permute.xlu0 %2972  ;;  %v9206_v25 = vpop.permute.xlu2 %2982 }
 0x521   : > { %11768 = vst [vmem:[#allocation9_spill] sm:$0xff] %v9204_v32  ;;  %v9321_v32 = vld [vmem:[#allocation3 + $0x78] sm:$0xff] }
 0x522   : > { %11769 = vst [vmem:[#allocation68_spill] sm:$0xff] %v9206_v25  ;;  %v4181_v25 = vld [vmem:[%s11318_s6 + $0x18] sm:$0xff] }
 0x527   : > { %3826 = vrot.lane.b32.xlu0 %v9064_v63, %s11359_s16  ;;  %3570 = vrot.lane.b32.xlu1 %v9194_v37, %s11355_s13 }
 0x528   : > { %3314 = vrot.lane.b32.xlu2 %v8732_v29, %s11357_s12  ;;  %v9216_v28 = vpop.permute.xlu0 %2978 }
 0x529   : > { %11771 = vst [vmem:[#allocation54_spill] sm:$0xff] %v9216_v28  ;;  %v9228_v8 = vpop.permute.xlu1 %2980 }
 0x52a   : > { %11773 = vst [vmem:[#allocation63_spill] sm:$0xff] %v9228_v8  ;;  %v9288_v8 = vld [vmem:[#allocation3 + $0x68] sm:$0xff] }
 0x52f   : > { %3444 = vrot.lane.b32.xlu0 %v9084_v62, %s11353_s29  ;;  %3188 = vrot.lane.b32.xlu1 %v9168_v19, %s11759_s25  ;;  %v4186_v62 = vld [vmem:[%s11318_s6 + $0x40] sm:$0xff] }
 0x530   : > { %3698 = vrot.lane.b32.xlu2 %v8778_v16, %s11351_s15  ;;  %4291 = vmatpush.msra.mxu1 %v4186_v62 }
 0x532   : > { %v9218_v29 = vpop.permute.xlu2 %2988 }
 0x533   : > { %11772 = vst [vmem:[#allocation21_spill] sm:$0xff] %v9218_v29  ;;  %v4185_v29 = vld [vmem:[%s11318_s6 + $0x38] sm:$0xff] }
 0x534   : > { %4292 = vmatpush.msra.mxu1 %v4185_v29  ;;  %v4182_v29 = vld [vmem:[%s11318_s6 + $0x20] sm:$0xff] }
 0x537   : > { %3828 = vrot.lane.b32.xlu0 %v9078_v58, %s11359_s16  ;;  %3572 = vrot.lane.b32.xlu1 %v9220_v51, %s11355_s13 }
 0x538   : > { %3316 = vrot.lane.b32.xlu2 %v8755_v54, %s11357_s12  ;;  %v9244_v54 = vld [vmem:[#allocation3 + $0x60] sm:$0xff] }
 0x539   : > { %v9230_v39 = vpop.permute.xlu0 %2984 }
 0x53a   : > { %11774 = vst [vmem:[#allocation11_spill] sm:$0xff] %v9230_v39  ;;  %v9232_v17 = vpop.permute.xlu2 %3058 }
 0x53f   : > { %3446 = vrot.lane.b32.xlu0 %v9064_v63, %s11353_s29  ;;  %3190 = vrot.lane.b32.xlu1 %v9194_v37, %s11759_s25  ;;  %s11862_s29 = sand.u32 1, %s6806_s18  }
 0x540   : > { %3700 = vrot.lane.b32.xlu2 %v8801_v59, %s11351_s15  ;;  %s6265_s15 = scalar_lea.sflag [#allocation5], %s11862_s29 }
 0x541   : > { %v3055_v57 = vpop.permute.xlu0 %3054  ;;  %v9240_v12 = vpop.permute.xlu1 %2986 }
 0x542   : > { %11775 = vst [vmem:[#allocation71_spill] sm:$0xff] %v9240_v12  ;;  %v9242_v34 = vpop.permute.xlu2 %3064  ;;  %v3950_v30 = vsel %vm2086_vm9, %v3918_v40, %v3055_v57 }
 0x547   : > { %3830 = vrot.lane.b32.xlu0 %v9100_v45, %s11359_s16  ;;  %3574 = vrot.lane.b32.xlu1 %v9244_v54, %s11355_s13  ;;  %s11776_s13 = smov 40   ;;  %s11778_s16 = smov 64  }
 0x548   : > { %3318 = vrot.lane.b32.xlu2 %v8778_v16, %s11357_s12  ;;  %s11777_s12 = smov 56   ;;  %v4184_v16 = vld [vmem:[%s11318_s6 + $0x30] sm:$0xff] }
 0x549   : > { %v9252_v63 = vpop.permute.xlu0 %3060  ;;  %v9254_v55 = vpop.permute.xlu1 %3056  ;;  %4293 = vmatpush.msra.mxu1 %v4184_v16  ;;  %v4180_v16 = vld [vmem:[%s11318_s6 + $0x10] sm:$0xff] }
 0x54a   : > { %v9256_v42 = vpop.permute.xlu2 %3070 }
 0x54f   : > { %3448 = vrot.lane.b32.xlu0 %v9078_v58, %s11776_s13  ;;  %3192 = vrot.lane.b32.xlu1 %v9220_v51, %s11759_s25  ;;  %v4183_v58 = vld [vmem:[%s11318_s6 + $0x28] sm:$0xff] }
 0x550   : > { %3702 = vrot.lane.b32.xlu2 %v8824_v15, %s11777_s12  ;;  %4294 = vmatpush.msra.mxu1 %v4183_v58 }
 0x551   : > { %v9273_v12 = vpop.permute.xlu0 %3066  ;;  %v9275_v39 = vpop.permute.xlu1 %3062 }
 0x552   : > { %v9277_v62 = vpop.permute.xlu2 %3076  ;;  %4295 = vmatpush.msra.mxu1 %v4182_v29 }
 0x554   : > { %4296 = vmatpush.msra.mxu1 %v4181_v25 }
 0x556   : > { %4297 = vmatpush.msra.mxu1 %v4180_v16 }
 0x557   : > { %3832 = vrot.lane.b32.xlu0 %v9076_v24, %s11778_s16  ;;  %3576 = vrot.lane.b32.xlu1 %v9288_v8, %s11779_s3 }
 0x558   : > { %3320 = vrot.lane.b32.xlu2 %v8801_v59, %s11780_s0  ;;  %v4178_v59 = vld [vmem:[%s11318_s6] sm:$0xff]  ;;  %4298 = vmatpush.msra.mxu1 %v4179_v43 }
 0x559   : > { %v9299_v58 = vpop.permute.xlu0 %3072  ;;  %v9301_v29 = vpop.permute.xlu1 %3068 }
 0x55a   : > { %v9303_v28 = vpop.permute.xlu2 %3082  ;;  %4299 = vmatpush.msra.mxu1 %v4178_v59 }
 0x55f   : > { %3450 = vrot.lane.b32.xlu0 %v9100_v45, %s11776_s13  ;;  %3194 = vrot.lane.b32.xlu1 %v9244_v54, %s11759_s25 }
 0x560   : > { %3704 = vrot.lane.b32.xlu2 %v8847_v2, %s11777_s12 }
 0x561   : > { %v9317_v25 = vpop.permute.xlu0 %3078  ;;  %v9319_v16 = vpop.permute.xlu1 %3074 }
 0x562   : > { %v3311_v9 = vpop.permute.xlu2 %3310 }
 0x567   : > { %3834 = vrot.lane.b32.xlu0 %v9092_v33, %s11778_s16  ;;  %3578 = vrot.lane.b32.xlu1 %v9321_v32, %s11779_s3 }
 0x568   : > { %3322 = vrot.lane.b32.xlu2 %v8824_v15, %s11780_s0 }
 0x569   : > { %v9329_v45 = vpop.permute.xlu0 %3084  ;;  %v9331_v43 = vpop.permute.xlu1 %3080 }
 0x56a   : > { %v3695_v59 = vpop.permute.xlu2 %3694 }
 0x56f   : > { %3452 = vrot.lane.b32.xlu0 %v9076_v24, %s11776_s13  ;;  %3196 = vrot.lane.b32.xlu1 %v9288_v8, %s11759_s25 }
 0x570   : > { %3706 = vrot.lane.b32.xlu2 %v8870_v11, %s11777_s12 }
 0x571   : > { %v3439_v52 = vpop.permute.xlu0 %3438  ;;  %v3183_v15 = vpop.permute.xlu1 %3182 }
 0x572   : > { %v3313_v61 = vpop.permute.xlu2 %3312  ;;  %v3982_v41 = vsel %vm2152_vm10, %v3950_v30, %v3183_v15  ;;  %v2606_v15 = vld [vmem:[#allocation3 + $0x8] sm:$0xff] }
 0x573   : > { %v4014_v24 = vsel %vm2218_vm11, %v3982_v41, %v3311_v9 }
 0x574   : > { %v4047_v30 = vsel %vm4046_vm14, %v4014_v24, %v3439_v52 }
 0x577   : > { %3836 = vrot.lane.b32.xlu0 %v9116_v56, %s11778_s16  ;;  %3580 = vrot.lane.b32.xlu1 %v9343_v23, %s11779_s3 }
 0x578   : > { %3324 = vrot.lane.b32.xlu2 %v8847_v2, %s11780_s0  ;;  %v3919_v2 = vsel %vm2020_vm6, %v2606_v15, %v9073_v31 }
 0x579   : > { %v3823_v3 = vpop.permute.xlu0 %3822  ;;  %v3567_v22 = vpop.permute.xlu1 %3566 }
 0x57a   : > { %v4080_v40 = vsel %vm4079_vm15, %v4047_v30, %v3567_v22  ;;  %v3697_v41 = vpop.permute.xlu2 %3696  ;;  %v9368_v30 = vld [vmem:[#allocation3 + $0x90] sm:$0xff] }
 0x57b   : > { %v4113_v9 = vsel %vm4112_vm0, %v4080_v40, %v3695_v59  ;;  %v3951_v59 = vsel %vm2086_vm9, %v3919_v2, %v9254_v55 }
 0x57c   : > { %v4146_v57 = vsel %vm4145_vm1, %v4113_v9, %v3823_v3 }
 0x57d   : > { %6383 = vmatmul.msk.f32.vlgmr.msra.gmra.mxu1 %vm4187_vm2, %v4146_v57 }
 0x57f   : > { %3454 = vrot.lane.b32.xlu0 %v9092_v33, %s11776_s13  ;;  %3198 = vrot.lane.b32.xlu1 %v9321_v32, %s11759_s25 }
 0x580   : > { %3708 = vrot.lane.b32.xlu2 %v8893_v18, %s11777_s12 }
 0x581   : > { %v3441_v52 = vpop.permute.xlu0 %3440  ;;  %v3185_v24 = vpop.permute.xlu1 %3184 }
 0x582   : > { %v3315_v3 = vpop.permute.xlu2 %3314  ;;  %v3983_v22 = vsel %vm2152_vm10, %v3951_v59, %v3185_v24 }
 0x583   : > { %v4015_v33 = vsel %vm2218_vm11, %v3983_v22, %v3313_v61  ;;  %v9394_v22 = vld [vmem:[#allocation3 + $0x98] sm:$0xff] }
 0x584   : > { %v4048_v55 = vsel %vm4046_vm14, %v4015_v33, %v3441_v52 }
 0x587   : > { %3838 = vrot.lane.b32.xlu0 %v9090_v5, %s11778_s16  ;;  %3582 = vrot.lane.b32.xlu1 %v9368_v30, %s11779_s3 }
 0x588   : > { %3326 = vrot.lane.b32.xlu2 %v8870_v11, %s11780_s0  ;;  %v3920_v11 = vsel %vm2020_vm6, %v9126_v20, %v9104_v49 }
 0x589   : > { %v3825_v31 = vpop.permute.xlu0 %3824  ;;  %v3569_v40 = vpop.permute.xlu1 %3568 }
 0x58a   : > { %v4081_v9 = vsel %vm4079_vm15, %v4048_v55, %v3569_v40  ;;  %v3699_v57 = vpop.permute.xlu2 %3698 }
 0x58b   : > { %v4114_v15 = vsel %vm4112_vm0, %v4081_v9, %v3697_v41  ;;  %v3952_v41 = vsel %vm2086_vm9, %v3920_v11, %v9232_v17  ;;  %v9420_v11 = vld [vmem:[#allocation3 + $0xa8] sm:$0xff] }
 0x58c   : > { %v4147_v61 = vsel %vm4145_vm1, %v4114_v15, %v3825_v31 }
 0x58d   : > { %6384 = vmatmul.msk.f32.gmra.mxu1 %vm4187_vm2, %v4147_v61 }
 0x58f   : > { %3456 = vrot.lane.b32.xlu0 %v9116_v56, %s11776_s13  ;;  %3200 = vrot.lane.b32.xlu1 %v9343_v23, %s11759_s25 }
 0x590   : > { %3710 = vrot.lane.b32.xlu2 %v8916_v35, %s11777_s12 }
 0x591   : > { %v3443_v2 = vpop.permute.xlu0 %3442  ;;  %v3187_v52 = vpop.permute.xlu1 %3186 }
 0x592   : > { %v3317_v24 = vpop.permute.xlu2 %3316  ;;  %v3984_v59 = vsel %vm2152_vm10, %v3952_v41, %v3187_v52 }
 0x593   : > { %v4016_v56 = vsel %vm2218_vm11, %v3984_v59, %v3315_v3 }
 0x594   : > { %v4049_v17 = vsel %vm4046_vm14, %v4016_v56, %v3443_v2 }
 0x597   : > { %3840 = vrot.lane.b32.xlu0 %v9110_v4, %s11778_s16  ;;  %3584 = vrot.lane.b32.xlu1 %v9394_v22, %s11779_s3 }
 0x598   : > { %3328 = vrot.lane.b32.xlu2 %v8893_v18, %s11780_s0  ;;  %v3921_v18 = vsel %vm2020_vm6, %v9155_v47, %v9120_v36 }
 0x599   : > { %v3827_v49 = vpop.permute.xlu0 %3826  ;;  %v3571_v20 = vpop.permute.xlu1 %3570 }
 0x59a   : > { %v4082_v33 = vsel %vm4079_vm15, %v4049_v17, %v3571_v20  ;;  %v3701_v31 = vpop.permute.xlu2 %3700  ;;  %v9446_v17 = vld [vmem:[#allocation3 + $0xb0] sm:$0xff] }
 0x59b   : > { %v4115_v40 = vsel %vm4112_vm0, %v4082_v33, %v3699_v57  ;;  %v3953_v57 = vsel %vm2086_vm9, %v3921_v18, %v9252_v63  ;;  %v2841_v18 = vld [vmem:[#allocation3 + $0xb1] sm:$0xff] }
 0x59c   : > { %v4148_v3 = vsel %vm4145_vm1, %v4115_v40, %v3827_v49 }
 0x59d   : > { %6385 = vmatmul.msk.f32.gmra.mxu1 %vm4187_vm2, %v4148_v3 }
 0x59f   : > { %3458 = vrot.lane.b32.xlu0 %v9090_v5, %s11776_s13  ;;  %3202 = vrot.lane.b32.xlu1 %v9368_v30, %s11759_s25 }
 0x5a0   : > { %3712 = vrot.lane.b32.xlu2 %v8939_v14, %s11777_s12 }
 0x5a1   : > { %v3445_v55 = vpop.permute.xlu0 %3444  ;;  %v3189_v9 = vpop.permute.xlu1 %3188 }
 0x5a2   : > { %v3319_v15 = vpop.permute.xlu2 %3318  ;;  %v3985_v61 = vsel %vm2152_vm10, %v3953_v57, %v3189_v9 }
 0x5a3   : > { %v4017_v5 = vsel %vm2218_vm11, %v3985_v61, %v3317_v24 }
 0x5a4   : > { %v4050_v47 = vsel %vm4046_vm14, %v4017_v5, %v3445_v55  ;;  %v3923_v55 = vsel %vm2020_vm6, %v9168_v19, %v9122_v21  ;;  %v2745_v21 = vld [vmem:[#allocation3 + $0xa9] sm:$0xff] }
 0x5a7   : > { %3842 = vrot.lane.b32.xlu0 %v9131_v50, %s11778_s16  ;;  %3586 = vrot.lane.b32.xlu1 %v9420_v11, %s11779_s3 }
 0x5a8   : > { %3330 = vrot.lane.b32.xlu2 %v8916_v35, %s11780_s0  ;;  %v3922_v35 = vsel %vm2020_vm6, %v9141_v53, %v9088_v46 }
 0x5a9   : > { %v3829_v14 = vpop.permute.xlu0 %3828  ;;  %v3573_v36 = vpop.permute.xlu1 %3572  ;;  %v3954_v56 = vsel %vm2086_vm9, %v3922_v35, %v9275_v39  ;;  %v2842_v35 = vld [vmem:[#allocation3 + $0xc1] sm:$0xff] }
 0x5aa   : > { %v4083_v63 = vsel %vm4079_vm15, %v4050_v47, %v3573_v36  ;;  %v3703_v2 = vpop.permute.xlu2 %3702  ;;  %v9473_v36 = vld [vmem:[#allocation3 + $0xc2] sm:$0xff] }
 0x5ab   : > { %v4116_v52 = vsel %vm4112_vm0, %v4083_v63, %v3701_v31 }
 0x5ac   : > { %v4149_v41 = vsel %vm4145_vm1, %v4116_v52, %v3829_v14  ;;  %v9470_v14 = vld [vmem:[#allocation3 + $0xc0] sm:$0xff] }
 0x5ad   : > { %6386 = vmatmul.msk.f32.gmra.mxu1 %vm4187_vm2, %v4149_v41 }
 0x5af   : > { %3460 = vrot.lane.b32.xlu0 %v9110_v4, %s11776_s13  ;;  %3204 = vrot.lane.b32.xlu1 %v9394_v22, %s11759_s25 }
 0x5b0   : > { %3714 = vrot.lane.b32.xlu2 %v8962_v7, %s11777_s12  ;;  %v2744_v7 = vld [vmem:[#allocation3 + $0x99] sm:$0xff] }
 0x5b1   : > { %v3447_v24 = vpop.permute.xlu0 %3446  ;;  %v3191_v59 = vpop.permute.xlu1 %3190 }
 0x5b2   : > { %v3321_v49 = vpop.permute.xlu2 %3320  ;;  %v3986_v20 = vsel %vm2152_vm10, %v3954_v56, %v3191_v59 }
 0x5b3   : > { %v4018_v4 = vsel %vm2218_vm11, %v3986_v20, %v3319_v15  ;;  %v3955_v15 = vsel %vm2086_vm9, %v3923_v55, %v9242_v34 }
 0x5b4   : > { %v4051_v39 = vsel %vm4046_vm14, %v4018_v4, %v3447_v24  ;;  %v3924_v24 = vsel %vm2020_vm6, %v9194_v37, %v9135_v26 }
 0x5b7   : > { %3844 = vrot.lane.b32.xlu0 %v9108_v48, %s11778_s16  ;;  %3588 = vrot.lane.b32.xlu1 %v9446_v17, %s11779_s3 }
 0x5b8   : > { %3332 = vrot.lane.b32.xlu2 %v2744_v7, %s11780_s0  ;;  %v9496_v7 = vld [vmem:[#allocation3 + $0xc8] sm:$0xff] }
 0x5b9   : > { %v3831_v46 = vpop.permute.xlu0 %3830  ;;  %v3575_v53 = vpop.permute.xlu1 %3574 }
 0x5ba   : > { %v4084_v33 = vsel %vm4079_vm15, %v4051_v39, %v3575_v53  ;;  %v3705_v31 = vpop.permute.xlu2 %3704 }
 0x5bb   : > { %v4117_v40 = vsel %vm4112_vm0, %v4084_v33, %v3703_v2 }
 0x5bc   : > { %v4150_v3 = vsel %vm4145_vm1, %v4117_v40, %v3831_v46  ;;  %v9499_v46 = vld [vmem:[#allocation3 + $0xca] sm:$0xff] }
 0x5bd   : > { %6387 = vmatmul.msk.f32.gmra.mxu1 %vm4187_vm2, %v4150_v3  ;;  %v2843_v40 = vld [vmem:[#allocation3 + $0xc9] sm:$0xff]  ;;  %v3925_v3 = vsel %vm2020_vm6, %v9220_v51, %v9106_v6 }
 0x5bf   : > { %3462 = vrot.lane.b32.xlu0 %v9131_v50, %s11776_s13  ;;  %3206 = vrot.lane.b32.xlu1 %v9420_v11, %s11759_s25 }
 0x5c0   : > { %3716 = vrot.lane.b32.xlu2 %v2841_v18, %s11777_s12 }
 0x5c1   : > { %v3449_v9 = vpop.permute.xlu0 %3448  ;;  %v3193_v57 = vpop.permute.xlu1 %3192 }
 0x5c2   : > { %v3323_v61 = vpop.permute.xlu2 %3322  ;;  %v3987_v5 = vsel %vm2152_vm10, %v3955_v15, %v3193_v57 }
 0x5c3   : > { %v4019_v50 = vsel %vm2218_vm11, %v3987_v5, %v3321_v49  ;;  %v3956_v49 = vsel %vm2086_vm9, %v3924_v24, %v9273_v12 }
 0x5c4   : > { %v4052_v47 = vsel %vm4046_vm14, %v4019_v50, %v3449_v9  ;;  %v3957_v9 = vsel %vm2086_vm9, %v3925_v3, %v9301_v29  ;;  %v9525_v50 = vld [vmem:[#allocation3 + $0xda] sm:$0xff] }
 0x5c7   : > { %3846 = vrot.lane.b32.xlu0 %v9473_v36, %s11778_s16  ;;  %3590 = vrot.lane.b32.xlu1 %v9470_v14, %s11779_s3 }
 0x5c8   : > { %3334 = vrot.lane.b32.xlu2 %v2745_v21, %s11780_s0 }
 0x5c9   : > { %v3833_v19 = vpop.permute.xlu0 %3832  ;;  %v3577_v34 = vpop.permute.xlu1 %3576 }
 0x5ca   : > { %v4085_v63 = vsel %vm4079_vm15, %v4052_v47, %v3577_v34  ;;  %v3707_v2 = vpop.permute.xlu2 %3706 }
 0x5cb   : > { %v4118_v52 = vsel %vm4112_vm0, %v4085_v63, %v3705_v31  ;;  %v2844_v63 = vld [vmem:[#allocation3 + $0xd9] sm:$0xff] }
 0x5cc   : > { %v4151_v41 = vsel %vm4145_vm1, %v4118_v52, %v3833_v19 }
 0x5cd   : > { %6388 = vmatmul.msk.f32.gmra.mxu1 %vm4187_vm2, %v4151_v41 }
 0x5cf   : > { %3464 = vrot.lane.b32.xlu0 %v9108_v48, %s11776_s13  ;;  %3208 = vrot.lane.b32.xlu1 %v9446_v17, %s11759_s25 }
 0x5d0   : > { %3718 = vrot.lane.b32.xlu2 %v2842_v35, %s11777_s12 }
 0x5d1   : > { %v3451_v59 = vpop.permute.xlu0 %3450  ;;  %v3195_v56 = vpop.permute.xlu1 %3194 }
 0x5d2   : > { %v3325_v20 = vpop.permute.xlu2 %3324  ;;  %v3988_v4 = vsel %vm2152_vm10, %v3956_v49, %v3195_v56  ;;  %v9548_v56 = vld [vmem:[#allocation3 + $0xe0] sm:$0xff] }
 0x5d3   : > { %v4020_v48 = vsel %vm2218_vm11, %v3988_v4, %v3323_v61  ;;  %v9522_v61 = vld [vmem:[#allocation3 + $0xd8] sm:$0xff] }
 0x5d4   : > { %v4053_v12 = vsel %vm4046_vm14, %v4020_v48, %v3451_v59 }
 0x5d7   : > { %3848 = vrot.lane.b32.xlu0 %v9499_v46, %s11778_s16  ;;  %3592 = vrot.lane.b32.xlu1 %v9496_v7, %s11779_s3 }
 0x5d8   : > { %3336 = vrot.lane.b32.xlu2 %v2841_v18, %s11780_s0 }
 0x5d9   : > { %v3835_v26 = vpop.permute.xlu0 %3834  ;;  %v3579_v37 = vpop.permute.xlu1 %3578 }
 0x5da   : > { %v4086_v53 = vsel %vm4079_vm15, %v4053_v12, %v3579_v37  ;;  %v3709_v39 = vpop.permute.xlu2 %3708  ;;  %v2845_v12 = vld [vmem:[#allocation3 + $0xe1] sm:$0xff] }
 0x5db   : > { %v4119_v33 = vsel %vm4112_vm0, %v4086_v53, %v3707_v2  ;;  %v3926_v2 = vsel %vm2020_vm6, %v9244_v54, %v9137_v38  ;;  %v3927_v53 = vsel %vm2020_vm6, %v9288_v8, %v9149_v0 }
 0x5dc   : > { %v4152_v31 = vsel %vm4145_vm1, %v4119_v33, %v3835_v26 }
 0x5dd   : > { %6389 = vmatmul.msk.f32.gmra.mxu1 %vm4187_vm2, %v4152_v31  ;;  %v3959_v31 = vsel %vm2086_vm9, %v3927_v53, %v9299_v58 }
 0x5df   : > { %3466 = vrot.lane.b32.xlu0 %v9473_v36, %s11776_s13  ;;  %3210 = vrot.lane.b32.xlu1 %v9470_v14, %s11759_s25 }
 0x5e0   : > { %3720 = vrot.lane.b32.xlu2 %v2843_v40, %s11777_s12 }
 0x5e1   : > { %v3453_v18 = vpop.permute.xlu0 %3452  ;;  %v3197_v55 = vpop.permute.xlu1 %3196 }
 0x5e2   : > { %v3327_v57 = vpop.permute.xlu2 %3326  ;;  %v3989_v15 = vsel %vm2152_vm10, %v3957_v9, %v3197_v55  ;;  %v9579_v9 = vld [vmem:[#allocation3 + $0xf1] sm:$0xff] }
 0x5e3   : > { %v4021_v5 = vsel %vm2218_vm11, %v3989_v15, %v3325_v20  ;;  %v9551_v20 = vld [vmem:[#allocation3 + $0xe2] sm:$0xff]  ;;  %v9592_v15 = vld [vmem:[%s11320_s8] ss:$0 sm:$0xff] }
 0x5e4   : > { %v4054_v29 = vsel %vm4046_vm14, %v4021_v5, %v3453_v18 }
 0x5e7   : > { %3850 = vrot.lane.b32.xlu0 %v9525_v50, %s11778_s16  ;;  %3594 = vrot.lane.b32.xlu1 %v9522_v61, %s11779_s3 }
 0x5e8   : > { %3338 = vrot.lane.b32.xlu2 %v2842_v35, %s11780_s0  ;;  %v3958_v35 = vsel %vm2086_vm9, %v3926_v2, %v9256_v42  ;;  %v9603_v2 = vld [vmem:[#allocation3 + $0xf0] sm:$0xff] }
 0x5e9   : > { %v3837_v6 = vpop.permute.xlu0 %3836  ;;  %v3581_v51 = vpop.permute.xlu1 %3580 }
 0x5ea   : > { %v4087_v21 = vsel %vm4079_vm15, %v4054_v29, %v3581_v51  ;;  %v3711_v19 = vpop.permute.xlu2 %3710 }
 0x5eb   : > { %v4120_v34 = vsel %vm4112_vm0, %v4087_v21, %v3709_v39 }
 0x5ec   : > { %v4153_v47 = vsel %vm4145_vm1, %v4120_v34, %v3837_v6 }
 0x5ed   : > { %6390 = vmatmul.msk.f32.gmra.mxu1 %vm4187_vm2, %v4153_v47 }
 0x5ef   : > { %3468 = vrot.lane.b32.xlu0 %v9499_v46, %s11776_s13  ;;  %3212 = vrot.lane.b32.xlu1 %v9496_v7, %s11759_s25 }
 0x5f0   : > { %3722 = vrot.lane.b32.xlu2 %v2844_v63, %s11777_s12 }
 0x5f1   : > { %v3455_v52 = vpop.permute.xlu0 %3454  ;;  %v3199_v41 = vpop.permute.xlu1 %3198 }
 0x5f2   : > { %v3329_v24 = vpop.permute.xlu2 %3328  ;;  %v3990_v59 = vsel %vm2152_vm10, %v3958_v35, %v3199_v41  ;;  %v3928_v41 = vsel %vm2020_vm6, %v9321_v32, %v9124_v1 }
 0x5f3   : > { %v4022_v49 = vsel %vm2218_vm11, %v3990_v59, %v3327_v57 }
 0x5f4   : > { %v4055_v42 = vsel %vm4046_vm14, %v4022_v49, %v3455_v52  ;;  %v3960_v49 = vsel %vm2086_vm9, %v3928_v41, %v9319_v16 }
 0x5f7   : > { %3852 = vrot.lane.b32.xlu0 %v9551_v20, %s11778_s16  ;;  %3596 = vrot.lane.b32.xlu1 %v9548_v56, %s11779_s3 }
 0x5f8   : > { %3340 = vrot.lane.b32.xlu2 %v2843_v40, %s11780_s0 }
 0x5f9   : > { %v3839_v38 = vpop.permute.xlu0 %3838  ;;  %v3583_v54 = vpop.permute.xlu1 %3582 }
 0x5fa   : > { %v4088_v4 = vsel %vm4079_vm15, %v4055_v42, %v3583_v54  ;;  %v3713_v48 = vpop.permute.xlu2 %3712  ;;  %v4301_v40 = vpop.f32.mrf.mxu1  ;;  %v9617_v42 = vld [vmem:[#allocation3 + $0xf8] sm:$0xff] }
 0x5fb   : > { %v4121_v26 = vsel %vm4112_vm0, %v4088_v4, %v3711_v19 }
 0x5fc   : > { %v4154_v37 = vsel %vm4145_vm1, %v4121_v26, %v3839_v38 }
 0x5fd   : > { %6391 = vmatmul.msk.f32.gmra.mxu1 %vm4187_vm2, %v4154_v37 }
 0x5ff   : > { %3342 = vrot.lane.b32.xlu0 %v2844_v63, %s11780_s0  ;;  %3086 = vrot.lane.b32.xlu1 %v9473_v36, %s11758_s30  ;;  %v9576_v36 = vld [vmem:[%s11319_s7] ss:$0 sm:$0xff]  ;;  %v9601_v63 = vld [vmem:[#allocation3 + $0xf2] sm:$0xff] }
 0x600   : > { %3724 = vrot.lane.b32.xlu2 %v2845_v12, %s11777_s12  ;;  %v4400_v0 = vmul.f32 %v9576_v36, %v4301_v40 }
 0x601   : > { %v3457_v39 = vpop.permute.xlu0 %3456  ;;  %v3201_v33 = vpop.permute.xlu1 %3200 }
 0x602   : > { %v3331_v3 = vpop.permute.xlu2 %3330  ;;  %v3991_v18 = vsel %vm2152_vm10, %v3959_v31, %v3201_v33  ;;  %v4435_v47 = vadd.f32 %v9592_v15, %v4400_v0 }
 0x603   : > { %v4023_v55 = vsel %vm2218_vm11, %v3991_v18, %v3329_v24 }
 0x604   : > { %v4056_v57 = vsel %vm4046_vm14, %v4023_v55, %v3457_v39  ;;  %v4467_v59 = vmax.f32 %v4435_v47, 0.0  ;;  %v2847_v39 = vld [vmem:[#allocation3 + $0xf9] sm:$0xff] }
 0x605   : > { %v9646_v55 = vld [vmem:[#allocation3 + $0xfa] sm:$0xff] }
 0x607   : > { %3726 = vrot.lane.b32.xlu0 %v9579_v9, %s11777_s12  ;;  %3470 = vrot.lane.b32.xlu1 %v9525_v50, %s11776_s13 }
 0x608   : > { %3214 = vrot.lane.b32.xlu2 %v9522_v61, %s11759_s25 }
 0x609   : > { %v3841_v8 = vpop.permute.xlu0 %3840  ;;  %v3585_v58 = vpop.permute.xlu1 %3584 }
 0x60a   : > { %v4089_v5 = vsel %vm4079_vm15, %v4056_v57, %v3585_v58  ;;  %v3715_v6 = vpop.permute.xlu2 %3714  ;;  %v4304_v51 = vpop.f32.mrf.mxu1 }
 0x60b   : > { %v4401_v29 = vmul.f32 %v9576_v36, %v4304_v51  ;;  %v4122_v21 = vsel %vm4112_vm0, %v4089_v5, %v3713_v48 }
 0x60c   : > { %v4155_v19 = vsel %vm4145_vm1, %v4122_v21, %v3841_v8 }
 0x60d   : > { %6392 = vmatmul.msk.f32.gmra.mxu1 %vm4187_vm2, %v4155_v19  ;;  %v4436_v34 = vadd.f32 %v9592_v15, %v4401_v29  ;;  %v9659_v19 = vld [vmem:[#allocation3 + $0x10a] sm:$0xff] }
 0x60f   : > { %3216 = vrot.lane.b32.xlu0 %v9548_v56, %s11759_s25  ;;  %3854 = vrot.lane.b32.xlu1 %v9601_v63, %s11778_s16  ;;  %v4468_v52 = vmax.f32 %v4436_v34, 0.0  ;;  %v2816_v34 = vld [vmem:[#allocation3 + $0x108] sm:$0xff] }
 0x610   : > { %3598 = vrot.lane.b32.xlu2 %v9603_v2, %s11779_s3 }
 0x611   : > { %v3459_v35 = vpop.permute.xlu0 %3458  ;;  %v3203_v24 = vpop.permute.xlu1 %3202  ;;  %4529 = vmatpush.msrb.mxu0 %v4468_v52  ;;  %6494 = vmatpush.msra.mxu2 %v4468_v52  ;;  %v3930_v52 = vsel %vm2020_vm6, %v9368_v30, %v9162_v27  ;;  %v2848_v27 = vld [vmem:[#allocation3 + $0x109] sm:$0xff] }
 0x612   : > { %v3333_v38 = vpop.permute.xlu2 %3332  ;;  %v3992_v54 = vsel %vm2152_vm10, %v3960_v49, %v3203_v24 }
 0x613   : > { %4530 = vmatpush.msrb.mxu0 %v4467_v59  ;;  %6495 = vmatpush.msra.mxu2 %v4467_v59  ;;  %v4024_v4 = vsel %vm2218_vm11, %v3992_v54, %v3331_v3  ;;  %v3962_v59 = vsel %vm2086_vm9, %v3930_v52, %v9317_v25 }
 0x614   : > { %v4057_v16 = vsel %vm4046_vm14, %v4024_v4, %v3459_v35 }
 0x617   : > { %3600 = vrot.lane.b32.xlu0 %v9617_v42, %s11779_s3  ;;  %3344 = vrot.lane.b32.xlu1 %v2845_v12, %s11780_s0 }
 0x618   : > { %3088 = vrot.lane.b32.xlu2 %v9499_v46, %s11758_s30  ;;  %v3929_v46 = vsel %vm2020_vm6, %v9343_v23, %v9151_v10 }
 0x619   : > { %v3843_v1 = vpop.permute.xlu0 %3842  ;;  %v3587_v32 = vpop.permute.xlu1 %3586  ;;  %v3961_v31 = vsel %vm2086_vm9, %v3929_v46, %v9277_v62 }
 0x61a   : > { %v4090_v48 = vsel %vm4079_vm15, %v4057_v16, %v3587_v32  ;;  %v3717_v26 = vpop.permute.xlu2 %3716  ;;  %v4307_v40 = vpop.f32.mrf.mxu1 }
 0x61b   : > { %v4123_v37 = vsel %vm4112_vm0, %v4090_v48, %v3715_v6  ;;  %v4402_v10 = vmul.f32 %v9576_v36, %v4307_v40  ;;  %v9682_v48 = vld [vmem:[#allocation3 + $0x111] sm:$0xff] }
 0x61c   : > { %v4156_v53 = vsel %vm4145_vm1, %v4123_v37, %v3843_v1  ;;  %v9696_v40 = vld [vmem:[#allocation3 + $0x112] sm:$0xff] }
 0x61d   : > { %6393 = vmatmul.msk.f32.gmra.mxu1 %vm4187_vm2, %v4156_v53  ;;  %v4437_v29 = vadd.f32 %v9592_v15, %v4402_v10 }
 0x61f   : > { %3090 = vrot.lane.b32.xlu0 %v9525_v50, %s11758_s30  ;;  %3728 = vrot.lane.b32.xlu1 %v2847_v39, %s11777_s12  ;;  %v4469_v24 = vmax.f32 %v4437_v29, 0.0 }
 0x620   : > { %3472 = vrot.lane.b32.xlu2 %v9551_v20, %s11776_s13 }
 0x621   : > { %v3461_v12 = vpop.permute.xlu0 %3460  ;;  %v3205_v33 = vpop.permute.xlu1 %3204 }
 0x622   : > { %v3335_v3 = vpop.permute.xlu2 %3334  ;;  %v3993_v18 = vsel %vm2152_vm10, %v3961_v31, %v3205_v33 }
 0x623   : > { %v4025_v50 = vsel %vm2218_vm11, %v3993_v18, %v3333_v38 }
 0x624   : > { %v4058_v0 = vsel %vm4046_vm14, %v4025_v50, %v3461_v12 }
 0x627   : > { %3474 = vrot.lane.b32.xlu0 %v9601_v63, %s11776_s13  ;;  %3218 = vrot.lane.b32.xlu1 %v9603_v2, %s11759_s25 }
 0x628   : > { %3856 = vrot.lane.b32.xlu2 %v9646_v55, %s11778_s16 }
 0x629   : > { %v3845_v23 = vpop.permute.xlu0 %3844  ;;  %v3589_v62 = vpop.permute.xlu1 %3588 }
 0x62a   : > { %v4091_v8 = vsel %vm4079_vm15, %v4058_v0, %v3589_v62  ;;  %v3719_v58 = vpop.permute.xlu2 %3718  ;;  %v4310_v57 = vpop.f32.mrf.mxu1 }
 0x62b   : > { %v4403_v5 = vmul.f32 %v9576_v36, %v4310_v57  ;;  %v4124_v6 = vsel %vm4112_vm0, %v4091_v8, %v3717_v26  ;;  %v3931_v26 = vsel %vm2020_vm6, %v9394_v22, %v9139_v60 }
 0x62c   : > { %v4157_v51 = vsel %vm4145_vm1, %v4124_v6, %v3845_v23 }
 0x62d   : > { %v4438_v21 = vadd.f32 %v9592_v15, %v4403_v5  ;;  %6394 = vmatmul.msk.f32.gmra.mxu1 %vm4187_vm2, %v4157_v51  ;;  %v9711_v5 = vld [vmem:[#allocation3 + $0x120] sm:$0xff]  ;;  %v3932_v51 = vsel %vm2020_vm6, %v9420_v11, %v9164_v44 }
 0x62f   : > { %v4470_v47 = vmax.f32 %v4438_v21, 0.0  ;;  %3858 = vrot.lane.b32.xlu0 %v9659_v19, %s11778_s16  ;;  %3602 = vrot.lane.b32.xlu1 %v2816_v34, %s11779_s3 }
 0x630   : > { %3346 = vrot.lane.b32.xlu2 %v9579_v9, %s11780_s0 }
 0x631   : > { %v3463_v41 = vpop.permute.xlu0 %3462  ;;  %v3207_v35 = vpop.permute.xlu1 %3206  ;;  %4558 = vmatpush.msra.mxu0 %v4470_v47  ;;  %6496 = vmatpush.msra.mxu3 %v4470_v47  ;;  %v3964_v47 = vsel %vm2086_vm9, %v3932_v51, %v9303_v28 }
 0x632   : > { %v3337_v49 = vpop.permute.xlu2 %3336  ;;  %v3994_v38 = vsel %vm2152_vm10, %v3962_v59, %v3207_v35 }
 0x633   : > { %4559 = vmatpush.msra.mxu0 %v4469_v24  ;;  %6497 = vmatpush.msra.mxu3 %v4469_v24  ;;  %v4026_v54 = vsel %vm2218_vm11, %v3994_v38, %v3335_v3  ;;  %v2817_v3 = vld [vmem:[#allocation3 + $0x110] sm:$0xff]  ;;  %v2850_v24 = vld [vmem:[#allocation3 + $0x121] sm:$0xff] }
 0x634   : > { %v4059_v4 = vsel %vm4046_vm14, %v4026_v54, %v3463_v41  ;;  %v3933_v54 = vsel %vm2020_vm6, %v9446_v17, %v9176_v13 }
 0x637   : > { %3348 = vrot.lane.b32.xlu0 %v2847_v39, %s11780_s0  ;;  %3092 = vrot.lane.b32.xlu1 %v9551_v20, %s11758_s30  ;;  %v2720_v20 = vld [vmem:[#allocation3 + $0xf8] sm:$0xff]  ;;  %v3963_v39 = vsel %vm2086_vm9, %v3931_v26, %v9331_v43 }
 0x638   : > { %3730 = vrot.lane.b32.xlu2 %v2848_v27, %s11777_s12 }
 0x639   : > { %v3847_v30 = vpop.permute.xlu0 %3846  ;;  %v3591_v9 = vpop.permute.xlu1 %3590 }
 0x63a   : > { %v4092_v25 = vsel %vm4079_vm15, %v4059_v4, %v3591_v9  ;;  %v3721_v1 = vpop.permute.xlu2 %3720  ;;  %v4313_v46 = vpop.f32.mrf.mxu1  ;;  %v3965_v9 = vsel %vm2086_vm9, %v3933_v54, %v9329_v45 }
 0x63b   : > { %v4125_v32 = vsel %vm4112_vm0, %v4092_v25, %v3719_v58  ;;  %v4404_v60 = vmul.f32 %v9576_v36, %v4313_v46 }
 0x63c   : > { %v4158_v16 = vsel %vm4145_vm1, %v4125_v32, %v3847_v30 }
 0x63d   : > { %6395 = vmatmul.msk.f32.gmra.mxu1 %vm4187_vm2, %v4158_v16  ;;  %v4439_v57 = vadd.f32 %v9592_v15, %v4404_v60  ;;  %v9749_v16 = vld [vmem:[#allocation3 + $0x12a] sm:$0xff] }
 0x63f   : > { %3732 = vrot.lane.b32.xlu0 %v9682_v48, %s11777_s12  ;;  %3476 = vrot.lane.b32.xlu1 %v9646_v55, %s11776_s13 }
 0x640   : > { %3220 = vrot.lane.b32.xlu2 %v2720_v20, %s11759_s25  ;;  %v2819_v20 = vld [vmem:[#allocation3 + $0x128] sm:$0xff] }
 0x641   : > { %v3465_v37 = vpop.permute.xlu0 %3464  ;;  %v3209_v53 = vpop.permute.xlu1 %3208 }
 0x642   : > { %v3339_v12 = vpop.permute.xlu2 %3338  ;;  %v3995_v33 = vsel %vm2152_vm10, %v3963_v39, %v3209_v53 }
 0x643   : > { %v4027_v31 = vsel %vm2218_vm11, %v3995_v33, %v3337_v49 }
 0x644   : > { %v4060_v18 = vsel %vm4046_vm14, %v4027_v31, %v3465_v37 }
 0x647   : > { %3222 = vrot.lane.b32.xlu0 %v2816_v34, %s11759_s25  ;;  %3860 = vrot.lane.b32.xlu1 %v9696_v40, %s11778_s16  ;;  %v4471_v34 = vmax.f32 %v4439_v57, 0.0 }
 0x648   : > { %3604 = vrot.lane.b32.xlu2 %v2817_v3, %s11779_s3 }
 0x649   : > { %v3849_v22 = vpop.permute.xlu0 %3848  ;;  %v3593_v43 = vpop.permute.xlu1 %3592 }
 0x64a   : > { %v4093_v50 = vsel %vm4079_vm15, %v4060_v18, %v3593_v43  ;;  %v3723_v10 = vpop.permute.xlu2 %3722  ;;  %v4316_v23 = vpop.f32.mrf.mxu1 }
 0x64b   : > { %v4405_v62 = vmul.f32 %v9576_v36, %v4316_v23  ;;  %v4126_v0 = vsel %vm4112_vm0, %v4093_v50, %v3721_v1  ;;  %v9772_v50 = vld [vmem:[%s11321_s9 + $0x8] sm:$0xff] }
 0x64c   : > { %v4159_v8 = vsel %vm4145_vm1, %v4126_v0, %v3849_v22  ;;  %6416 = vmatmul.msk.f32.vlgmr.msra.gmra.mxu2 %vm2086_vm9, %v9772_v50  ;;  %6420 = vmatmul.msk.f32.vlgmr.msra.gmra.mxu3 %vm2086_vm9, %v9772_v50  ;;  %v9782_v0 = vld [vmem:[#allocation3 + $0x139] sm:$0xff] }
 0x64d   : > { %6396 = vmatmul.msk.f32.gmra.mxu1 %vm4187_vm2, %v4159_v8  ;;  %v4440_v58 = vadd.f32 %v9592_v15, %v4405_v62 }
 0x64f   : > { %3606 = vrot.lane.b32.xlu0 %v9711_v5, %s11779_s3  ;;  %3350 = vrot.lane.b32.xlu1 %v2848_v27, %s11780_s0  ;;  %v4472_v6 = vmax.f32 %v4440_v58, 0.0 }
 0x650   : > { %3094 = vrot.lane.b32.xlu2 %v9601_v63, %s11758_s30 }
 0x651   : > { %v3467_v29 = vpop.permute.xlu0 %3466  ;;  %v3211_v21 = vpop.permute.xlu1 %3210  ;;  %4587 = vmatpush.msrb.mxu2 %v4472_v6 }
 0x652   : > { %v3341_v52 = vpop.permute.xlu2 %3340  ;;  %v3996_v41 = vsel %vm2152_vm10, %v3964_v47, %v3211_v21  ;;  %v9794_v21 = vld [vmem:[#allocation3 + $0x13a] sm:$0xff] }
 0x653   : > { %4588 = vmatpush.msrb.mxu2 %v4471_v34  ;;  %v4028_v35 = vsel %vm2218_vm11, %v3996_v41, %v3339_v12  ;;  %v2820_v34 = vld [vmem:[#allocation3 + $0x138] sm:$0xff] }
 0x654   : > { %v4061_v63 = vsel %vm4046_vm14, %v4028_v35, %v3467_v29 }
 0x657   : > { %3096 = vrot.lane.b32.xlu0 %v9646_v55, %s11758_s30  ;;  %3734 = vrot.lane.b32.xlu1 %v2850_v24, %s11777_s12  ;;  %v9738_v55 = vld [vmem:[#allocation3 + $0x122] sm:$0xff] }
 0x658   : > { %3478 = vrot.lane.b32.xlu2 %v9659_v19, %s11776_s13 }
 0x659   : > { %v3851_v44 = vpop.permute.xlu0 %3850  ;;  %v3595_v11 = vpop.permute.xlu1 %3594 }
 0x65a   : > { %v4094_v28 = vsel %vm4079_vm15, %v4061_v63, %v3595_v11  ;;  %v3725_v59 = vpop.permute.xlu2 %3724  ;;  %v4319_v4 = vpop.f32.mrf.mxu1  ;;  %v9812_v11 = vld [vmem:[#allocation3 + $0x140] sm:$0xff]  ;;  %v11782_v63 = vld [vmem:[#allocation14_spill] sm:$0xff] }
 0x65b   : > { %v4127_v49 = vsel %vm4112_vm0, %v4094_v28, %v3723_v10  ;;  %v4406_v13 = vmul.f32 %v9576_v36, %v4319_v4  ;;  %v3935_v28 = vsel %vm2020_vm6, %v9496_v7, %v11782_v63 }
 0x65c   : > { %v4160_v38 = vsel %vm4145_vm1, %v4127_v49, %v3851_v44  ;;  %v9805_v44 = vld [vmem:[%s11321_s9 + $0x10] sm:$0xff] }
 0x65d   : > { %6397 = vmatmul.msk.f32.gmra.mxu1 %vm4187_vm2, %v4160_v38  ;;  %v4441_v31 = vadd.f32 %v9592_v15, %v4406_v13  ;;  %6421 = vmatmul.msk.f32.gmra.mxu3 %vm2086_vm9, %v9805_v44 }
 0x65e   : > { %6417 = vmatmul.msk.f32.gmra.mxu2 %vm2086_vm9, %v9805_v44 }
 0x65f   : > { %3480 = vrot.lane.b32.xlu0 %v9696_v40, %s11776_s13  ;;  %3224 = vrot.lane.b32.xlu1 %v2817_v3, %s11759_s25  ;;  %v2851_v3 = vld [vmem:[#allocation3 + $0x129] sm:$0xff]  ;;  %v4473_v18 = vmax.f32 %v4441_v31, 0.0 }
 0x660   : > { %3862 = vrot.lane.b32.xlu2 %v9738_v55, %s11778_s16 }
 0x661   : > { %v3469_v27 = vpop.permute.xlu0 %3468  ;;  %v3213_v30 = vpop.permute.xlu1 %3212 }
 0x662   : > { %v3215_v25 = vpop.permute.xlu2 %3214  ;;  %v3997_v1 = vsel %vm2152_vm10, %v3965_v9, %v3213_v30 }
 0x663   : > { %v4029_v32 = vsel %vm2218_vm11, %v3997_v1, %v3341_v52 }
 0x664   : > { %v4062_v26 = vsel %vm4046_vm14, %v4029_v32, %v3469_v27 }
 0x667   : > { %3864 = vrot.lane.b32.xlu0 %v9749_v16, %s11778_s16  ;;  %3608 = vrot.lane.b32.xlu1 %v2819_v20, %s11779_s3 }
 0x668   : > { %3352 = vrot.lane.b32.xlu2 %v9682_v48, %s11780_s0 }
 0x669   : > { %v3853_v45 = vpop.permute.xlu0 %3852  ;;  %v3597_v17 = vpop.permute.xlu1 %3596 }
 0x66a   : > { %v4095_v37 = vsel %vm4079_vm15, %v4062_v26, %v3597_v17  ;;  %v3599_v53 = vpop.permute.xlu2 %3598  ;;  %v4322_v39 = vpop.f32.mrf.mxu1 }
 0x66b   : > { %v4407_v46 = vmul.f32 %v9576_v36, %v4322_v39  ;;  %v4128_v12 = vsel %vm4112_vm0, %v4095_v37, %v3725_v59 }
 0x66c   : > { %v4161_v33 = vsel %vm4145_vm1, %v4128_v12, %v3853_v45  ;;  %v9862_v12 = vld [vmem:[#allocation3 + $0x142] sm:$0xff] }
 0x66d   : > { %6398 = vmatmul.msk.f32.gmra.mxu1 %vm4187_vm2, %v4161_v33  ;;  %v4442_v48 = vadd.f32 %v9592_v15, %v4407_v46  ;;  %v11783_v33 = vld [vmem:[#allocation17_spill] sm:$0xff] }
 0x66f   : > { %3354 = vrot.lane.b32.xlu0 %v2850_v24, %s11780_s0  ;;  %3098 = vrot.lane.b32.xlu1 %v9659_v19, %s11758_s30  ;;  %v4474_v60 = vmax.f32 %v4442_v48, 0.0  ;;  %v11781_v19 = vld [vmem:[#allocation10_spill] sm:$0xff]  ;;  %v3936_v48 = vsel %vm2020_vm6, %v9522_v61, %v11783_v33 }
 0x670   : > { %3736 = vrot.lane.b32.xlu2 %v2851_v3, %s11777_s12  ;;  %v3934_v23 = vsel %vm2020_vm6, %v9470_v14, %v11781_v19  ;;  %v2822_v19 = vld [vmem:[#allocation3 + $0x150] sm:$0xff] }
 0x671   : > { %v3343_v22 = vpop.permute.xlu0 %3342  ;;  %v3087_v43 = vpop.permute.xlu1 %3086  ;;  %4616 = vmatpush.msrb.mxu3 %v4474_v60 }
 0x672   : > { %v3089_v10 = vpop.permute.xlu2 %3088  ;;  %v3966_v62 = vsel %vm2086_vm9, %v3934_v23, %v3087_v43 }
 0x673   : > { %4617 = vmatpush.msrb.mxu3 %v4473_v18  ;;  %v3998_v8 = vsel %vm2152_vm10, %v3966_v62, %v3215_v25  ;;  %v3967_v59 = vsel %vm2086_vm9, %v3935_v28, %v3089_v10  ;;  %v9874_v10 = vld [vmem:[#allocation3 + $0x152] sm:$0xff] }
 0x674   : > { %v4030_v14 = vsel %vm2218_vm11, %v3998_v8, %v3343_v22  ;;  %v9906_v28 = vld [vmem:[#allocation3 + $0x159] sm:$0xff] }
 0x677   : > { %3738 = vrot.lane.b32.xlu0 %v9782_v0, %s11777_s12  ;;  %3482 = vrot.lane.b32.xlu1 %v9738_v55, %s11776_s13 }
 0x678   : > { %3226 = vrot.lane.b32.xlu2 %v9711_v5, %s11759_s25 }
 0x679   : > { %v3727_v58 = vpop.permute.xlu0 %3726  ;;  %v3471_v57 = vpop.permute.xlu1 %3470 }
 0x67a   : > { %v3473_v6 = vpop.permute.xlu2 %3472  ;;  %v4063_v51 = vsel %vm4046_vm14, %v4030_v14, %v3471_v57  ;;  %v4325_v41 = vpop.f32.mrf.mxu1 }
 0x67b   : > { %v4096_v29 = vsel %vm4079_vm15, %v4063_v51, %v3599_v53  ;;  %v4408_v49 = vmul.f32 %v9576_v36, %v4325_v41 }
 0x67c   : > { %v4129_v52 = vsel %vm4112_vm0, %v4096_v29, %v3727_v58 }
 0x67d   : > { %v4443_v1 = vadd.f32 %v9592_v15, %v4408_v49 }
 0x67f   : > { %3228 = vrot.lane.b32.xlu0 %v2819_v20, %s11759_s25  ;;  %3866 = vrot.lane.b32.xlu1 %v9794_v21, %s11778_s16  ;;  %v2853_v20 = vld [vmem:[#allocation3 + $0x141] sm:$0xff]  ;;  %v4475_v45 = vmax.f32 %v4443_v1, 0.0 }
 0x680   : > { %3610 = vrot.lane.b32.xlu2 %v2820_v34, %s11779_s3 }
 0x681   : > { %v3217_v5 = vpop.permute.xlu0 %3216  ;;  %v3855_v47 = vpop.permute.xlu1 %3854 }
 0x682   : > { %v3857_v35 = vpop.permute.xlu2 %3856  ;;  %v4162_v24 = vsel %vm4145_vm1, %v4129_v52, %v3855_v47  ;;  %v3999_v27 = vsel %vm2152_vm10, %v3967_v59, %v3217_v5  ;;  %v11784_v52 = vld [vmem:[#allocation53_spill] sm:$0xff] }
 0x683   : > { %6399 = vmatmul.msk.f32.gmra.mxu1 %vm4187_vm2, %v4162_v24  ;;  %v3937_v41 = vsel %vm2020_vm6, %v9548_v56, %v11784_v52 }
 0x687   : > { %3612 = vrot.lane.b32.xlu0 %v9812_v11, %s11779_s3  ;;  %3356 = vrot.lane.b32.xlu1 %v2851_v3, %s11780_s0 }
 0x688   : > { %3100 = vrot.lane.b32.xlu2 %v9696_v40, %s11758_s30  ;;  %v9832_v40 = vld [vmem:[%s11321_s9 + $0x18] sm:$0xff] }
 0x689   : > { %v3601_v38 = vpop.permute.xlu0 %3600  ;;  %v3345_v54 = vpop.permute.xlu1 %3344  ;;  %6422 = vmatmul.msk.f32.gmra.mxu3 %vm2086_vm9, %v9832_v40  ;;  %6418 = vmatmul.msk.f32.gmra.mxu2 %vm2086_vm9, %v9832_v40 }
 0x68a   : > { %v3347_v30 = vpop.permute.xlu2 %3346  ;;  %v4328_v9 = vpop.f32.mrf.mxu1  ;;  %v4031_v4 = vsel %vm2218_vm11, %v3999_v27, %v3345_v54 }
 0x68b   : > { %v4409_v25 = vmul.f32 %v9576_v36, %v4328_v9  ;;  %v4064_v32 = vsel %vm4046_vm14, %v4031_v4, %v3473_v6 }
 0x68c   : > { %v4097_v37 = vsel %vm4079_vm15, %v4064_v32, %v3601_v38 }
 0x68d   : > { %v4444_v7 = vadd.f32 %v9592_v15, %v4409_v25  ;;  %v9922_v25 = vld [vmem:[#allocation3 + $0x15a] sm:$0xff] }
 0x68f   : > { %v4476_v13 = vmax.f32 %v4444_v7, 0.0  ;;  %3102 = vrot.lane.b32.xlu0 %v9738_v55, %s11758_s30  ;;  %3740 = vrot.lane.b32.xlu1 %v2853_v20, %s11777_s12  ;;  %v9850_v55 = vld [vmem:[%s11321_s9] sm:$0xff] }
 0x690   : > { %3484 = vrot.lane.b32.xlu2 %v9749_v16, %s11776_s13  ;;  %6415 = vmatmul.msk.f32.vlgmr.msrb.gmra.mxu0 %vm2086_vm9, %v9850_v55 }
 0x691   : > { %v3091_v17 = vpop.permute.xlu0 %3090  ;;  %v3729_v26 = vpop.permute.xlu1 %3728  ;;  %4645 = vmatpush.msra.mxu2 %v4476_v13  ;;  %6427 = vmatmul.msk.f32.vlgmr.msrb.gmra.mxu3 %vm2086_vm9, %v9850_v55 }
 0x692   : > { %v4130_v53 = vsel %vm4112_vm0, %v4097_v37, %v3729_v26  ;;  %v3731_v39 = vpop.permute.xlu2 %3730  ;;  %6423 = vmatmul.msk.f32.vlgmr.msrb.gmra.mxu2 %vm2086_vm9, %v9850_v55  ;;  %v3968_v60 = vsel %vm2086_vm9, %v3936_v48, %v3091_v17  ;;  %v11785_v17 = vld [vmem:[#allocation49_spill] sm:$0xff] }
 0x693   : > { %4646 = vmatpush.msra.mxu2 %v4475_v45  ;;  %v4163_v46 = vsel %vm4145_vm1, %v4130_v53, %v3857_v35  ;;  %v9935_v45 = vld [vmem:[#allocation3 + $0x168] sm:$0xff]  ;;  %v3938_v26 = vsel %vm2020_vm6, %v9603_v2, %v11785_v17 }
 0x694   : > { %6400 = vmatmul.msk.f32.gmra.mxu1 %vm4187_vm2, %v4163_v46 }
 0x697   : > { %3486 = vrot.lane.b32.xlu0 %v9794_v21, %s11776_s13  ;;  %3230 = vrot.lane.b32.xlu1 %v2820_v34, %s11759_s25 }
 0x698   : > { %3868 = vrot.lane.b32.xlu2 %v9862_v12, %s11778_s16  ;;  %6419 = vmatmul.msk.f32.vlgmr.msra.gmra.mxu0 %vm2086_vm9, %v9850_v55 }
 0x699   : > { %v3475_v31 = vpop.permute.xlu0 %3474  ;;  %v3219_v3 = vpop.permute.xlu1 %3218  ;;  %6428 = vmatmul.msk.f32.gmra.mxu3 %vm2086_vm9, %v9772_v50 }
 0x69a   : > { %v3221_v22 = vpop.permute.xlu2 %3220  ;;  %v4000_v43 = vsel %vm2152_vm10, %v3968_v60, %v3219_v3  ;;  %6424 = vmatmul.msk.f32.gmra.mxu2 %vm2086_vm9, %v9772_v50  ;;  %v4331_v8 = vpop.f32.mrf.mxu1  ;;  %v2856_v60 = vld [vmem:[#allocation3 + $0x169] sm:$0xff] }
 0x69b   : > { %v4032_v18 = vsel %vm2218_vm11, %v4000_v43, %v3347_v30  ;;  %v4410_v51 = vmul.f32 %v9576_v36, %v4331_v8 }
 0x69c   : > { %v4065_v62 = vsel %vm4046_vm14, %v4032_v18, %v3475_v31 }
 0x69d   : > { %v4445_v63 = vadd.f32 %v9592_v15, %v4410_v51 }
 0x69f   : > { %3870 = vrot.lane.b32.xlu0 %v9874_v10, %s11778_s16  ;;  %3614 = vrot.lane.b32.xlu1 %v2822_v19, %s11779_s3  ;;  %v4477_v56 = vmax.f32 %v4445_v63, 0.0 }
 0x6a0   : > { %3358 = vrot.lane.b32.xlu2 %v9782_v0, %s11780_s0  ;;  %v2854_v0 = vld [vmem:[#allocation3 + $0x151] sm:$0xff] }
 0x6a1   : > { %v3859_v61 = vpop.permute.xlu0 %3858  ;;  %v3603_v23 = vpop.permute.xlu1 %3602  ;;  %6429 = vmatmul.msk.f32.gmra.mxu3 %vm2086_vm9, %v9805_v44 }
 0x6a2   : > { %v4098_v58 = vsel %vm4079_vm15, %v4065_v62, %v3603_v23  ;;  %v3605_v57 = vpop.permute.xlu2 %3604  ;;  %6425 = vmatmul.msk.f32.gmra.mxu2 %vm2086_vm9, %v9805_v44 }
 0x6a3   : > { %v4131_v14 = vsel %vm4112_vm0, %v4098_v58, %v3731_v39 }
 0x6a4   : > { %v4164_v6 = vsel %vm4145_vm1, %v4131_v14, %v3859_v61  ;;  %v11786_v14 = vld [vmem:[#allocation58_spill] sm:$0xff] }
 0x6a5   : > { %6401 = vmatmul.msk.f32.gmra.mxu1 %vm4187_vm2, %v4164_v6  ;;  %v3939_v6 = vsel %vm2020_vm6, %v9617_v42, %v11786_v14 }
 0x6a7   : > { %3360 = vrot.lane.b32.xlu0 %v2853_v20, %s11780_s0  ;;  %3104 = vrot.lane.b32.xlu1 %v9749_v16, %s11758_s30 }
 0x6a8   : > { %3742 = vrot.lane.b32.xlu2 %v2854_v0, %s11777_s12 }
 0x6a9   : > { %v3349_v29 = vpop.permute.xlu0 %3348  ;;  %v3093_v34 = vpop.permute.xlu1 %3092  ;;  %6430 = vmatmul.msk.f32.gmra.mxu3 %vm2086_vm9, %v9832_v40 }
 0x6aa   : > { %v3095_v5 = vpop.permute.xlu2 %3094  ;;  %v4334_v47 = vpop.f32.mrf.mxu1  ;;  %v3969_v24 = vsel %vm2086_vm9, %v3937_v41, %v3093_v34  ;;  %6426 = vmatmul.msk.f32.gmra.mxu2 %vm2086_vm9, %v9832_v40  ;;  %v9987_v41 = vld [vmem:[#allocation3 + $0x172] sm:$0xff] }
 0x6ab   : > { %v4411_v35 = vmul.f32 %v9576_v36, %v4334_v47  ;;  %v4001_v59 = vsel %vm2152_vm10, %v3969_v24, %v3221_v22  ;;  %v3970_v37 = vsel %vm2086_vm9, %v3938_v26, %v3095_v5 }
 0x6ac   : > { %v4033_v27 = vsel %vm2218_vm11, %v4001_v59, %v3349_v29 }
 0x6ad   : > { %v4446_v16 = vadd.f32 %v9592_v15, %v4411_v35  ;;  %v2825_v35 = vld [vmem:[#allocation3 + $0x170] sm:$0xff] }
 0x6af   : > { %v4478_v49 = vmax.f32 %v4446_v16, 0.0  ;;  %3744 = vrot.lane.b32.xlu0 %v9906_v28, %s11777_s12  ;;  %3488 = vrot.lane.b32.xlu1 %v9862_v12, %s11776_s13 }
 0x6b0   : > { %3232 = vrot.lane.b32.xlu2 %v9812_v11, %s11759_s25  ;;  %v2823_v11 = vld [vmem:[#allocation3 + $0x158] sm:$0xff] }
 0x6b1   : > { %v3733_v38 = vpop.permute.xlu0 %3732  ;;  %v3477_v54 = vpop.permute.xlu1 %3476  ;;  %4674 = vmatpush.msra.mxu3 %v4478_v49 }
 0x6b2   : > { %v3479_v30 = vpop.permute.xlu2 %3478  ;;  %v4066_v9 = vsel %vm4046_vm14, %v4033_v27, %v3477_v54  ;;  %6431 = vmatmul.msk.f32.vlgmr.msra.gmra.mxu2 %vm2086_vm9, %v9850_v55  ;;  %v2627_v27 = vld [vmem:[#allocation3 + $0x108] sm:$0xff] }
 0x6b3   : > { %4675 = vmatpush.msra.mxu3 %v4477_v56  ;;  %v4099_v4 = vsel %vm4079_vm15, %v4066_v9, %v3605_v57  ;;  %v9977_v57 = vld [vmem:[#allocation3 + $0x16a] sm:$0xff] }
 0x6b4   : > { %6435 = vmatmul.msk.f32.vlgmr.msra.gmra.mxu3 %vm2086_vm9, %v9850_v55  ;;  %v4132_v32 = vsel %vm4112_vm0, %v4099_v4, %v3733_v38  ;;  %v11787_v4 = vld [vmem:[#allocation65_spill] sm:$0xff] }
 0x6b7   : > { %3234 = vrot.lane.b32.xlu0 %v2822_v19, %s11759_s25  ;;  %3872 = vrot.lane.b32.xlu1 %v9922_v25, %s11778_s16 }
 0x6b8   : > { %3616 = vrot.lane.b32.xlu2 %v2823_v11, %s11779_s3 }
 0x6b9   : > { %v3223_v1 = vpop.permute.xlu0 %3222  ;;  %v3861_v7 = vpop.permute.xlu1 %3860 }
 0x6ba   : > { %v3863_v20 = vpop.permute.xlu2 %3862  ;;  %v4165_v13 = vsel %vm4145_vm1, %v4132_v32, %v3861_v7  ;;  %6432 = vmatmul.msk.f32.gmra.mxu2 %vm2086_vm9, %v9772_v50  ;;  %v4002_v46 = vsel %vm2152_vm10, %v3970_v37, %v3223_v1  ;;  %v4337_v33 = vpop.f32.mrf.mxu1  ;;  %v10010_v7 = vld [vmem:[#allocation3 + $0x181] sm:$0xff] }
 0x6bb   : > { %6402 = vmatmul.msk.f32.gmra.mxu1 %vm4187_vm2, %v4165_v13  ;;  %v4412_v2 = vmul.f32 %v9576_v36, %v4337_v33 }
 0x6bc   : > { %6436 = vmatmul.msk.f32.gmra.mxu3 %vm2086_vm9, %v9772_v50 }
 0x6bf   : > { %3618 = vrot.lane.b32.xlu0 %v9935_v45, %s11779_s3  ;;  %3362 = vrot.lane.b32.xlu1 %v2854_v0, %s11780_s0 }
 0x6c0   : > { %3106 = vrot.lane.b32.xlu2 %v9794_v21, %s11758_s30 }
 0x6c1   : > { %v3607_v53 = vpop.permute.xlu0 %3606  ;;  %v3351_v39 = vpop.permute.xlu1 %3350 }
 0x6c2   : > { %v3353_v48 = vpop.permute.xlu2 %3352  ;;  %v4034_v31 = vsel %vm2218_vm11, %v4002_v46, %v3351_v39  ;;  %6433 = vmatmul.msk.f32.gmra.mxu2 %vm2086_vm9, %v9805_v44 }
 0x6c3   : > { %v4067_v3 = vsel %vm4046_vm14, %v4034_v31, %v3479_v30  ;;  %v2890_v31 = vld [vmem:[#allocation3 + $0x182] sm:$0xff] }
 0x6c4   : > { %6437 = vmatmul.msk.f32.gmra.mxu3 %vm2086_vm9, %v9805_v44  ;;  %v4100_v43 = vsel %vm4079_vm15, %v4067_v3, %v3607_v53  ;;  %v2826_v3 = vld [vmem:[#allocation3 + $0x180] sm:$0xff] }
 0x6c7   : > { %3108 = vrot.lane.b32.xlu0 %v9862_v12, %s11758_s30  ;;  %3746 = vrot.lane.b32.xlu1 %v2856_v60, %s11777_s12  ;;  %v4447_v12 = vadd.f32 %v9592_v15, %v4412_v2 }
 0x6c8   : > { %3490 = vrot.lane.b32.xlu2 %v9874_v10, %s11776_s13 }
 0x6c9   : > { %v3097_v21 = vpop.permute.xlu0 %3096  ;;  %v3735_v22 = vpop.permute.xlu1 %3734  ;;  %v4479_v0 = vmax.f32 %v4447_v12, 0.0 }
 0x6ca   : > { %v4133_v18 = vsel %vm4112_vm0, %v4100_v43, %v3735_v22  ;;  %v3737_v19 = vpop.permute.xlu2 %3736  ;;  %v4340_v61 = vpop.f32.mrf.mxu1  ;;  %6434 = vmatmul.msk.f32.gmra.mxu2 %vm2086_vm9, %v9832_v40  ;;  %v3971_v34 = vsel %vm2086_vm9, %v3939_v6, %v3097_v21 }
 0x6cb   : > { %v4413_v23 = vmul.f32 %v9576_v36, %v4340_v61  ;;  %v4166_v62 = vsel %vm4145_vm1, %v4133_v18, %v3863_v20  ;;  %v10038_v18 = vld [vmem:[#allocation3 + $0x188] sm:$0xff]  ;;  %v11788_v61 = vld [vmem:[#allocation9_spill] sm:$0xff] }
 0x6cc   : > { %6403 = vmatmul.msk.f32.gmra.mxu1 %vm4187_vm2, %v4166_v62  ;;  %6438 = vmatmul.msk.f32.gmra.mxu3 %vm2086_vm9, %v9832_v40 }
 0x6cd   : > { %v4448_v8 = vadd.f32 %v9592_v15, %v4413_v23 }
 0x6cf   : > { %v4480_v58 = vmax.f32 %v4448_v8, 0.0  ;;  %3492 = vrot.lane.b32.xlu0 %v9922_v25, %s11776_s13  ;;  %3236 = vrot.lane.b32.xlu1 %v2823_v11, %s11759_s25  ;;  %v3940_v11 = vsel %vm2020_vm6, %v2627_v27, %v11787_v4 }
 0x6d0   : > { %3874 = vrot.lane.b32.xlu2 %v9977_v57, %s11778_s16 }
 0x6d1   : > { %v3481_v51 = vpop.permute.xlu0 %3480  ;;  %v3225_v29 = vpop.permute.xlu1 %3224  ;;  %4703 = vmatpush.msrb.mxu2 %v4480_v58 }
 0x6d2   : > { %v3227_v5 = vpop.permute.xlu2 %3226  ;;  %v4003_v47 = vsel %vm2152_vm10, %v3971_v34, %v3225_v29 }
 0x6d3   : > { %4704 = vmatpush.msrb.mxu2 %v4479_v0  ;;  %v4035_v52 = vsel %vm2218_vm11, %v4003_v47, %v3353_v48 }
 0x6d4   : > { %6439 = vmatmul.msk.f32.vlgmr.msrb.gmra.mxu2 %vm2086_vm9, %v9850_v55  ;;  %v4068_v63 = vsel %vm4046_vm14, %v4035_v52, %v3481_v51  ;;  %v2859_v51 = vld [vmem:[#allocation3 + $0x189] sm:$0xff] }
 0x6d7   : > { %3876 = vrot.lane.b32.xlu0 %v9987_v41, %s11778_s16  ;;  %3620 = vrot.lane.b32.xlu1 %v2825_v35, %s11779_s3 }
 0x6d8   : > { %3364 = vrot.lane.b32.xlu2 %v9906_v28, %s11780_s0  ;;  %v2857_v28 = vld [vmem:[#allocation3 + $0x171] sm:$0xff] }
 0x6d9   : > { %v3865_v42 = vpop.permute.xlu0 %3864  ;;  %v3609_v24 = vpop.permute.xlu1 %3608 }
 0x6da   : > { %v4101_v16 = vsel %vm4079_vm15, %v4068_v63, %v3609_v24  ;;  %v3611_v59 = vpop.permute.xlu2 %3610  ;;  %v4343_v30 = vpop.f32.mrf.mxu1  ;;  %v2629_v24 = vld [vmem:[#allocation3 + $0x120] sm:$0xff]  ;;  %v11791_v63 = vld [vmem:[#allocation12_spill] sm:$0xff] }
 0x6db   : > { %v4134_v49 = vsel %vm4112_vm0, %v4101_v16, %v3737_v19  ;;  %v4414_v32 = vmul.f32 %v9576_v36, %v4343_v30  ;;  %v2628_v19 = vld [vmem:[#allocation3 + $0x110] sm:$0xff]  ;;  %v3942_v16 = vsel %vm2020_vm6, %v2629_v24, %v11791_v63  ;;  %v2828_v30 = vld [vmem:[#allocation3 + $0x198] sm:$0xff] }
 0x6dc   : > { %v4167_v56 = vsel %vm4145_vm1, %v4134_v49, %v3865_v42  ;;  %6440 = vmatmul.msk.f32.gmra.mxu2 %vm2086_vm9, %v9772_v50  ;;  %v3941_v23 = vsel %vm2020_vm6, %v2628_v19, %v11788_v61  ;;  %v2891_v42 = vld [vmem:[#allocation3 + $0x18a] sm:$0xff]  ;;  %v2631_v63 = vld [vmem:[#allocation3 + $0x138] sm:$0xff] }
 0x6dd   : > { %6404 = vmatmul.msk.f32.gmra.mxu1 %vm4187_vm2, %v4167_v56  ;;  %v4449_v46 = vadd.f32 %v9592_v15, %v4414_v32 }
 0x6df   : > { %3366 = vrot.lane.b32.xlu0 %v2856_v60, %s11780_s0  ;;  %3110 = vrot.lane.b32.xlu1 %v9874_v10, %s11758_s30  ;;  %v4481_v60 = vmax.f32 %v4449_v46, 0.0  ;;  %v10102_v46 = vld [vmem:[%s11320_s8] ss:$0 sm:$0xff] }
 0x6e0   : > { %3748 = vrot.lane.b32.xlu2 %v2857_v28, %s11777_s12 }
 0x6e1   : > { %v3355_v38 = vpop.permute.xlu0 %3354  ;;  %v3099_v54 = vpop.permute.xlu1 %3098 }
 0x6e2   : > { %v3101_v9 = vpop.permute.xlu2 %3100  ;;  %v3972_v1 = vsel %vm2086_vm9, %v3940_v11, %v3099_v54 }
 0x6e3   : > { %v4004_v10 = vsel %vm2152_vm10, %v3972_v1, %v3227_v5  ;;  %v3973_v62 = vsel %vm2086_vm9, %v3941_v23, %v3101_v9  ;;  %v2892_v9 = vld [vmem:[#allocation3 + $0x19a] sm:$0xff] }
 0x6e4   : > { %6441 = vmatmul.msk.f32.gmra.mxu2 %vm2086_vm9, %v9805_v44  ;;  %v4036_v17 = vsel %vm2218_vm11, %v4004_v10, %v3355_v38  ;;  %v2861_v23 = vld [vmem:[#allocation3 + $0x1a1] sm:$0xff] }
 0x6e7   : > { %3494 = vrot.lane.b32.xlu1 %v9977_v57, %s11776_s13  ;;  %3750 = vrot.lane.b32.xlu0 %v10010_v7, %s11777_s12 }
 0x6e8   : > { %3238 = vrot.lane.b32.xlu2 %v9935_v45, %s11759_s25 }
 0x6e9   : > { %v3739_v20 = vpop.permute.xlu0 %3738  ;;  %v3483_v13 = vpop.permute.xlu1 %3482 }
 0x6ea   : > { %v3485_v26 = vpop.permute.xlu2 %3484  ;;  %v4346_v37 = vpop.f32.mrf.mxu1  ;;  %v4069_v53 = vsel %vm4046_vm14, %v4036_v17, %v3483_v13 }
 0x6eb   : > { %v4415_v39 = vmul.f32 %v9576_v36, %v4346_v37  ;;  %v4102_v48 = vsel %vm4079_vm15, %v4069_v53, %v3611_v59  ;;  %v10093_v53 = vld [vmem:[%s11319_s7] ss:$0 sm:$0xff] }
 0x6ec   : > { %6442 = vmatmul.msk.f32.gmra.mxu2 %vm2086_vm9, %v9832_v40 }
 0x6ed   : > { %v4450_v33 = vadd.f32 %v9592_v15, %v4415_v39  ;;  %v4135_v15 = vsel %vm4112_vm0, %v4102_v48, %v3739_v20 }
 0x6ef   : > { %v4482_v45 = vmax.f32 %v4450_v33, 0.0  ;;  %3240 = vrot.lane.b32.xlu0 %v2825_v35, %s11759_s25  ;;  %3878 = vrot.lane.b32.xlu1 %v2890_v31, %s11778_s16  ;;  %v10061_v35 = vpop.f32.mrf.mxu2 }
 0x6f0   : > { %3622 = vrot.lane.b32.xlu2 %v2826_v3, %s11779_s3  ;;  %11789 = vst [vmem:[#allocation15_spill] sm:$0xff] %v10061_v35 }
 0x6f1   : > { %v3229_v2 = vpop.permute.xlu0 %3228  ;;  %v3867_v21 = vpop.permute.xlu1 %3866  ;;  %4732 = vmatpush.msrb.mxu3 %v4482_v45 }
 0x6f2   : > { %v3869_v22 = vpop.permute.xlu2 %3868  ;;  %v4168_v43 = vsel %vm4145_vm1, %v4135_v15, %v3867_v21  ;;  %v4005_v58 = vsel %vm2152_vm10, %v3973_v62, %v3229_v2  ;;  %v2630_v21 = vld [vmem:[#allocation3 + $0x128] sm:$0xff] }
 0x6f3   : > { %6405 = vmatmul.msk.f32.gmra.mxu1 %vm4187_vm2, %v4168_v43  ;;  %4733 = vmatpush.msrb.mxu3 %v4481_v60 }
 0x6f4   : > { %6443 = vmatmul.msk.f32.vlgmr.msrb.gmra.mxu3 %vm2086_vm9, %v9850_v55 }
 0x6f7   : > { %3368 = vrot.lane.b32.xlu1 %v2857_v28, %s11780_s0  ;;  %3624 = vrot.lane.b32.xlu0 %v10038_v18, %s11779_s3  ;;  %v10075_v27 = vpop.f32.mrf.mxu2 }
 0x6f8   : > { %3112 = vrot.lane.b32.xlu2 %v9922_v25, %s11758_s30 }
 0x6f9   : > { %v3613_v12 = vpop.permute.xlu0 %3612  ;;  %v3357_v8 = vpop.permute.xlu1 %3356 }
 0x6fa   : > { %v3359_v14 = vpop.permute.xlu2 %3358  ;;  %v4037_v6 = vsel %vm2218_vm11, %v4005_v58, %v3357_v8 }
 0x6fb   : > { %v4070_v0 = vsel %vm4046_vm14, %v4037_v6, %v3485_v26 }
 0x6fc   : > { %6444 = vmatmul.msk.f32.gmra.mxu3 %vm2086_vm9, %v9772_v50  ;;  %v4103_v34 = vsel %vm4079_vm15, %v4070_v0, %v3613_v12 }
 0x6ff   : > { %3752 = vrot.lane.b32.xlu1 %v2859_v51, %s11777_s12  ;;  %3114 = vrot.lane.b32.xlu0 %v9977_v57, %s11758_s30  ;;  %v10066_v57 = vpop.f32.mrf.mxu3 }
 0x700   : > { %3496 = vrot.lane.b32.xlu2 %v9987_v41, %s11776_s13  ;;  %11790 = vst [vmem:[#allocation59_spill] sm:$0xff] %v10066_v57  ;;  %v4349_v56 = vpop.f32.mrf.mxu1 }
 0x701   : > { %v3103_v25 = vpop.permute.xlu0 %3102  ;;  %v3741_v29 = vpop.permute.xlu1 %3740  ;;  %v4416_v1 = vmul.f32 %v9576_v36, %v4349_v56 }
 0x702   : > { %v4136_v5 = vsel %vm4112_vm0, %v4103_v34, %v3741_v29  ;;  %v3743_v47 = vpop.permute.xlu2 %3742  ;;  %v3974_v28 = vsel %vm2086_vm9, %v3942_v16, %v3103_v25  ;;  %v2829_v25 = vld [vmem:[#allocation3 + $0x1a0] sm:$0xff]  ;;  %v11795_v16 = vld [vmem:[#allocation54_spill] sm:$0xff] }
 0x703   : > { %v4169_v52 = vsel %vm4145_vm1, %v4136_v5, %v3869_v22  ;;  %v4451_v33 = vadd.f32 %v10102_v46, %v4416_v1  ;;  %v11793_v22 = vld [vmem:[#allocation7_spill] sm:$0xff] }
 0x704   : > { %6406 = vmatmul.msk.f32.gmra.mxu1 %vm4187_vm2, %v4169_v52  ;;  %6445 = vmatmul.msk.f32.gmra.mxu3 %vm2086_vm9, %v9805_v44  ;;  %v3943_v43 = vsel %vm2020_vm6, %v2630_v21, %v11793_v22 }
 0x707   : > { %3242 = vrot.lane.b32.xlu1 %v2826_v3, %s11759_s25  ;;  %3498 = vrot.lane.b32.xlu0 %v2890_v31, %s11776_s13  ;;  %v10084_v11 = vpop.f32.mrf.mxu3  ;;  %v2860_v31 = vld [vmem:[#allocation3 + $0x199] sm:$0xff]  ;;  %v4483_v3 = vmax.f32 %v4451_v33, 0.0 }
 0x708   : > { %3880 = vrot.lane.b32.xlu2 %v2891_v42, %s11778_s16 }
 0x709   : > { %v3487_v59 = vpop.permute.xlu0 %3486  ;;  %v3231_v49 = vpop.permute.xlu1 %3230 }
 0x70a   : > { %v3233_v38 = vpop.permute.xlu2 %3232  ;;  %v4006_v54 = vsel %vm2152_vm10, %v3974_v28, %v3231_v49 }
 0x70b   : > { %v4038_v4 = vsel %vm2218_vm11, %v4006_v54, %v3359_v14 }
 0x70c   : > { %6446 = vmatmul.msk.f32.gmra.mxu3 %vm2086_vm9, %v9832_v40  ;;  %v4071_v20 = vsel %vm4046_vm14, %v4038_v4, %v3487_v59  ;;  %v10096_v39 = vpop.f32.mrf.mxu2  ;;  %v3944_v59 = vsel %vm2020_vm6, %v2631_v63, %v11795_v16  ;;  %v2633_v16 = vld [vmem:[#allocation3 + $0x150] sm:$0xff] }
 0x70d   : > { %11792 = vst [vmem:[#allocation25_spill] sm:$0xff] %v10096_v39 }
 0x70f   : > { %3626 = vrot.lane.b32.xlu1 %v2828_v30, %s11779_s3  ;;  %3882 = vrot.lane.b32.xlu0 %v2892_v9, %s11778_s16 }
 0x710   : > { %3370 = vrot.lane.b32.xlu2 %v10010_v7, %s11780_s0 }
 0x711   : > { %v3871_v10 = vpop.permute.xlu0 %3870  ;;  %v3615_v32 = vpop.permute.xlu1 %3614 }
 0x712   : > { %v4104_v13 = vsel %vm4079_vm15, %v4071_v20, %v3615_v32  ;;  %v4352_v17 = vpop.f32.mrf.mxu1  ;;  %v3617_v26 = vpop.permute.xlu2 %3616 }
 0x713   : > { %v4137_v37 = vsel %vm4112_vm0, %v4104_v13, %v3743_v47  ;;  %v4417_v7 = vmul.f32 %v10093_v53, %v4352_v17 }
 0x714   : > { %v4170_v36 = vsel %vm4145_vm1, %v4137_v37, %v3871_v10 }
 0x715   : > { %v4452_v48 = vadd.f32 %v10102_v46, %v4417_v7  ;;  %6407 = vmatmul.msk.f32.gmra.mxu1 %vm4187_vm2, %v4170_v36  ;;  %v10113_v19 = vpop.f32.mrf.mxu2 }
 0x717   : > { %v4484_v45 = vmax.f32 %v4452_v48, 0.0  ;;  %3116 = vrot.lane.b32.xlu1 %v9987_v41, %s11758_s30  ;;  %3372 = vrot.lane.b32.xlu0 %v2859_v51, %s11780_s0  ;;  %v10116_v41 = vpop.f32.mrf.mxu3  ;;  %v2893_v51 = vld [vmem:[#allocation3 + $0x1a2] sm:$0xff] }
 0x718   : > { %3754 = vrot.lane.b32.xlu2 %v2860_v31, %s11777_s12  ;;  %11794 = vst [vmem:[#allocation66_spill] sm:$0xff] %v10116_v41 }
 0x719   : > { %4761 = vmatpush.msra.mxu2 %v4484_v45  ;;  %v3361_v60 = vpop.permute.xlu0 %3360  ;;  %v3105_v2 = vpop.permute.xlu1 %3104 }
 0x71a   : > { %v3107_v15 = vpop.permute.xlu2 %3106  ;;  %v3975_v61 = vsel %vm2086_vm9, %v3943_v43, %v3105_v2  ;;  %v2632_v2 = vld [vmem:[#allocation3 + $0x140] sm:$0xff] }
 0x71b   : > { %4762 = vmatpush.msra.mxu2 %v4483_v3  ;;  %v4007_v62 = vsel %vm2152_vm10, %v3975_v61, %v3233_v38  ;;  %v3976_v28 = vsel %vm2086_vm9, %v3944_v59, %v3107_v15  ;;  %v11796_v15 = vld [vmem:[#allocation63_spill] sm:$0xff] }
 0x71c   : > { %6447 = vmatmul.msk.f32.vlgmr.msra.gmra.mxu2 %vm2086_vm9, %v9850_v55  ;;  %v4039_v58 = vsel %vm2218_vm11, %v4007_v62, %v3361_v60  ;;  %v3945_v22 = vsel %vm2020_vm6, %v2632_v2, %v11796_v15  ;;  %v4532_v15 = vpop.f32.mrf.mxu0 }
 0x71d   : > { %v10127_v0 = vpop.f32.mrf.mxu2 }
 0x71f   : > { %3500 = vrot.lane.b32.xlu1 %v2891_v42, %s11776_s13  ;;  %3756 = vrot.lane.b32.xlu0 %v2861_v23, %s11777_s12  ;;  %v10132_v34 = vpop.f32.mrf.mxu3 }
 0x720   : > { %3244 = vrot.lane.b32.xlu2 %v10038_v18, %s11759_s25 }
 0x721   : > { %v3745_v12 = vpop.permute.xlu0 %3744  ;;  %v3489_v8 = vpop.permute.xlu1 %3488 }
 0x722   : > { %v3491_v14 = vpop.permute.xlu2 %3490  ;;  %v4072_v6 = vsel %vm4046_vm14, %v4039_v58, %v3489_v8  ;;  %v4355_v49 = vpop.f32.mrf.mxu1 }
 0x723   : > { %v4105_v29 = vsel %vm4079_vm15, %v4072_v6, %v3617_v26  ;;  %v4418_v32 = vmul.f32 %v10093_v53, %v4355_v49  ;;  %v11797_v49 = vld [vmem:[#allocation68_spill] sm:$0xff] }
 0x724   : > { %6448 = vmatmul.msk.f32.gmra.mxu2 %vm2086_vm9, %v9772_v50  ;;  %v4138_v47 = vsel %vm4112_vm0, %v4105_v29, %v3745_v12 }
 0x725   : > { %v10139_v24 = vpop.f32.mrf.mxu2  ;;  %v4453_v48 = vadd.f32 %v10102_v46, %v4418_v32 }
 0x727   : > { %3884 = vrot.lane.b32.xlu1 %v2893_v51, %s11778_s16  ;;  %v10145_v56 = vpop.f32.mrf.mxu3  ;;  %v4485_v60 = vmax.f32 %v4453_v48, 0.0 }
 0x728   : > { %3628 = vrot.lane.b32.xlu2 %v2829_v25, %s11779_s3 }
 0x729   : > { %v3235_v18 = vpop.permute.xlu0 %3234  ;;  %v3873_v5 = vpop.permute.xlu1 %3872 }
 0x72a   : > { %v4171_v52 = vsel %vm4145_vm1, %v4138_v47, %v3873_v5  ;;  %v3875_v42 = vpop.permute.xlu2 %3874  ;;  %v4008_v30 = vsel %vm2152_vm10, %v3976_v28, %v3235_v18  ;;  %v3946_v28 = vsel %vm2020_vm6, %v2633_v16, %v11797_v49 }
 0x72b   : > { %6408 = vmatmul.msk.f32.gmra.mxu1 %vm4187_vm2, %v4171_v52 }
 0x72c   : > { %6449 = vmatmul.msk.f32.gmra.mxu2 %vm2086_vm9, %v9805_v44 }
 0x72d   : > { %v10153_v10 = vpop.f32.mrf.mxu2 }
 0x72f   : > { %v10159_v33 = vpop.f32.mrf.mxu3 }
 0x731   : > { %v3619_v38 = vpop.permute.xlu0 %3618  ;;  %v3363_v54 = vpop.permute.xlu1 %3362 }
 0x732   : > { %v3365_v9 = vpop.permute.xlu2 %3364  ;;  %v4040_v4 = vsel %vm2218_vm11, %v4008_v30, %v3363_v54 }
 0x733   : > { %v4073_v1 = vsel %vm4046_vm14, %v4040_v4, %v3491_v14 }
 0x734   : > { %6450 = vmatmul.msk.f32.gmra.mxu2 %vm2086_vm9, %v9832_v40  ;;  %v4106_v37 = vsel %vm4079_vm15, %v4073_v1, %v3619_v38 }
 0x735   : > { %v10165_v21 = vpop.f32.mrf.mxu2 }
 0x737   : > { %v10173_v8 = vpop.f32.mrf.mxu3 }
 0x738   : > { %v4358_v20 = vpop.f32.mrf.mxu1 }
 0x739   : > { %v4419_v13 = vmul.f32 %v10093_v53, %v4358_v20  ;;  %v3109_v17 = vpop.permute.xlu0 %3108  ;;  %v3747_v26 = vpop.permute.xlu1 %3746 }
 0x73a   : > { %v4139_v7 = vsel %vm4112_vm0, %v4106_v37, %v3747_v26  ;;  %v3749_v36 = vpop.permute.xlu2 %3748  ;;  %v3977_v23 = vsel %vm2086_vm9, %v3945_v22, %v3109_v17 }
 0x73b   : > { %v4454_v31 = vadd.f32 %v10102_v46, %v4419_v13  ;;  %v4172_v45 = vsel %vm4145_vm1, %v4139_v7, %v3875_v42 }
 0x73c   : > { %6409 = vmatmul.msk.f32.gmra.mxu1 %vm4187_vm2, %v4172_v45  ;;  %v4983_v45 = vrot.slane %v10113_v19, 4 }
 0x73d   : > { %v4486_v3 = vmax.f32 %v4454_v31, 0.0  ;;  %v10178_v29 = vpop.f32.mrf.mxu2 }
 0x73f   : > { %4790 = vmatpush.msra.mxu3 %v4486_v3  ;;  %v10185_v52 = vpop.f32.mrf.mxu3 }
 0x741   : > { %v3493_v43 = vpop.permute.xlu0 %3492  ;;  %v3237_v61 = vpop.permute.xlu1 %3236  ;;  %4791 = vmatpush.msra.mxu3 %v4485_v60  ;;  %v6829_v60 = vmov 1983009808  }
 0x742   : > { %6451 = vmatmul.msk.f32.vlgmr.msra.gmra.mxu3 %vm2086_vm9, %v9850_v55  ;;  %v4009_v62 = vsel %vm2152_vm10, %v3977_v23, %v3237_v61  ;;  %v3239_v12 = vpop.permute.xlu2 %3238  ;;  %v4989_v2 = vunpack.c.l.s4 %v6829_v60 }
 0x743   : > { %v4041_v58 = vsel %vm2218_vm11, %v4009_v62, %v3365_v9  ;;  %v4986_v62 = vrot.slane %v4532_v15, 4 }
 0x744   : > { %v4074_v51 = vsel %vm4046_vm14, %v4041_v58, %v3493_v43 }
 0x745   : > { %v10192_v54 = vpop.f32.mrf.mxu2 }
 0x747   : > { %v10195_v4 = vpop.f32.mrf.mxu3 }
 0x749   : > { %v3877_v14 = vpop.permute.xlu0 %3876  ;;  %v3621_v6 = vpop.permute.xlu1 %3620 }
 0x74a   : > { %v4107_v25 = vsel %vm4079_vm15, %v4074_v51, %v3621_v6  ;;  %6452 = vmatmul.msk.f32.gmra.mxu3 %vm2086_vm9, %v9772_v50  ;;  %v3623_v47 = vpop.permute.xlu2 %3622  ;;  %v4361_v59 = vpop.f32.mrf.mxu1  ;;  %v4985_v6 = vsel %vm4984_vm3, %v4983_v45, %v4532_v15  ;;  %v4987_v51 = vsel %vm4984_vm3, %v10113_v19, %v4986_v62  ;;  %v5234_v62 = vrot.slane %v10178_v29, 4 }
 0x74b   : > { %v4140_v18 = vsel %vm4112_vm0, %v4107_v25, %v3749_v36  ;;  %v4420_v1 = vmul.f32 %v10093_v53, %v4361_v59  ;;  %v10217_v25 = vunpack.c.0.s8 %v4989_v2  ;;  %v4561_v19 = vpop.f32.mrf.mxu0 }
 0x74c   : > { %v4173_v5 = vsel %vm4145_vm1, %v4140_v18, %v3877_v14  ;;  %v4996_v18 = vrot.slane %v10132_v34, 4 }
 0x74d   : > { %6410 = vmatmul.msk.f32.gmra.mxu1 %vm4187_vm2, %v4173_v5  ;;  %v4455_v7 = vadd.f32 %v10102_v46, %v4420_v1  ;;  %v10206_v31 = vpop.f32.mrf.mxu2  ;;  %v10223_v5 = vperm.slane %v4985_v6, %v10217_v25  ;;  %v4998_v1 = vrot.slane %v4561_v19, 4 }
 0x74f   : > { %v4487_v22 = vmax.f32 %v4455_v7, 0.0  ;;  %v10212_v14 = vpop.f32.mrf.mxu3  ;;  %v5034_v49 = vrot.slane %v10223_v5, 4 }
 0x751   : > { %v3367_v42 = vpop.permute.xlu0 %3366  ;;  %v3111_v63 = vpop.permute.xlu1 %3110 }
 0x752   : > { %6453 = vmatmul.msk.f32.gmra.mxu3 %vm2086_vm9, %v9805_v44  ;;  %v3978_v38 = vsel %vm2086_vm9, %v3946_v28, %v3111_v63  ;;  %v3113_v9 = vpop.permute.xlu2 %3112  ;;  %v11798_v63 = vld [vmem:[#allocation11_spill] sm:$0xff] }
 0x753   : > { %v4010_v30 = vsel %vm2152_vm10, %v3978_v38, %v3239_v12 }
 0x754   : > { %v4042_v13 = vsel %vm2218_vm11, %v4010_v30, %v3367_v42  ;;  %v2634_v42 = vld [vmem:[#allocation3 + $0x158] sm:$0xff] }
 0x755   : > { %v3947_v16 = vsel %vm2020_vm6, %v2634_v42, %v11798_v63 }
 0x756   : > { %v3979_v28 = vsel %vm2086_vm9, %v3947_v16, %v3113_v9 }
 0x757   : > { %v4706_v59 = vpop.f32.mrf.mxu2 }
 0x759   : > { %v3495_v32 = vpop.permute.xlu1 %3494  ;;  %v3751_v20 = vpop.permute.xlu0 %3750 }
 0x75a   : > { %v4364_v17 = vpop.f32.mrf.mxu1  ;;  %6454 = vmatmul.msk.f32.gmra.mxu3 %vm2086_vm9, %v9832_v40  ;;  %v4075_v26 = vsel %vm4046_vm14, %v4042_v13, %v3495_v32  ;;  %v3497_v12 = vpop.permute.xlu2 %3496 }
 0x75b   : > { %v4421_v37 = vmul.f32 %v10093_v53, %v4364_v17  ;;  %v4108_v48 = vsel %vm4079_vm15, %v4075_v26, %v3623_v47  ;;  %v4995_v47 = vperm.slane %v4987_v51, %v10217_v25  ;;  %v4999_v26 = vsel %vm4984_vm3, %v10132_v34, %v4998_v1 }
 0x75c   : > { %v4141_v43 = vsel %vm4112_vm0, %v4108_v48, %v3751_v20  ;;  %v5007_v9 = vperm.slane %v4999_v26, %v10217_v25  ;;  %v10246_v48 = vpop.f32.mrf.mxu3  ;;  %v5008_v34 = vrot.slane %v4706_v59, 4  ;;  %v5022_v51 = vrot.slane %v10185_v52, 4 }
 0x75d   : > { %v4456_v36 = vadd.f32 %v10102_v46, %v4421_v37  ;;  %v5046_v20 = vrot.slane %v4995_v47, 4  ;;  %v5010_v37 = vrot.slane %v10165_v21, 4  ;;  %v5458_v26 = vrot.slane %v10192_v54, 4 }
 0x75f   : > { %v4488_v3 = vmax.f32 %v4456_v36, 0.0  ;;  %v10250_v60 = vsel %vm4984_vm3, %v5007_v9, %v5046_v20  ;;  %v5011_v2 = vsel %vm4984_vm3, %v4706_v59, %v5010_v37  ;;  %v4709_v6 = vpop.f32.mrf.mxu2  ;;  %v11799_v59 = vld [vmem:[#allocation71_spill] sm:$0xff] }
 0x760   : > { %v5232_v16 = vrot.slane %v4709_v6, 4 }
 0x761   : > { %4819 = vmatpush.msrb.mxu2 %v4488_v3  ;;  %v3241_v61 = vpop.permute.xlu0 %3240  ;;  %v3879_v23 = vpop.permute.xlu1 %3878  ;;  %v5044_v3 = vrot.slane %v5007_v9, 4 }
 0x762   : > { %v4174_v58 = vsel %vm4145_vm1, %v4141_v43, %v3879_v23  ;;  %v4011_v32 = vsel %vm2152_vm10, %v3979_v28, %v3241_v61  ;;  %v3881_v7 = vpop.permute.xlu2 %3880 }
 0x763   : > { %6411 = vmatmul.msk.f32.gmra.mxu1 %vm4187_vm2, %v4174_v58  ;;  %4820 = vmatpush.msrb.mxu2 %v4487_v22  ;;  %v10254_v15 = vsel %vm4984_vm3, %v5044_v3, %v4995_v47  ;;  %v5019_v58 = vperm.slane %v5011_v2, %v10217_v25  ;;  %v2635_v47 = vld [vmem:[#allocation3 + $0x168] sm:$0xff]  ;;  %v5233_v2 = vsel %vm4984_vm3, %v5232_v16, %v10178_v29 }
 0x764   : > { %6455 = vmatmul.msk.f32.vlgmr.msrb.gmra.mxu2 %vm2086_vm9, %v9850_v55  ;;  %v4997_v55 = vsel %vm4984_vm3, %v4996_v18, %v4561_v19  ;;  %v5009_v18 = vsel %vm4984_vm3, %v5008_v34, %v10165_v21  ;;  %v6830_v21 = vmov 1934713408  }
 0x765   : > { %v10233_v13 = vperm.slane %v4997_v55, %v10217_v25  ;;  %v10273_v28 = vperm.slane %v5009_v18, %v10217_v25  ;;  %v5037_v55 = vunpack.c.l.s4 %v6830_v21 }
 0x767   : > { %v10242_v36 = vsel %vm4984_vm3, %v10233_v13, %v5034_v49  ;;  %v3948_v49 = vsel %vm2020_vm6, %v2635_v47, %v11799_v59  ;;  %v4712_v18 = vpop.f32.mrf.mxu2  ;;  %v10308_v47 = vunpack.c.0.s8 %v5037_v55 }
 0x768   : > { %v5456_v55 = vrot.slane %v4712_v18, 4 }
 0x769   : > { %v3369_v38 = vpop.permute.xlu1 %3368  ;;  %v3625_v30 = vpop.permute.xlu0 %3624 }
 0x76a   : > { %v4043_v17 = vsel %vm2218_vm11, %v4011_v32, %v3369_v38  ;;  %v3371_v63 = vpop.permute.xlu2 %3370  ;;  %v5070_v38 = vrot.slane %v5019_v58, 4 }
 0x76b   : > { %v4076_v45 = vsel %vm4046_vm14, %v4043_v17, %v3497_v12 }
 0x76c   : > { %6456 = vmatmul.msk.f32.gmra.mxu2 %vm2086_vm9, %v9772_v50  ;;  %v4109_v22 = vsel %vm4079_vm15, %v4076_v45, %v3625_v30  ;;  %v5444_v50 = vrot.slane %v10159_v33, 4  ;;  %v5235_v30 = vsel %vm4984_vm3, %v4709_v6, %v5234_v62  ;;  %v5239_v6 = vperm.slane %v5233_v2, %v10217_v25 }
 0x76e   : > { %v5445_v42 = vsel %vm4984_vm3, %v5444_v50, %v10084_v11 }
 0x76f   : > { %v10279_v17 = vperm.slane %v5445_v42, %v10217_v25 }
 0x770   : > { %v4367_v1 = vpop.f32.mrf.mxu1 }
 0x771   : > { %v3753_v43 = vpop.permute.xlu1 %3752  ;;  %v3115_v61 = vpop.permute.xlu0 %3114  ;;  %v5480_v42 = vrot.slane %v10279_v17, 4 }
 0x772   : > { %v4142_v23 = vsel %vm4112_vm0, %v4109_v22, %v3753_v43  ;;  %v3980_v3 = vsel %vm2086_vm9, %v3948_v49, %v3115_v61  ;;  %v5243_v22 = vperm.slane %v5235_v30, %v10217_v25  ;;  %v5246_v61 = vrot.slane %v10195_v4, 4  ;;  %v3755_v30 = vpop.permute.xlu2 %3754 }
 0x773   : > { %v4175_v12 = vsel %vm4145_vm1, %v4142_v23, %v3881_v7  ;;  %v5058_v7 = vrot.slane %v10273_v28, 4 }
 0x774   : > { %6412 = vmatmul.msk.f32.gmra.mxu1 %vm4187_vm2, %v4175_v12  ;;  %6457 = vmatmul.msk.f32.gmra.mxu2 %vm2086_vm9, %v9805_v44  ;;  %v5432_v44 = vrot.slane %v10139_v24, 4 }
 0x776   : > { %v5433_v12 = vsel %vm4984_vm3, %v5432_v44, %v10075_v27 }
 0x777   : > { %v4735_v19 = vpop.f32.mrf.mxu3  ;;  %v10313_v59 = vperm.slane %v5433_v12, %v10217_v25 }
 0x778   : > { %v5020_v32 = vrot.slane %v4735_v19, 4  ;;  %v5023_v20 = vsel %vm4984_vm3, %v4735_v19, %v5022_v51  ;;  %v5032_v51 = vrot.slane %v10233_v13, 4  ;;  %v5294_v19 = vrot.slane %v5243_v22, 4 }
 0x779   : > { %v5031_v37 = vperm.slane %v5023_v20, %v10217_v25  ;;  %v3243_v9 = vpop.permute.xlu1 %3242  ;;  %v3499_v45 = vpop.permute.xlu0 %3498  ;;  %v5282_v20 = vrot.slane %v5239_v6, 4 }
 0x77a   : > { %v5021_v34 = vsel %vm4984_vm3, %v5020_v32, %v10185_v52  ;;  %v4012_v62 = vsel %vm2152_vm10, %v3980_v3, %v3243_v9 }
 0x77b   : > { %v5027_v43 = vperm.slane %v5021_v34, %v10217_v25  ;;  %v5068_v50 = vrot.slane %v5031_v37, 4  ;;  %v10292_v23 = vsel %vm4984_vm3, %v5031_v37, %v5070_v38  ;;  %v4044_v16 = vsel %vm2218_vm11, %v4012_v62, %v3371_v63 }
 0x77c   : > { %6458 = vmatmul.msk.f32.gmra.mxu2 %vm2086_vm9, %v9832_v40  ;;  %v5470_v40 = vrot.slane %v10212_v14, 4  ;;  %v4422_v38 = vmul.f32 %v10093_v53, %v4367_v1  ;;  %v4077_v44 = vsel %vm4046_vm14, %v4044_v16, %v3499_v45 }
 0x77d   : > { %v10301_v29 = vsel %vm4984_vm3, %v5027_v43, %v5058_v7  ;;  %v10304_v52 = vsel %vm4984_vm3, %v5068_v50, %v5019_v58  ;;  %v5459_v58 = vsel %vm4984_vm3, %v4712_v18, %v5458_v26  ;;  %v5033_v7 = vsel %vm4984_vm3, %v5032_v51, %v10223_v5 }
 0x77e   : > { %v5467_v3 = vperm.slane %v5459_v58, %v10217_v25  ;;  %v4457_v5 = vadd.f32 %v10102_v46, %v4422_v38  ;;  %v5056_v51 = vrot.slane %v5027_v43, 4  ;;  %v5481_v58 = vsel %vm4984_vm3, %v5480_v42, %v10313_v59 }
 0x77f   : > { %v4738_v49 = vpop.f32.mrf.mxu3 }
 0x780   : > { %v5244_v13 = vrot.slane %v4738_v49, 4  ;;  %v5247_v21 = vsel %vm4984_vm3, %v4738_v49, %v5246_v61  ;;  %v5457_v61 = vsel %vm4984_vm3, %v5456_v55, %v10192_v54  ;;  %v5518_v43 = vrot.slane %v5467_v3, 4 }
 0x781   : > { %v5255_v63 = vperm.slane %v5247_v21, %v10217_v25  ;;  %v4370_v32 = vpop.f32.mrf.mxu1  ;;  %v3627_v37 = vpop.permute.xlu1 %3626  ;;  %v5463_v54 = vperm.slane %v5457_v61, %v10217_v25  ;;  %v10352_v21 = vperm.slane %v5033_v7, %v10308_v47  ;;  %v11806_v7 = vld [vmem:[#allocation21_spill] sm:$0xff] }
 0x782   : > { %v5245_v26 = vsel %vm4984_vm3, %v5244_v13, %v10195_v4  ;;  %v4423_v1 = vmul.f32 %v10093_v53, %v4370_v32  ;;  %v4110_v9 = vsel %vm4079_vm15, %v4077_v44, %v3627_v37  ;;  %v3883_v62 = vpop.permute.xlu0 %3882  ;;  %v4489_v13 = vmax.f32 %v4457_v5, 0.0  ;;  %v2636_v32 = vld [vmem:[#allocation3 + $0x170] sm:$0xff] }
 0x783   : > { %v5251_v34 = vperm.slane %v5245_v26, %v10217_v25  ;;  %v5292_v45 = vrot.slane %v5255_v63, 4  ;;  %v10330_v2 = vsel %vm4984_vm3, %v5255_v63, %v5294_v19  ;;  %v4143_v50 = vsel %vm4112_vm0, %v4110_v9, %v3755_v30  ;;  %11804 = vst [vmem:[#allocation92_spill] sm:$0xff] %v10352_v21 }
 0x784   : > { %11800 = vst [vmem:[#allocation56_spill] sm:$0xff] %v10330_v2  ;;  %v4458_v12 = vadd.f32 %v10102_v46, %v4423_v1  ;;  %v4176_v4 = vsel %vm4145_vm1, %v4143_v50, %v3883_v62  ;;  %v5057_v44 = vsel %vm4984_vm3, %v5056_v51, %v10273_v28  ;;  %v5506_v63 = vrot.slane %v5463_v54, 4 }
 0x785   : > { %v5280_v18 = vrot.slane %v5251_v34, 4  ;;  %v10339_v16 = vsel %vm4984_vm3, %v5251_v34, %v5282_v20  ;;  %v10342_v49 = vsel %vm4984_vm3, %v5292_v45, %v5243_v22  ;;  %6413 = vmatmul.msk.f32.gmra.mxu1 %vm4187_vm2, %v4176_v4  ;;  %v10359_v20 = vperm.slane %v5481_v58, %v10308_v47  ;;  %v10372_v34 = vld [vmem:[%s11321_s9] sm:$0xff] }
 0x786   : > { %11801 = vst [vmem:[#allocation135_spill] sm:$0xff] %v10339_v16  ;;  %v4490_v19 = vmax.f32 %v4458_v12, 0.0  ;;  %v3949_v26 = vsel %vm2020_vm6, %v2636_v32, %v11806_v7  ;;  %v5082_v45 = vrot.slane %v10352_v21, 4 }
 0x787   : > { %11802 = vst [vmem:[#allocation13_spill] sm:$0xff] %v10342_v49  ;;  %v10348_v38 = vsel %vm4984_vm3, %v5280_v18, %v5239_v6  ;;  %v4741_v30 = vpop.f32.mrf.mxu3  ;;  %v5530_v61 = vrot.slane %v10359_v20, 4 }
 0x788   : > { %11803 = vst [vmem:[#allocation74_spill] sm:$0xff] %v10348_v38  ;;  %v5468_v55 = vrot.slane %v4741_v30, 4  ;;  %v5471_v22 = vsel %vm4984_vm3, %v4741_v30, %v5470_v40  ;;  %4848 = vmatpush.msrb.mxu3 %v4490_v19  ;;  %v3245_v40 = vpop.permute.xlu2 %3244 }
 0x789   : > { %v5479_v42 = vperm.slane %v5471_v22, %v10217_v25  ;;  %v3117_v6 = vpop.permute.xlu1 %3116  ;;  %11805 = vst [vmem:[#allocation112_spill] sm:$0xff] %v10359_v20 }
 0x78a   : > { %v5469_v37 = vsel %vm4984_vm3, %v5468_v55, %v10212_v14  ;;  %4849 = vmatpush.msrb.mxu3 %v4489_v13  ;;  %v10377_v14 = vperm.slane %v5057_v44, %v10308_v47  ;;  %v3981_v50 = vsel %vm2086_vm9, %v3949_v26, %v3117_v6  ;;  %v3373_v4 = vpop.permute.xlu0 %3372  ;;  %v10417_v26 = vld [vmem:[%s11321_s9 + $0x18] sm:$0xff] }
 0x78b   : > { %v5475_v1 = vperm.slane %v5469_v37, %v10217_v25  ;;  %v5516_v9 = vrot.slane %v5479_v42, 4  ;;  %v10367_v28 = vsel %vm4984_vm3, %v5479_v42, %v5518_v43  ;;  %6459 = vmatmul.msk.f32.vlgmr.msrb.gmra.mxu3 %vm2086_vm9, %v10372_v34  ;;  %v4013_v18 = vsel %vm2152_vm10, %v3981_v50, %v3245_v40  ;;  %v10410_v37 = vld [vmem:[%s11321_s9 + $0x10] sm:$0xff] }
 0x78c   : > { %11807 = vst [vmem:[#allocation122_spill] sm:$0xff] %v10377_v14  ;;  %v5083_v58 = vsel %vm4984_vm3, %v10377_v14, %v5082_v45  ;;  %v4045_v43 = vsel %vm2218_vm11, %v4013_v18, %v3373_v4  ;;  %v5434_v45 = vrot.slane %v10075_v27, 4 }
 0x78d   : > { %v5504_v62 = vrot.slane %v5475_v1, 4  ;;  %v5507_v5 = vsel %vm4984_vm3, %v5475_v1, %v5506_v63  ;;  %v5517_v12 = vsel %vm4984_vm3, %v5516_v9, %v5467_v3  ;;  %v5446_v1 = vrot.slane %v10084_v11, 4 }
 0x78f   : > { %v5505_v51 = vsel %vm4984_vm3, %v5504_v62, %v5463_v54  ;;  %v10398_v54 = vld [vmem:[%s11321_s9 + $0x8] sm:$0xff] }
 0x790   : > { %v10387_v19 = vperm.slane %v5505_v51, %v10308_v47  ;;  %v3629_v55 = vpop.permute.xlu2 %3628  ;;  %v5435_v51 = vsel %vm4984_vm3, %v10139_v24, %v5434_v45  ;;  %v5482_v24 = vrot.slane %v10313_v59, 4 }
 0x791   : > { %v3501_v30 = vpop.permute.xlu1 %3500  ;;  %v5443_v11 = vperm.slane %v5435_v51, %v10217_v25 }
 0x792   : > { %11808 = vst [vmem:[#allocation137_spill] sm:$0xff] %v10387_v19  ;;  %v5531_v13 = vsel %vm4984_vm3, %v10387_v19, %v5530_v61  ;;  %v4078_v3 = vsel %vm4046_vm14, %v4045_v43, %v3501_v30  ;;  %v3757_v42 = vpop.permute.xlu0 %3756  ;;  %v4373_v7 = vpop.f32.mrf.mxu1  ;;  %v5447_v61 = vsel %vm4984_vm3, %v10159_v33, %v5446_v1  ;;  %v5523_v33 = vperm.slane %v5517_v12, %v10308_v47 }
 0x793   : > { %v6570_v22 = vpack.i.bf16 %v5531_v13, %v5083_v58  ;;  %6460 = vmatmul.msk.f32.gmra.mxu3 %vm2086_vm9, %v10398_v54  ;;  %v4111_v44 = vsel %vm4079_vm15, %v4078_v3, %v3629_v55  ;;  %v4424_v40 = vmul.f32 %v10093_v53, %v4373_v7  ;;  %v5455_v58 = vperm.slane %v5447_v61, %v10217_v25 }
 0x794   : > { %v4144_v63 = vsel %vm4112_vm0, %v4111_v44, %v3757_v42  ;;  %v5494_v43 = vrot.slane %v5443_v11, 4  ;;  %v5075_v13 = vperm.slane %v10304_v52, %v10308_v47  ;;  %v5043_v44 = vperm.slane %v10242_v36, %v10308_v47 }
 0x795   : > { %6571 = vrot.lane.b32.xlu1 %v6570_v22, %s11634_s14  ;;  %v4459_v62 = vadd.f32 %v10102_v46, %v4424_v40  ;;  %v5492_v27 = vrot.slane %v5455_v58, 4  ;;  %v5067_v22 = vperm.slane %v10301_v29, %v10308_v47  ;;  %v5515_v42 = vperm.slane %v5507_v5, %v10308_v47 }
 0x796   : > { %v5495_v55 = vsel %vm4984_vm3, %v5455_v58, %v5494_v43  ;;  %v5536_v52 = vrot.slane %v5523_v33, 4  ;;  %v5483_v12 = vsel %vm4984_vm3, %v10279_v17, %v5482_v24  ;;  %v5079_v29 = vperm.slane %v10292_v23, %v10308_v47 }
 0x797   : > { %v4491_v30 = vmax.f32 %v4459_v62, 0.0  ;;  %v5493_v3 = vsel %vm4984_vm3, %v5492_v27, %v5443_v11  ;;  %v5503_v59 = vperm.slane %v5495_v55, %v10308_v47  ;;  %v5527_v36 = vperm.slane %v10367_v28, %v10308_v47 }
 0x798   : > { %v5051_v5 = vperm.slane %v10254_v15, %v10308_v47  ;;  %v5055_v7 = vperm.slane %v10250_v60, %v10308_v47  ;;  %v5086_v40 = vrot.slane %v5043_v44, 4  ;;  %v5491_v1 = vperm.slane %v5483_v12, %v10308_v47 }
 0x799   : > { %v3885_v6 = vpop.permute.xlu1 %3884  ;;  %v5540_v61 = vrot.slane %v5527_v36, 4  ;;  %v5542_v11 = vrot.slane %v5503_v59, 4 }
 0x79a   : > { %v4177_v32 = vsel %vm4145_vm1, %v4144_v63, %v3885_v6  ;;  %v5499_v63 = vperm.slane %v5493_v3, %v10308_v47  ;;  %v5088_v6 = vrot.slane %v5075_v13, 4  ;;  %v5534_v60 = vrot.slane %v5491_v1, 4 }
 0x79b   : > { %6414 = vmatmul.msk.f32.gmra.mxu1 %vm4187_vm2, %v4177_v32  ;;  %6461 = vmatmul.msk.f32.gmra.mxu3 %vm2086_vm9, %v10410_v37  ;;  %v5084_v32 = vrot.slane %v5067_v22, 4  ;;  %v5090_v62 = vrot.slane %v5051_v5, 4 }
 0x79c   : > { %v5538_v45 = vrot.slane %v5499_v63, 4  ;;  %v10462_v17 = vsel %vm4984_vm3, %v5088_v6, %v5051_v5  ;;  %v10465_v23 = vsel %vm4984_vm3, %v5536_v52, %v5499_v63  ;;  %v10481_v58 = vsel %vm4984_vm3, %v5515_v42, %v5534_v60 }
 0x79d   : > { %v10468_v28 = vsel %vm4984_vm3, %v5084_v32, %v5043_v44  ;;  %11810 = vst [vmem:[#allocation19_spill] sm:$0xff] %v10481_v58  ;;  %v10488_v24 = vsel %vm4984_vm3, %v5075_v13, %v5090_v62  ;;  %v10507_v13 = vsel %vm4984_vm3, %v5540_v61, %v5503_v59  ;;  %v10531_v61 = vpop.f32.mrf.mxu2 }
 0x79e   : > { %11811 = vst [vmem:[#allocation64_spill] sm:$0xff] %v10488_v24  ;;  %v10491_v3 = vsel %vm4984_vm3, %v5523_v33, %v5538_v45 }
 0x79f   : > { %11812 = vst [vmem:[#allocation98_spill] sm:$0xff] %v10491_v3 }
 0x7a0   : > { %11816 = vst [vmem:[#allocation159_spill] sm:$0xff] %v10507_v13 }
 0x7a3   : > { %6462 = vmatmul.msk.f32.gmra.mxu3 %vm2086_vm9, %v10417_v26 }
 0x7a8   : > { %v4376_v9 = vpop.f32.mrf.mxu1 }
 0x7a9   : > { %v4425_v50 = vmul.f32 %v10093_v53, %v4376_v9  ;;  %v5532_v9 = vrot.slane %v5515_v42, 4 }
 0x7ab   : > { %v4460_v4 = vadd.f32 %v10102_v46, %v4425_v50  ;;  %v10473_v50 = vsel %vm4984_vm3, %v5532_v9, %v5491_v1 }
 0x7ad   : > { %v4492_v18 = vmax.f32 %v4460_v4, 0.0  ;;  %v5092_v4 = vrot.slane %v5079_v29, 4 }
 0x7af   : > { %4877 = vmatpush.msra.mxu2 %v4492_v18  ;;  %v10478_v18 = vsel %vm4984_vm3, %v5067_v22, %v5086_v40  ;;  %v10497_v22 = vsel %vm4984_vm3, %v5527_v36, %v5542_v11  ;;  %v10504_v63 = vsel %vm4984_vm3, %v5092_v4, %v5055_v7  ;;  %v10529_v4 = vpop.f32.mrf.mxu3  ;;  %v4764_v11 = vpop.f32.mrf.mxu2 }
 0x7b0   : > { %11809 = vst [vmem:[#allocation157_spill] sm:$0xff] %v10478_v18 }
 0x7b1   : > { %4878 = vmatpush.msra.mxu2 %v4491_v30  ;;  %v5094_v30 = vrot.slane %v5055_v7, 4  ;;  %11814 = vst [vmem:[#allocation51_spill] sm:$0xff] %v10497_v22 }
 0x7b2   : > { %6463 = vmatmul.msk.f32.vlgmr.msra.gmra.mxu2 %vm2086_vm9, %v10372_v34  ;;  %11815 = vst [vmem:[#allocation143_spill] sm:$0xff] %v10504_v63 }
 0x7b3   : > { %v10494_v55 = vsel %vm4984_vm3, %v5079_v29, %v5094_v30 }
 0x7b4   : > { %11813 = vst [vmem:[#allocation114_spill] sm:$0xff] %v10494_v55 }
 0x7b9   : > { %v4379_v27 = vpop.f32.mrf.mxu1 }
 0x7ba   : > { %6464 = vmatmul.msk.f32.gmra.mxu2 %vm2086_vm9, %v10398_v54  ;;  %v4426_v6 = vmul.f32 %v10093_v53, %v4379_v27 }
 0x7bc   : > { %v4461_v29 = vadd.f32 %v10102_v46, %v4426_v6  ;;  %v4767_v6 = vpop.f32.mrf.mxu2 }
 0x7be   : > { %v4493_v32 = vmax.f32 %v4461_v29, 0.0 }
 0x7c2   : > { %6465 = vmatmul.msk.f32.gmra.mxu2 %vm2086_vm9, %v10410_v37 }
 0x7c4   : > { %v10541_v29 = vpop.f32.mrf.mxu2 }
 0x7c5   : > { %v4793_v30 = vpop.f32.mrf.mxu3 }
 0x7ca   : > { %v4382_v52 = vpop.f32.mrf.mxu1  ;;  %6466 = vmatmul.msk.f32.gmra.mxu2 %vm2086_vm9, %v10417_v26 }
 0x7cb   : > { %v4427_v12 = vmul.f32 %v10093_v53, %v4382_v52 }
 0x7cd   : > { %v4462_v36 = vadd.f32 %v10102_v46, %v4427_v12  ;;  %v4796_v27 = vpop.f32.mrf.mxu3 }
 0x7ce   : > { %v5334_v43 = vrot.slane %v4796_v27, 4 }
 0x7cf   : > { %v4494_v5 = vmax.f32 %v4462_v36, 0.0 }
 0x7d1   : > { %4906 = vmatpush.msra.mxu3 %v4494_v5 }
 0x7d3   : > { %4907 = vmatpush.msra.mxu3 %v4493_v32 }
 0x7d4   : > { %6467 = vmatmul.msk.f32.vlgmr.msra.gmra.mxu3 %vm2086_vm9, %v10372_v34 }
 0x7d5   : > { %v10539_v12 = vpop.f32.mrf.mxu3 }
 0x7dc   : > { %6468 = vmatmul.msk.f32.gmra.mxu3 %vm2086_vm9, %v10398_v54 }
 0x7e0   : > { %v4385_v59 = vpop.f32.mrf.mxu1 }
 0x7e1   : > { %v4428_v7 = vmul.f32 %v10093_v53, %v4385_v59  ;;  %v10547_v59 = vpop.f32.mrf.mxu3 }
 0x7e3   : > { %v4463_v9 = vadd.f32 %v10102_v46, %v4428_v7  ;;  %v10549_v7 = vpop.f32.mrf.mxu2 }
 0x7e4   : > { %6469 = vmatmul.msk.f32.gmra.mxu3 %vm2086_vm9, %v10410_v37 }
 0x7e5   : > { %v4495_v62 = vmax.f32 %v4463_v9, 0.0 }
 0x7ec   : > { %6470 = vmatmul.msk.f32.gmra.mxu3 %vm2086_vm9, %v10417_v26 }
 0x7f1   : > { %v4388_v40 = vpop.f32.mrf.mxu1 }
 0x7f2   : > { %v4429_v1 = vmul.f32 %v10093_v53, %v4388_v40 }
 0x7f4   : > { %v4464_v45 = vadd.f32 %v10102_v46, %v4429_v1 }
 0x7f6   : > { %v4496_v60 = vmax.f32 %v4464_v45, 0.0  ;;  %v5110_v45 = vrot.slane %v4793_v30, 4 }
 0x7f8   : > { %4935 = vmatpush.msrb.mxu2 %v4496_v60 }
 0x7fa   : > { %4936 = vmatpush.msrb.mxu2 %v4495_v62  ;;  %v5098_v62 = vrot.slane %v4764_v11, 4 }
 0x7fb   : > { %6471 = vmatmul.msk.f32.vlgmr.msrb.gmra.mxu2 %vm2086_vm9, %v10372_v34 }
 0x802   : > { %v4391_v52 = vpop.f32.mrf.mxu1 }
 0x803   : > { %6472 = vmatmul.msk.f32.gmra.mxu2 %vm2086_vm9, %v10398_v54  ;;  %v4430_v36 = vmul.f32 %v10093_v53, %v4391_v52 }
 0x805   : > { %v4465_v40 = vadd.f32 %v10102_v46, %v4430_v36 }
 0x807   : > { %v4497_v60 = vmax.f32 %v4465_v40, 0.0 }
 0x80b   : > { %6473 = vmatmul.msk.f32.gmra.mxu2 %vm2086_vm9, %v10410_v37 }
 0x80e   : > { %v4851_v33 = vpop.f32.mrf.mxu3 }
 0x80f   : > { %v5108_v52 = vrot.slane %v4851_v33, 4 }
 0x813   : > { %6474 = vmatmul.msk.f32.gmra.mxu2 %vm2086_vm9, %v10417_v26 }
 0x818   : > { %v4394_v5 = vpop.f32.mrf.mxu1 }
 0x819   : > { %v4431_v32 = vmul.f32 %v10093_v53, %v4394_v5  ;;  %v5111_v53 = vsel %vm4984_vm3, %v4851_v33, %v5110_v45  ;;  %v4822_v5 = vpop.f32.mrf.mxu2  ;;  %v5322_v33 = vrot.slane %v4767_v6, 4 }
 0x81a   : > { %v5119_v44 = vperm.slane %v5111_v53, %v10217_v25  ;;  %v5096_v42 = vrot.slane %v4822_v5, 4  ;;  %v5099_v36 = vsel %vm4984_vm3, %v4822_v5, %v5098_v62 }
 0x81b   : > { %v4466_v1 = vadd.f32 %v10102_v46, %v4431_v32  ;;  %v5109_v46 = vsel %vm4984_vm3, %v5108_v52, %v4793_v30  ;;  %v5107_v32 = vperm.slane %v5099_v36, %v10217_v25  ;;  %v4854_v52 = vpop.f32.mrf.mxu3 }
 0x81c   : > { %v5115_v40 = vperm.slane %v5109_v46, %v10217_v25  ;;  %v5335_v36 = vsel %vm4984_vm3, %v4854_v52, %v5334_v43 }
 0x81d   : > { %v4498_v9 = vmax.f32 %v4466_v1, 0.0  ;;  %v5156_v1 = vrot.slane %v5119_v44, 4 }
 0x81e   : > { %v5144_v45 = vrot.slane %v5115_v40, 4 }
 0x81f   : > { %4964 = vmatpush.msrb.mxu3 %v4498_v9  ;;  %v5097_v9 = vsel %vm4984_vm3, %v5096_v42, %v4764_v11  ;;  %v10564_v53 = vsel %vm4984_vm3, %v5156_v1, %v5107_v32  ;;  %v5332_v11 = vrot.slane %v4854_v52, 4  ;;  %v5343_v1 = vperm.slane %v5335_v36, %v10217_v25 }
 0x820   : > { %v5546_v52 = vrot.slane %v10541_v29, 4 }
 0x821   : > { %4965 = vmatpush.msrb.mxu3 %v4497_v60  ;;  %v5158_v60 = vrot.slane %v5107_v32, 4  ;;  %v4825_v5 = vpop.f32.mrf.mxu2 }
 0x822   : > { %6475 = vmatmul.msk.f32.vlgmr.msrb.gmra.mxu3 %vm2086_vm9, %v10372_v34  ;;  %v5103_v34 = vperm.slane %v5097_v9, %v10217_v25  ;;  %v5320_v46 = vrot.slane %v4825_v5, 4  ;;  %v5323_v32 = vsel %vm4984_vm3, %v4825_v5, %v5322_v33 }
 0x823   : > { %v10567_v62 = vsel %vm4984_vm3, %v5119_v44, %v5158_v60  ;;  %v5333_v44 = vsel %vm4984_vm3, %v5332_v11, %v4796_v27  ;;  %v5331_v9 = vperm.slane %v5323_v32, %v10217_v25  ;;  %v4857_v36 = vpop.f32.mrf.mxu3 }
 0x824   : > { %v5146_v51 = vrot.slane %v5103_v34, 4  ;;  %v10570_v30 = vsel %vm4984_vm3, %v5144_v45, %v5103_v34  ;;  %v5339_v34 = vperm.slane %v5333_v44, %v10217_v25 }
 0x825   : > { %v5382_v45 = vrot.slane %v5331_v9, 4 }
 0x826   : > { %v10575_v42 = vsel %vm4984_vm3, %v5115_v40, %v5146_v51  ;;  %v5558_v51 = vrot.slane %v10539_v12, 4  ;;  %v5380_v40 = vrot.slane %v5343_v1, 4  ;;  %v5368_v43 = vrot.slane %v5339_v34, 4 }
 0x827   : > { %v10589_v11 = vsel %vm4984_vm3, %v5343_v1, %v5382_v45 }
 0x828   : > { %v5381_v27 = vsel %vm4984_vm3, %v5380_v40, %v5331_v9  ;;  %v5559_v32 = vsel %vm4984_vm3, %v4857_v36, %v5558_v51 }
 0x829   : > { %v4828_v44 = vpop.f32.mrf.mxu2 }
 0x82a   : > { %6476 = vmatmul.msk.f32.gmra.mxu3 %vm2086_vm9, %v10398_v54  ;;  %v5321_v54 = vsel %vm4984_vm3, %v5320_v46, %v4767_v6  ;;  %v5556_v46 = vrot.slane %v4857_v36, 4  ;;  %v5544_v9 = vrot.slane %v4828_v44, 4  ;;  %v5547_v40 = vsel %vm4984_vm3, %v4828_v44, %v5546_v52 }
 0x82b   : > { %v5327_v60 = vperm.slane %v5321_v54, %v10217_v25  ;;  %v5567_v54 = vperm.slane %v5559_v32, %v10217_v25 }
 0x82c   : > { %v5557_v1 = vsel %vm4984_vm3, %v5556_v46, %v10539_v12 }
 0x82d   : > { %v5370_v33 = vrot.slane %v5327_v60, 4  ;;  %v10592_v5 = vsel %vm4984_vm3, %v5368_v43, %v5327_v60  ;;  %v5563_v60 = vperm.slane %v5557_v1, %v10217_v25  ;;  %v5604_v45 = vrot.slane %v5567_v54, 4  ;;  %v4860_v1 = vpop.f32.mrf.mxu3 }
 0x82e   : > { %v5782_v43 = vrot.slane %v10547_v59, 4 }
 0x82f   : > { %v10597_v6 = vsel %vm4984_vm3, %v5339_v34, %v5370_v33  ;;  %v5555_v34 = vperm.slane %v5547_v40, %v10217_v25  ;;  %v5770_v33 = vrot.slane %v10549_v7, 4  ;;  %v5592_v36 = vrot.slane %v5563_v60, 4 }
 0x830   : > { %v5780_v40 = vrot.slane %v4860_v1, 4 }
 0x831   : > { %v5605_v32 = vsel %vm4984_vm3, %v5604_v45, %v5555_v34  ;;  %v5606_v12 = vrot.slane %v5555_v34, 4 }
 0x832   : > { %6477 = vmatmul.msk.f32.gmra.mxu3 %vm2086_vm9, %v10410_v37  ;;  %v5545_v37 = vsel %vm4984_vm3, %v5544_v9, %v10541_v29  ;;  %v4831_v9 = vpop.f32.mrf.mxu2 }
 0x833   : > { %v5551_v51 = vperm.slane %v5545_v37, %v10217_v25  ;;  %v5607_v44 = vsel %vm4984_vm3, %v5567_v54, %v5606_v12  ;;  %v5783_v37 = vsel %vm4984_vm3, %v4860_v1, %v5782_v43  ;;  %v5768_v15 = vrot.slane %v4831_v9, 4 }
 0x834   : > { %v5771_v20 = vsel %vm4984_vm3, %v4831_v9, %v5770_v33  ;;  %v5791_v45 = vperm.slane %v5783_v37, %v10217_v25  ;;  %v5781_v54 = vsel %vm4984_vm3, %v5780_v40, %v10547_v59 }
 0x835   : > { %v5594_v46 = vrot.slane %v5551_v51, 4  ;;  %v5593_v52 = vsel %vm4984_vm3, %v5592_v36, %v5551_v51  ;;  %v5779_v34 = vperm.slane %v5771_v20, %v10217_v25  ;;  %v5769_v51 = vsel %vm4984_vm3, %v5768_v15, %v10549_v7 }
 0x836   : > { %v5775_v36 = vperm.slane %v5769_v51, %v10217_v25  ;;  %v10674_v14 = vperm.slane %v5593_v52, %v10308_v47 }
 0x837   : > { %v5595_v29 = vsel %vm4984_vm3, %v5563_v60, %v5594_v46  ;;  %v5828_v60 = vrot.slane %v5791_v45, 4  ;;  %v5830_v12 = vrot.slane %v5779_v34, 4 }
 0x838   : > { %v5818_v46 = vrot.slane %v5775_v36, 4 }
 0x839   : > { %v5829_v33 = vsel %vm4984_vm3, %v5828_v60, %v5779_v34  ;;  %v5831_v1 = vsel %vm4984_vm3, %v5791_v45, %v5830_v12  ;;  %v10643_v45 = vperm.slane %v10570_v30, %v10308_v47  ;;  %v10651_v60 = vperm.slane %v10567_v62, %v10308_v47 }
 0x83a   : > { %6478 = vmatmul.msk.f32.gmra.mxu3 %vm2086_vm9, %v10417_v26  ;;  %v5787_v26 = vperm.slane %v5781_v54, %v10217_v25  ;;  %v4880_v59 = vpop.f32.mrf.mxu2  ;;  %v10656_v12 = vperm.slane %v5381_v27, %v10308_v47  ;;  %v10664_v30 = vperm.slane %v10592_v5, %v10308_v47  ;;  %v10671_v62 = vperm.slane %v5605_v32, %v10308_v47 }
 0x83b   : > { %v10677_v27 = vperm.slane %v5607_v44, %v10308_v47  ;;  %v11817_v57 = vrot.slane %v10651_v60, 4 }
 0x83c   : > { %v5816_v43 = vrot.slane %v5787_v26, 4  ;;  %v10631_v9 = vsel %vm4984_vm3, %v5787_v26, %v5818_v46  ;;  %v10647_v26 = vperm.slane %v10564_v53, %v10308_v47  ;;  %v10660_v46 = vperm.slane %v10575_v42, %v10308_v47 }
 0x83d   : > { %v10668_v53 = vperm.slane %v10589_v11, %v10308_v47  ;;  %v10681_v42 = vperm.slane %v10597_v6, %v10308_v47  ;;  %v10692_v6 = vperm.slane %v5595_v29, %v10308_v47  ;;  %v10697_v11 = vperm.slane %v5829_v33, %v10308_v47 }
 0x83e   : > { %v5817_v20 = vsel %vm4984_vm3, %v5816_v43, %v5775_v36  ;;  %v5122_v43 = vrot.slane %v4880_v59, 4 }
 0x83f   : > { %v10709_v24 = vperm.slane %v5817_v20, %v10308_v47 }
 0x842   : > { %v4883_v40 = vpop.f32.mrf.mxu2 }
 0x843   : > { %v5346_v63 = vrot.slane %v4883_v40, 4 }
 0x84a   : > { %v10633_v15 = vpop.f32.mrf.mxu2 }
 0x84b   : > { %v5570_v38 = vrot.slane %v10633_v15, 4 }
 0x852   : > { %v10635_v7 = vpop.f32.mrf.mxu2 }
 0x853   : > { %v5794_v16 = vrot.slane %v10635_v7, 4 }
 0x857   : > { %v4909_v37 = vpop.f32.mrf.mxu3 }
 0x858   : > { %v5134_v5 = vrot.slane %v4909_v37, 4 }
 0x85f   : > { %v10637_v51 = vpop.f32.mrf.mxu3 }
 0x867   : > { %v10639_v19 = vpop.f32.mrf.mxu3 }
 0x86f   : > { %v10653_v36 = vpop.f32.mrf.mxu3 }
 0x87e   : > { %v4938_v54 = vpop.f32.mrf.mxu2 }
 0x87f   : > { %v5120_v49 = vrot.slane %v4938_v54, 4  ;;  %v5123_v52 = vsel %vm4984_vm3, %v4938_v54, %v5122_v43  ;;  %v10702_v43 = vperm.slane %v5831_v1, %v10308_v47 }
 0x880   : > { %v5131_v13 = vperm.slane %v5123_v52, %v10217_v25 }
 0x881   : > { %v5121_v29 = vsel %vm4984_vm3, %v5120_v49, %v4880_v59 }
 0x882   : > { %v5127_v49 = vperm.slane %v5121_v29, %v10217_v25 }
 0x886   : > { %v4941_v21 = vpop.f32.mrf.mxu2 }
 0x887   : > { %v5344_v44 = vrot.slane %v4941_v21, 4  ;;  %v5347_v2 = vsel %vm4984_vm3, %v4941_v21, %v5346_v63  ;;  %v5182_v21 = vrot.slane %v5131_v13, 4 }
 0x888   : > { %v5355_v63 = vperm.slane %v5347_v2, %v10217_v25  ;;  %v5170_v2 = vrot.slane %v5127_v49, 4 }
 0x889   : > { %v5345_v18 = vsel %vm4984_vm3, %v5344_v44, %v4883_v40  ;;  %v10731_v40 = vperm.slane %v10631_v9, %v10308_v47 }
 0x88a   : > { %v5406_v44 = vrot.slane %v5355_v63, 4 }
 0x88e   : > { %v4944_v34 = vpop.f32.mrf.mxu2 }
 0x88f   : > { %v5568_v33 = vrot.slane %v4944_v34, 4  ;;  %v5571_v1 = vsel %vm4984_vm3, %v4944_v34, %v5570_v38  ;;  %v5351_v38 = vperm.slane %v5345_v18, %v10217_v25  ;;  %v5582_v18 = vrot.slane %v10639_v19, 4 }
 0x891   : > { %v5569_v58 = vsel %vm4984_vm3, %v5568_v33, %v10633_v15 }
 0x896   : > { %v4947_v32 = vpop.f32.mrf.mxu2 }
 0x897   : > { %v5792_v54 = vrot.slane %v4947_v32, 4 }
 0x899   : > { %v5793_v29 = vsel %vm4984_vm3, %v5792_v54, %v10635_v7 }
 0x89a   : > { %v10744_v34 = vperm.slane %v5793_v29, %v10217_v25 }
 0x8a5   : > { %v4967_v3 = vpop.f32.mrf.mxu3 }
 0x8a6   : > { %v5132_v59 = vrot.slane %v4967_v3, 4  ;;  %v5135_v52 = vsel %vm4984_vm3, %v4967_v3, %v5134_v5  ;;  %v5795_v3 = vsel %vm4984_vm3, %v4947_v32, %v5794_v16 }
 0x8a7   : > { %v5143_v20 = vperm.slane %v5135_v52, %v10217_v25  ;;  %v5358_v52 = vrot.slane %v10637_v51, 4  ;;  %v10747_v9 = vperm.slane %v5795_v3, %v10217_v25 }
 0x8a8   : > { %v5133_v55 = vsel %vm4984_vm3, %v5132_v59, %v4909_v37  ;;  %v10736_v37 = vperm.slane %v5571_v1, %v10217_v25 }
 0x8a9   : > { %v5139_v5 = vperm.slane %v5133_v55, %v10217_v25  ;;  %v5180_v22 = vrot.slane %v5143_v20, 4  ;;  %v5183_v16 = vsel %vm4984_vm3, %v5143_v20, %v5182_v21  ;;  %v10741_v55 = vperm.slane %v5569_v58, %v10217_v25 }
 0x8aa   : > { %v5191_v58 = vperm.slane %v5183_v16, %v10308_v47  ;;  %v5394_v21 = vrot.slane %v5351_v38, 4  ;;  %v5630_v20 = vrot.slane %v10736_v37, 4 }
 0x8ab   : > { %v5181_v7 = vsel %vm4984_vm3, %v5180_v22, %v5131_v13  ;;  %v5171_v32 = vsel %vm4984_vm3, %v5139_v5, %v5170_v2  ;;  %v5168_v33 = vrot.slane %v5139_v5, 4  ;;  %v5618_v2 = vrot.slane %v10741_v55, 4 }
 0x8ac   : > { %v5187_v13 = vperm.slane %v5181_v7, %v10308_v47  ;;  %v5179_v29 = vperm.slane %v5171_v32, %v10308_v47  ;;  %v5204_v32 = vrot.slane %v5191_v58, 4  ;;  %v10770_v15 = vsel %vm4984_vm3, %v5191_v58, %v11817_v57 }
 0x8ad   : > { %v4970_v22 = vpop.f32.mrf.mxu3  ;;  %v5169_v16 = vsel %vm4984_vm3, %v5168_v33, %v5127_v49 }
 0x8ae   : > { %v5356_v1 = vrot.slane %v4970_v22, 4  ;;  %v5359_v59 = vsel %vm4984_vm3, %v4970_v22, %v5358_v52  ;;  %v5200_v41 = vrot.slane %v5187_v13, 4  ;;  %v5196_v49 = vrot.slane %v5179_v29, 4 }
 0x8af   : > { %v5367_v3 = vperm.slane %v5359_v59, %v10217_v25 }
 0x8b0   : > { %v5357_v7 = vsel %vm4984_vm3, %v5356_v1, %v10637_v51 }
 0x8b1   : > { %v5363_v52 = vperm.slane %v5357_v7, %v10217_v25  ;;  %v5404_v22 = vrot.slane %v5367_v3, 4  ;;  %v5407_v54 = vsel %vm4984_vm3, %v5367_v3, %v5406_v44  ;;  %v10777_v44 = vperm.slane %v5169_v16, %v10308_v47 }
 0x8b2   : > { %v5415_v59 = vperm.slane %v5407_v54, %v10308_v47  ;;  %v11818_v54 = vrot.slane %v10668_v53, 4 }
 0x8b3   : > { %v5392_v5 = vrot.slane %v5363_v52, 4  ;;  %v5395_v39 = vsel %vm4984_vm3, %v5363_v52, %v5394_v21  ;;  %v5405_v51 = vsel %vm4984_vm3, %v5404_v22, %v5355_v63  ;;  %v11819_v21 = vrot.slane %v10660_v46, 4 }
 0x8b4   : > { %v5403_v33 = vperm.slane %v5395_v39, %v10308_v47  ;;  %v5411_v1 = vperm.slane %v5405_v51, %v10308_v47  ;;  %v10782_v3 = vsel %vm4984_vm3, %v5415_v59, %v11818_v54  ;;  %v5428_v58 = vrot.slane %v5415_v59, 4 }
 0x8b5   : > { %v5393_v57 = vsel %vm4984_vm3, %v5392_v5, %v5351_v38  ;;  %v4973_v7 = vpop.f32.mrf.mxu3  ;;  %v10788_v63 = vsel %vm4984_vm3, %v5179_v29, %v11819_v21  ;;  %v11820_v39 = vrot.slane %v10647_v26, 4  ;;  %v11821_v59 = vrot.slane %v10656_v12, 4 }
 0x8b6   : > { %v5399_v16 = vperm.slane %v5393_v57, %v10308_v47  ;;  %v5424_v22 = vrot.slane %v5411_v1, 4  ;;  %v5580_v51 = vrot.slane %v4973_v7, 4  ;;  %v5583_v54 = vsel %vm4984_vm3, %v4973_v7, %v5582_v18 }
 0x8b7   : > { %v10793_v52 = vsel %vm4984_vm3, %v5187_v13, %v11820_v39  ;;  %v5591_v38 = vperm.slane %v5583_v54, %v10217_v25  ;;  %v5420_v5 = vrot.slane %v5403_v33, 4  ;;  %v10801_v35 = vsel %vm4984_vm3, %v5411_v1, %v11821_v59 }
 0x8b8   : > { %v11822_v29 = vrot.slane %v10681_v42, 4  ;;  %v5581_v13 = vsel %vm4984_vm3, %v5580_v51, %v10639_v19  ;;  %v5416_v57 = vrot.slane %v5399_v16, 4  ;;  %v11823_v39 = vrot.slane %v10664_v30, 4 }
 0x8b9   : > { %v10817_v7 = vsel %vm4984_vm3, %v5424_v22, %v10656_v12  ;;  %v5587_v1 = vperm.slane %v5581_v13, %v10217_v25  ;;  %v5628_v54 = vrot.slane %v5591_v38, 4  ;;  %v5631_v59 = vsel %vm4984_vm3, %v5591_v38, %v5630_v20 }
 0x8ba   : > { %v10806_v21 = vsel %vm4984_vm3, %v5403_v33, %v11822_v29  ;;  %v10813_v18 = vsel %vm4984_vm3, %v5399_v16, %v11823_v39  ;;  %v10823_v33 = vsel %vm4984_vm3, %v5420_v5, %v10681_v42  ;;  %v5639_v19 = vperm.slane %v5631_v59, %v10308_v47 }
 0x8bb   : > { %v5201_v51 = vsel %vm4984_vm3, %v5200_v41, %v10647_v26  ;;  %v10830_v16 = vsel %vm4984_vm3, %v5416_v57, %v10664_v30  ;;  %v10834_v12 = vsel %vm4984_vm3, %v5428_v58, %v10668_v53  ;;  %v5616_v22 = vrot.slane %v5587_v1, 4 }
 0x8bc   : > { %v5619_v20 = vsel %vm4984_vm3, %v5587_v1, %v5618_v2  ;;  %v5629_v42 = vsel %vm4984_vm3, %v5628_v54, %v10736_v37  ;;  %v5197_v38 = vsel %vm4984_vm3, %v5196_v49, %v10660_v46  ;;  %v11824_v26 = vrot.slane %v10677_v27, 4 }
 0x8bd   : > { %v5627_v5 = vperm.slane %v5619_v20, %v10308_v47  ;;  %v5635_v41 = vperm.slane %v5629_v42, %v10308_v47  ;;  %v10850_v53 = vsel %vm4984_vm3, %v5204_v32, %v10651_v60  ;;  %v5617_v2 = vsel %vm4984_vm3, %v5616_v22, %v10741_v55  ;;  %v4976_v58 = vpop.f32.mrf.mxu3 }
 0x8be   : > { %v10846_v30 = vsel %vm4984_vm3, %v5639_v19, %v11824_v26  ;;  %v5652_v37 = vrot.slane %v5639_v19, 4  ;;  %v11825_v46 = vrot.slane %v10643_v45, 4  ;;  %v5804_v57 = vrot.slane %v4976_v58, 4 }
 0x8bf   : > { %v6615_v29 = vpack.i.bf16 %v10846_v30, %v10770_v15  ;;  %v5648_v13 = vrot.slane %v5635_v41, 4  ;;  %v11826_v39 = vrot.slane %v10653_v36, 4  ;;  %v5644_v32 = vrot.slane %v5627_v5, 4  ;;  %v11842_v15 = vld [vmem:[#allocation157_spill] sm:$0xff] }
 0x8c0   : > { %v5195_v49 = vsel %vm4984_vm3, %v10777_v44, %v11825_v46  ;;  %v10865_v55 = vperm.slane %v5617_v2, %v10308_v47  ;;  %v11827_v54 = vrot.slane %v10692_v6, 4  ;;  %v11828_v19 = vrot.slane %v10671_v62, 4 }
 0x8c1   : > { %v5807_v60 = vsel %vm4984_vm3, %v4976_v58, %v11826_v39  ;;  %v5805_v20 = vsel %vm4984_vm3, %v5804_v57, %v10653_v36  ;;  %v5649_v42 = vsel %vm4984_vm3, %v5648_v13, %v10671_v62  ;;  %v5645_v26 = vsel %vm4984_vm3, %v5644_v32, %v10692_v6 }
 0x8c2   : > { %v5815_v1 = vperm.slane %v5807_v60, %v10217_v25  ;;  %v5647_v59 = vsel %vm4984_vm3, %v5627_v5, %v11827_v54  ;;  %v10873_v22 = vsel %vm4984_vm3, %v5635_v41, %v11828_v19  ;;  %v5811_v58 = vperm.slane %v5805_v20, %v10217_v25 }
 0x8c3   : > { %v6575_v2 = vpack.i.bf16 %v5647_v59, %v10788_v63  ;;  %v11829_v5 = vrot.slane %v10747_v9, 4  ;;  %v6585_v41 = vpack.i.bf16 %v5649_v42, %v5201_v51  ;;  %v6565_v54 = vpack.i.bf16 %v5645_v26, %v5197_v38 }
 0x8c4   : > { %v5852_v46 = vrot.slane %v5815_v1, 4  ;;  %v11830_v36 = vrot.slane %v10674_v14, 4  ;;  %v6595_v6 = vpack.i.bf16 %v10873_v22, %v10793_v52  ;;  %v5840_v63 = vrot.slane %v5811_v58, 4 }
 0x8c5   : > { %v5855_v39 = vsel %vm4984_vm3, %v5815_v1, %v11829_v5  ;;  %v11831_v13 = vrot.slane %v10744_v34, 4  ;;  %6586 = vrot.lane.b32.xlu1 %v6585_v41, %s11780_s0  ;;  %6566 = vrot.lane.b32.xlu0 %v6565_v54, %s11758_s30  ;;  %v5653_v52 = vsel %vm4984_vm3, %v5652_v37, %v10677_v27  ;;  %v5870_v22 = vrot.slane %v10731_v40, 4 }
 0x8c6   : > { %v5863_v60 = vperm.slane %v5855_v39, %v10308_v47  ;;  %v5643_v62 = vsel %vm4984_vm3, %v10865_v55, %v11830_v36  ;;  %v5853_v32 = vsel %vm4984_vm3, %v5852_v46, %v10747_v9  ;;  %v5841_v19 = vsel %vm4984_vm3, %v5840_v63, %v10744_v34 }
 0x8c7   : > { %v5843_v57 = vsel %vm4984_vm3, %v5811_v58, %v11831_v13  ;;  %v6560_v51 = vpack.i.bf16 %v5643_v62, %v5195_v49  ;;  %v5859_v1 = vperm.slane %v5853_v32, %v10308_v47  ;;  %v6605_v9 = vpack.i.bf16 %v5653_v52, %v10850_v53 }
 0x8c8   : > { %v5851_v38 = vperm.slane %v5843_v57, %v10308_v47  ;;  %v5876_v59 = vrot.slane %v5863_v60, 4  ;;  %v11832_v49 = vrot.slane %v10702_v43, 4  ;;  %v5847_v42 = vperm.slane %v5841_v19, %v10308_v47 }
 0x8c9   : > { %6561 = vrot.lane.b32.xlu2 %v6560_v51, %s11634_s14  ;;  %v5872_v26 = vrot.slane %v5859_v1, 4  ;;  %v11833_v27 = vrot.slane %v10697_v11, 4  ;;  %v11835_v32 = vpack.i.bf16 %v10465_v23, %v10462_v17  ;;  %v5220_v23 = vrot.slane %v10145_v56, 4  ;;  %s6833_s14 = smov 104  }
 0x8ca   : > { %v10912_v20 = vsel %vm4984_vm3, %v5863_v60, %v11832_v49  ;;  %v5868_v58 = vrot.slane %v5851_v38, 4  ;;  %v10923_v53 = vsel %vm4984_vm3, %v5851_v38, %v5870_v22  ;;  %v10927_v46 = vsel %vm4984_vm3, %v5876_v59, %v10702_v43  ;;  %v11838_v22 = vld [vmem:[#allocation25_spill] sm:$0xff] }
 0x8cb   : > { %v10918_v37 = vsel %vm4984_vm3, %v5859_v1, %v11833_v27  ;;  %v5864_v41 = vrot.slane %v5847_v42, 4  ;;  %v11834_v60 = vrot.slane %v10709_v24, 4  ;;  %v6655_v36 = vpack.i.bf16 %v10923_v53, %v10806_v21  ;;  %v11840_v27 = vld [vmem:[#allocation66_spill] sm:$0xff] }
 0x8cc   : > { %v6675_v34 = vpack.i.bf16 %v10918_v37, %v10801_v35  ;;  %v10933_v39 = vsel %vm4984_vm3, %v5868_v58, %v10731_v40  ;;  %v10948_v63 = vsel %vm4984_vm3, %v5872_v26, %v10697_v11  ;;  %v6685_v40 = vpack.i.bf16 %v10927_v46, %v10834_v12  ;;  %v11839_v26 = vld [vmem:[#allocation59_spill] sm:$0xff] }
 0x8cd   : > { %v10938_v54 = vsel %vm4984_vm3, %v5847_v42, %v11834_v60  ;;  %v6645_v43 = vpack.i.bf16 %v10933_v39, %v10823_v33  ;;  %v10954_v13 = vsel %vm4984_vm3, %v5864_v41, %v10709_v24  ;;  %v6665_v57 = vpack.i.bf16 %v10948_v63, %v10817_v7  ;;  %6601 = vrot.lane.b32.xlu1 %v11835_v32, %s11780_s0  ;;  %v11841_v60 = vld [vmem:[#allocation19_spill] sm:$0xff]  ;;  %s6837_s0 = smov 112  }
 0x8ce   : > { %v6635_v62 = vpack.i.bf16 %v10938_v54, %v10813_v18  ;;  %v6625_v51 = vpack.i.bf16 %v10954_v13, %v10830_v16  ;;  %v5680_v11 = vrot.slane %v10531_v61, 4  ;;  %v11836_v38 = vpack.i.bf16 %v10473_v50, %v10468_v28  ;;  %v11837_v50 = vld [vmem:[#allocation15_spill] sm:$0xff] }
 0x8cf   : > { %v5692_v24 = vrot.slane %v10529_v4, 4  ;;  %v5208_v1 = vrot.slane %v10127_v0, 4  ;;  %v5656_v59 = vrot.slane %v10153_v10, 4  ;;  %v5668_v52 = vrot.slane %v10173_v8, 4  ;;  %v11852_v33 = vld [vmem:[#allocation159_spill] sm:$0xff] }
 0x8d0   : > { %6581 = vrot.lane.b32.xlu0 %v11836_v38, %s11758_s30  ;;  %v5681_v17 = vsel %vm4984_vm3, %v5680_v11, %v10206_v31  ;;  %v5221_v58 = vsel %vm4984_vm3, %v5220_v23, %v11839_v26  ;;  %v11843_v30 = vpack.i.bf16 %v11841_v60, %v11842_v15  ;;  %v11845_v60 = vld [vmem:[#allocation114_spill] sm:$0xff]  ;;  %v11853_v39 = vld [vmem:[#allocation143_spill] sm:$0xff] }
 0x8d1   : > { %6576 = vrot.lane.b32.xlu2 %v6575_v2, %s11759_s25  ;;  %v5693_v19 = vsel %vm4984_vm3, %v5692_v24, %v10246_v48  ;;  %v5687_v28 = vperm.slane %v5681_v17, %v10217_v25  ;;  %v5209_v2 = vsel %vm4984_vm3, %v5208_v1, %v11837_v50  ;;  %v5657_v49 = vsel %vm4984_vm3, %v5656_v59, %v11838_v22 }
 0x8d2   : > { %v5699_v42 = vperm.slane %v5693_v19, %v10217_v25  ;;  %v5669_v41 = vsel %vm4984_vm3, %v5668_v52, %v11840_v27  ;;  %v5663_v32 = vperm.slane %v5657_v49, %v10217_v25  ;;  %v5227_v38 = vperm.slane %v5221_v58, %v10217_v25  ;;  %v11844_v19 = vld [vmem:[#allocation51_spill] sm:$0xff] }
 0x8d3   : > { %v5730_v11 = vrot.slane %v5687_v28, 4  ;;  %v5222_v1 = vrot.slane %v11839_v26, 4  ;;  %v5670_v59 = vrot.slane %v11840_v27, 4  ;;  %v5210_v26 = vrot.slane %v11837_v50, 4 }
 0x8d4   : > { %v5728_v24 = vrot.slane %v5699_v42, 4  ;;  %v5706_v23 = vrot.slane %v5663_v32, 4  ;;  %v5256_v49 = vrot.slane %v5227_v38, 4 }
 0x8d5   : > { %6616 = vrot.lane.b32.xlu1 %v6615_v29, %s11777_s12  ;;  %v5215_v29 = vperm.slane %v5209_v2, %v10217_v25  ;;  %v5731_v52 = vsel %vm4984_vm3, %v5699_v42, %v5730_v11  ;;  %v11846_v2 = vpack.i.bf16 %v11844_v19, %v11845_v60  ;;  %v5223_v42 = vsel %vm4984_vm3, %v10145_v56, %v5222_v1  ;;  %v11850_v11 = vld [vmem:[#allocation135_spill] sm:$0xff] }
 0x8d6   : > { %v5729_v58 = vsel %vm4984_vm3, %v5728_v24, %v5687_v28  ;;  %v5671_v27 = vsel %vm4984_vm3, %v10173_v8, %v5670_v59  ;;  %v11022_v19 = vperm.slane %v11850_v11, %v10308_v47  ;;  %v11025_v28 = vperm.slane %v5731_v52, %v10308_v47  ;;  %v11851_v24 = vld [vmem:[#allocation74_spill] sm:$0xff] }
 0x8d7   : > { %v5258_v17 = vrot.slane %v5215_v29, 4  ;;  %v5735_v50 = vperm.slane %v5729_v58, %v10308_v47  ;;  %v5658_v56 = vrot.slane %v11838_v22, 4  ;;  %v5257_v8 = vsel %vm4984_vm3, %v5256_v49, %v5215_v29 }
 0x8d8   : > { %6596 = vrot.lane.b32.xlu0 %v6595_v6, %s11776_s13  ;;  %v5675_v6 = vperm.slane %v5669_v41, %v10217_v25  ;;  %v11847_v41 = vld [vmem:[#allocation98_spill] sm:$0xff]  ;;  %v5231_v59 = vperm.slane %v5223_v42, %v10217_v25  ;;  %v5211_v52 = vsel %vm4984_vm3, %v10127_v0, %v5210_v26  ;;  %v5756_v29 = vrot.slane %v11025_v28, 4 }
 0x8d9   : > { %6591 = vrot.lane.b32.xlu2 %v11843_v30, %s11759_s25  ;;  %v11848_v30 = vld [vmem:[#allocation64_spill] sm:$0xff]  ;;  %v5263_v0 = vperm.slane %v5257_v8, %v10308_v47  ;;  %v5219_v49 = vperm.slane %v5211_v52, %v10217_v25  ;;  %s6834_s25 = smov 88  }
 0x8da   : > { %v5704_v15 = vrot.slane %v5675_v6, 4  ;;  %v11849_v5 = vpack.i.bf16 %v11847_v41, %v11848_v30  ;;  %v5707_v60 = vsel %vm4984_vm3, %v5675_v6, %v5706_v23  ;;  %v5694_v41 = vrot.slane %v10246_v48, 4 }
 0x8db   : > { %v11045_v22 = vperm.slane %v5707_v60, %v10308_v47  ;;  %v5752_v6 = vrot.slane %v5735_v50, 4  ;;  %v5268_v23 = vrot.slane %v5231_v59, 4  ;;  %v5306_v60 = vrot.slane %v5263_v0, 4 }
 0x8dc   : > { %v5705_v1 = vsel %vm4984_vm3, %v5704_v15, %v5663_v32  ;;  %v5682_v15 = vrot.slane %v10206_v31, 4  ;;  %v5695_v30 = vsel %vm4984_vm3, %v10529_v4, %v5694_v41  ;;  %v5270_v52 = vrot.slane %v5219_v49, 4 }
 0x8dd   : > { %6631 = vrot.lane.b32.xlu1 %v11846_v2, %s11777_s12  ;;  %v5679_v2 = vperm.slane %v5671_v27, %v10217_v25  ;;  %s6831_s12 = smov 80   ;;  %v5711_v48 = vperm.slane %v5705_v1, %v10308_v47  ;;  %v5757_v16 = vsel %vm4984_vm3, %v5756_v29, %v11045_v22  ;;  %v5703_v27 = vperm.slane %v5695_v30, %v10217_v25 }
 0x8de   : > { %v5683_v31 = vsel %vm4984_vm3, %v10531_v61, %v5682_v15 }
 0x8df   : > { %v5716_v13 = vrot.slane %v5679_v2, 4  ;;  %v5753_v42 = vsel %vm4984_vm3, %v5752_v6, %v5711_v48  ;;  %v5740_v8 = vrot.slane %v5703_v27, 4  ;;  %v5691_v1 = vperm.slane %v5683_v31, %v10217_v25 }
 0x8e0   : > { %6611 = vrot.lane.b32.xlu0 %v11849_v5, %s11776_s13  ;;  %v5287_v5 = vperm.slane %v11851_v24, %v10308_v47  ;;  %v5269_v24 = vsel %vm4984_vm3, %v5268_v23, %v5219_v49  ;;  %s6835_s13 = smov 96  }
 0x8e1   : > { %6606 = vrot.lane.b32.xlu2 %v6605_v9, %s11779_s3  ;;  %v5259_v9 = vsel %vm4984_vm3, %v5227_v38, %v5258_v17  ;;  %v5308_v38 = vrot.slane %v11022_v19, 4  ;;  %v5659_v17 = vsel %vm4984_vm3, %v10153_v10, %v5658_v56  ;;  %v5754_v56 = vrot.slane %v5711_v48, 4 }
 0x8e2   : > { %v11041_v58 = vperm.slane %v5259_v9, %v10308_v47  ;;  %v5304_v32 = vrot.slane %v5287_v5, 4  ;;  %v5275_v61 = vperm.slane %v5269_v24, %v10308_v47  ;;  %v5307_v29 = vsel %vm4984_vm3, %v5287_v5, %v5306_v60  ;;  %v11855_v5 = vld [vmem:[#allocation13_spill] sm:$0xff] }
 0x8e3   : > { %v5271_v48 = vsel %vm4984_vm3, %v5231_v59, %v5270_v52  ;;  %v5742_v59 = vrot.slane %v5691_v1, 4 }
 0x8e4   : > { %v5309_v10 = vsel %vm4984_vm3, %v5308_v38, %v11041_v58  ;;  %v5305_v26 = vsel %vm4984_vm3, %v5304_v32, %v5263_v0  ;;  %v5755_v32 = vsel %vm4984_vm3, %v5735_v50, %v5754_v56  ;;  %v5741_v0 = vsel %vm4984_vm3, %v5740_v8, %v5691_v1 }
 0x8e5   : > { %6646 = vrot.lane.b32.xlu1 %v6645_v43, %s6831_s12  ;;  %v11854_v43 = vpack.i.bf16 %v11852_v33, %v11853_v39  ;;  %v6660_v11 = vpack.i.bf16 %v5757_v16, %v5309_v10  ;;  %v6640_v4 = vpack.i.bf16 %v5753_v42, %v5305_v26  ;;  %v6650_v18 = vpack.i.bf16 %v5755_v32, %v5307_v29  ;;  %v11856_v39 = vld [vmem:[#allocation56_spill] sm:$0xff] }
 0x8e6   : > { %v5310_v54 = vrot.slane %v11041_v58, 4  ;;  %v5299_v50 = vperm.slane %v11855_v5, %v10308_v47  ;;  %v5747_v23 = vperm.slane %v5741_v0, %v10308_v47  ;;  %v5279_v35 = vperm.slane %v5271_v48, %v10308_v47 }
 0x8e7   : > { %v5743_v49 = vsel %vm4984_vm3, %v5703_v27, %v5742_v59  ;;  %v11857_v27 = vpack.i.bf16 %v10912_v20, %v10782_v3  ;;  %v5192_v20 = vrot.slane %v10777_v44, 4 }
 0x8e8   : > { %6626 = vrot.lane.b32.xlu0 %v6625_v51, %s11778_s16  ;;  %v5667_v51 = vperm.slane %v5659_v17, %v10217_v25  ;;  %v5314_v25 = vrot.slane %v5275_v61, 4  ;;  %v5311_v58 = vsel %vm4984_vm3, %v11022_v19, %v5310_v54  ;;  %v5312_v15 = vrot.slane %v5299_v50, 4 }
 0x8e9   : > { %6621 = vrot.lane.b32.xlu2 %v11854_v43, %s11779_s3  ;;  %s6832_s3 = smov 72   ;;  %v5303_v43 = vperm.slane %v11856_v39, %v10308_v47  ;;  %v5751_v30 = vperm.slane %v5743_v49, %v10308_v47  ;;  %v5760_v10 = vrot.slane %v5747_v23, 4 }
 0x8ea   : > { %v5717_v9 = vsel %vm4984_vm3, %v5716_v13, %v5667_v51  ;;  %v5718_v38 = vrot.slane %v5667_v51, 4  ;;  %v5313_v16 = vsel %vm4984_vm3, %v5312_v15, %v5275_v61 }
 0x8eb   : > { %v5723_v41 = vperm.slane %v5717_v9, %v10308_v47  ;;  %v5316_v26 = vrot.slane %v5303_v43, 4  ;;  %v5764_v42 = vrot.slane %v5751_v30, 4 }
 0x8ec   : > { %v5719_v17 = vsel %vm4984_vm3, %v5679_v2, %v5718_v38 }
 0x8ed   : > { %6661 = vrot.lane.b32.xlu1 %v6660_v11, %s6831_s12  ;;  %v5762_v6 = vrot.slane %v5723_v41, 4  ;;  %v5727_v37 = vperm.slane %v5719_v17, %v10308_v47  ;;  %v5761_v13 = vsel %vm4984_vm3, %v5760_v10, %v5723_v41  ;;  %v5317_v7 = vsel %vm4984_vm3, %v5316_v26, %v5279_v35  ;;  %s6772_s12 = scalar_lea.hbm %s11323_s11, 128 }
 0x8ee   : > { %v6680_v47 = vpack.i.bf16 %v5761_v13, %v5313_v16  ;;  %v5640_v41 = vrot.slane %v10865_v55, 4  ;;  %v5193_v17 = vsel %vm4984_vm3, %v5192_v20, %v10643_v45 }
 0x8ef   : > { %v5763_v2 = vsel %vm4984_vm3, %v5747_v23, %v5762_v6  ;;  %v5766_v33 = vrot.slane %v5727_v37, 4  ;;  %v5765_v63 = vsel %vm4984_vm3, %v5764_v42, %v5727_v37  ;;  %v11858_v23 = vld [vmem:[#allocation122_spill] sm:$0xff] }
 0x8f0   : > { %6641 = vrot.lane.b32.xlu0 %v6640_v4, %s11778_s16  ;;  %s6836_s16 = smov 120   ;;  %v6572_v4 = vpop.permute.xlu1 %6571  ;;  %v5080_v59 = vrot.slane %v11858_v23, 4 }
 0x8f1   : > { %6636 = vrot.lane.b32.xlu2 %v6635_v62, %s6832_s3  ;;  %v5758_v62 = vrot.slane %v11045_v22, 4 }
 0x8f3   : > { %v5759_v22 = vsel %vm4984_vm3, %v11025_v28, %v5758_v62  ;;  %v5767_v28 = vsel %vm4984_vm3, %v5751_v30, %v5766_v33  ;;  %v11861_v30 = vld [vmem:[#allocation112_spill] sm:$0xff] }
 0x8f4   : > { %v6670_v53 = vpack.i.bf16 %v5759_v22, %v5311_v58 }
 0x8f5   : > { %6676 = vrot.lane.b32.xlu1 %v6675_v34, %s6833_s14  ;;  %v5315_v34 = vsel %vm4984_vm3, %v5299_v50, %v5314_v25 }
 0x8f6   : > { %v6690_v21 = vpack.i.bf16 %v5763_v2, %v5315_v34  ;;  %v6574_v34 = vunpack.i.h.bf16 %v6572_v4  ;;  %v6573_v2 = vunpack.i.l.bf16 %v6572_v4 }
 0x8f8   : > { %6656 = vrot.lane.b32.xlu0 %v6655_v36, %s6834_s25  ;;  %v5318_v36 = vrot.slane %v5279_v35, 4  ;;  %v11859_v35 = vld [vmem:[#allocation137_spill] sm:$0xff] }
 0x8f9   : > { %6651 = vrot.lane.b32.xlu2 %v6650_v18, %s6832_s3  ;;  %v5641_v18 = vsel %vm4984_vm3, %v5640_v41, %v10674_v14  ;;  %v5528_v37 = vrot.slane %v11859_v35, 4 }
 0x8fa   : > { %v5319_v19 = vsel %vm4984_vm3, %v5303_v43, %v5318_v36  ;;  %v11860_v43 = vld [vmem:[#allocation92_spill] sm:$0xff] }
 0x8fb   : > { %v6705_v51 = vpack.i.bf16 %v5767_v28, %v5319_v19  ;;  %v5081_v15 = vsel %vm4984_vm3, %v5080_v59, %v11860_v43  ;;  %v5529_v10 = vsel %vm4984_vm3, %v5528_v37, %v11861_v30 }
 0x8fc   : > { %v6156_v19 = vsel %vm2020_vm6, %v5529_v10, %v6574_v34  ;;  %v6120_v28 = vsel %vm2020_vm6, %v5081_v15, %v6573_v2 }
 0x8fd   : > { %6691 = vrot.lane.b32.xlu1 %v6690_v21, %s6833_s14  ;;  %s6493_s14 = sshll.u32 %s6920_s21, 6 }
 0x900   : > { %6671 = vrot.lane.b32.xlu0 %v6670_v53, %s6834_s25 }
 0x901   : > { %6666 = vrot.lane.b32.xlu2 %v6665_v57, %s6835_s13  ;;  %v6700_v57 = vpack.i.bf16 %v5765_v63, %v5317_v7 }
 0x905   : > { %6706 = vrot.lane.b32.xlu1 %v6705_v51, %s6836_s16 }
 0x908   : > { %6686 = vrot.lane.b32.xlu0 %v6685_v40, %s6837_s0 }
 0x909   : > { %6681 = vrot.lane.b32.xlu2 %v6680_v47, %s6835_s13 }
 0x910   : > { %6701 = vrot.lane.b32.xlu0 %v6700_v57, %s6837_s0  ;;  %s6277_s0 = sshll.u32 %s6957_s22, 4  ;;  %s6278_s0 = int_to_ptr.vmem [resolvable:$true] %s6277_s0 }
 0x911   : > { %6696 = vrot.lane.b32.xlu2 %v11857_v27, %s6836_s16  ;;  %s6276_s16 = scalar_lea.hbm %s11323_s11, %s6493_s14 }
 0x912   : > { %s6279_s4 = sshll.u32 %s6276_s16, 4  ;;  %s6280_s4 = int_to_ptr.hbm [resolvable:$true] %s6279_s4 }
 0x913   : > { %s6766_s21 = sshra.s32 %s6280_s4, 4  ;;  %s6767_s21 = int_to_ptr.hbm [resolvable:$true] %s6766_s21 }
 0x914   : > { %s6768_s2 = scalar_lea.hbm %s6767_s21, 64  ;;  %p6773_p1 = scmp.lt.s32.totalorder %s6767_s21, %s11323_s11 }
 0x915   : > { %p6769_p12 = scmp.ne.s32.totalorder %s6767_s21, %s6768_s2  ;;  %p6774_p2 = scmp.lt.s32.totalorder %s6772_s12, %s6768_s2 }
 0x917   : > { %p6770_p13 = pnand %p6769_p12, %p6937_p5  ;;  %p6775_p3 = por %p6774_p2, %p6773_p1 }
 0x919   : > { %p6771_p0 = pneg %p6770_p13 }
 0x91b   : > { %p6776_p4 = pnand %p6775_p3, %p6771_p0 }
 0x923   : > { %v6562_v11 = vpop.permute.xlu2 %6561 }
 0x924   : > { %v6564_v38 = vunpack.i.h.bf16 %v6562_v11  ;;  %v6563_v29 = vunpack.i.l.bf16 %v6562_v11 }
 0x926   : > { %v6121_v54 = vsel %vm2020_vm6, %v5193_v17, %v6563_v29  ;;  %v6157_v44 = vsel %vm2020_vm6, %v5641_v18, %v6564_v38  ;;  %vm6144_vm6 = vcmask 785408  }
 0x92b   : > { %v6577_v31 = vpop.permute.xlu2 %6576 }
 0x92c   : > { %v6579_v5 = vunpack.i.h.bf16 %v6577_v31  ;;  %v6578_v50 = vunpack.i.l.bf16 %v6577_v31 }
 0x933   : > { %v6592_v24 = vpop.permute.xlu2 %6591 }
 0x934   : > { %v6594_v63 = vunpack.i.h.bf16 %v6592_v24  ;;  %v6593_v57 = vunpack.i.l.bf16 %v6592_v24 }
 0x937   : > { %v6587_v9 = vpop.permute.xlu1 %6586  ;;  %v6567_v60 = vpop.permute.xlu0 %6566 }
 0x938   : > { %v6569_v0 = vunpack.i.h.bf16 %v6567_v60  ;;  %v6568_v48 = vunpack.i.l.bf16 %v6567_v60  ;;  %v6589_v36 = vunpack.i.h.bf16 %v6587_v9  ;;  %v6588_v33 = vunpack.i.l.bf16 %v6587_v9 }
 0x93a   : > { %v6123_v55 = vsel %vm2086_vm9, %v6121_v54, %v6568_v48  ;;  %v6159_v62 = vsel %vm2086_vm9, %v6157_v44, %v6569_v0 }
 0x93b   : > { %v6607_v56 = vpop.permute.xlu2 %6606  ;;  %v6125_v45 = vsel %vm2152_vm10, %v6123_v55, %v6578_v50  ;;  %v6161_v14 = vsel %vm2152_vm10, %v6159_v62, %v6579_v5 }
 0x93c   : > { %v6127_v16 = vsel %vm2218_vm11, %v6125_v45, %v6588_v33  ;;  %v6163_v13 = vsel %vm2218_vm11, %v6161_v14, %v6589_v36  ;;  %v6609_v27 = vunpack.i.h.bf16 %v6607_v56  ;;  %v6608_v11 = vunpack.i.l.bf16 %v6607_v56 }
 0x93f   : > { %v11129_v12 = vpop.permute.xlu1 %6601 }
 0x940   : > { %v6604_v29 = vunpack.i.h.bf16 %v11129_v12  ;;  %v6603_v24 = vunpack.i.l.bf16 %v11129_v12 }
 0x942   : > { %v6582_v46 = vpop.permute.xlu0 %6581 }
 0x943   : > { %v11131_v40 = vpop.permute.xlu2 %6621  ;;  %v6584_v58 = vunpack.i.h.bf16 %v6582_v46  ;;  %v6583_v22 = vunpack.i.l.bf16 %v6582_v46 }
 0x944   : > { %v6624_v62 = vunpack.i.h.bf16 %v11131_v40 }
 0x945   : > { %v6158_v26 = vsel %vm2086_vm9, %v6156_v19, %v6584_v58  ;;  %v6122_v42 = vsel %vm2086_vm9, %v6120_v28, %v6583_v22 }
 0x946   : > { %v6124_v31 = vsel %vm2152_vm10, %v6122_v42, %v6593_v57  ;;  %v6160_v4 = vsel %vm2152_vm10, %v6158_v26, %v6594_v63  ;;  %vm6153_vm10 = vcmask 982016  }
 0x947   : > { %v11133_v8 = vpop.permute.xlu1 %6616  ;;  %v6126_v48 = vsel %vm2218_vm11, %v6124_v31, %v6603_v24  ;;  %v6162_v17 = vsel %vm2218_vm11, %v6160_v4, %v6604_v29 }
 0x948   : > { %v6619_v56 = vunpack.i.h.bf16 %v11133_v8  ;;  %v6618_v0 = vunpack.i.l.bf16 %v11133_v8  ;;  %v6623_v8 = vunpack.i.l.bf16 %v11131_v40 }
 0x94a   : > { %v6597_v1 = vpop.permute.xlu0 %6596 }
 0x94b   : > { %v11135_v52 = vpop.permute.xlu2 %6636  ;;  %v6599_v49 = vunpack.i.h.bf16 %v6597_v1  ;;  %v6598_v21 = vunpack.i.l.bf16 %v6597_v1 }
 0x94c   : > { %v6639_v5 = vunpack.i.h.bf16 %v11135_v52  ;;  %v6638_v50 = vunpack.i.l.bf16 %v11135_v52 }
 0x94d   : > { %v6129_v47 = vsel %vm4046_vm14, %v6127_v16, %v6598_v21  ;;  %v6165_v7 = vsel %vm4046_vm14, %v6163_v13, %v6599_v49 }
 0x94e   : > { %v6131_v9 = vsel %vm4079_vm15, %v6129_v47, %v6608_v11  ;;  %v6167_v60 = vsel %vm4079_vm15, %v6165_v7, %v6609_v27 }
 0x94f   : > { %v11137_v61 = vpop.permute.xlu1 %6631  ;;  %v6133_v18 = vsel %vm4112_vm0, %v6131_v9, %v6618_v0  ;;  %v6169_v54 = vsel %vm4112_vm0, %v6167_v60, %v6619_v56 }
 0x950   : > { %v6634_v52 = vunpack.i.h.bf16 %v11137_v61  ;;  %v6633_v22 = vunpack.i.l.bf16 %v11137_v61 }
 0x952   : > { %v11139_v3 = vpop.permute.xlu0 %6611 }
 0x953   : > { %v11145_v6 = vpop.permute.xlu2 %6651  ;;  %v6614_v46 = vunpack.i.h.bf16 %v11139_v3  ;;  %v6613_v1 = vunpack.i.l.bf16 %v11139_v3 }
 0x954   : > { %v6654_v19 = vunpack.i.h.bf16 %v11145_v6 }
 0x955   : > { %v6164_v44 = vsel %vm4046_vm14, %v6162_v17, %v6614_v46 }
 0x956   : > { %v6166_v35 = vsel %vm4079_vm15, %v6164_v44, %v6624_v62 }
 0x957   : > { %v11143_v32 = vpop.permute.xlu1 %6646  ;;  %v6168_v33 = vsel %vm4112_vm0, %v6166_v35, %v6634_v52  ;;  %v4982_v52 = vld [vmem:[%s11322_s10 + $0x18] sm:$0xff] }
 0x958   : > { %v6649_v49 = vunpack.i.h.bf16 %v11143_v32  ;;  %v6648_v21 = vunpack.i.l.bf16 %v11143_v32  ;;  %v6653_v32 = vunpack.i.l.bf16 %v11145_v6 }
 0x95a   : > { %v6627_v25 = vpop.permute.xlu0 %6626 }
 0x95b   : > { %v11171_v51 = vpop.permute.xlu2 %6666  ;;  %v6629_v20 = vunpack.i.h.bf16 %v6627_v25  ;;  %v6628_v41 = vunpack.i.l.bf16 %v6627_v25  ;;  %v6128_v25 = vsel %vm4046_vm14, %v6126_v48, %v6613_v1 }
 0x95c   : > { %v6130_v59 = vsel %vm4079_vm15, %v6128_v25, %v6623_v8  ;;  %v6669_v28 = vunpack.i.h.bf16 %v11171_v51  ;;  %v6668_v16 = vunpack.i.l.bf16 %v11171_v51 }
 0x95d   : > { %v6171_v55 = vsel %vm4145_vm1, %v6169_v54, %v6629_v20  ;;  %v6135_v12 = vsel %vm4145_vm1, %v6133_v18, %v6628_v41  ;;  %v6132_v36 = vsel %vm4112_vm0, %v6130_v59, %v6633_v22 }
 0x95e   : > { %v6173_v37 = vsel %vm4187_vm2, %v6171_v55, %v6639_v5  ;;  %v6137_v34 = vsel %vm4187_vm2, %v6135_v12, %v6638_v50 }
 0x95f   : > { %v11161_v39 = vpop.permute.xlu1 %6661  ;;  %v6140_v43 = vsel %vm6138_vm4, %v6137_v34, %v6648_v21 }
 0x960   : > { %v6664_v51 = vunpack.i.h.bf16 %v11161_v39  ;;  %v6663_v4 = vunpack.i.l.bf16 %v11161_v39 }
 0x962   : > { %v11159_v53 = vpop.permute.xlu0 %6641 }
 0x963   : > { %v11199_v23 = vpop.permute.xlu2 %6681  ;;  %v6644_v2 = vunpack.i.h.bf16 %v11159_v53  ;;  %v6643_v40 = vunpack.i.l.bf16 %v11159_v53  ;;  %v6175_v53 = vsel %vm6138_vm4, %v6173_v37, %v6649_v49 }
 0x964   : > { %v6684_v18 = vunpack.i.h.bf16 %v11199_v23  ;;  %v6683_v54 = vunpack.i.l.bf16 %v11199_v23 }
 0x965   : > { %v6170_v15 = vsel %vm4145_vm1, %v6168_v33, %v6644_v2  ;;  %v6134_v30 = vsel %vm4145_vm1, %v6132_v36, %v6643_v40  ;;  %v4979_v2 = vld [vmem:[%s11322_s10] sm:$0xff] }
 0x966   : > { %v6172_v26 = vsel %vm4187_vm2, %v6170_v15, %v6654_v19  ;;  %v6136_v42 = vsel %vm4187_vm2, %v6134_v30, %v6653_v32 }
 0x967   : > { %v6677_v3 = vpop.permute.xlu1 %6676  ;;  %v6174_v29 = vsel %vm6138_vm4, %v6172_v26, %v6664_v51 }
 0x968   : > { %v6679_v57 = vunpack.i.h.bf16 %v6677_v3  ;;  %v6678_v27 = vunpack.i.l.bf16 %v6677_v3 }
 0x96a   : > { %v6657_v38 = vpop.permute.xlu0 %6656 }
 0x96b   : > { %v6659_v45 = vunpack.i.h.bf16 %v6657_v38  ;;  %v6658_v14 = vunpack.i.l.bf16 %v6657_v38  ;;  %v6697_v47 = vpop.permute.xlu2 %6696  ;;  %v6139_v38 = vsel %vm6138_vm4, %v6136_v42, %v6663_v4 }
 0x96c   : > { %v6699_v46 = vunpack.i.h.bf16 %v6697_v47  ;;  %v6698_v1 = vunpack.i.l.bf16 %v6697_v47 }
 0x96d   : > { %v6143_v10 = vsel %vm6141_vm5, %v6140_v43, %v6658_v14  ;;  %v6177_v61 = vsel %vm6141_vm5, %v6175_v53, %v6659_v45  ;;  %v4980_v14 = vld [vmem:[%s11322_s10 + $0x8] sm:$0xff] }
 0x96e   : > { %v6146_v7 = vsel %vm6144_vm6, %v6143_v10, %v6668_v16  ;;  %v6179_v63 = vsel %vm6144_vm6, %v6177_v61, %v6669_v28 }
 0x96f   : > { %v6692_v13 = vpop.permute.xlu1 %6691  ;;  %v6149_v20 = vsel %vm6147_vm7, %v6146_v7, %v6678_v27  ;;  %v6181_v41 = vsel %vm6147_vm7, %v6179_v63, %v6679_v57 }
 0x970   : > { %v6694_v55 = vunpack.i.h.bf16 %v6692_v13  ;;  %v6693_v12 = vunpack.i.l.bf16 %v6692_v13 }
 0x972   : > { %v6672_v58 = vpop.permute.xlu0 %6671 }
 0x973   : > { %v6674_v6 = vunpack.i.h.bf16 %v6672_v58  ;;  %v6673_v11 = vunpack.i.l.bf16 %v6672_v58  ;;  %v4981_v58 = vld [vmem:[%s11322_s10 + $0x10] sm:$0xff] }
 0x975   : > { %v6142_v0 = vsel %vm6141_vm5, %v6139_v38, %v6673_v11  ;;  %v6176_v39 = vsel %vm6141_vm5, %v6174_v29, %v6674_v6 }
 0x976   : > { %v6145_v25 = vsel %vm6144_vm6, %v6142_v0, %v6683_v54  ;;  %v6178_v44 = vsel %vm6144_vm6, %v6176_v39, %v6684_v18 }
 0x977   : > { %v6707_v3 = vpop.permute.xlu1 %6706  ;;  %v6148_v35 = vsel %vm6147_vm7, %v6145_v25, %v6693_v12  ;;  %v6180_v37 = vsel %vm6147_vm7, %v6178_v44, %v6694_v55 }
 0x978   : > { %v6709_v50 = vunpack.i.h.bf16 %v6707_v3  ;;  %v6708_v59 = vunpack.i.l.bf16 %v6707_v3 }
 0x97a   : > { %v6687_v31 = vpop.permute.xlu0 %6686 }
 0x97b   : > { %v6689_v9 = vunpack.i.h.bf16 %v6687_v31  ;;  %v6688_v60 = vunpack.i.l.bf16 %v6687_v31 }
 0x97d   : > { %v6152_v24 = vsel %vm6150_vm8, %v6149_v20, %v6688_v60  ;;  %v6183_v56 = vsel %vm6150_vm8, %v6181_v41, %v6689_v9 }
 0x97e   : > { %v6155_v48 = vsel %vm6153_vm10, %v6152_v24, %v6698_v1  ;;  %v6185_v17 = vsel %vm6153_vm10, %v6183_v56, %v6699_v46 }
 0x97f   : > { %6212 = vmatpush.msra.mxu2 %v6155_v48  ;;  %6241 = vmatpush.msra.mxu3 %v6185_v17 }
 0x982   : > { %v6702_v62 = vpop.permute.xlu0 %6701 }
 0x983   : > { %v6704_v8 = vunpack.i.h.bf16 %v6702_v62  ;;  %v6703_v5 = vunpack.i.l.bf16 %v6702_v62 }
 0x985   : > { %v6151_v23 = vsel %vm6150_vm8, %v6148_v35, %v6703_v5  ;;  %v6182_v34 = vsel %vm6150_vm8, %v6180_v37, %v6704_v8 }
 0x986   : > { %v6154_v40 = vsel %vm6153_vm10, %v6151_v23, %v6708_v59  ;;  %v6184_v45 = vsel %vm6153_vm10, %v6182_v34, %v6709_v50 }
 0x987   : > { %6213 = vmatpush.msra.mxu2 %v6154_v40  ;;  %6242 = vmatpush.msra.mxu3 %v6184_v45 }
 0x988   : > { %6479 = vmatmul.msk.f32.vlgmr.msra.gmra.mxu2 %vm2086_vm9, %v4979_v2  ;;  %6483 = vmatmul.msk.f32.vlgmr.msra.gmra.mxu3 %vm2086_vm9, %v4979_v2 }
 0x990   : > { %6480 = vmatmul.msk.f32.gmra.mxu2 %vm2086_vm9, %v4980_v14  ;;  %6484 = vmatmul.msk.f32.gmra.mxu3 %vm2086_vm9, %v4980_v14 }
 0x998   : > { %6481 = vmatmul.msk.f32.gmra.mxu2 %vm2086_vm9, %v4981_v58  ;;  %6485 = vmatmul.msk.f32.gmra.mxu3 %vm2086_vm9, %v4981_v58 }
 0x9a0   : > { %6482 = vmatmul.msk.f32.gmra.mxu2 %vm2086_vm9, %v4982_v52  ;;  %6486 = vmatmul.msk.f32.gmra.mxu3 %vm2086_vm9, %v4982_v52 }
 0xa0b   : > { %v6215_v22 = vpop.f32.mrf.mxu2  ;;  %v6244_v49 = vpop.f32.mrf.mxu3 }
 0xa0c   : > { %6256 = vst [vmem:[%s6957_s22] sm:$0xff] %v6215_v22 }
 0xa0d   : > { %6257 = vst [vmem:[%s6957_s22 + $0x8] sm:$0xff] %v6244_v49 }
 0xa13   : > { %v6218_v21 = vpop.f32.mrf.mxu2  ;;  %v6247_v36 = vpop.f32.mrf.mxu3 }
 0xa14   : > { %6258 = vst [vmem:[%s6957_s22 + $0x10] sm:$0xff] %v6218_v21 }
 0xa15   : > { %6259 = vst [vmem:[%s6957_s22 + $0x18] sm:$0xff] %v6247_v36 }
 0xa1b   : > { %v6221_v33 = vpop.f32.mrf.mxu2  ;;  %v6250_v43 = vpop.f32.mrf.mxu3 }
 0xa1c   : > { %6260 = vst [vmem:[%s6957_s22 + $0x20] sm:$0xff] %v6221_v33 }
 0xa1d   : > { %6261 = vst [vmem:[%s6957_s22 + $0x28] sm:$0xff] %v6250_v43 }
 0xa23   : > { %v6224_v53 = vpop.f32.mrf.mxu2  ;;  %v6253_v15 = vpop.f32.mrf.mxu3 }
 0xa24   : > { %6262 = vst [vmem:[%s6957_s22 + $0x30] sm:$0xff] %v6224_v53 }
 0xa25   : > { %6263 = vst [vmem:[%s6957_s22 + $0x38] sm:$0xff] %v6253_v15 }
 0xa26   : > { %6779 = shalt.err (!%p6776_p4)
}
 0xa27   : > { %s6838_s22 = smov 256  }
 0xa28   : > { %6498 = dma.vmem_to_hbm [thread:$0]  (%p6937_p5), %s6278_s0, 1024, %s6280_s4, %s6265_s15, %s6838_s22, %s6838_s22, %s11758_s30  }
 0xa29 PF: > { %p6504_p7 = scmp.ge.s32.totalorder %s6814_s20, 2  ;;  %s6294_s25 = sand.u32 1, %s6802_s17  }
 0xa2a   : > { %s6295_s13 = scalar_lea.sflag [#allocation5], %s6294_s25 }
 0xa2b   : > { %p6501_p8 = pnand %p6504_p7, %p6941_p6 }
 0xa2d   : > { %p6502_p9 = pneg %p6501_p8 }
 0xa2f   : > { %6797 = dma.done.wait (%p6502_p9), %s6295_s13, 1024  }
 0xa30   : > { %6799 = vsyncadd (%p6502_p9), %s6295_s13, 4294966272  ;;  %p21_p10 = scmp.ge.s32.totalorder %s6924_s23, 4   ;;  %s11863_s17 = smov %s6806_s18 }
 0xa31   : > { %s11864_s18 = smov %s6810_s19  ;;  %s11865_s19 = smov %s6935_s26 }
 0xa32   : > { %s11866_s20 = smov %s6924_s23  ;;  %23 = sbr.rel (!%p21_p10) target bundleno = 9 (0x9), region = 107 }
 0xa37   :  { %6301 = vsyncpa [#allocation5], 1 }
 0xa38   :  { %6303 = vsyncpa [#allocation5 + $0x1], 1 }

</bundles_post_ra>
